<compile_context>
chip_gen: v7x
topology: tpu7x:2x2x1
jax: 0.10.0
libtpu: 0.0.40
codegen_flags: <defaults>
</compile_context>

<pallas_src>
import functools
import math

import numpy as np
import jax
import jax.numpy as jnp
from jax import lax
from jax.experimental import pallas as pl
from jax.experimental.pallas import tpu as pltpu


# ----------------------------- kernel helpers -------------------------------


def _layer_norm(y, gamma, beta, eps=1e-5):
    mu = jnp.mean(y, axis=-1, keepdims=True)
    var = jnp.mean((y - mu) ** 2, axis=-1, keepdims=True)
    return (y - mu) * lax.rsqrt(var + eps) * gamma + beta


def _mha_ln(x3, wqkv, bqkv, wo, bo, gamma, beta, *, num_heads):
    """Batched multi-head self-attention + residual + LayerNorm.

    x3: (N, L, H) f32 -- N independent sequences of length L.
    wqkv/wo are bf16; accumulation and all elementwise math stay in f32.
    Returns (N*L, H) f32, rows ordered (n, l)."""
    N, L, H = x3.shape
    hd = H // num_heads
    scale = 1.0 / math.sqrt(hd)

    x2 = x3.reshape(N * L, H)
    # Fused QKV projection: one (N*L, H) x (H, 3H) bf16 matmul, f32 accum.
    qkv = jnp.dot(x2.astype(jnp.bfloat16), wqkv,
                  preferred_element_type=jnp.float32) + bqkv
    q = qkv[:, 0 * H:1 * H].reshape(N, L, H).astype(jnp.bfloat16)
    k = qkv[:, 1 * H:2 * H].reshape(N, L, H).astype(jnp.bfloat16)
    v = qkv[:, 2 * H:3 * H].reshape(N, L, H).astype(jnp.bfloat16)

    # Per-head batched attention (contraction depth is hd no matter how heads
    # are grouped); head outputs are lane-concatenated so the output
    # projection is a single K=H matmul against the full wo.
    head_outs = []
    for h in range(num_heads):
        lo, hi = h * hd, (h + 1) * hd
        qh, kh, vh = q[:, :, lo:hi], k[:, :, lo:hi], v[:, :, lo:hi]
        s = jnp.einsum('nqd,nkd->nqk', qh, kh,
                       preferred_element_type=jnp.float32) * scale
        s = s - jnp.max(s, axis=-1, keepdims=True)
        p = jnp.exp(s)
        p = p * pl.reciprocal(jnp.sum(p, axis=-1, keepdims=True), approx=True)
        head_outs.append(
            jnp.einsum('nqk,nkd->nqd', p.astype(jnp.bfloat16), vh,
                       preferred_element_type=jnp.float32))       # (N, L, hd)
    o_all = jnp.concatenate(head_outs, axis=-1).reshape(N * L, H)  # f32
    attn = jnp.dot(o_all.astype(jnp.bfloat16), wo,
                   preferred_element_type=jnp.float32) + bo
    y = attn + x2                                        # residual (attn + x)
    return _layer_norm(y, gamma, beta)


def _ffn_ln(x2, w1, b1, w2, b2, gamma, beta):
    h = jnp.dot(x2.astype(jnp.bfloat16), w1,
                preferred_element_type=jnp.float32) + b1
    h = 0.5 * h * (1.0 + lax.erf(h * (1.0 / math.sqrt(2.0))))     # exact GELU
    y = jnp.dot(h.astype(jnp.bfloat16), w2,
                preferred_element_type=jnp.float32) + b2 + x2
    return _layer_norm(y, gamma, beta)


# ------------------------------ fused kernel --------------------------------


def stt_fused_kernel(x_ref, pe_ref, pfwd_ref,
                     s_wqkv, s_bqkv, s_wo, s_bo, s_g, s_b,
                     t_wqkv, t_bqkv, t_wo, t_bo, t_g, t_b,
                     f_w1, f_b1, f_w2, f_b2, f_g, f_b,
                     o_ref, *, num_heads):
    """Per grid step (NB batch elements):
       spatial MHA+LN -> (s,t)->(t,s) perm (bf16 matmul) -> +PE ->
       temporal MHA+LN -> FFN+LN -> store in (b, t, s, h) order."""
    NB, S, T, H = x_ref.shape
    xb = x_ref[...].astype(jnp.float32)                  # (NB, S, T, H)

    # --- Spatial attention: NB*S sequences of length T (batched) ---
    y_sp = _mha_ln(xb.reshape(NB * S, T, H),
                   s_wqkv[...], s_bqkv[...], s_wo[...], s_bo[...],
                   s_g[...], s_b[...], num_heads=num_heads)   # (NB*S*T, H)

    # --- (s,t) -> (t,s) reorder: bf16 permutation matmul on the MXU, one per
    #     batch element (dense 128x128 matrix, no block-diagonal waste).
    pf = pfwd_ref[...]                                   # (T*S, S*T) bf16
    chunks = [
        jnp.dot(pf, y_sp[b * S * T:(b + 1) * S * T, :].astype(jnp.bfloat16),
                preferred_element_type=jnp.float32)
        for b in range(NB)
    ]
    xt = chunks[0] if NB == 1 else jnp.concatenate(chunks, axis=0)
    xt3 = xt.reshape(NB * T, S, H) + pe_ref[...][None, :, :]     # add PE

    # --- Temporal attention: NB*T sequences of length S; the residual path
    #     includes the positional encoding (matches the PyTorch reference).
    y_t = _mha_ln(xt3, t_wqkv[...], t_bqkv[...], t_wo[...], t_bo[...],
                  t_g[...], t_b[...], num_heads=num_heads)    # (NB*T*S, H)

    # --- FeedForward + LN (per token, order-independent) ---
    z = _ffn_ln(y_t, f_w1[...], f_b1[...], f_w2[...], f_b2[...],
                f_g[...], f_b[...])                           # (NB*T*S, H)

    # --- Store in (b, t, s, h) order; the (t,s)->(s,t) swap is a free XLA
    #     transpose in the wrapper (backward permutation matmul removed).
    # TODO(synk): H=32 < 128 lanes -> masked vst; a lane-dense (B, S, T*H)
    # output would need an in-kernel sublane->lane relayout, skipped here.
    o_ref[...] = z.reshape(NB, T, S, H).astype(o_ref.dtype)


# -------------------------------- wrapper ------------------------------------


def positional_encoding(seq_len, d_model):
    pos = jnp.arange(seq_len, dtype=jnp.float32)[:, None]
    div = jnp.exp(jnp.arange(0, d_model, 2, dtype=jnp.float32)
                  * (-math.log(10000.0) / d_model))
    pe = jnp.zeros((seq_len, d_model), jnp.float32)
    pe = pe.at[:, 0::2].set(jnp.sin(pos * div))
    pe = pe.at[:, 1::2].set(jnp.cos(pos * div))
    return pe


def _full(shape):
    return pl.BlockSpec(shape, lambda g: (0,) * len(shape))


def _single_tensorcore_device():
    """True on single-TensorCore inference chips (v5e / v6e): fold the whole
    batch into one kernel invocation there.  Multi-TC parts (v4 megacore, v7x)
    keep a 'parallel' batch grid axis so every core gets a batch element.
    Unknown backends fall back to the grid mapping."""
    try:
        kind = jax.devices()[0].device_kind.lower()
    except Exception:
        return False
    return any(tag in kind for tag in ("v5 lite", "v5e", "v6 lite", "v6e"))


def stt_block_forward(x, params, num_heads, fold_batch=None):
    B, S, T, H = x.shape
    if fold_batch is None:
        fold_batch = _single_tensorcore_device()
    nb = B if fold_batch else 1                          # batch elems per step

    pe = positional_encoding(S, H)                       # (S, H) f32

    # Row-permutation matrix (constant, bf16): row (t*S+s) selects row (s*T+t).
    pf_np = np.zeros((T * S, S * T), np.float32)
    for t in range(T):
        for s in range(S):
            pf_np[t * S + s, s * T + t] = 1.0
    pf = jnp.asarray(pf_np, dtype=jnp.bfloat16)

    sp, tp, ff = params["spatial"], params["temporal"], params["ff"]
    F = ff["w1"].shape[1]
    bf = lambda w: w.astype(jnp.bfloat16)                # matmul weights only

    # NOTE: all weights stay VMEM-resident (<0.5 MiB at these sizes).  If H/F
    # are ever scaled up (H >~ 1024 on v7x's 64 MiB VMEM), tile the FFN over F
    # and QKV over 3H, and raise vmem_limit_bytes in CompilerParams.
    out_tsh = pl.pallas_call(
        functools.partial(stt_fused_kernel, num_heads=num_heads),
        out_shape=jax.ShapeDtypeStruct((B, T, S, H), x.dtype),
        grid=(B // nb,),
        in_specs=[
            pl.BlockSpec((nb, S, T, H), lambda g: (g, 0, 0, 0)),  # x
            _full((S, H)),                                        # pe
            _full((T * S, S * T)),                                # perm fwd
            # spatial attention params
            _full((H, 3 * H)), _full((1, 3 * H)), _full((H, H)), _full((1, H)),
            _full((1, H)), _full((1, H)),
            # temporal attention params
            _full((H, 3 * H)), _full((1, 3 * H)), _full((H, H)), _full((1, H)),
            _full((1, H)), _full((1, H)),
            # feed-forward params
            _full((H, F)), _full((1, F)), _full((F, H)), _full((1, H)),
            _full((1, H)), _full((1, H)),
        ],
        out_specs=pl.BlockSpec((nb, T, S, H), lambda g: (g, 0, 0, 0)),
        compiler_params=pltpu.CompilerParams(
            dimension_semantics=("parallel",)),
    )(x, pe, pf,
      bf(sp["wqkv"]), sp["bqkv"], bf(sp["wo"]), sp["bo"], sp["gamma"], sp["beta"],
      bf(tp["wqkv"]), tp["bqkv"], bf(tp["wo"]), tp["bo"], tp["gamma"], tp["beta"],
      bf(ff["w1"]), ff["b1"], bf(ff["w2"]), ff["b2"], ff["gamma"], ff["beta"])

    # (B, T, S, H) -> (B, S, T, H): HBM-side transpose, essentially free in XLA.
    return jnp.transpose(out_tsh, (0, 2, 1, 3))


# ------------------------------- parameters ----------------------------------


def init_params(key, hidden_dim):
    ff_dim = hidden_dim * 4
    keys = jax.random.split(key, 24)
    ki = iter(keys)

    def attn_params():
        return {
            "wqkv": 0.05 * jax.random.normal(next(ki), (hidden_dim, 3 * hidden_dim), jnp.float32),
            "bqkv": 0.01 * jax.random.normal(next(ki), (1, 3 * hidden_dim), jnp.float32),
            "wo": 0.05 * jax.random.normal(next(ki), (hidden_dim, hidden_dim), jnp.float32),
            "bo": 0.01 * jax.random.normal(next(ki), (1, hidden_dim), jnp.float32),
            "gamma": jnp.ones((1, hidden_dim), jnp.float32)
                     + 0.02 * jax.random.normal(next(ki), (1, hidden_dim), jnp.float32),
            "beta": 0.02 * jax.random.normal(next(ki), (1, hidden_dim), jnp.float32),
        }

    ff = {
        "w1": 0.05 * jax.random.normal(next(ki), (hidden_dim, ff_dim), jnp.float32),
        "b1": 0.01 * jax.random.normal(next(ki), (1, ff_dim), jnp.float32),
        "w2": 0.05 * jax.random.normal(next(ki), (ff_dim, hidden_dim), jnp.float32),
        "b2": 0.01 * jax.random.normal(next(ki), (1, hidden_dim), jnp.float32),
        "gamma": jnp.ones((1, hidden_dim), jnp.float32)
                 + 0.02 * jax.random.normal(next(ki), (1, hidden_dim), jnp.float32),
        "beta": 0.02 * jax.random.normal(next(ki), (1, hidden_dim), jnp.float32),
    }
    return {"spatial": attn_params(), "temporal": attn_params(), "ff": ff}


# ---------------------------------- main --------------------------------------


if __name__ == "__main__":
    B, S, T, H = 2, 8, 16, 32       # batch, frames, tokens-per-frame, hidden
    NUM_HEADS = 4

    key = jax.random.PRNGKey(0)
    kx, kp = jax.random.split(key)
    x = jax.random.normal(kx, (B, S, T, H), jnp.float32)
    params = init_params(kp, H)

    fwd = jax.jit(functools.partial(stt_block_forward, num_heads=NUM_HEADS))
    out = fwd(x, params)
    jax.block_until_ready(out)
    assert out.shape == (B, S, T, H)
    assert bool(jnp.all(jnp.isfinite(out)))
    print("KERNEL_OK")
</pallas_src>

<mosaic_0001>
module attributes {stable_mosaic.version = 11 : i64} {
  func.func @stt_fused_kernel(%arg0: i32, %arg1: memref<1x8x16x32xf32, #tpu.memory_space<vmem>>, %arg2: memref<8x32xf32, #tpu.memory_space<vmem>>, %arg3: memref<128x128xbf16, #tpu.memory_space<vmem>>, %arg4: memref<32x96xbf16, #tpu.memory_space<vmem>>, %arg5: memref<1x96xf32, #tpu.memory_space<vmem>>, %arg6: memref<32x32xbf16, #tpu.memory_space<vmem>>, %arg7: memref<1x32xf32, #tpu.memory_space<vmem>>, %arg8: memref<1x32xf32, #tpu.memory_space<vmem>>, %arg9: memref<1x32xf32, #tpu.memory_space<vmem>>, %arg10: memref<32x96xbf16, #tpu.memory_space<vmem>>, %arg11: memref<1x96xf32, #tpu.memory_space<vmem>>, %arg12: memref<32x32xbf16, #tpu.memory_space<vmem>>, %arg13: memref<1x32xf32, #tpu.memory_space<vmem>>, %arg14: memref<1x32xf32, #tpu.memory_space<vmem>>, %arg15: memref<1x32xf32, #tpu.memory_space<vmem>>, %arg16: memref<32x128xbf16, #tpu.memory_space<vmem>>, %arg17: memref<1x128xf32, #tpu.memory_space<vmem>>, %arg18: memref<128x32xbf16, #tpu.memory_space<vmem>>, %arg19: memref<1x32xf32, #tpu.memory_space<vmem>>, %arg20: memref<1x32xf32, #tpu.memory_space<vmem>>, %arg21: memref<1x32xf32, #tpu.memory_space<vmem>>, %arg22: memref<1x16x8x32xf32, #tpu.memory_space<vmem>>) attributes {dimension_semantics = [#tpu.dimension_semantics<parallel>], iteration_bounds = array<i64: 2>, scalar_prefetch = 0 : i64, scratch_operands = 0 : i64, tpu.core_type = #tpu.core_type<tc>, window_params = [{transform_indices = @transform_0, window_bounds = array<i64: 1, 8, 16, 32>}, {pipeline_mode = #tpu.pipeline_mode<synchronous>, transform_indices = @transform_1, window_bounds = array<i64: 8, 32>}, {pipeline_mode = #tpu.pipeline_mode<synchronous>, transform_indices = @transform_2, window_bounds = array<i64: 128, 128>}, {pipeline_mode = #tpu.pipeline_mode<synchronous>, transform_indices = @transform_3, window_bounds = array<i64: 32, 96>}, {pipeline_mode = #tpu.pipeline_mode<synchronous>, transform_indices = @transform_4, window_bounds = array<i64: 1, 96>}, {pipeline_mode = #tpu.pipeline_mode<synchronous>, transform_indices = @transform_5, window_bounds = array<i64: 32, 32>}, {pipeline_mode = #tpu.pipeline_mode<synchronous>, transform_indices = @transform_6, window_bounds = array<i64: 1, 32>}, {pipeline_mode = #tpu.pipeline_mode<synchronous>, transform_indices = @transform_7, window_bounds = array<i64: 1, 32>}, {pipeline_mode = #tpu.pipeline_mode<synchronous>, transform_indices = @transform_8, window_bounds = array<i64: 1, 32>}, {pipeline_mode = #tpu.pipeline_mode<synchronous>, transform_indices = @transform_9, window_bounds = array<i64: 32, 96>}, {pipeline_mode = #tpu.pipeline_mode<synchronous>, transform_indices = @transform_10, window_bounds = array<i64: 1, 96>}, {pipeline_mode = #tpu.pipeline_mode<synchronous>, transform_indices = @transform_11, window_bounds = array<i64: 32, 32>}, {pipeline_mode = #tpu.pipeline_mode<synchronous>, transform_indices = @transform_12, window_bounds = array<i64: 1, 32>}, {pipeline_mode = #tpu.pipeline_mode<synchronous>, transform_indices = @transform_13, window_bounds = array<i64: 1, 32>}, {pipeline_mode = #tpu.pipeline_mode<synchronous>, transform_indices = @transform_14, window_bounds = array<i64: 1, 32>}, {pipeline_mode = #tpu.pipeline_mode<synchronous>, transform_indices = @transform_15, window_bounds = array<i64: 32, 128>}, {pipeline_mode = #tpu.pipeline_mode<synchronous>, transform_indices = @transform_16, window_bounds = array<i64: 1, 128>}, {pipeline_mode = #tpu.pipeline_mode<synchronous>, transform_indices = @transform_17, window_bounds = array<i64: 128, 32>}, {pipeline_mode = #tpu.pipeline_mode<synchronous>, transform_indices = @transform_18, window_bounds = array<i64: 1, 32>}, {pipeline_mode = #tpu.pipeline_mode<synchronous>, transform_indices = @transform_19, window_bounds = array<i64: 1, 32>}, {pipeline_mode = #tpu.pipeline_mode<synchronous>, transform_indices = @transform_20, window_bounds = array<i64: 1, 32>}, {transform_indices = @transform_21, window_bounds = array<i64: 1, 16, 8, 32>}]} {
    %c0 = arith.constant 0 : index
    %c0_0 = arith.constant 0 : index
    %c0_1 = arith.constant 0 : index
    %c0_2 = arith.constant 0 : index
    %0 = vector.load %arg1[%c0, %c0_0, %c0_1, %c0_2] : memref<1x8x16x32xf32, #tpu.memory_space<vmem>>, vector<1x8x16x32xf32>
    %1 = vector.shape_cast %0 : vector<1x8x16x32xf32> to vector<8x16x32xf32>
    %c0_3 = arith.constant 0 : index
    %c0_4 = arith.constant 0 : index
    %2 = vector.load %arg4[%c0_3, %c0_4] : memref<32x96xbf16, #tpu.memory_space<vmem>>, vector<32x96xbf16>
    %c0_5 = arith.constant 0 : index
    %c0_6 = arith.constant 0 : index
    %3 = vector.load %arg5[%c0_5, %c0_6] : memref<1x96xf32, #tpu.memory_space<vmem>>, vector<1x96xf32>
    %c0_7 = arith.constant 0 : index
    %c0_8 = arith.constant 0 : index
    %4 = vector.load %arg6[%c0_7, %c0_8] : memref<32x32xbf16, #tpu.memory_space<vmem>>, vector<32x32xbf16>
    %c0_9 = arith.constant 0 : index
    %c0_10 = arith.constant 0 : index
    %5 = vector.load %arg7[%c0_9, %c0_10] : memref<1x32xf32, #tpu.memory_space<vmem>>, vector<1x32xf32>
    %c0_11 = arith.constant 0 : index
    %c0_12 = arith.constant 0 : index
    %6 = vector.load %arg8[%c0_11, %c0_12] : memref<1x32xf32, #tpu.memory_space<vmem>>, vector<1x32xf32>
    %c0_13 = arith.constant 0 : index
    %c0_14 = arith.constant 0 : index
    %7 = vector.load %arg9[%c0_13, %c0_14] : memref<1x32xf32, #tpu.memory_space<vmem>>, vector<1x32xf32>
    %8 = vector.shape_cast %1 : vector<8x16x32xf32> to vector<128x32xf32>
    %9 = arith.truncf %8 : vector<128x32xf32> to vector<128x32xbf16>
    %cst = arith.constant dense<0.000000e+00> : vector<128x96xf32>
    %10 = tpu.matmul %9, %2, %cst {dimension_numbers = #tpu.dot_dimension_numbers<[1], [0], [0], [1], [0, 0, 1, 1], [], []>} : vector<128x32xbf16>, vector<32x96xbf16>, vector<128x96xf32> -> vector<128x96xf32>
    %11 = vector.broadcast %3 : vector<1x96xf32> to vector<128x96xf32>
    %12 = arith.addf %10, %11 : vector<128x96xf32>
    %13 = vector.extract_strided_slice %12 {offsets = [0, 0], sizes = [128, 32], strides = [1, 1]} : vector<128x96xf32> to vector<128x32xf32>
    %14 = vector.shape_cast %13 : vector<128x32xf32> to vector<8x16x32xf32>
    %15 = arith.truncf %14 : vector<8x16x32xf32> to vector<8x16x32xbf16>
    %16 = vector.extract_strided_slice %12 {offsets = [0, 32], sizes = [128, 32], strides = [1, 1]} : vector<128x96xf32> to vector<128x32xf32>
    %17 = vector.shape_cast %16 : vector<128x32xf32> to vector<8x16x32xf32>
    %18 = arith.truncf %17 : vector<8x16x32xf32> to vector<8x16x32xbf16>
    %19 = vector.extract_strided_slice %12 {offsets = [0, 64], sizes = [128, 32], strides = [1, 1]} : vector<128x96xf32> to vector<128x32xf32>
    %20 = vector.shape_cast %19 : vector<128x32xf32> to vector<8x16x32xf32>
    %21 = arith.truncf %20 : vector<8x16x32xf32> to vector<8x16x32xbf16>
    %22 = vector.extract_strided_slice %15 {offsets = [0, 0, 0], sizes = [8, 16, 8], strides = [1, 1, 1]} : vector<8x16x32xbf16> to vector<8x16x8xbf16>
    %23 = vector.extract_strided_slice %18 {offsets = [0, 0, 0], sizes = [8, 16, 8], strides = [1, 1, 1]} : vector<8x16x32xbf16> to vector<8x16x8xbf16>
    %24 = vector.extract_strided_slice %21 {offsets = [0, 0, 0], sizes = [8, 16, 8], strides = [1, 1, 1]} : vector<8x16x32xbf16> to vector<8x16x8xbf16>
    "tpu.trace_start"() <{level = 10 : i32, message = "nqd,nkd->nqk"}> : () -> ()
    %cst_15 = arith.constant dense<0.000000e+00> : vector<8x16x16xf32>
    %25 = tpu.matmul %22, %23, %cst_15 {dimension_numbers = #tpu.dot_dimension_numbers<[2], [2], [1], [1], [0, 0, 0, 1, 1, 1], [0], [0]>} : vector<8x16x8xbf16>, vector<8x16x8xbf16>, vector<8x16x16xf32> -> vector<8x16x16xf32>
    "tpu.trace_stop"() : () -> ()
    %cst_16 = arith.constant 0.353553385 : f32
    %26 = vector.broadcast %cst_16 : f32 to vector<8x16x16xf32>
    %27 = arith.mulf %25, %26 : vector<8x16x16xf32>
    %cst_17 = arith.constant dense<0xFF800000> : vector<8x16xf32>
    %28 = vector.multi_reduction <maximumf>, %27, %cst_17 [2] : vector<8x16x16xf32> to vector<8x16xf32>
    %29 = vector.shape_cast %28 : vector<8x16xf32> to vector<8x16x1xf32>
    %30 = vector.broadcast %29 : vector<8x16x1xf32> to vector<8x16x16xf32>
    %31 = arith.subf %27, %30 : vector<8x16x16xf32>
    %32 = math.exp %31 : vector<8x16x16xf32>
    %cst_18 = arith.constant dense<0.000000e+00> : vector<8x16xf32>
    %33 = vector.multi_reduction <add>, %32, %cst_18 [2] : vector<8x16x16xf32> to vector<8x16xf32>
    %34 = vector.shape_cast %33 : vector<8x16xf32> to vector<8x16x1xf32>
    %35 = tpu.reciprocal %34 {approx = true} : vector<8x16x1xf32> -> vector<8x16x1xf32>
    %36 = vector.broadcast %35 : vector<8x16x1xf32> to vector<8x16x16xf32>
    %37 = arith.mulf %32, %36 : vector<8x16x16xf32>
    %38 = arith.truncf %37 : vector<8x16x16xf32> to vector<8x16x16xbf16>
    "tpu.trace_start"() <{level = 10 : i32, message = "nqk,nkd->nqd"}> : () -> ()
    %cst_19 = arith.constant dense<0.000000e+00> : vector<8x16x8xf32>
    %39 = tpu.matmul %38, %24, %cst_19 {dimension_numbers = #tpu.dot_dimension_numbers<[2], [1], [1], [2], [0, 0, 0, 1, 1, 2], [0], [0]>} : vector<8x16x16xbf16>, vector<8x16x8xbf16>, vector<8x16x8xf32> -> vector<8x16x8xf32>
    "tpu.trace_stop"() : () -> ()
    %40 = vector.extract_strided_slice %15 {offsets = [0, 0, 8], sizes = [8, 16, 8], strides = [1, 1, 1]} : vector<8x16x32xbf16> to vector<8x16x8xbf16>
    %41 = vector.extract_strided_slice %18 {offsets = [0, 0, 8], sizes = [8, 16, 8], strides = [1, 1, 1]} : vector<8x16x32xbf16> to vector<8x16x8xbf16>
    %42 = vector.extract_strided_slice %21 {offsets = [0, 0, 8], sizes = [8, 16, 8], strides = [1, 1, 1]} : vector<8x16x32xbf16> to vector<8x16x8xbf16>
    "tpu.trace_start"() <{level = 10 : i32, message = "nqd,nkd->nqk"}> : () -> ()
    %cst_20 = arith.constant dense<0.000000e+00> : vector<8x16x16xf32>
    %43 = tpu.matmul %40, %41, %cst_20 {dimension_numbers = #tpu.dot_dimension_numbers<[2], [2], [1], [1], [0, 0, 0, 1, 1, 1], [0], [0]>} : vector<8x16x8xbf16>, vector<8x16x8xbf16>, vector<8x16x16xf32> -> vector<8x16x16xf32>
    "tpu.trace_stop"() : () -> ()
    %cst_21 = arith.constant 0.353553385 : f32
    %44 = vector.broadcast %cst_21 : f32 to vector<8x16x16xf32>
    %45 = arith.mulf %43, %44 : vector<8x16x16xf32>
    %cst_22 = arith.constant dense<0xFF800000> : vector<8x16xf32>
    %46 = vector.multi_reduction <maximumf>, %45, %cst_22 [2] : vector<8x16x16xf32> to vector<8x16xf32>
    %47 = vector.shape_cast %46 : vector<8x16xf32> to vector<8x16x1xf32>
    %48 = vector.broadcast %47 : vector<8x16x1xf32> to vector<8x16x16xf32>
    %49 = arith.subf %45, %48 : vector<8x16x16xf32>
    %50 = math.exp %49 : vector<8x16x16xf32>
    %cst_23 = arith.constant dense<0.000000e+00> : vector<8x16xf32>
    %51 = vector.multi_reduction <add>, %50, %cst_23 [2] : vector<8x16x16xf32> to vector<8x16xf32>
    %52 = vector.shape_cast %51 : vector<8x16xf32> to vector<8x16x1xf32>
    %53 = tpu.reciprocal %52 {approx = true} : vector<8x16x1xf32> -> vector<8x16x1xf32>
    %54 = vector.broadcast %53 : vector<8x16x1xf32> to vector<8x16x16xf32>
    %55 = arith.mulf %50, %54 : vector<8x16x16xf32>
    %56 = arith.truncf %55 : vector<8x16x16xf32> to vector<8x16x16xbf16>
    "tpu.trace_start"() <{level = 10 : i32, message = "nqk,nkd->nqd"}> : () -> ()
    %cst_24 = arith.constant dense<0.000000e+00> : vector<8x16x8xf32>
    %57 = tpu.matmul %56, %42, %cst_24 {dimension_numbers = #tpu.dot_dimension_numbers<[2], [1], [1], [2], [0, 0, 0, 1, 1, 2], [0], [0]>} : vector<8x16x16xbf16>, vector<8x16x8xbf16>, vector<8x16x8xf32> -> vector<8x16x8xf32>
    "tpu.trace_stop"() : () -> ()
    %58 = vector.extract_strided_slice %15 {offsets = [0, 0, 16], sizes = [8, 16, 8], strides = [1, 1, 1]} : vector<8x16x32xbf16> to vector<8x16x8xbf16>
    %59 = vector.extract_strided_slice %18 {offsets = [0, 0, 16], sizes = [8, 16, 8], strides = [1, 1, 1]} : vector<8x16x32xbf16> to vector<8x16x8xbf16>
    %60 = vector.extract_strided_slice %21 {offsets = [0, 0, 16], sizes = [8, 16, 8], strides = [1, 1, 1]} : vector<8x16x32xbf16> to vector<8x16x8xbf16>
    "tpu.trace_start"() <{level = 10 : i32, message = "nqd,nkd->nqk"}> : () -> ()
    %cst_25 = arith.constant dense<0.000000e+00> : vector<8x16x16xf32>
    %61 = tpu.matmul %58, %59, %cst_25 {dimension_numbers = #tpu.dot_dimension_numbers<[2], [2], [1], [1], [0, 0, 0, 1, 1, 1], [0], [0]>} : vector<8x16x8xbf16>, vector<8x16x8xbf16>, vector<8x16x16xf32> -> vector<8x16x16xf32>
    "tpu.trace_stop"() : () -> ()
    %cst_26 = arith.constant 0.353553385 : f32
    %62 = vector.broadcast %cst_26 : f32 to vector<8x16x16xf32>
    %63 = arith.mulf %61, %62 : vector<8x16x16xf32>
    %cst_27 = arith.constant dense<0xFF800000> : vector<8x16xf32>
    %64 = vector.multi_reduction <maximumf>, %63, %cst_27 [2] : vector<8x16x16xf32> to vector<8x16xf32>
    %65 = vector.shape_cast %64 : vector<8x16xf32> to vector<8x16x1xf32>
    %66 = vector.broadcast %65 : vector<8x16x1xf32> to vector<8x16x16xf32>
    %67 = arith.subf %63, %66 : vector<8x16x16xf32>
    %68 = math.exp %67 : vector<8x16x16xf32>
    %cst_28 = arith.constant dense<0.000000e+00> : vector<8x16xf32>
    %69 = vector.multi_reduction <add>, %68, %cst_28 [2] : vector<8x16x16xf32> to vector<8x16xf32>
    %70 = vector.shape_cast %69 : vector<8x16xf32> to vector<8x16x1xf32>
    %71 = tpu.reciprocal %70 {approx = true} : vector<8x16x1xf32> -> vector<8x16x1xf32>
    %72 = vector.broadcast %71 : vector<8x16x1xf32> to vector<8x16x16xf32>
    %73 = arith.mulf %68, %72 : vector<8x16x16xf32>
    %74 = arith.truncf %73 : vector<8x16x16xf32> to vector<8x16x16xbf16>
    "tpu.trace_start"() <{level = 10 : i32, message = "nqk,nkd->nqd"}> : () -> ()
    %cst_29 = arith.constant dense<0.000000e+00> : vector<8x16x8xf32>
    %75 = tpu.matmul %74, %60, %cst_29 {dimension_numbers = #tpu.dot_dimension_numbers<[2], [1], [1], [2], [0, 0, 0, 1, 1, 2], [0], [0]>} : vector<8x16x16xbf16>, vector<8x16x8xbf16>, vector<8x16x8xf32> -> vector<8x16x8xf32>
    "tpu.trace_stop"() : () -> ()
    %76 = vector.extract_strided_slice %15 {offsets = [0, 0, 24], sizes = [8, 16, 8], strides = [1, 1, 1]} : vector<8x16x32xbf16> to vector<8x16x8xbf16>
    %77 = vector.extract_strided_slice %18 {offsets = [0, 0, 24], sizes = [8, 16, 8], strides = [1, 1, 1]} : vector<8x16x32xbf16> to vector<8x16x8xbf16>
    %78 = vector.extract_strided_slice %21 {offsets = [0, 0, 24], sizes = [8, 16, 8], strides = [1, 1, 1]} : vector<8x16x32xbf16> to vector<8x16x8xbf16>
    "tpu.trace_start"() <{level = 10 : i32, message = "nqd,nkd->nqk"}> : () -> ()
    %cst_30 = arith.constant dense<0.000000e+00> : vector<8x16x16xf32>
    %79 = tpu.matmul %76, %77, %cst_30 {dimension_numbers = #tpu.dot_dimension_numbers<[2], [2], [1], [1], [0, 0, 0, 1, 1, 1], [0], [0]>} : vector<8x16x8xbf16>, vector<8x16x8xbf16>, vector<8x16x16xf32> -> vector<8x16x16xf32>
    "tpu.trace_stop"() : () -> ()
    %cst_31 = arith.constant 0.353553385 : f32
    %80 = vector.broadcast %cst_31 : f32 to vector<8x16x16xf32>
    %81 = arith.mulf %79, %80 : vector<8x16x16xf32>
    %cst_32 = arith.constant dense<0xFF800000> : vector<8x16xf32>
    %82 = vector.multi_reduction <maximumf>, %81, %cst_32 [2] : vector<8x16x16xf32> to vector<8x16xf32>
    %83 = vector.shape_cast %82 : vector<8x16xf32> to vector<8x16x1xf32>
    %84 = vector.broadcast %83 : vector<8x16x1xf32> to vector<8x16x16xf32>
    %85 = arith.subf %81, %84 : vector<8x16x16xf32>
    %86 = math.exp %85 : vector<8x16x16xf32>
    %cst_33 = arith.constant dense<0.000000e+00> : vector<8x16xf32>
    %87 = vector.multi_reduction <add>, %86, %cst_33 [2] : vector<8x16x16xf32> to vector<8x16xf32>
    %88 = vector.shape_cast %87 : vector<8x16xf32> to vector<8x16x1xf32>
    %89 = tpu.reciprocal %88 {approx = true} : vector<8x16x1xf32> -> vector<8x16x1xf32>
    %90 = vector.broadcast %89 : vector<8x16x1xf32> to vector<8x16x16xf32>
    %91 = arith.mulf %86, %90 : vector<8x16x16xf32>
    %92 = arith.truncf %91 : vector<8x16x16xf32> to vector<8x16x16xbf16>
    "tpu.trace_start"() <{level = 10 : i32, message = "nqk,nkd->nqd"}> : () -> ()
    %cst_34 = arith.constant dense<0.000000e+00> : vector<8x16x8xf32>
    %93 = tpu.matmul %92, %78, %cst_34 {dimension_numbers = #tpu.dot_dimension_numbers<[2], [1], [1], [2], [0, 0, 0, 1, 1, 2], [0], [0]>} : vector<8x16x16xbf16>, vector<8x16x8xbf16>, vector<8x16x8xf32> -> vector<8x16x8xf32>
    "tpu.trace_stop"() : () -> ()
    %94 = tpu.concatenate %39, %57, %75, %93 in 2 : vector<8x16x8xf32>, vector<8x16x8xf32>, vector<8x16x8xf32>, vector<8x16x8xf32> -> vector<8x16x32xf32>
    %95 = vector.shape_cast %94 : vector<8x16x32xf32> to vector<128x32xf32>
    %96 = arith.truncf %95 : vector<128x32xf32> to vector<128x32xbf16>
    %cst_35 = arith.constant dense<0.000000e+00> : vector<128x32xf32>
    %97 = tpu.matmul %96, %4, %cst_35 {dimension_numbers = #tpu.dot_dimension_numbers<[1], [0], [0], [1], [0, 0, 1, 1], [], []>} : vector<128x32xbf16>, vector<32x32xbf16>, vector<128x32xf32> -> vector<128x32xf32>
    %98 = vector.broadcast %5 : vector<1x32xf32> to vector<128x32xf32>
    %99 = arith.addf %97, %98 : vector<128x32xf32>
    %100 = arith.addf %99, %8 : vector<128x32xf32>
    %cst_36 = arith.constant dense<0.000000e+00> : vector<128xf32>
    %101 = vector.multi_reduction <add>, %100, %cst_36 [1] : vector<128x32xf32> to vector<128xf32>
    %102 = vector.shape_cast %101 : vector<128xf32> to vector<128x1xf32>
    %cst_37 = arith.constant 3.200000e+01 : f32
    %103 = vector.broadcast %cst_37 : f32 to vector<128x1xf32>
    %104 = arith.divf %102, %103 : vector<128x1xf32>
    %105 = vector.broadcast %104 : vector<128x1xf32> to vector<128x32xf32>
    %106 = arith.subf %100, %105 : vector<128x32xf32>
    %107 = arith.mulf %106, %106 : vector<128x32xf32>
    %cst_38 = arith.constant dense<0.000000e+00> : vector<128xf32>
    %108 = vector.multi_reduction <add>, %107, %cst_38 [1] : vector<128x32xf32> to vector<128xf32>
    %109 = vector.shape_cast %108 : vector<128xf32> to vector<128x1xf32>
    %cst_39 = arith.constant 3.200000e+01 : f32
    %110 = vector.broadcast %cst_39 : f32 to vector<128x1xf32>
    %111 = arith.divf %109, %110 : vector<128x1xf32>
    %112 = vector.broadcast %104 : vector<128x1xf32> to vector<128x32xf32>
    %113 = arith.subf %100, %112 : vector<128x32xf32>
    %cst_40 = arith.constant 9.99999974E-6 : f32
    %114 = vector.broadcast %cst_40 : f32 to vector<128x1xf32>
    %115 = arith.addf %111, %114 : vector<128x1xf32>
    %116 = math.rsqrt %115 : vector<128x1xf32>
    %117 = vector.broadcast %116 : vector<128x1xf32> to vector<128x32xf32>
    %118 = arith.mulf %113, %117 : vector<128x32xf32>
    %119 = vector.broadcast %6 : vector<1x32xf32> to vector<128x32xf32>
    %120 = arith.mulf %118, %119 : vector<128x32xf32>
    %121 = vector.broadcast %7 : vector<1x32xf32> to vector<128x32xf32>
    %122 = arith.addf %120, %121 : vector<128x32xf32>
    %c0_41 = arith.constant 0 : index
    %c0_42 = arith.constant 0 : index
    %123 = vector.load %arg3[%c0_41, %c0_42] : memref<128x128xbf16, #tpu.memory_space<vmem>>, vector<128x128xbf16>
    %124 = arith.truncf %122 : vector<128x32xf32> to vector<128x32xbf16>
    %cst_43 = arith.constant dense<0.000000e+00> : vector<128x32xf32>
    %125 = tpu.matmul %123, %124, %cst_43 {dimension_numbers = #tpu.dot_dimension_numbers<[1], [0], [0], [1], [0, 0, 1, 1], [], []>} : vector<128x128xbf16>, vector<128x32xbf16>, vector<128x32xf32> -> vector<128x32xf32>
    %126 = vector.shape_cast %125 : vector<128x32xf32> to vector<16x8x32xf32>
    %c0_44 = arith.constant 0 : index
    %c0_45 = arith.constant 0 : index
    %127 = vector.load %arg2[%c0_44, %c0_45] : memref<8x32xf32, #tpu.memory_space<vmem>>, vector<8x32xf32>
    %128 = vector.shape_cast %127 : vector<8x32xf32> to vector<1x8x32xf32>
    %129 = vector.broadcast %128 : vector<1x8x32xf32> to vector<16x8x32xf32>
    %130 = arith.addf %126, %129 : vector<16x8x32xf32>
    %c0_46 = arith.constant 0 : index
    %c0_47 = arith.constant 0 : index
    %131 = vector.load %arg10[%c0_46, %c0_47] : memref<32x96xbf16, #tpu.memory_space<vmem>>, vector<32x96xbf16>
    %c0_48 = arith.constant 0 : index
    %c0_49 = arith.constant 0 : index
    %132 = vector.load %arg11[%c0_48, %c0_49] : memref<1x96xf32, #tpu.memory_space<vmem>>, vector<1x96xf32>
    %c0_50 = arith.constant 0 : index
    %c0_51 = arith.constant 0 : index
    %133 = vector.load %arg12[%c0_50, %c0_51] : memref<32x32xbf16, #tpu.memory_space<vmem>>, vector<32x32xbf16>
    %c0_52 = arith.constant 0 : index
    %c0_53 = arith.constant 0 : index
    %134 = vector.load %arg13[%c0_52, %c0_53] : memref<1x32xf32, #tpu.memory_space<vmem>>, vector<1x32xf32>
    %c0_54 = arith.constant 0 : index
    %c0_55 = arith.constant 0 : index
    %135 = vector.load %arg14[%c0_54, %c0_55] : memref<1x32xf32, #tpu.memory_space<vmem>>, vector<1x32xf32>
    %c0_56 = arith.constant 0 : index
    %c0_57 = arith.constant 0 : index
    %136 = vector.load %arg15[%c0_56, %c0_57] : memref<1x32xf32, #tpu.memory_space<vmem>>, vector<1x32xf32>
    %137 = vector.shape_cast %130 : vector<16x8x32xf32> to vector<128x32xf32>
    %138 = arith.truncf %137 : vector<128x32xf32> to vector<128x32xbf16>
    %cst_58 = arith.constant dense<0.000000e+00> : vector<128x96xf32>
    %139 = tpu.matmul %138, %131, %cst_58 {dimension_numbers = #tpu.dot_dimension_numbers<[1], [0], [0], [1], [0, 0, 1, 1], [], []>} : vector<128x32xbf16>, vector<32x96xbf16>, vector<128x96xf32> -> vector<128x96xf32>
    %140 = vector.broadcast %132 : vector<1x96xf32> to vector<128x96xf32>
    %141 = arith.addf %139, %140 : vector<128x96xf32>
    %142 = vector.extract_strided_slice %141 {offsets = [0, 0], sizes = [128, 32], strides = [1, 1]} : vector<128x96xf32> to vector<128x32xf32>
    %143 = vector.shape_cast %142 : vector<128x32xf32> to vector<16x8x32xf32>
    %144 = arith.truncf %143 : vector<16x8x32xf32> to vector<16x8x32xbf16>
    %145 = vector.extract_strided_slice %141 {offsets = [0, 32], sizes = [128, 32], strides = [1, 1]} : vector<128x96xf32> to vector<128x32xf32>
    %146 = vector.shape_cast %145 : vector<128x32xf32> to vector<16x8x32xf32>
    %147 = arith.truncf %146 : vector<16x8x32xf32> to vector<16x8x32xbf16>
    %148 = vector.extract_strided_slice %141 {offsets = [0, 64], sizes = [128, 32], strides = [1, 1]} : vector<128x96xf32> to vector<128x32xf32>
    %149 = vector.shape_cast %148 : vector<128x32xf32> to vector<16x8x32xf32>
    %150 = arith.truncf %149 : vector<16x8x32xf32> to vector<16x8x32xbf16>
    %151 = vector.extract_strided_slice %144 {offsets = [0, 0, 0], sizes = [16, 8, 8], strides = [1, 1, 1]} : vector<16x8x32xbf16> to vector<16x8x8xbf16>
    %152 = vector.extract_strided_slice %147 {offsets = [0, 0, 0], sizes = [16, 8, 8], strides = [1, 1, 1]} : vector<16x8x32xbf16> to vector<16x8x8xbf16>
    %153 = vector.extract_strided_slice %150 {offsets = [0, 0, 0], sizes = [16, 8, 8], strides = [1, 1, 1]} : vector<16x8x32xbf16> to vector<16x8x8xbf16>
    "tpu.trace_start"() <{level = 10 : i32, message = "nqd,nkd->nqk"}> : () -> ()
    %cst_59 = arith.constant dense<0.000000e+00> : vector<16x8x8xf32>
    %154 = tpu.matmul %151, %152, %cst_59 {dimension_numbers = #tpu.dot_dimension_numbers<[2], [2], [1], [1], [0, 0, 0, 1, 1, 1], [0], [0]>} : vector<16x8x8xbf16>, vector<16x8x8xbf16>, vector<16x8x8xf32> -> vector<16x8x8xf32>
    "tpu.trace_stop"() : () -> ()
    %cst_60 = arith.constant 0.353553385 : f32
    %155 = vector.broadcast %cst_60 : f32 to vector<16x8x8xf32>
    %156 = arith.mulf %154, %155 : vector<16x8x8xf32>
    %cst_61 = arith.constant dense<0xFF800000> : vector<16x8xf32>
    %157 = vector.multi_reduction <maximumf>, %156, %cst_61 [2] : vector<16x8x8xf32> to vector<16x8xf32>
    %158 = vector.shape_cast %157 : vector<16x8xf32> to vector<16x8x1xf32>
    %159 = vector.broadcast %158 : vector<16x8x1xf32> to vector<16x8x8xf32>
    %160 = arith.subf %156, %159 : vector<16x8x8xf32>
    %161 = math.exp %160 : vector<16x8x8xf32>
    %cst_62 = arith.constant dense<0.000000e+00> : vector<16x8xf32>
    %162 = vector.multi_reduction <add>, %161, %cst_62 [2] : vector<16x8x8xf32> to vector<16x8xf32>
    %163 = vector.shape_cast %162 : vector<16x8xf32> to vector<16x8x1xf32>
    %164 = tpu.reciprocal %163 {approx = true} : vector<16x8x1xf32> -> vector<16x8x1xf32>
    %165 = vector.broadcast %164 : vector<16x8x1xf32> to vector<16x8x8xf32>
    %166 = arith.mulf %161, %165 : vector<16x8x8xf32>
    %167 = arith.truncf %166 : vector<16x8x8xf32> to vector<16x8x8xbf16>
    "tpu.trace_start"() <{level = 10 : i32, message = "nqk,nkd->nqd"}> : () -> ()
    %cst_63 = arith.constant dense<0.000000e+00> : vector<16x8x8xf32>
    %168 = tpu.matmul %167, %153, %cst_63 {dimension_numbers = #tpu.dot_dimension_numbers<[2], [1], [1], [2], [0, 0, 0, 1, 1, 2], [0], [0]>} : vector<16x8x8xbf16>, vector<16x8x8xbf16>, vector<16x8x8xf32> -> vector<16x8x8xf32>
    "tpu.trace_stop"() : () -> ()
    %169 = vector.extract_strided_slice %144 {offsets = [0, 0, 8], sizes = [16, 8, 8], strides = [1, 1, 1]} : vector<16x8x32xbf16> to vector<16x8x8xbf16>
    %170 = vector.extract_strided_slice %147 {offsets = [0, 0, 8], sizes = [16, 8, 8], strides = [1, 1, 1]} : vector<16x8x32xbf16> to vector<16x8x8xbf16>
    %171 = vector.extract_strided_slice %150 {offsets = [0, 0, 8], sizes = [16, 8, 8], strides = [1, 1, 1]} : vector<16x8x32xbf16> to vector<16x8x8xbf16>
    "tpu.trace_start"() <{level = 10 : i32, message = "nqd,nkd->nqk"}> : () -> ()
    %cst_64 = arith.constant dense<0.000000e+00> : vector<16x8x8xf32>
    %172 = tpu.matmul %169, %170, %cst_64 {dimension_numbers = #tpu.dot_dimension_numbers<[2], [2], [1], [1], [0, 0, 0, 1, 1, 1], [0], [0]>} : vector<16x8x8xbf16>, vector<16x8x8xbf16>, vector<16x8x8xf32> -> vector<16x8x8xf32>
    "tpu.trace_stop"() : () -> ()
    %cst_65 = arith.constant 0.353553385 : f32
    %173 = vector.broadcast %cst_65 : f32 to vector<16x8x8xf32>
    %174 = arith.mulf %172, %173 : vector<16x8x8xf32>
    %cst_66 = arith.constant dense<0xFF800000> : vector<16x8xf32>
    %175 = vector.multi_reduction <maximumf>, %174, %cst_66 [2] : vector<16x8x8xf32> to vector<16x8xf32>
    %176 = vector.shape_cast %175 : vector<16x8xf32> to vector<16x8x1xf32>
    %177 = vector.broadcast %176 : vector<16x8x1xf32> to vector<16x8x8xf32>
    %178 = arith.subf %174, %177 : vector<16x8x8xf32>
    %179 = math.exp %178 : vector<16x8x8xf32>
    %cst_67 = arith.constant dense<0.000000e+00> : vector<16x8xf32>
    %180 = vector.multi_reduction <add>, %179, %cst_67 [2] : vector<16x8x8xf32> to vector<16x8xf32>
    %181 = vector.shape_cast %180 : vector<16x8xf32> to vector<16x8x1xf32>
    %182 = tpu.reciprocal %181 {approx = true} : vector<16x8x1xf32> -> vector<16x8x1xf32>
    %183 = vector.broadcast %182 : vector<16x8x1xf32> to vector<16x8x8xf32>
    %184 = arith.mulf %179, %183 : vector<16x8x8xf32>
    %185 = arith.truncf %184 : vector<16x8x8xf32> to vector<16x8x8xbf16>
    "tpu.trace_start"() <{level = 10 : i32, message = "nqk,nkd->nqd"}> : () -> ()
    %cst_68 = arith.constant dense<0.000000e+00> : vector<16x8x8xf32>
    %186 = tpu.matmul %185, %171, %cst_68 {dimension_numbers = #tpu.dot_dimension_numbers<[2], [1], [1], [2], [0, 0, 0, 1, 1, 2], [0], [0]>} : vector<16x8x8xbf16>, vector<16x8x8xbf16>, vector<16x8x8xf32> -> vector<16x8x8xf32>
    "tpu.trace_stop"() : () -> ()
    %187 = vector.extract_strided_slice %144 {offsets = [0, 0, 16], sizes = [16, 8, 8], strides = [1, 1, 1]} : vector<16x8x32xbf16> to vector<16x8x8xbf16>
    %188 = vector.extract_strided_slice %147 {offsets = [0, 0, 16], sizes = [16, 8, 8], strides = [1, 1, 1]} : vector<16x8x32xbf16> to vector<16x8x8xbf16>
    %189 = vector.extract_strided_slice %150 {offsets = [0, 0, 16], sizes = [16, 8, 8], strides = [1, 1, 1]} : vector<16x8x32xbf16> to vector<16x8x8xbf16>
    "tpu.trace_start"() <{level = 10 : i32, message = "nqd,nkd->nqk"}> : () -> ()
    %cst_69 = arith.constant dense<0.000000e+00> : vector<16x8x8xf32>
    %190 = tpu.matmul %187, %188, %cst_69 {dimension_numbers = #tpu.dot_dimension_numbers<[2], [2], [1], [1], [0, 0, 0, 1, 1, 1], [0], [0]>} : vector<16x8x8xbf16>, vector<16x8x8xbf16>, vector<16x8x8xf32> -> vector<16x8x8xf32>
    "tpu.trace_stop"() : () -> ()
    %cst_70 = arith.constant 0.353553385 : f32
    %191 = vector.broadcast %cst_70 : f32 to vector<16x8x8xf32>
    %192 = arith.mulf %190, %191 : vector<16x8x8xf32>
    %cst_71 = arith.constant dense<0xFF800000> : vector<16x8xf32>
    %193 = vector.multi_reduction <maximumf>, %192, %cst_71 [2] : vector<16x8x8xf32> to vector<16x8xf32>
    %194 = vector.shape_cast %193 : vector<16x8xf32> to vector<16x8x1xf32>
    %195 = vector.broadcast %194 : vector<16x8x1xf32> to vector<16x8x8xf32>
    %196 = arith.subf %192, %195 : vector<16x8x8xf32>
    %197 = math.exp %196 : vector<16x8x8xf32>
    %cst_72 = arith.constant dense<0.000000e+00> : vector<16x8xf32>
    %198 = vector.multi_reduction <add>, %197, %cst_72 [2] : vector<16x8x8xf32> to vector<16x8xf32>
    %199 = vector.shape_cast %198 : vector<16x8xf32> to vector<16x8x1xf32>
    %200 = tpu.reciprocal %199 {approx = true} : vector<16x8x1xf32> -> vector<16x8x1xf32>
    %201 = vector.broadcast %200 : vector<16x8x1xf32> to vector<16x8x8xf32>
    %202 = arith.mulf %197, %201 : vector<16x8x8xf32>
    %203 = arith.truncf %202 : vector<16x8x8xf32> to vector<16x8x8xbf16>
    "tpu.trace_start"() <{level = 10 : i32, message = "nqk,nkd->nqd"}> : () -> ()
    %cst_73 = arith.constant dense<0.000000e+00> : vector<16x8x8xf32>
    %204 = tpu.matmul %203, %189, %cst_73 {dimension_numbers = #tpu.dot_dimension_numbers<[2], [1], [1], [2], [0, 0, 0, 1, 1, 2], [0], [0]>} : vector<16x8x8xbf16>, vector<16x8x8xbf16>, vector<16x8x8xf32> -> vector<16x8x8xf32>
    "tpu.trace_stop"() : () -> ()
    %205 = vector.extract_strided_slice %144 {offsets = [0, 0, 24], sizes = [16, 8, 8], strides = [1, 1, 1]} : vector<16x8x32xbf16> to vector<16x8x8xbf16>
    %206 = vector.extract_strided_slice %147 {offsets = [0, 0, 24], sizes = [16, 8, 8], strides = [1, 1, 1]} : vector<16x8x32xbf16> to vector<16x8x8xbf16>
    %207 = vector.extract_strided_slice %150 {offsets = [0, 0, 24], sizes = [16, 8, 8], strides = [1, 1, 1]} : vector<16x8x32xbf16> to vector<16x8x8xbf16>
    "tpu.trace_start"() <{level = 10 : i32, message = "nqd,nkd->nqk"}> : () -> ()
    %cst_74 = arith.constant dense<0.000000e+00> : vector<16x8x8xf32>
    %208 = tpu.matmul %205, %206, %cst_74 {dimension_numbers = #tpu.dot_dimension_numbers<[2], [2], [1], [1], [0, 0, 0, 1, 1, 1], [0], [0]>} : vector<16x8x8xbf16>, vector<16x8x8xbf16>, vector<16x8x8xf32> -> vector<16x8x8xf32>
    "tpu.trace_stop"() : () -> ()
    %cst_75 = arith.constant 0.353553385 : f32
    %209 = vector.broadcast %cst_75 : f32 to vector<16x8x8xf32>
    %210 = arith.mulf %208, %209 : vector<16x8x8xf32>
    %cst_76 = arith.constant dense<0xFF800000> : vector<16x8xf32>
    %211 = vector.multi_reduction <maximumf>, %210, %cst_76 [2] : vector<16x8x8xf32> to vector<16x8xf32>
    %212 = vector.shape_cast %211 : vector<16x8xf32> to vector<16x8x1xf32>
    %213 = vector.broadcast %212 : vector<16x8x1xf32> to vector<16x8x8xf32>
    %214 = arith.subf %210, %213 : vector<16x8x8xf32>
    %215 = math.exp %214 : vector<16x8x8xf32>
    %cst_77 = arith.constant dense<0.000000e+00> : vector<16x8xf32>
    %216 = vector.multi_reduction <add>, %215, %cst_77 [2] : vector<16x8x8xf32> to vector<16x8xf32>
    %217 = vector.shape_cast %216 : vector<16x8xf32> to vector<16x8x1xf32>
    %218 = tpu.reciprocal %217 {approx = true} : vector<16x8x1xf32> -> vector<16x8x1xf32>
    %219 = vector.broadcast %218 : vector<16x8x1xf32> to vector<16x8x8xf32>
    %220 = arith.mulf %215, %219 : vector<16x8x8xf32>
    %221 = arith.truncf %220 : vector<16x8x8xf32> to vector<16x8x8xbf16>
    "tpu.trace_start"() <{level = 10 : i32, message = "nqk,nkd->nqd"}> : () -> ()
    %cst_78 = arith.constant dense<0.000000e+00> : vector<16x8x8xf32>
    %222 = tpu.matmul %221, %207, %cst_78 {dimension_numbers = #tpu.dot_dimension_numbers<[2], [1], [1], [2], [0, 0, 0, 1, 1, 2], [0], [0]>} : vector<16x8x8xbf16>, vector<16x8x8xbf16>, vector<16x8x8xf32> -> vector<16x8x8xf32>
    "tpu.trace_stop"() : () -> ()
    %223 = tpu.concatenate %168, %186, %204, %222 in 2 : vector<16x8x8xf32>, vector<16x8x8xf32>, vector<16x8x8xf32>, vector<16x8x8xf32> -> vector<16x8x32xf32>
    %224 = vector.shape_cast %223 : vector<16x8x32xf32> to vector<128x32xf32>
    %225 = arith.truncf %224 : vector<128x32xf32> to vector<128x32xbf16>
    %cst_79 = arith.constant dense<0.000000e+00> : vector<128x32xf32>
    %226 = tpu.matmul %225, %133, %cst_79 {dimension_numbers = #tpu.dot_dimension_numbers<[1], [0], [0], [1], [0, 0, 1, 1], [], []>} : vector<128x32xbf16>, vector<32x32xbf16>, vector<128x32xf32> -> vector<128x32xf32>
    %227 = vector.broadcast %134 : vector<1x32xf32> to vector<128x32xf32>
    %228 = arith.addf %226, %227 : vector<128x32xf32>
    %229 = arith.addf %228, %137 : vector<128x32xf32>
    %cst_80 = arith.constant dense<0.000000e+00> : vector<128xf32>
    %230 = vector.multi_reduction <add>, %229, %cst_80 [1] : vector<128x32xf32> to vector<128xf32>
    %231 = vector.shape_cast %230 : vector<128xf32> to vector<128x1xf32>
    %cst_81 = arith.constant 3.200000e+01 : f32
    %232 = vector.broadcast %cst_81 : f32 to vector<128x1xf32>
    %233 = arith.divf %231, %232 : vector<128x1xf32>
    %234 = vector.broadcast %233 : vector<128x1xf32> to vector<128x32xf32>
    %235 = arith.subf %229, %234 : vector<128x32xf32>
    %236 = arith.mulf %235, %235 : vector<128x32xf32>
    %cst_82 = arith.constant dense<0.000000e+00> : vector<128xf32>
    %237 = vector.multi_reduction <add>, %236, %cst_82 [1] : vector<128x32xf32> to vector<128xf32>
    %238 = vector.shape_cast %237 : vector<128xf32> to vector<128x1xf32>
    %cst_83 = arith.constant 3.200000e+01 : f32
    %239 = vector.broadcast %cst_83 : f32 to vector<128x1xf32>
    %240 = arith.divf %238, %239 : vector<128x1xf32>
    %241 = vector.broadcast %233 : vector<128x1xf32> to vector<128x32xf32>
    %242 = arith.subf %229, %241 : vector<128x32xf32>
    %cst_84 = arith.constant 9.99999974E-6 : f32
    %243 = vector.broadcast %cst_84 : f32 to vector<128x1xf32>
    %244 = arith.addf %240, %243 : vector<128x1xf32>
    %245 = math.rsqrt %244 : vector<128x1xf32>
    %246 = vector.broadcast %245 : vector<128x1xf32> to vector<128x32xf32>
    %247 = arith.mulf %242, %246 : vector<128x32xf32>
    %248 = vector.broadcast %135 : vector<1x32xf32> to vector<128x32xf32>
    %249 = arith.mulf %247, %248 : vector<128x32xf32>
    %250 = vector.broadcast %136 : vector<1x32xf32> to vector<128x32xf32>
    %251 = arith.addf %249, %250 : vector<128x32xf32>
    %c0_85 = arith.constant 0 : index
    %c0_86 = arith.constant 0 : index
    %252 = vector.load %arg16[%c0_85, %c0_86] : memref<32x128xbf16, #tpu.memory_space<vmem>>, vector<32x128xbf16>
    %c0_87 = arith.constant 0 : index
    %c0_88 = arith.constant 0 : index
    %253 = vector.load %arg17[%c0_87, %c0_88] : memref<1x128xf32, #tpu.memory_space<vmem>>, vector<1x128xf32>
    %c0_89 = arith.constant 0 : index
    %c0_90 = arith.constant 0 : index
    %254 = vector.load %arg18[%c0_89, %c0_90] : memref<128x32xbf16, #tpu.memory_space<vmem>>, vector<128x32xbf16>
    %c0_91 = arith.constant 0 : index
    %c0_92 = arith.constant 0 : index
    %255 = vector.load %arg19[%c0_91, %c0_92] : memref<1x32xf32, #tpu.memory_space<vmem>>, vector<1x32xf32>
    %c0_93 = arith.constant 0 : index
    %c0_94 = arith.constant 0 : index
    %256 = vector.load %arg20[%c0_93, %c0_94] : memref<1x32xf32, #tpu.memory_space<vmem>>, vector<1x32xf32>
    %c0_95 = arith.constant 0 : index
    %c0_96 = arith.constant 0 : index
    %257 = vector.load %arg21[%c0_95, %c0_96] : memref<1x32xf32, #tpu.memory_space<vmem>>, vector<1x32xf32>
    %258 = arith.truncf %251 : vector<128x32xf32> to vector<128x32xbf16>
    %cst_97 = arith.constant dense<0.000000e+00> : vector<128x128xf32>
    %259 = tpu.matmul %258, %252, %cst_97 {dimension_numbers = #tpu.dot_dimension_numbers<[1], [0], [0], [1], [0, 0, 1, 1], [], []>} : vector<128x32xbf16>, vector<32x128xbf16>, vector<128x128xf32> -> vector<128x128xf32>
    %260 = vector.broadcast %253 : vector<1x128xf32> to vector<128x128xf32>
    %261 = arith.addf %259, %260 : vector<128x128xf32>
    %cst_98 = arith.constant 5.000000e-01 : f32
    %262 = vector.broadcast %cst_98 : f32 to vector<128x128xf32>
    %263 = arith.mulf %262, %261 : vector<128x128xf32>
    %cst_99 = arith.constant 0.707106769 : f32
    %264 = vector.broadcast %cst_99 : f32 to vector<128x128xf32>
    %265 = arith.mulf %261, %264 : vector<128x128xf32>
    %266 = math.erf %265 : vector<128x128xf32>
    %cst_100 = arith.constant 1.000000e+00 : f32
    %267 = vector.broadcast %cst_100 : f32 to vector<128x128xf32>
    %268 = arith.addf %267, %266 : vector<128x128xf32>
    %269 = arith.mulf %263, %268 : vector<128x128xf32>
    %270 = arith.truncf %269 : vector<128x128xf32> to vector<128x128xbf16>
    %cst_101 = arith.constant dense<0.000000e+00> : vector<128x32xf32>
    %271 = tpu.matmul %270, %254, %cst_101 {dimension_numbers = #tpu.dot_dimension_numbers<[1], [0], [0], [1], [0, 0, 1, 1], [], []>} : vector<128x128xbf16>, vector<128x32xbf16>, vector<128x32xf32> -> vector<128x32xf32>
    %272 = vector.broadcast %255 : vector<1x32xf32> to vector<128x32xf32>
    %273 = arith.addf %271, %272 : vector<128x32xf32>
    %274 = arith.addf %273, %251 : vector<128x32xf32>
    %cst_102 = arith.constant dense<0.000000e+00> : vector<128xf32>
    %275 = vector.multi_reduction <add>, %274, %cst_102 [1] : vector<128x32xf32> to vector<128xf32>
    %276 = vector.shape_cast %275 : vector<128xf32> to vector<128x1xf32>
    %cst_103 = arith.constant 3.200000e+01 : f32
    %277 = vector.broadcast %cst_103 : f32 to vector<128x1xf32>
    %278 = arith.divf %276, %277 : vector<128x1xf32>
    %279 = vector.broadcast %278 : vector<128x1xf32> to vector<128x32xf32>
    %280 = arith.subf %274, %279 : vector<128x32xf32>
    %281 = arith.mulf %280, %280 : vector<128x32xf32>
    %cst_104 = arith.constant dense<0.000000e+00> : vector<128xf32>
    %282 = vector.multi_reduction <add>, %281, %cst_104 [1] : vector<128x32xf32> to vector<128xf32>
    %283 = vector.shape_cast %282 : vector<128xf32> to vector<128x1xf32>
    %cst_105 = arith.constant 3.200000e+01 : f32
    %284 = vector.broadcast %cst_105 : f32 to vector<128x1xf32>
    %285 = arith.divf %283, %284 : vector<128x1xf32>
    %286 = vector.broadcast %278 : vector<128x1xf32> to vector<128x32xf32>
    %287 = arith.subf %274, %286 : vector<128x32xf32>
    %cst_106 = arith.constant 9.99999974E-6 : f32
    %288 = vector.broadcast %cst_106 : f32 to vector<128x1xf32>
    %289 = arith.addf %285, %288 : vector<128x1xf32>
    %290 = math.rsqrt %289 : vector<128x1xf32>
    %291 = vector.broadcast %290 : vector<128x1xf32> to vector<128x32xf32>
    %292 = arith.mulf %287, %291 : vector<128x32xf32>
    %293 = vector.broadcast %256 : vector<1x32xf32> to vector<128x32xf32>
    %294 = arith.mulf %292, %293 : vector<128x32xf32>
    %295 = vector.broadcast %257 : vector<1x32xf32> to vector<128x32xf32>
    %296 = arith.addf %294, %295 : vector<128x32xf32>
    %297 = vector.shape_cast %296 : vector<128x32xf32> to vector<1x16x8x32xf32>
    %c0_107 = arith.constant 0 : index
    %c0_108 = arith.constant 0 : index
    %c0_109 = arith.constant 0 : index
    %c0_110 = arith.constant 0 : index
    %298 = vector.load %arg22[%c0_107, %c0_108, %c0_109, %c0_110] : memref<1x16x8x32xf32, #tpu.memory_space<vmem>>, vector<1x16x8x32xf32>
    tpu.vector_store %arg22[%c0_107, %c0_108, %c0_109, %c0_110], %297 {strides = array<i32>} : memref<1x16x8x32xf32, #tpu.memory_space<vmem>>, vector<1x16x8x32xf32>,
    return
  }
  func.func @transform_0(%arg0: i32) -> (i32, i32, i32, i32) {
    %c0_i32 = arith.constant 0 : i32
    %c0_i32_0 = arith.constant 0 : i32
    %c0_i32_1 = arith.constant 0 : i32
    %c0_i32_2 = arith.constant 0 : i32
    return %arg0, %c0_i32, %c0_i32_0, %c0_i32_1 : i32, i32, i32, i32
  }
  func.func @transform_1(%arg0: i32) -> (i32, i32) {
    %c0_i32 = arith.constant 0 : i32
    %c0_i32_0 = arith.constant 0 : i32
    %c0_i32_1 = arith.constant 0 : i32
    return %c0_i32, %c0_i32_0 : i32, i32
  }
  func.func @transform_2(%arg0: i32) -> (i32, i32) {
    %c0_i32 = arith.constant 0 : i32
    %c0_i32_0 = arith.constant 0 : i32
    %c0_i32_1 = arith.constant 0 : i32
    return %c0_i32, %c0_i32_0 : i32, i32
  }
  func.func @transform_3(%arg0: i32) -> (i32, i32) {
    %c0_i32 = arith.constant 0 : i32
    %c0_i32_0 = arith.constant 0 : i32
    %c0_i32_1 = arith.constant 0 : i32
    return %c0_i32, %c0_i32_0 : i32, i32
  }
  func.func @transform_4(%arg0: i32) -> (i32, i32) {
    %c0_i32 = arith.constant 0 : i32
    %c0_i32_0 = arith.constant 0 : i32
    %c0_i32_1 = arith.constant 0 : i32
    return %c0_i32, %c0_i32_0 : i32, i32
  }
  func.func @transform_5(%arg0: i32) -> (i32, i32) {
    %c0_i32 = arith.constant 0 : i32
    %c0_i32_0 = arith.constant 0 : i32
    %c0_i32_1 = arith.constant 0 : i32
    return %c0_i32, %c0_i32_0 : i32, i32
  }
  func.func @transform_6(%arg0: i32) -> (i32, i32) {
    %c0_i32 = arith.constant 0 : i32
    %c0_i32_0 = arith.constant 0 : i32
    %c0_i32_1 = arith.constant 0 : i32
    return %c0_i32, %c0_i32_0 : i32, i32
  }
  func.func @transform_7(%arg0: i32) -> (i32, i32) {
    %c0_i32 = arith.constant 0 : i32
    %c0_i32_0 = arith.constant 0 : i32
    %c0_i32_1 = arith.constant 0 : i32
    return %c0_i32, %c0_i32_0 : i32, i32
  }
  func.func @transform_8(%arg0: i32) -> (i32, i32) {
    %c0_i32 = arith.constant 0 : i32
    %c0_i32_0 = arith.constant 0 : i32
    %c0_i32_1 = arith.constant 0 : i32
    return %c0_i32, %c0_i32_0 : i32, i32
  }
  func.func @transform_9(%arg0: i32) -> (i32, i32) {
    %c0_i32 = arith.constant 0 : i32
    %c0_i32_0 = arith.constant 0 : i32
    %c0_i32_1 = arith.constant 0 : i32
    return %c0_i32, %c0_i32_0 : i32, i32
  }
  func.func @transform_10(%arg0: i32) -> (i32, i32) {
    %c0_i32 = arith.constant 0 : i32
    %c0_i32_0 = arith.constant 0 : i32
    %c0_i32_1 = arith.constant 0 : i32
    return %c0_i32, %c0_i32_0 : i32, i32
  }
  func.func @transform_11(%arg0: i32) -> (i32, i32) {
    %c0_i32 = arith.constant 0 : i32
    %c0_i32_0 = arith.constant 0 : i32
    %c0_i32_1 = arith.constant 0 : i32
    return %c0_i32, %c0_i32_0 : i32, i32
  }
  func.func @transform_12(%arg0: i32) -> (i32, i32) {
    %c0_i32 = arith.constant 0 : i32
    %c0_i32_0 = arith.constant 0 : i32
    %c0_i32_1 = arith.constant 0 : i32
    return %c0_i32, %c0_i32_0 : i32, i32
  }
  func.func @transform_13(%arg0: i32) -> (i32, i32) {
    %c0_i32 = arith.constant 0 : i32
    %c0_i32_0 = arith.constant 0 : i32
    %c0_i32_1 = arith.constant 0 : i32
    return %c0_i32, %c0_i32_0 : i32, i32
  }
  func.func @transform_14(%arg0: i32) -> (i32, i32) {
    %c0_i32 = arith.constant 0 : i32
    %c0_i32_0 = arith.constant 0 : i32
    %c0_i32_1 = arith.constant 0 : i32
    return %c0_i32, %c0_i32_0 : i32, i32
  }
  func.func @transform_15(%arg0: i32) -> (i32, i32) {
    %c0_i32 = arith.constant 0 : i32
    %c0_i32_0 = arith.constant 0 : i32
    %c0_i32_1 = arith.constant 0 : i32
    return %c0_i32, %c0_i32_0 : i32, i32
  }
  func.func @transform_16(%arg0: i32) -> (i32, i32) {
    %c0_i32 = arith.constant 0 : i32
    %c0_i32_0 = arith.constant 0 : i32
    %c0_i32_1 = arith.constant 0 : i32
    return %c0_i32, %c0_i32_0 : i32, i32
  }
  func.func @transform_17(%arg0: i32) -> (i32, i32) {
    %c0_i32 = arith.constant 0 : i32
    %c0_i32_0 = arith.constant 0 : i32
    %c0_i32_1 = arith.constant 0 : i32
    return %c0_i32, %c0_i32_0 : i32, i32
  }
  func.func @transform_18(%arg0: i32) -> (i32, i32) {
    %c0_i32 = arith.constant 0 : i32
    %c0_i32_0 = arith.constant 0 : i32
    %c0_i32_1 = arith.constant 0 : i32
    return %c0_i32, %c0_i32_0 : i32, i32
  }
  func.func @transform_19(%arg0: i32) -> (i32, i32) {
    %c0_i32 = arith.constant 0 : i32
    %c0_i32_0 = arith.constant 0 : i32
    %c0_i32_1 = arith.constant 0 : i32
    return %c0_i32, %c0_i32_0 : i32, i32
  }
  func.func @transform_20(%arg0: i32) -> (i32, i32) {
    %c0_i32 = arith.constant 0 : i32
    %c0_i32_0 = arith.constant 0 : i32
    %c0_i32_1 = arith.constant 0 : i32
    return %c0_i32, %c0_i32_0 : i32, i32
  }
  func.func @transform_21(%arg0: i32) -> (i32, i32, i32, i32) {
    %c0_i32 = arith.constant 0 : i32
    %c0_i32_0 = arith.constant 0 : i32
    %c0_i32_1 = arith.constant 0 : i32
    %c0_i32_2 = arith.constant 0 : i32
    return %arg0, %c0_i32, %c0_i32_0, %c0_i32_1 : i32, i32, i32, i32
  }
}

</mosaic_0001>

<bundles_post_ra>
// kernel: stt_block_forward.1
= control target key start
LH: loop header
LB: loop body
LE: loop exit
PB: predicated region body
PF: predicated region fallthrough
CT: control target
= control target key end

     0   :  { %s22054_s0 = inlined_call_operand.vmem [shape: f32[2,8,16,32], index: 0, kind: input, shape index: {}]   ;;  %s22055_s1 = inlined_call_operand.vmem [shape: f32[8,32], index: 1, kind: input, shape index: {}]   ;;  %s22056_s2 = inlined_call_operand.vmem [shape: bf16[128,128], index: 2, kind: input, shape index: {}]   ;;  %s22057_s3 = inlined_call_operand.vmem [shape: bf16[32,96], index: 3, kind: input, shape index: {}]   ;;  %s22058_s4 = inlined_call_operand.vmem [shape: f32[1,96], index: 4, kind: input, shape index: {}]   ;;  %s22059_s5 = inlined_call_operand.vmem [shape: bf16[32,32], index: 5, kind: input, shape index: {}]   ;;  %s22060_s6 = inlined_call_operand.vmem [shape: f32[1,32], index: 6, kind: input, shape index: {}]   ;;  %s22061_s7 = inlined_call_operand.vmem [shape: f32[1,32], index: 7, kind: input, shape index: {}]   ;;  %s22062_s8 = inlined_call_operand.vmem [shape: f32[1,32], index: 8, kind: input, shape index: {}]   ;;  %s22063_s9 = inlined_call_operand.vmem [shape: bf16[32,96], index: 9, kind: input, shape index: {}]   ;;  %s22064_s10 = inlined_call_operand.vmem [shape: f32[1,96], index: 10, kind: input, shape index: {}]   ;;  %s22065_s11 = inlined_call_operand.vmem [shape: bf16[32,32], index: 11, kind: input, shape index: {}]   ;;  %s22066_s12 = inlined_call_operand.vmem [shape: f32[1,32], index: 12, kind: input, shape index: {}]   ;;  %s22067_s13 = inlined_call_operand.vmem [shape: f32[1,32], index: 13, kind: input, shape index: {}]   ;;  %s22068_s14 = inlined_call_operand.vmem [shape: f32[1,32], index: 14, kind: input, shape index: {}]   ;;  %s22069_s15 = inlined_call_operand.vmem [shape: bf16[32,128], index: 15, kind: input, shape index: {}]   ;;  %s22070_s16 = inlined_call_operand.vmem [shape: f32[1,128], index: 16, kind: input, shape index: {}]   ;;  %s22071_s17 = inlined_call_operand.vmem [shape: bf16[128,32], index: 17, kind: input, shape index: {}]   ;;  %s22072_s18 = inlined_call_operand.vmem [shape: f32[1,32], index: 18, kind: input, shape index: {}]   ;;  %s22073_s19 = inlined_call_operand.vmem [shape: f32[1,32], index: 19, kind: input, shape index: {}]   ;;  %s22074_s20 = inlined_call_operand.vmem [shape: f32[1,32], index: 20, kind: input, shape index: {}]   ;;  %s22075_s21 = inlined_call_operand.vmem [shape: f32[2,16,8,32], index: 21, kind: output, shape index: {}]  }
   0x1   :  { %22137 = sst [smem:[#allocation44_spill]] %s22054_s0 }
   0x2   :  { %22138 = sst [smem:[#allocation45_spill]] %s22055_s1 }
   0x3   :  { %22139 = sst [smem:[#allocation46_spill]] %s22056_s2  ;;  %s17428_s2 = smov 0  }
   0x4   :  { %22140 = sst [smem:[#allocation47_spill]] %s22057_s3 }
   0x5   :  { %22141 = sst [smem:[#allocation48_spill]] %s22058_s4 }
   0x6   :  { %22142 = sst [smem:[#allocation49_spill]] %s22059_s5 }
   0x7 LB: > { %s14283_s25 = sadd.s32 4294967295, %s17300_s2   ;;  %p14287_p0 = scmp.ge.s32.totalorder %s17300_s2, 1  ;;  %s17300_s2 = sphi %s17428_s2, %s31_s2  }
   0x8   : > { %p587_p1 = scmp.lt.s32.totalorder %s17300_s2, 3 }
   0xa   : > { %p588_p2 = pnand %p14287_p0, %p587_p1 }
   0xc   : > { %591 = sbr.rel (%p588_p2) target bundleno = 8286 (0x205e), region = 104 }
  0x13   : > { %s22143_s3 = sld [smem:[#allocation47_spill]]  ;;  %p647_p3 = scmp.lt.s32.totalorder %s14283_s25, 1  ;;  %vm712_vm0 = vcmask 261120   ;;  %v22079_v26 = vmov 0.0   ;;  %vm17303_vm1 = vmmov 0   ;;  %vm845_vm2 = vcmask 64512  }
  0x14   : > { %s22144_s5 = sld [smem:[#allocation44_spill]]  ;;  %15058 = vmatprep.subr.bf16.mxu1 %v22079_v26  ;;  %s22145_s24 = sld [smem:[#allocation48_spill]]  ;;  %15060 = vmatprep.mubr.msk.bf16.mxu1 %vm17303_vm1, %v22079_v26  ;;  %vm1259_vm3 = vcmask 130048   ;;  %vm4996_vm4 = vcmask 195584   ;;  %vm6787_vm5 = vcmask 1043456  }
  0x15   : > { %s22316_s25 = smov (!%p647_p3, %s14283_s25), 1  ;;  %s22109_s26 = smov 96  }
  0x16   : > { %s22081_s0 = sshll.u32 %s22316_s25, 7  ;;  %s22107_s27 = smov 64  }
  0x17   : > { %s22105_s28 = smov 88   ;;  %s22097_s29 = smov 120  }
  0x18   : > { %s22095_s4 = smov 56   ;;  %s22093_s30 = smov 80  }
  0x19   : > { %v16612_v0 = vld [vmem:[%s22143_s3] sm:$0xff]   ;;  %v16613_v1 = vld [vmem:[%s22143_s3 + $0x8] sm:$0xff]   ;;  %s22089_s23 = smov 48   ;;  %s22085_s1 = smov 72  }
  0x1a   : > { %15032 = vmatprep.subr.bf16.mxu0 %v16612_v0  ;;  %s17450_s22 = scalar_lea.vmem %s22144_s5, %s22081_s0  ;;  %v14292_v28 = vld [vmem:[%s22145_s24] ss:$0 sm:$0xff]  ;;  %s22091_s5 = smov 112  }
  0x1b   : > { %15033 = vmatpush3.bf16.msra.mxu0 %v16612_v0  ;;  %v658_v2 = vld [vmem:[%s17450_s22] sm:$0xff]  ;;  %v659_v3 = vld [vmem:[%s17450_s22 + $0x8] sm:$0xff]  ;;  %v660_v4 = vld [vmem:[%s17450_s22 + $0x10] sm:$0xff]  ;;  %s22083_s24 = smov 104   ;;  %s22087_s0 = smov 40  }
  0x1c   : > { %15034 = vmatprep.subr.bf16.mxu0 %v16613_v1  ;;  %v686_v5 = vpack.c.bf16 %v659_v3, %v658_v2  ;;  %v661_v6 = vld [vmem:[%s17450_s22 + $0x18] sm:$0xff]  ;;  %v662_v7 = vld [vmem:[%s17450_s22 + $0x20] sm:$0xff]  ;;  %v663_v8 = vld [vmem:[%s17450_s22 + $0x28] sm:$0xff] }
  0x1d   : > { %v687_v9 = vpack.c.bf16 %v661_v6, %v660_v4  ;;  %v688_v10 = vpack.c.bf16 %v663_v8, %v662_v7  ;;  %v664_v11 = vld [vmem:[%s17450_s22 + $0x30] sm:$0xff]  ;;  %v665_v12 = vld [vmem:[%s17450_s22 + $0x38] sm:$0xff]  ;;  %v666_v13 = vld [vmem:[%s17450_s22 + $0x40] sm:$0xff] }
  0x1e   : > { %15036 = vmatprep.mubr.msk.bf16.mxu0 %vm712_vm0, %v686_v5  ;;  %v667_v14 = vld [vmem:[%s17450_s22 + $0x48] sm:$0xff]  ;;  %v689_v15 = vpack.c.bf16 %v665_v12, %v664_v11  ;;  %v668_v17 = vld [vmem:[%s17450_s22 + $0x50] sm:$0xff]  ;;  %v669_v18 = vld [vmem:[%s17450_s22 + $0x58] sm:$0xff] }
  0x1f   : > { %15035 = vmatpush3.bf16.msra.mxu0 %v16613_v1  ;;  %v690_v16 = vpack.c.bf16 %v667_v14, %v666_v13  ;;  %v670_v19 = vld [vmem:[%s17450_s22 + $0x60] sm:$0xff]  ;;  %v671_v20 = vld [vmem:[%s17450_s22 + $0x68] sm:$0xff]  ;;  %v691_v21 = vpack.c.bf16 %v669_v18, %v668_v17  ;;  %v672_v23 = vld [vmem:[%s17450_s22 + $0x70] sm:$0xff] }
  0x20   : > { %v692_v22 = vpack.c.bf16 %v671_v20, %v670_v19  ;;  %v673_v24 = vld [vmem:[%s17450_s22 + $0x78] sm:$0xff]  ;;  %15052 = vmatprep.subr.bf16.mxu0 %v22079_v26 }
  0x21   : > { %v693_v25 = vpack.c.bf16 %v673_v24, %v672_v23 }
  0x22   : > { %15037 = vmatmul.mubr.msk.bf16.vlgmr.msra.gmra.mrb[0].mxu0 %vm712_vm0, %v687_v9 }
  0x23   : > { %15040 = vmatprep.mubr.msk.bf16.mxu0 %vm712_vm0, %v688_v10 }
  0x2a   : > { %15041 = vmatmul.mubr.msk.bf16.gmra.mrb[4].mxu0 %vm712_vm0, %v689_v15 }
  0x2b   : > { %15044 = vmatprep.mubr.msk.bf16.mxu0 %vm712_vm0, %v690_v16 }
  0x32   : > { %15045 = vmatmul.mubr.msk.bf16.gmra.mrb[8].mxu0 %vm712_vm0, %v691_v21 }
  0x33   : > { %15048 = vmatprep.mubr.msk.bf16.mxu0 %vm712_vm0, %v692_v22 }
  0x3a   : > { %15049 = vmatmul.mubr.msk.bf16.gmra.mrb[12].mxu0 %vm712_vm0, %v693_v25 }
  0x3b   : > { %15054 = vmatprep.mubr.msk.bf16.mxu0 %vm17303_vm1, %v22079_v26 }
  0xf5   : > { %v15038_v27 = vpop.f32.mrb[0].mxu0 }
  0xf6   : > { %v771_v29 = vpop.f32.mrb[1].mxu0  ;;  %v780_v31 = vadd.f32 %v15038_v27, %v14292_v28 }
  0xf7   : > { %v15039_v30 = vpop.f32.mrb[2].mxu0  ;;  %v772_v34 = vadd.f32 %v14292_v28, %v771_v29 }
  0xf8   : > { %v783_v32 = vadd.f32 %v15039_v30, %v14292_v28  ;;  %v774_v33 = vpop.f32.mrb[3].mxu0 }
  0xf9   : > { %v775_v35 = vadd.f32 %v14292_v28, %v774_v33 }
  0xfa   : > { %v17485_v36 = vpack.c.bf16 %v783_v32, %v780_v31 }
  0xfb   : > { %v17487_v37 = vpack.c.bf16 %v775_v35, %v772_v34 }
  0xfc   : > { %894 = vrot.lane.b32.xlu0 %v17485_v36, %s22109_s26 }
  0xfd   : > { %v15042_v38 = vpop.f32.mrb[4].mxu0 }
  0xfe   : > { %v796_v39 = vadd.f32 %v15042_v38, %v14292_v28  ;;  %v787_v40 = vpop.f32.mrb[5].mxu0 }
  0xff   : > { %v788_v41 = vadd.f32 %v14292_v28, %v787_v40  ;;  %v15043_v42 = vpop.f32.mrb[6].mxu0 }
 0x100   : > { %v799_v43 = vadd.f32 %v15043_v42, %v14292_v28  ;;  %v790_v44 = vpop.f32.mrb[7].mxu0  ;;  %843 = vrot.lane.b32.xlu0 %v17487_v37, %s22109_s26 }
 0x101   : > { %v791_v45 = vadd.f32 %v14292_v28, %v790_v44 }
 0x102   : > { %v17493_v46 = vpack.c.bf16 %v799_v43, %v796_v39 }
 0x103   : > { %v17495_v47 = vpack.c.bf16 %v791_v45, %v788_v41 }
 0x105   : > { %v15046_v48 = vpop.f32.mrb[8].mxu0  ;;  %944 = vrot.lane.b32.xlu1 %v17495_v47, %s22109_s26 }
 0x106   : > { %v812_v49 = vadd.f32 %v15046_v48, %v14292_v28  ;;  %v803_v50 = vpop.f32.mrb[9].mxu0 }
 0x107   : > { %v804_v51 = vadd.f32 %v14292_v28, %v803_v50  ;;  %v15047_v52 = vpop.f32.mrb[10].mxu0 }
 0x108   : > { %v815_v53 = vadd.f32 %v15047_v52, %v14292_v28  ;;  %v806_v54 = vpop.f32.mrb[11].mxu0 }
 0x109   : > { %v807_v55 = vadd.f32 %v14292_v28, %v806_v54  ;;  %994 = vrot.lane.b32.xlu1 %v17493_v46, %s22109_s26 }
 0x10a   : > { %v17501_v56 = vpack.c.bf16 %v815_v53, %v812_v49 }
 0x10b   : > { %v17503_v57 = vpack.c.bf16 %v807_v55, %v804_v51 }
 0x10d   : > { %v15050_v58 = vpop.f32.mrb[12].mxu0  ;;  %1044 = vrot.lane.b32.xlu0 %v17503_v57, %s22109_s26  ;;  %1094 = vrot.lane.b32.xlu1 %v17501_v56, %s22109_s26 }
 0x10e   : > { %v828_v59 = vadd.f32 %v15050_v58, %v14292_v28  ;;  %v819_v60 = vpop.f32.mrb[13].mxu0 }
 0x10f   : > { %v820_v61 = vadd.f32 %v14292_v28, %v819_v60  ;;  %v15051_v62 = vpop.f32.mrb[14].mxu0 }
 0x110   : > { %v831_v63 = vadd.f32 %v15051_v62, %v14292_v28  ;;  %v822_v0 = vpop.f32.mrb[15].mxu0 }
 0x111   : > { %v823_v1 = vadd.f32 %v14292_v28, %v822_v0 }
 0x112   : > { %v17509_v2 = vpack.c.bf16 %v831_v63, %v828_v59 }
 0x113   : > { %v17511_v3 = vpack.c.bf16 %v823_v1, %v820_v61 }
 0x114   : > { %1194 = vrot.lane.b32.xlu1 %v17509_v2, %s22109_s26 }
 0x115   : > { %1144 = vrot.lane.b32.xlu0 %v17511_v3, %s22109_s26  ;;  %s22237_s26 = smov 80  }
 0x118   : > { %1444 = vrot.lane.b32.xlu1 %v17487_v37, %s22107_s27 }
 0x119   : > { %1491 = vrot.lane.b32.xlu0 %v17485_v36, %s22107_s27 }
 0x11c   : > { %1538 = vrot.lane.b32.xlu1 %v17495_v47, %s22107_s27 }
 0x120   : > { %1585 = vrot.lane.b32.xlu1 %v17493_v46, %s22107_s27 }
 0x16e   : > { %v895_v4 = vpop.permute.xlu0 %894 }
 0x16f   : > { %v900_v5 = vsel %vm845_vm2, %v895_v4, 0 }
 0x170   : > { %15059 = vmatpush3.bf16.xpose.msra.mxu1 %v900_v5 }
 0x171   : > { %15064 = vmatprep.subr.bf16.mxu1 %v22079_v26 }
 0x172   : > { %v844_v6 = vpop.permute.xlu0 %843 }
 0x173   : > { %v850_v7 = vsel %vm845_vm2, %v844_v6, 0 }
 0x174   : > { %15053 = vmatpush3.bf16.xpose.msra.mxu0 %v850_v7 }
 0x175   : > { %15076 = vmatprep.subr.bf16.mxu0 %v22079_v26 }
 0x177   : > { %15061 = vmatmul.mubr.msk.bf16.vlgmr.msra.gmra.mrb[0].mxu1 %vm845_vm2, %v17485_v36  ;;  %v945_v8 = vpop.permute.xlu1 %944 }
 0x178   : > { %v950_v9 = vsel %vm845_vm2, %v945_v8, 0  ;;  %15066 = vmatprep.mubr.msk.bf16.mxu1 %vm17303_vm1, %v22079_v26 }
 0x179   : > { %15065 = vmatpush3.bf16.xpose.msra.mxu1 %v950_v9 }
 0x17a   : > { %15070 = vmatprep.subr.bf16.mxu1 %v22079_v26 }
 0x17b   : > { %15055 = vmatmul.mubr.msk.bf16.vlgmr.msra.gmra.mrb[16].mxu0 %vm845_vm2, %v17487_v37  ;;  %v995_v10 = vpop.permute.xlu1 %994 }
 0x17c   : > { %15078 = vmatprep.mubr.msk.bf16.mxu0 %vm17303_vm1, %v22079_v26  ;;  %v1000_v12 = vsel %vm845_vm2, %v995_v10, 0 }
 0x17f   : > { %v1045_v11 = vpop.permute.xlu0 %1044  ;;  %v1095_v14 = vpop.permute.xlu1 %1094 }
 0x180   : > { %v1050_v13 = vsel %vm845_vm2, %v1045_v11, 0  ;;  %15067 = vmatmul.mubr.msk.bf16.vlgmr.msra.gmra.mrb[4].mxu1 %vm845_vm2, %v17495_v47  ;;  %v1100_v16 = vsel %vm845_vm2, %v1095_v14, 0 }
 0x181   : > { %15071 = vmatpush3.bf16.xpose.msra.mxu1 %v1000_v12  ;;  %15077 = vmatpush3.bf16.xpose.msra.mxu0 %v1050_v13 }
 0x182   : > { %15072 = vmatprep.mubr.msk.bf16.mxu1 %vm17303_vm1, %v22079_v26  ;;  %15082 = vmatprep.subr.bf16.mxu1 %v22079_v26 }
 0x183   : > { %15088 = vmatprep.subr.bf16.mxu0 %v22079_v26 }
 0x186   : > { %v1195_v18 = vpop.permute.xlu1 %1194 }
 0x187   : > { %v1145_v15 = vpop.permute.xlu0 %1144  ;;  %v1200_v19 = vsel %vm845_vm2, %v1195_v18, 0 }
 0x188   : > { %v1150_v17 = vsel %vm845_vm2, %v1145_v15, 0  ;;  %15073 = vmatmul.mubr.msk.bf16.vlgmr.msra.gmra.mrb[8].mxu1 %vm845_vm2, %v17493_v46  ;;  %15079 = vmatmul.mubr.msk.bf16.vlgmr.msra.gmra.mrb[20].mxu0 %vm845_vm2, %v17503_v57 }
 0x189   : > { %15083 = vmatpush3.bf16.xpose.msra.mxu1 %v1100_v16  ;;  %15089 = vmatpush3.bf16.xpose.msra.mxu0 %v1150_v17 }
 0x18a   : > { %15084 = vmatprep.mubr.msk.bf16.mxu1 %vm17303_vm1, %v22079_v26  ;;  %15090 = vmatprep.mubr.msk.bf16.mxu0 %vm17303_vm1, %v22079_v26  ;;  %v1445_v20 = vpop.permute.xlu1 %1444 }
 0x18b   : > { %15094 = vmatprep.subr.bf16.mxu1 %v22079_v26  ;;  %15100 = vmatprep.subr.bf16.mxu0 %v22079_v26  ;;  %v1492_v21 = vpop.permute.xlu0 %1491 }
 0x190   : > { %15085 = vmatmul.mubr.msk.bf16.vlgmr.msra.gmra.mrb[12].mxu1 %vm845_vm2, %v17501_v56  ;;  %15091 = vmatmul.mubr.msk.bf16.vlgmr.msra.gmra.mrb[24].mxu0 %vm845_vm2, %v17511_v3 }
 0x191   : > { %15095 = vmatpush3.bf16.xpose.msra.mxu1 %v1200_v19  ;;  %15101 = vmatpush3.bf16.msra.mxu0 %v1445_v20 }
 0x192   : > { %15096 = vmatprep.mubr.msk.bf16.mxu1 %vm17303_vm1, %v22079_v26  ;;  %15106 = vmatprep.subr.bf16.mxu1 %v22079_v26 }
 0x193   : > { %15102 = vmatprep.mubr.msk.bf16.mxu0 %vm17303_vm1, %v22079_v26  ;;  %15112 = vmatprep.subr.bf16.mxu0 %v22079_v26 }
 0x198   : > { %15097 = vmatmul.mubr.msk.bf16.vlgmr.msra.gmra.mrb[16].mxu1 %vm845_vm2, %v17509_v2 }
 0x199   : > { %15107 = vmatpush3.bf16.msra.mxu1 %v1492_v21  ;;  %15108 = vmatprep.mubr.msk.bf16.mxu1 %vm17303_vm1, %v22079_v26 }
 0x19a   : > { %15118 = vmatprep.subr.bf16.mxu1 %v22079_v26 }
 0x24a   : > { %v936_v22 = vpop.f32.mrb[0].mxu1 }
 0x24b   : > { %v15062_v23 = vpop.f32.mrb[1].mxu1  ;;  %v17575_v24 = vmul.f32 0.35355338, %v936_v22 }
 0x24c   : > { %v939_v25 = vpop.f32.mrb[2].mxu1 }
 0x24d   : > { %v15063_v27 = vpop.f32.mrb[3].mxu1  ;;  %v1266_v28 = vsel %vm1259_vm3, %v17575_v24, -inf  ;;  %v17585_v38 = vmul.f32 0.35355338, %v939_v25 }
 0x24e   : > { %1267 = vmax.xlane.f32.xlu0 %v1266_v28  ;;  %v886_v29 = vpop.f32.mrb[16].mxu0 }
 0x24f   : > { %v15056_v30 = vpop.f32.mrb[17].mxu0  ;;  %v17579_v31 = vmul.f32 0.35355338, %v886_v29  ;;  %v1269_v44 = vsel %vm1259_vm3, %v17585_v38, -inf }
 0x250   : > { %v889_v32 = vpop.f32.mrb[18].mxu0 }
 0x251   : > { %v15057_v33 = vpop.f32.mrb[19].mxu0  ;;  %v1260_v34 = vsel %vm1259_vm3, %v17579_v31, -inf  ;;  %v17583_v35 = vmul.f32 0.35355338, %v889_v32 }
 0x252   : > { %1261 = vmax.xlane.f32.xlu0 %v1260_v34  ;;  %v17647_v34 = vpop.permute.xlu1 %1538 }
 0x253   : > { %v986_v39 = vpop.f32.mrb[4].mxu1  ;;  %v1263_v40 = vsel %vm1259_vm3, %v17583_v35, -inf }
 0x254   : > { %v15068_v41 = vpop.f32.mrb[5].mxu1  ;;  %1264 = vmax.xlane.f32.xlu1 %v1263_v40  ;;  %v17589_v42 = vmul.f32 0.35355338, %v986_v39 }
 0x255   : > { %v989_v43 = vpop.f32.mrb[6].mxu1 }
 0x256   : > { %v15069_v45 = vpop.f32.mrb[7].mxu1  ;;  %1270 = vmax.xlane.f32.xlu0 %v1269_v44  ;;  %v1272_v48 = vsel %vm1259_vm3, %v17589_v42, -inf  ;;  %v17595_v49 = vmul.f32 0.35355338, %v989_v43  ;;  %v17650_v41 = vpop.permute.xlu1 %1585 }
 0x258   : > { %1273 = vmax.xlane.f32.xlu1 %v1272_v48  ;;  %v1275_v50 = vsel %vm1259_vm3, %v17595_v49, -inf }
 0x25a   : > { %1276 = vmax.xlane.f32.xlu0 %v1275_v50 }
 0x25b   : > { %v1036_v51 = vpop.f32.mrb[8].mxu1  ;;  %v1086_v52 = vpop.f32.mrb[20].mxu0 }
 0x25c   : > { %v15074_v53 = vpop.f32.mrb[9].mxu1  ;;  %v15080_v54 = vpop.f32.mrb[21].mxu0  ;;  %v17599_v55 = vmul.f32 0.35355338, %v1036_v51  ;;  %v17601_v60 = vmul.f32 0.35355338, %v1086_v52 }
 0x25d   : > { %v1039_v58 = vpop.f32.mrb[10].mxu1  ;;  %v1089_v59 = vpop.f32.mrb[22].mxu0 }
 0x25e   : > { %v15075_v61 = vpop.f32.mrb[11].mxu1  ;;  %v15081_v62 = vpop.f32.mrb[23].mxu0  ;;  %v1278_v63 = vsel %vm1259_vm3, %v17599_v55, -inf  ;;  %v17605_v0 = vmul.f32 0.35355338, %v1039_v58  ;;  %v1284_v5 = vsel %vm1259_vm3, %v17601_v60, -inf }
 0x25f   : > { %1279 = vmax.xlane.f32.xlu1 %v1278_v63  ;;  %v17609_v4 = vmul.f32 0.35355338, %v1089_v59 }
 0x260   : > { %v1281_v1 = vsel %vm1259_vm3, %v17605_v0, -inf }
 0x261   : > { %1282 = vmax.xlane.f32.xlu0 %v1281_v1  ;;  %v1287_v10 = vsel %vm1259_vm3, %v17609_v4, -inf }
 0x263   : > { %v1136_v6 = vpop.f32.mrb[12].mxu1  ;;  %1285 = vmax.xlane.f32.xlu1 %v1284_v5  ;;  %v1186_v7 = vpop.f32.mrb[24].mxu0 }
 0x264   : > { %v15086_v8 = vpop.f32.mrb[13].mxu1  ;;  %v15092_v9 = vpop.f32.mrb[25].mxu0  ;;  %v17615_v11 = vmul.f32 0.35355338, %v1136_v6  ;;  %v17617_v14 = vmul.f32 0.35355338, %v1186_v7 }
 0x265   : > { %v1139_v12 = vpop.f32.mrb[14].mxu1  ;;  %1288 = vmax.xlane.f32.xlu0 %v1287_v10  ;;  %v1189_v13 = vpop.f32.mrb[26].mxu0 }
 0x266   : > { %v15087_v15 = vpop.f32.mrb[15].mxu1  ;;  %v15093_v16 = vpop.f32.mrb[27].mxu0  ;;  %v1290_v17 = vsel %vm1259_vm3, %v17615_v11, -inf  ;;  %v17621_v18 = vmul.f32 0.35355338, %v1139_v12  ;;  %v1296_v21 = vsel %vm1259_vm3, %v17617_v14, -inf }
 0x267   : > { %1291 = vmax.xlane.f32.xlu1 %v1290_v17  ;;  %v17625_v20 = vmul.f32 0.35355338, %v1189_v13 }
 0x268   : > { %v1293_v19 = vsel %vm1259_vm3, %v17621_v18, -inf }
 0x269   : > { %1294 = vmax.xlane.f32.xlu0 %v1293_v19  ;;  %v1299_v25 = vsel %vm1259_vm3, %v17625_v20, -inf }
 0x26b   : > { %v1236_v22 = vpop.f32.mrb[16].mxu1  ;;  %1297 = vmax.xlane.f32.xlu1 %v1296_v21 }
 0x26c   : > { %v15098_v23 = vpop.f32.mrb[17].mxu1  ;;  %v17631_v27 = vmul.f32 0.35355338, %v1236_v22 }
 0x26d   : > { %v1239_v28 = vpop.f32.mrb[18].mxu1  ;;  %1300 = vmax.xlane.f32.xlu0 %v1299_v25 }
 0x26e   : > { %v15099_v29 = vpop.f32.mrb[19].mxu1  ;;  %v1302_v30 = vsel %vm1259_vm3, %v17631_v27, -inf  ;;  %v17635_v32 = vmul.f32 0.35355338, %v1239_v28 }
 0x26f   : > { %1303 = vmax.xlane.f32.xlu1 %v1302_v30 }
 0x270   : > { %v1305_v33 = vsel %vm1259_vm3, %v17635_v32, -inf }
 0x271   : > { %1306 = vmax.xlane.f32.xlu0 %v1305_v33 }
 0x280   : > { %1679 = vrot.lane.b32.xlu1 %v17501_v56, %s22107_s27 }
 0x284   : > { %1773 = vrot.lane.b32.xlu1 %v17509_v2, %s22107_s27 }
 0x287   : > { %1632 = vrot.lane.b32.xlu0 %v17503_v57, %s22107_s27 }
 0x28b   : > { %1726 = vrot.lane.b32.xlu0 %v17511_v3, %s22107_s27  ;;  %s22238_s27 = smov 112  }
 0x2db   : > { %v1268_v39 = vpop.xlane.xlu0 %1267 }
 0x2dc   : > { %v1310_v40 = vsub.f32 %v17575_v24, %v1268_v39 }
 0x2de   : > { %v1328_v43 = vmul.f32 1.442695, %v1310_v40 }
 0x2df   : > { %v1262_v44 = vpop.xlane.xlu0 %1261 }
 0x2e0   : > { %16638 = vpow2.f32 %v1328_v43  ;;  %v1308_v45 = vsub.f32 %v17579_v31, %v1262_v44 }
 0x2e1   : > { %v1265_v48 = vpop.xlane.xlu1 %1264 }
 0x2e2   : > { %v1324_v50 = vmul.f32 1.442695, %v1308_v45  ;;  %v1309_v51 = vsub.f32 %v17583_v35, %v1265_v48 }
 0x2e3   : > { %v1271_v52 = vpop.xlane.xlu0 %1270 }
 0x2e4   : > { %16640 = vpow2.f32 %v1324_v50  ;;  %v1311_v53 = vsub.f32 %v17585_v38, %v1271_v52  ;;  %v1326_v54 = vmul.f32 1.442695, %v1309_v51 }
 0x2e5   : > { %v1274_v58 = vpop.xlane.xlu1 %1273 }
 0x2e6   : > { %v1330_v59 = vmul.f32 1.442695, %v1311_v53  ;;  %v1312_v24 = vsub.f32 %v17589_v42, %v1274_v58 }
 0x2e7   : > { %v1277_v61 = vpop.xlane.xlu0 %1276 }
 0x2e8   : > { %16642 = vpow2.f32 %v1330_v59  ;;  %v1332_v62 = vmul.f32 1.442695, %v1312_v24  ;;  %v1313_v63 = vsub.f32 %v17595_v49, %v1277_v61 }
 0x2e9   : > { %16644 = vpow2.f32 %v1326_v54 }
 0x2ea   : > { %v17657_v31 = vpop.eup %16638  ;;  %16646 = vpow2.f32 %v1332_v62  ;;  %v1334_v1 = vmul.f32 1.442695, %v1313_v63 }
 0x2eb   : > { %v1362_v35 = vsel %vm1259_vm3, %v17657_v31, 0.0 }
 0x2ec   : > { %v1280_v5 = vpop.xlane.xlu1 %1279  ;;  %1363 = vadd.xlane.f32.xlu1 %v1362_v35  ;;  %16648 = vpow2.f32 %v1334_v1 }
 0x2ed   : > { %v1314_v38 = vsub.f32 %v17599_v55, %v1280_v5 }
 0x2ee   : > { %v17662_v6 = vpop.eup %16640  ;;  %v1283_v42 = vpop.xlane.xlu0 %1282 }
 0x2ef   : > { %v1336_v7 = vmul.f32 1.442695, %v1314_v38  ;;  %v1315_v8 = vsub.f32 %v17605_v0, %v1283_v42  ;;  %v1356_v49 = vsel %vm1259_vm3, %v17662_v6, 0.0 }
 0x2f0   : > { %v1286_v9 = vpop.xlane.xlu1 %1285  ;;  %1357 = vadd.xlane.f32.xlu1 %v1356_v49 }
 0x2f1   : > { %16650 = vpow2.f32 %v1336_v7  ;;  %v1338_v10 = vmul.f32 1.442695, %v1315_v8  ;;  %v1316_v12 = vsub.f32 %v17601_v60, %v1286_v9 }
 0x2f2   : > { %v17668_v13 = vpop.eup %16642  ;;  %v1289_v15 = vpop.xlane.xlu0 %1288 }
 0x2f3   : > { %v17670_v55 = vpop.eup %16644  ;;  %16652 = vpow2.f32 %v1338_v10  ;;  %v1340_v16 = vmul.f32 1.442695, %v1316_v12  ;;  %v1317_v17 = vsub.f32 %v17609_v4, %v1289_v15  ;;  %v1365_v0 = vsel %vm1259_vm3, %v17668_v13, 0.0 }
 0x2f4   : > { %v17675_v19 = vpop.eup %16646  ;;  %v1292_v21 = vpop.xlane.xlu1 %1291  ;;  %1366 = vadd.xlane.f32.xlu0 %v1365_v0  ;;  %v1359_v29 = vsel %vm1259_vm3, %v17670_v55, 0.0 }
 0x2f5   : > { %16654 = vpow2.f32 %v1340_v16  ;;  %v1342_v22 = vmul.f32 1.442695, %v1317_v17  ;;  %v1318_v60 = vsub.f32 %v17615_v11, %v1292_v21  ;;  %v1368_v23 = vsel %vm1259_vm3, %v17675_v19, 0.0 }
 0x2f6   : > { %1369 = vadd.xlane.f32.xlu1 %v1368_v23  ;;  %v1295_v25 = vpop.xlane.xlu0 %1294  ;;  %v17683_v30 = vpop.eup %16648 }
 0x2f7   : > { %16656 = vpow2.f32 %v1342_v22  ;;  %v1344_v28 = vmul.f32 1.442695, %v1318_v60  ;;  %v1319_v4 = vsub.f32 %v17621_v18, %v1295_v25  ;;  %v1371_v18 = vsel %vm1259_vm3, %v17683_v30, 0.0 }
 0x2f8   : > { %v1298_v33 = vpop.xlane.xlu1 %1297  ;;  %1360 = vadd.xlane.f32.xlu0 %v1359_v29 }
 0x2f9   : > { %16658 = vpow2.f32 %v1344_v28  ;;  %v1346_v39 = vmul.f32 1.442695, %v1319_v4  ;;  %v1320_v11 = vsub.f32 %v17617_v14, %v1298_v33 }
 0x2fa   : > { %v1301_v40 = vpop.xlane.xlu0 %1300 }
 0x2fb   : > { %v17686_v43 = vpop.eup %16650  ;;  %16660 = vpow2.f32 %v1346_v39  ;;  %v1348_v44 = vmul.f32 1.442695, %v1320_v11  ;;  %v1321_v45 = vsub.f32 %v17625_v20, %v1301_v40 }
 0x2fc   : > { %v1304_v48 = vpop.xlane.xlu1 %1303  ;;  %1372 = vadd.xlane.f32.xlu0 %v1371_v18  ;;  %v1374_v50 = vsel %vm1259_vm3, %v17686_v43, 0.0 }
 0x2fd   : > { %v17693_v51 = vpop.eup %16652  ;;  %16662 = vpow2.f32 %v1348_v44  ;;  %v1350_v52 = vmul.f32 1.442695, %v1321_v45  ;;  %v1322_v14 = vsub.f32 %v17631_v27, %v1304_v48  ;;  %1375 = vadd.xlane.f32.xlu1 %v1374_v50 }
 0x2fe   : > { %v1307_v53 = vpop.xlane.xlu0 %1306  ;;  %v1377_v54 = vsel %vm1259_vm3, %v17693_v51, 0.0 }
 0x2ff   : > { %v17698_v20 = vpop.eup %16654  ;;  %16664 = vpow2.f32 %v1350_v52  ;;  %v1352_v58 = vmul.f32 1.442695, %v1322_v14  ;;  %v1323_v59 = vsub.f32 %v17635_v32, %v1307_v53 }
 0x300   : > { %1378 = vadd.xlane.f32.xlu0 %v1377_v54  ;;  %v1380_v24 = vsel %vm1259_vm3, %v17698_v20, 0.0  ;;  %v17771_v12 = vpop.permute.xlu1 %1679 }
 0x301   : > { %v17703_v61 = vpop.eup %16656  ;;  %16666 = vpow2.f32 %v1352_v58  ;;  %v1354_v62 = vmul.f32 1.442695, %v1323_v59  ;;  %1381 = vadd.xlane.f32.xlu1 %v1380_v24 }
 0x302   : > { %v1383_v27 = vsel %vm1259_vm3, %v17703_v61, 0.0  ;;  %v17773_v15 = vpop.permute.xlu0 %1632 }
 0x303   : > { %v17707_v63 = vpop.eup %16658  ;;  %16668 = vpow2.f32 %v1354_v62 }
 0x304   : > { %1384 = vadd.xlane.f32.xlu0 %v1383_v27  ;;  %v1386_v1 = vsel %vm1259_vm3, %v17707_v63, 0.0  ;;  %v17775_v16 = vpop.permute.xlu1 %1773 }
 0x305   : > { %v17711_v32 = vpop.eup %16660  ;;  %1387 = vadd.xlane.f32.xlu1 %v1386_v1 }
 0x306   : > { %v1389_v35 = vsel %vm1259_vm3, %v17711_v32, 0.0  ;;  %v17777_v0 = vpop.permute.xlu0 %1726 }
 0x307   : > { %v17715_v5 = vpop.eup %16662 }
 0x308   : > { %1390 = vadd.xlane.f32.xlu0 %v1389_v35  ;;  %v1392_v38 = vsel %vm1259_vm3, %v17715_v5, 0.0 }
 0x309   : > { %v17719_v42 = vpop.eup %16664  ;;  %1393 = vadd.xlane.f32.xlu1 %v1392_v38 }
 0x30a   : > { %v1395_v7 = vsel %vm1259_vm3, %v17719_v42, 0.0 }
 0x30b   : > { %v17723_v8 = vpop.eup %16666 }
 0x30c   : > { %1396 = vadd.xlane.f32.xlu0 %v1395_v7  ;;  %v1398_v49 = vsel %vm1259_vm3, %v17723_v8, 0.0 }
 0x30d   : > { %v17727_v9 = vpop.eup %16668  ;;  %1399 = vadd.xlane.f32.xlu1 %v1398_v49 }
 0x30e   : > { %v1401_v10 = vsel %vm1259_vm3, %v17727_v9, 0.0 }
 0x310   : > { %1402 = vadd.xlane.f32.xlu0 %v1401_v10 }
 0x31e   : > { %1873 = vrot.lane.b32.xlu1 %v17485_v36, %s22105_s28 }
 0x322   : > { %1924 = vrot.lane.b32.xlu1 %v17495_v47, %s22105_s28 }
 0x326   : > { %1975 = vrot.lane.b32.xlu1 %v17493_v46, %s22105_s28  ;;  %1822 = vrot.lane.b32.xlu0 %v17487_v37, %s22105_s28 }
 0x32a   : > { %2026 = vrot.lane.b32.xlu1 %v17503_v57, %s22105_s28  ;;  %1820 = vrot.lane.b32.xlu0 %v17487_v37, %s22097_s29 }
 0x32e   : > { %2077 = vrot.lane.b32.xlu1 %v17501_v56, %s22105_s28  ;;  %1871 = vrot.lane.b32.xlu0 %v17485_v36, %s22097_s29 }
 0x332   : > { %2128 = vrot.lane.b32.xlu1 %v17511_v3, %s22105_s28  ;;  %1922 = vrot.lane.b32.xlu0 %v17495_v47, %s22097_s29 }
 0x336   : > { %2179 = vrot.lane.b32.xlu1 %v17509_v2, %s22105_s28  ;;  %1973 = vrot.lane.b32.xlu0 %v17493_v46, %s22097_s29  ;;  %s22217_s28 = smov 64  }
 0x33a   : > { %2177 = vrot.lane.b32.xlu1 %v17509_v2, %s22097_s29  ;;  %2024 = vrot.lane.b32.xlu0 %v17503_v57, %s22097_s29 }
 0x33e   : > { %2428 = vrot.lane.b32.xlu1 %v17487_v37, %s22095_s4  ;;  %2075 = vrot.lane.b32.xlu0 %v17501_v56, %s22097_s29 }
 0x342   : > { %2522 = vrot.lane.b32.xlu1 %v17495_v47, %s22095_s4  ;;  %2126 = vrot.lane.b32.xlu0 %v17511_v3, %s22097_s29  ;;  %s22099_s29 = smov 24  }
 0x346   : > { %2569 = vrot.lane.b32.xlu1 %v17493_v46, %s22095_s4  ;;  %2475 = vrot.lane.b32.xlu0 %v17485_v36, %s22095_s4 }
 0x379   : > { %v1364_v17 = vpop.xlane.xlu1 %1363 }
 0x37a   : > { %16670 = vrcp.f32 %v1364_v17 }
 0x37d   : > { %v1358_v21 = vpop.xlane.xlu1 %1357 }
 0x381   : > { %v1367_v22 = vpop.xlane.xlu0 %1366 }
 0x382   : > { %16672 = vrcp.f32 %v1367_v22 }
 0x383   : > { %16674 = vrcp.f32 %v1358_v21  ;;  %v1370_v23 = vpop.xlane.xlu1 %1369 }
 0x384   : > { %v16671_v28 = vpop.eup %16670 }
 0x385   : > { %v1361_v60 = vpop.xlane.xlu0 %1360  ;;  %v1422_v33 = vmul.f32 %v16671_v28, %v17657_v31 }
 0x386   : > { %16676 = vrcp.f32 %v1361_v60 }
 0x389   : > { %v1373_v25 = vpop.xlane.xlu0 %1372 }
 0x38a   : > { %16678 = vrcp.f32 %v1373_v25  ;;  %v1376_v4 = vpop.xlane.xlu1 %1375 }
 0x38b   : > { %16680 = vrcp.f32 %v1370_v23 }
 0x38c   : > { %v16673_v29 = vpop.eup %16672  ;;  %16682 = vrcp.f32 %v1376_v4 }
 0x38d   : > { %v1423_v39 = vmul.f32 %v16673_v29, %v17668_v13  ;;  %v1379_v11 = vpop.xlane.xlu0 %1378  ;;  %v16675_v40 = vpop.eup %16674 }
 0x38e   : > { %16684 = vrcp.f32 %v1379_v11  ;;  %v1382_v44 = vpop.xlane.xlu1 %1381  ;;  %v1420_v48 = vmul.f32 %v16675_v40, %v17662_v6 }
 0x38f   : > { %v1437_v45 = vpack.c.bf16 %v1423_v39, %v1422_v33 }
 0x390   : > { %v16677_v18 = vpop.eup %16676 }
 0x391   : > { %v1421_v50 = vmul.f32 %v16677_v18, %v17670_v55  ;;  %15109 = vmatmul.mubr.msk.bf16.vlgmr.msra.gmra.mrb[20].mxu1 %vm1259_vm3, %v1437_v45  ;;  %v1385_v52 = vpop.xlane.xlu0 %1384 }
 0x392   : > { %15119 = vmatpush3.bf16.msra.mxu1 %v17650_v41  ;;  %16686 = vrcp.f32 %v1385_v52  ;;  %v1388_v14 = vpop.xlane.xlu1 %1387  ;;  %15120 = vmatprep.mubr.msk.bf16.mxu1 %vm17303_vm1, %v22079_v26 }
 0x393   : > { %16688 = vrcp.f32 %v1382_v44  ;;  %v1436_v31 = vpack.c.bf16 %v1421_v50, %v1420_v48  ;;  %15130 = vmatprep.subr.bf16.mxu1 %v22079_v26 }
 0x394   : > { %v16679_v13 = vpop.eup %16678  ;;  %16690 = vrcp.f32 %v1388_v14 }
 0x395   : > { %v16681_v53 = vpop.eup %16680  ;;  %15103 = vmatmul.mubr.msk.bf16.vlgmr.msra.gmra.mrb[28].mxu0 %vm1259_vm3, %v1436_v31  ;;  %v1391_v6 = vpop.xlane.xlu0 %1390  ;;  %v1425_v54 = vmul.f32 %v16679_v13, %v17683_v30 }
 0x396   : > { %v16683_v55 = vpop.eup %16682  ;;  %15113 = vmatpush3.bf16.msra.mxu0 %v17647_v34  ;;  %16692 = vrcp.f32 %v1391_v6  ;;  %v1394_v41 = vpop.xlane.xlu1 %1393  ;;  %15114 = vmatprep.mubr.msk.bf16.mxu0 %vm17303_vm1, %v22079_v26  ;;  %v1424_v59 = vmul.f32 %v16681_v53, %v17675_v19 }
 0x397   : > { %15124 = vmatprep.subr.bf16.mxu0 %v22079_v26  ;;  %v1426_v24 = vmul.f32 %v16683_v55, %v17686_v43 }
 0x398   : > { %v16685_v58 = vpop.eup %16684  ;;  %v1438_v34 = vpack.c.bf16 %v1425_v54, %v1424_v59 }
 0x399   : > { %v1427_v62 = vmul.f32 %v16685_v58, %v17693_v51  ;;  %v1397_v27 = vpop.xlane.xlu0 %1396 }
 0x39a   : > { %16694 = vrcp.f32 %v1397_v27  ;;  %v1400_v1 = vpop.xlane.xlu1 %1399 }
 0x39b   : > { %16696 = vrcp.f32 %v1394_v41  ;;  %v1439_v35 = vpack.c.bf16 %v1427_v62, %v1426_v24 }
 0x39c   : > { %v16687_v38 = vpop.eup %16686  ;;  %16698 = vrcp.f32 %v1400_v1 }
 0x39d   : > { %v16689_v7 = vpop.eup %16688  ;;  %15115 = vmatmul.mubr.msk.bf16.vlgmr.msra.gmra.mrb[32].mxu0 %vm1259_vm3, %v1438_v34  ;;  %15121 = vmatmul.mubr.msk.bf16.vlgmr.msra.gmra.mrb[24].mxu1 %vm1259_vm3, %v1439_v35  ;;  %v1403_v30 = vpop.xlane.xlu0 %1402  ;;  %v1429_v43 = vmul.f32 %v16687_v38, %v17703_v61 }
 0x39e   : > { %v16691_v49 = vpop.eup %16690  ;;  %15125 = vmatpush3.bf16.msra.mxu0 %v17773_v15  ;;  %15131 = vmatpush3.bf16.msra.mxu1 %v17771_v12  ;;  %16700 = vrcp.f32 %v1403_v30  ;;  %v1874_v19 = vpop.permute.xlu1 %1873  ;;  %v1428_v10 = vmul.f32 %v16689_v7, %v17698_v20 }
 0x39f   : > { %15126 = vmatprep.mubr.msk.bf16.mxu0 %vm17303_vm1, %v22079_v26  ;;  %15132 = vmatprep.mubr.msk.bf16.mxu1 %vm17303_vm1, %v22079_v26  ;;  %v1430_v15 = vmul.f32 %v16691_v49, %v17707_v63  ;;  %v1879_v39 = vsel %vm845_vm2, %v1874_v19, 0 }
 0x3a0   : > { %v16693_v51 = vpop.eup %16692  ;;  %15136 = vmatprep.subr.bf16.mxu0 %v22079_v26  ;;  %15142 = vmatprep.subr.bf16.mxu1 %v22079_v26  ;;  %v1440_v21 = vpack.c.bf16 %v1429_v43, %v1428_v10 }
 0x3a1   : > { %v1431_v12 = vmul.f32 %v16693_v51, %v17711_v32  ;;  %v1823_v17 = vpop.permute.xlu0 %1822 }
 0x3a2   : > { %v1925_v60 = vpop.permute.xlu1 %1924  ;;  %v1828_v11 = vsel %vm845_vm2, %v1823_v17, 0 }
 0x3a3   : > { %v1441_v61 = vpack.c.bf16 %v1431_v12, %v1430_v15 }
 0x3a4   : > { %v16695_v22 = vpop.eup %16694 }
 0x3a5   : > { %v16697_v23 = vpop.eup %16696  ;;  %15127 = vmatmul.mubr.msk.bf16.vlgmr.msra.gmra.mrb[36].mxu0 %vm1259_vm3, %v1440_v21  ;;  %15133 = vmatmul.mubr.msk.bf16.vlgmr.msra.gmra.mrb[28].mxu1 %vm1259_vm3, %v1441_v61  ;;  %v1821_v25 = vpop.permute.xlu0 %1820  ;;  %v1433_v20 = vmul.f32 %v16695_v22, %v17719_v42 }
 0x3a6   : > { %v16699_v28 = vpop.eup %16698  ;;  %15137 = vmatpush3.bf16.msra.mxu0 %v17777_v0  ;;  %15143 = vmatpush3.bf16.msra.mxu1 %v17775_v16  ;;  %v1432_v32 = vmul.f32 %v16697_v23, %v17715_v5  ;;  %v1976_v16 = vpop.permute.xlu1 %1975 }
 0x3a7   : > { %15138 = vmatprep.mubr.msk.bf16.mxu0 %vm17303_vm1, %v22079_v26  ;;  %15144 = vmatprep.mubr.msk.bf16.mxu1 %vm17303_vm1, %v22079_v26  ;;  %v1434_v4 = vmul.f32 %v16699_v28, %v17723_v8  ;;  %v1981_v40 = vsel %vm845_vm2, %v1976_v16, 0 }
 0x3a8   : > { %v16701_v63 = vpop.eup %16700  ;;  %15148 = vmatprep.subr.bf16.mxu0 %v22079_v26  ;;  %15154 = vmatprep.subr.bf16.mxu1 %v22079_v26  ;;  %v1442_v42 = vpack.c.bf16 %v1433_v20, %v1432_v32 }
 0x3a9   : > { %v1435_v0 = vmul.f32 %v16701_v63, %v17727_v9  ;;  %v1872_v29 = vpop.permute.xlu0 %1871  ;;  %v1930_v9 = vsel %vm845_vm2, %v1925_v60, 0 }
 0x3aa   : > { %v2027_v5 = vpop.permute.xlu1 %2026 }
 0x3ab   : > { %v1443_v33 = vpack.c.bf16 %v1435_v0, %v1434_v4  ;;  %v2032_v50 = vsel %vm845_vm2, %v2027_v5, 0 }
 0x3ad   : > { %15139 = vmatmul.mubr.msk.bf16.vlgmr.msra.gmra.mrb[40].mxu0 %vm1259_vm3, %v1442_v42  ;;  %15145 = vmatmul.mubr.msk.bf16.vlgmr.msra.gmra.mrb[32].mxu1 %vm1259_vm3, %v1443_v33  ;;  %v1923_v8 = vpop.permute.xlu0 %1922 }
 0x3ae   : > { %15150 = vmatprep.mubr.msk.bf16.mxu0 %vm17303_vm1, %v22079_v26  ;;  %15156 = vmatprep.mubr.msk.bf16.mxu1 %vm17303_vm1, %v22079_v26  ;;  %v2078_v44 = vpop.permute.xlu1 %2077 }
 0x3af   : > { %15149 = vmatpush3.bf16.xpose.msra.mxu0 %v1828_v11  ;;  %15155 = vmatpush3.bf16.xpose.msra.mxu1 %v1879_v39  ;;  %v2083_v52 = vsel %vm845_vm2, %v2078_v44, 0 }
 0x3b0   : > { %15160 = vmatprep.subr.bf16.mxu0 %v22079_v26  ;;  %15166 = vmatprep.subr.bf16.mxu1 %v22079_v26 }
 0x3b1   : > { %v1974_v45 = vpop.permute.xlu0 %1973 }
 0x3b2   : > { %v2129_v18 = vpop.permute.xlu1 %2128 }
 0x3b3   : > { %v2134_v13 = vsel %vm845_vm2, %v2129_v18, 0 }
 0x3b5   : > { %v2025_v48 = vpop.permute.xlu0 %2024 }
 0x3b6   : > { %15151 = vmatmul.mubr.msk.bf16.vlgmr.msra.gmra.mrb[44].mxu0 %vm845_vm2, %v1821_v25  ;;  %15157 = vmatmul.mubr.msk.bf16.vlgmr.msra.gmra.mrb[36].mxu1 %vm845_vm2, %v1872_v29  ;;  %v2180_v14 = vpop.permute.xlu1 %2179 }
 0x3b7   : > { %15161 = vmatpush3.bf16.xpose.msra.mxu0 %v1930_v9  ;;  %15167 = vmatpush3.bf16.xpose.msra.mxu1 %v1981_v40  ;;  %v2185_v53 = vsel %vm845_vm2, %v2180_v14, 0 }
 0x3b8   : > { %15162 = vmatprep.mubr.msk.bf16.mxu0 %vm17303_vm1, %v22079_v26  ;;  %15168 = vmatprep.mubr.msk.bf16.mxu1 %vm17303_vm1, %v22079_v26 }
 0x3b9   : > { %15172 = vmatprep.subr.bf16.mxu0 %v22079_v26  ;;  %15178 = vmatprep.subr.bf16.mxu1 %v22079_v26  ;;  %v2076_v31 = vpop.permute.xlu0 %2075 }
 0x3ba   : > { %v2178_v6 = vpop.permute.xlu1 %2177 }
 0x3bd   : > { %v2127_v55 = vpop.permute.xlu0 %2126 }
 0x3be   : > { %15163 = vmatmul.mubr.msk.bf16.vlgmr.msra.gmra.mrb[48].mxu0 %vm845_vm2, %v1923_v8  ;;  %15169 = vmatmul.mubr.msk.bf16.vlgmr.msra.gmra.mrb[40].mxu1 %vm845_vm2, %v1974_v45  ;;  %v2429_v41 = vpop.permute.xlu1 %2428 }
 0x3bf   : > { %15173 = vmatpush3.bf16.xpose.msra.mxu0 %v2032_v50  ;;  %15179 = vmatpush3.bf16.xpose.msra.mxu1 %v2083_v52 }
 0x3c0   : > { %15174 = vmatprep.mubr.msk.bf16.mxu0 %vm17303_vm1, %v22079_v26  ;;  %15180 = vmatprep.mubr.msk.bf16.mxu1 %vm17303_vm1, %v22079_v26 }
 0x3c1   : > { %15184 = vmatprep.subr.bf16.mxu0 %v22079_v26  ;;  %15190 = vmatprep.subr.bf16.mxu1 %v22079_v26  ;;  %v2476_v54 = vpop.permute.xlu0 %2475 }
 0x3c6   : > { %15175 = vmatmul.mubr.msk.bf16.vlgmr.msra.gmra.mrb[52].mxu0 %vm845_vm2, %v2025_v48  ;;  %15181 = vmatmul.mubr.msk.bf16.vlgmr.msra.gmra.mrb[44].mxu1 %vm845_vm2, %v2076_v31 }
 0x3c7   : > { %15185 = vmatpush3.bf16.xpose.msra.mxu0 %v2134_v13  ;;  %15191 = vmatpush3.bf16.xpose.msra.mxu1 %v2185_v53 }
 0x3c8   : > { %15186 = vmatprep.mubr.msk.bf16.mxu0 %vm17303_vm1, %v22079_v26  ;;  %15192 = vmatprep.mubr.msk.bf16.mxu1 %vm17303_vm1, %v22079_v26 }
 0x3c9   : > { %15196 = vmatprep.subr.bf16.mxu0 %v22079_v26  ;;  %15202 = vmatprep.subr.bf16.mxu1 %v22079_v26 }
 0x3ce   : > { %15187 = vmatmul.mubr.msk.bf16.vlgmr.msra.gmra.mrb[56].mxu0 %vm845_vm2, %v2127_v55  ;;  %15193 = vmatmul.mubr.msk.bf16.vlgmr.msra.gmra.mrb[48].mxu1 %vm845_vm2, %v2178_v6 }
 0x3cf   : > { %15197 = vmatpush3.bf16.msra.mxu0 %v2429_v41  ;;  %15203 = vmatpush3.bf16.msra.mxu1 %v2476_v54 }
 0x3d0   : > { %15198 = vmatprep.mubr.msk.bf16.mxu0 %vm17303_vm1, %v22079_v26  ;;  %15208 = vmatprep.subr.bf16.mxu0 %v22079_v26 }
 0x3d1   : > { %15204 = vmatprep.mubr.msk.bf16.mxu1 %vm17303_vm1, %v22079_v26  ;;  %15214 = vmatprep.subr.bf16.mxu1 %v22079_v26 }
 0x464   : > { %v17873_v58 = vpop.f32.mrb[20].mxu1 }
 0x465   : > { %22146 = vst [vmem:[#allocation2_spill] sm:$0xff] %v17873_v58  ;;  %v15110_v59 = vpop.f32.mrb[21].mxu1 }
 0x466   : > { %v17875_v24 = vpop.f32.mrb[22].mxu1 }
 0x467   : > { %22147 = vst [vmem:[#allocation3_spill] sm:$0xff] %v17875_v24  ;;  %v15111_v62 = vpop.f32.mrb[23].mxu1 }
 0x468   : > { %v17877_v27 = vpop.f32.mrb[28].mxu0 }
 0x469   : > { %22148 = vst [vmem:[#allocation4_spill] sm:$0xff] %v17877_v27  ;;  %v15104_v1 = vpop.f32.mrb[29].mxu0 }
 0x46a   : > { %v17879_v34 = vpop.f32.mrb[30].mxu0 }
 0x46b   : > { %22149 = vst [vmem:[#allocation5_spill] sm:$0xff] %v17879_v34  ;;  %v15105_v35 = vpop.f32.mrb[31].mxu0 }
 0x470   : > { %v17881_v38 = vpop.f32.mrb[32].mxu0  ;;  %v17883_v7 = vpop.f32.mrb[24].mxu1 }
 0x471   : > { %22150 = vst [vmem:[#allocation6_spill] sm:$0xff] %v17881_v38  ;;  %22151 = vst [vmem:[#allocation7_spill] sm:$0xff] %v17883_v7  ;;  %v15116_v30 = vpop.f32.mrb[33].mxu0  ;;  %v15122_v49 = vpop.f32.mrb[25].mxu1 }
 0x472   : > { %v17885_v19 = vpop.f32.mrb[34].mxu0  ;;  %v17887_v43 = vpop.f32.mrb[26].mxu1 }
 0x473   : > { %22152 = vst [vmem:[#allocation8_spill] sm:$0xff] %v17885_v19  ;;  %22153 = vst [vmem:[#allocation9_spill] sm:$0xff] %v17887_v43  ;;  %v15117_v51 = vpop.f32.mrb[35].mxu0  ;;  %v15123_v10 = vpop.f32.mrb[27].mxu1 }
 0x478   : > { %v17889_v15 = vpop.f32.mrb[36].mxu0  ;;  %v17891_v12 = vpop.f32.mrb[28].mxu1 }
 0x479   : > { %22154 = vst [vmem:[#allocation10_spill] sm:$0xff] %v17889_v15  ;;  %22155 = vst [vmem:[#allocation11_spill] sm:$0xff] %v17891_v12  ;;  %v15128_v17 = vpop.f32.mrb[37].mxu0  ;;  %v15134_v21 = vpop.f32.mrb[29].mxu1 }
 0x47a   : > { %v17893_v61 = vpop.f32.mrb[38].mxu0  ;;  %v17895_v22 = vpop.f32.mrb[30].mxu1 }
 0x47b   : > { %22156 = vst [vmem:[#allocation12_spill] sm:$0xff] %v17893_v61  ;;  %22157 = vst [vmem:[#allocation13_spill] sm:$0xff] %v17895_v22  ;;  %v15129_v60 = vpop.f32.mrb[39].mxu0  ;;  %v15135_v23 = vpop.f32.mrb[31].mxu1 }
 0x480   : > { %v17897_v25 = vpop.f32.mrb[40].mxu0  ;;  %v17899_v28 = vpop.f32.mrb[32].mxu1 }
 0x481   : > { %22158 = vst [vmem:[#allocation14_spill] sm:$0xff] %v17897_v25  ;;  %22159 = vst [vmem:[#allocation15_spill] sm:$0xff] %v17899_v28  ;;  %v15140_v20 = vpop.f32.mrb[41].mxu0  ;;  %v15146_v63 = vpop.f32.mrb[33].mxu1 }
 0x482   : > { %v17901_v32 = vpop.f32.mrb[42].mxu0  ;;  %v17903_v4 = vpop.f32.mrb[34].mxu1 }
 0x483   : > { %22160 = vst [vmem:[#allocation16_spill] sm:$0xff] %v17901_v32  ;;  %22161 = vst [vmem:[#allocation17_spill] sm:$0xff] %v17903_v4  ;;  %v15141_v0 = vpop.f32.mrb[43].mxu0  ;;  %v15147_v16 = vpop.f32.mrb[35].mxu1 }
 0x489   : > { %v1864_v29 = vpop.f32.mrb[44].mxu0  ;;  %v1915_v42 = vpop.f32.mrb[36].mxu1 }
 0x48a   : > { %v15152_v33 = vpop.f32.mrb[45].mxu0  ;;  %v15158_v39 = vpop.f32.mrb[37].mxu1  ;;  %v17905_v11 = vmul.f32 0.35355338, %v1864_v29  ;;  %v17907_v9 = vmul.f32 0.35355338, %v1915_v42 }
 0x48b   : > { %v1867_v5 = vpop.f32.mrb[46].mxu0  ;;  %v1918_v8 = vpop.f32.mrb[38].mxu1 }
 0x48c   : > { %v15153_v40 = vpop.f32.mrb[47].mxu0  ;;  %v15159_v44 = vpop.f32.mrb[39].mxu1  ;;  %v2244_v45 = vsel %vm1259_vm3, %v17905_v11, -inf  ;;  %v17911_v18 = vmul.f32 0.35355338, %v1867_v5  ;;  %v2250_v50 = vsel %vm1259_vm3, %v17907_v9, -inf }
 0x48d   : > { %2245 = vmax.xlane.f32.xlu0 %v2244_v45  ;;  %v17917_v52 = vmul.f32 0.35355338, %v1918_v8 }
 0x48e   : > { %v2247_v48 = vsel %vm1259_vm3, %v17911_v18, -inf }
 0x48f   : > { %2248 = vmax.xlane.f32.xlu1 %v2247_v48  ;;  %v2253_v1 = vsel %vm1259_vm3, %v17917_v52, -inf }
 0x491   : > { %2251 = vmax.xlane.f32.xlu0 %v2250_v50  ;;  %v1966_v14 = vpop.f32.mrb[48].mxu0  ;;  %v2017_v31 = vpop.f32.mrb[40].mxu1 }
 0x492   : > { %v15164_v13 = vpop.f32.mrb[49].mxu0  ;;  %v15170_v53 = vpop.f32.mrb[41].mxu1  ;;  %v17919_v6 = vmul.f32 0.35355338, %v1966_v14  ;;  %v17921_v54 = vmul.f32 0.35355338, %v2017_v31 }
 0x493   : > { %v1969_v55 = vpop.f32.mrb[50].mxu0  ;;  %v2020_v41 = vpop.f32.mrb[42].mxu1 }
 0x494   : > { %v15165_v59 = vpop.f32.mrb[51].mxu0  ;;  %v15171_v62 = vpop.f32.mrb[43].mxu1  ;;  %v2256_v35 = vsel %vm1259_vm3, %v17919_v6, -inf  ;;  %v17927_v30 = vmul.f32 0.35355338, %v1969_v55  ;;  %v2262_v51 = vsel %vm1259_vm3, %v17921_v54, -inf }
 0x495   : > { %2254 = vmax.xlane.f32.xlu0 %v2253_v1  ;;  %2257 = vmax.xlane.f32.xlu1 %v2256_v35  ;;  %v17933_v10 = vmul.f32 0.35355338, %v2020_v41 }
 0x496   : > { %v2259_v49 = vsel %vm1259_vm3, %v17927_v30, -inf }
 0x497   : > { %v2265_v33 = vsel %vm1259_vm3, %v17933_v10, -inf }
 0x499   : > { %2260 = vmax.xlane.f32.xlu0 %v2259_v49  ;;  %2263 = vmax.xlane.f32.xlu1 %v2262_v51  ;;  %v2068_v17 = vpop.f32.mrb[52].mxu0  ;;  %v2119_v21 = vpop.f32.mrb[44].mxu1 }
 0x49a   : > { %v15176_v60 = vpop.f32.mrb[53].mxu0  ;;  %v15182_v23 = vpop.f32.mrb[45].mxu1  ;;  %v17935_v20 = vmul.f32 0.35355338, %v2068_v17  ;;  %v17937_v16 = vmul.f32 0.35355338, %v2119_v21 }
 0x49b   : > { %v2071_v63 = vpop.f32.mrb[54].mxu0  ;;  %v2122_v0 = vpop.f32.mrb[46].mxu1 }
 0x49c   : > { %v15177_v29 = vpop.f32.mrb[55].mxu0  ;;  %v15183_v42 = vpop.f32.mrb[47].mxu1  ;;  %v2268_v39 = vsel %vm1259_vm3, %v17935_v20, -inf  ;;  %v17943_v5 = vmul.f32 0.35355338, %v2071_v63  ;;  %v2274_v40 = vsel %vm1259_vm3, %v17937_v16, -inf }
 0x49d   : > { %2266 = vmax.xlane.f32.xlu0 %v2265_v33  ;;  %2269 = vmax.xlane.f32.xlu1 %v2268_v39  ;;  %v17949_v44 = vmul.f32 0.35355338, %v2122_v0  ;;  %v17977_v60 = vpop.permute.xlu1 %2522 }
 0x49e   : > { %v2271_v8 = vsel %vm1259_vm3, %v17943_v5, -inf }
 0x49f   : > { %v2277_v62 = vsel %vm1259_vm3, %v17949_v44, -inf }
 0x4a1   : > { %2272 = vmax.xlane.f32.xlu0 %v2271_v8  ;;  %2275 = vmax.xlane.f32.xlu1 %v2274_v40  ;;  %v2170_v45 = vpop.f32.mrb[56].mxu0  ;;  %v2221_v48 = vpop.f32.mrb[48].mxu1 }
 0x4a2   : > { %v15188_v50 = vpop.f32.mrb[57].mxu0  ;;  %v15194_v14 = vpop.f32.mrb[49].mxu1  ;;  %v17951_v31 = vmul.f32 0.35355338, %v2170_v45  ;;  %v17953_v55 = vmul.f32 0.35355338, %v2221_v48 }
 0x4a3   : > { %v2173_v13 = vpop.f32.mrb[58].mxu0  ;;  %v2224_v53 = vpop.f32.mrb[50].mxu1 }
 0x4a4   : > { %v15189_v41 = vpop.f32.mrb[59].mxu0  ;;  %v15195_v59 = vpop.f32.mrb[51].mxu1  ;;  %v2280_v1 = vsel %vm1259_vm3, %v17951_v31, -inf  ;;  %v17959_v35 = vmul.f32 0.35355338, %v2173_v13  ;;  %v2286_v49 = vsel %vm1259_vm3, %v17953_v55, -inf }
 0x4a5   : > { %2278 = vmax.xlane.f32.xlu0 %v2277_v62  ;;  %2281 = vmax.xlane.f32.xlu1 %v2280_v1  ;;  %v17965_v17 = vmul.f32 0.35355338, %v2224_v53  ;;  %v17979_v23 = vpop.permute.xlu1 %2569 }
 0x4a6   : > { %v2283_v51 = vsel %vm1259_vm3, %v17959_v35, -inf }
 0x4a7   : > { %v2289_v21 = vsel %vm1259_vm3, %v17965_v17, -inf }
 0x4a9   : > { %2287 = vmax.xlane.f32.xlu1 %v2286_v49  ;;  %2284 = vmax.xlane.f32.xlu0 %v2283_v51 }
 0x4ad   : > { %2290 = vmax.xlane.f32.xlu0 %v2289_v21 }
 0x4ba   : > { %2663 = vrot.lane.b32.xlu1 %v17501_v56, %s22095_s4 }
 0x4be   : > { %2757 = vrot.lane.b32.xlu1 %v17509_v2, %s22095_s4 }
 0x4c3   : > { %2616 = vrot.lane.b32.xlu0 %v17503_v57, %s22095_s4 }
 0x4c7   : > { %2710 = vrot.lane.b32.xlu0 %v17511_v3, %s22095_s4  ;;  %s22249_s4 = smov 72  }
 0x51a   : > { %v2246_v63 = vpop.xlane.xlu0 %2245 }
 0x51b   : > { %v2292_v0 = vsub.f32 %v17905_v11, %v2246_v63 }
 0x51c   : > { %v2249_v29 = vpop.xlane.xlu1 %2248 }
 0x51d   : > { %v2308_v42 = vmul.f32 1.442695, %v2292_v0  ;;  %v2293_v33 = vsub.f32 %v17911_v18, %v2249_v29 }
 0x51e   : > { %v2252_v39 = vpop.xlane.xlu0 %2251 }
 0x51f   : > { %16702 = vpow2.f32 %v2308_v42  ;;  %v2310_v8 = vmul.f32 1.442695, %v2293_v33  ;;  %v2294_v40 = vsub.f32 %v17907_v9, %v2252_v39 }
 0x521   : > { %16704 = vpow2.f32 %v2310_v8  ;;  %v2312_v45 = vmul.f32 1.442695, %v2294_v40 }
 0x522   : > { %v2258_v48 = vpop.xlane.xlu1 %2257  ;;  %v2255_v50 = vpop.xlane.xlu0 %2254 }
 0x523   : > { %16706 = vpow2.f32 %v2312_v45  ;;  %v2296_v14 = vsub.f32 %v17919_v6, %v2258_v48  ;;  %v2295_v13 = vsub.f32 %v17917_v52, %v2255_v50 }
 0x525   : > { %v2316_v53 = vmul.f32 1.442695, %v2296_v14  ;;  %v2314_v11 = vmul.f32 1.442695, %v2295_v13 }
 0x526   : > { %v2264_v41 = vpop.xlane.xlu1 %2263  ;;  %v2261_v59 = vpop.xlane.xlu0 %2260 }
 0x527   : > { %16708 = vpow2.f32 %v2316_v53  ;;  %v2298_v18 = vsub.f32 %v17921_v54, %v2264_v41  ;;  %v2297_v62 = vsub.f32 %v17927_v30, %v2261_v59 }
 0x528   : > { %16710 = vpow2.f32 %v2314_v11 }
 0x529   : > { %v17988_v9 = vpop.eup %16702  ;;  %v2320_v1 = vmul.f32 1.442695, %v2298_v18  ;;  %v2318_v49 = vmul.f32 1.442695, %v2297_v62 }
 0x52a   : > { %v2270_v51 = vpop.xlane.xlu1 %2269  ;;  %v2267_v21 = vpop.xlane.xlu0 %2266  ;;  %v2340_v6 = vsel %vm1259_vm3, %v17988_v9, 0.0 }
 0x52b   : > { %v17992_v52 = vpop.eup %16704  ;;  %16712 = vpow2.f32 %v2320_v1  ;;  %v2300_v63 = vsub.f32 %v17935_v20, %v2270_v51  ;;  %v2299_v0 = vsub.f32 %v17933_v10, %v2267_v21  ;;  %2341 = vadd.xlane.f32.xlu1 %v2340_v6 }
 0x52c   : > { %16714 = vpow2.f32 %v2318_v49  ;;  %v2343_v54 = vsel %vm1259_vm3, %v17992_v52, 0.0 }
 0x52d   : > { %v17998_v30 = vpop.eup %16706  ;;  %v2324_v29 = vmul.f32 1.442695, %v2300_v63  ;;  %v2322_v42 = vmul.f32 1.442695, %v2299_v0  ;;  %2344 = vadd.xlane.f32.xlu0 %v2343_v54 }
 0x52e   : > { %v2276_v33 = vpop.xlane.xlu1 %2275  ;;  %v2273_v39 = vpop.xlane.xlu0 %2272  ;;  %v2346_v8 = vsel %vm1259_vm3, %v17998_v30, 0.0 }
 0x52f   : > { %16716 = vpow2.f32 %v2324_v29  ;;  %v2302_v20 = vsub.f32 %v17937_v16, %v2276_v33  ;;  %v2301_v10 = vsub.f32 %v17943_v5, %v2273_v39  ;;  %2347 = vadd.xlane.f32.xlu1 %v2346_v8 }
 0x530   : > { %16718 = vpow2.f32 %v2322_v42 }
 0x531   : > { %v18004_v40 = vpop.eup %16708  ;;  %v2328_v45 = vmul.f32 1.442695, %v2302_v20  ;;  %v2326_v48 = vmul.f32 1.442695, %v2301_v10 }
 0x532   : > { %v18006_v50 = vpop.eup %16710  ;;  %v2282_v14 = vpop.xlane.xlu1 %2281  ;;  %v2352_v53 = vsel %vm1259_vm3, %v18004_v40, 0.0 }
 0x533   : > { %v2279_v13 = vpop.xlane.xlu0 %2278  ;;  %16720 = vpow2.f32 %v2328_v45  ;;  %v2304_v11 = vsub.f32 %v17951_v31, %v2282_v14  ;;  %2353 = vadd.xlane.f32.xlu1 %v2352_v53  ;;  %v2349_v5 = vsel %vm1259_vm3, %v18006_v50, 0.0 }
 0x534   : > { %v2303_v16 = vsub.f32 %v17949_v44, %v2279_v13  ;;  %16722 = vpow2.f32 %v2326_v48  ;;  %2350 = vadd.xlane.f32.xlu0 %v2349_v5 }
 0x535   : > { %v18014_v41 = vpop.eup %16712  ;;  %v2332_v59 = vmul.f32 1.442695, %v2304_v11 }
 0x536   : > { %v2330_v18 = vmul.f32 1.442695, %v2303_v16  ;;  %v18016_v62 = vpop.eup %16714  ;;  %v2288_v1 = vpop.xlane.xlu1 %2287  ;;  %v2358_v51 = vsel %vm1259_vm3, %v18014_v41, 0.0 }
 0x537   : > { %v2285_v49 = vpop.xlane.xlu0 %2284  ;;  %16724 = vpow2.f32 %v2332_v59  ;;  %v2306_v44 = vsub.f32 %v17953_v55, %v2288_v1  ;;  %2359 = vadd.xlane.f32.xlu1 %v2358_v51  ;;  %v2355_v21 = vsel %vm1259_vm3, %v18016_v62, 0.0 }
 0x538   : > { %v2305_v31 = vsub.f32 %v17959_v35, %v2285_v49  ;;  %16726 = vpow2.f32 %v2330_v18  ;;  %2356 = vadd.xlane.f32.xlu0 %v2355_v21 }
 0x539   : > { %v18024_v6 = vpop.eup %16716  ;;  %v2336_v63 = vmul.f32 1.442695, %v2306_v44 }
 0x53a   : > { %v2334_v0 = vmul.f32 1.442695, %v2305_v31  ;;  %v18026_v54 = vpop.eup %16718  ;;  %v2364_v42 = vsel %vm1259_vm3, %v18024_v6, 0.0  ;;  %v18101_v18 = vpop.permute.xlu1 %2663 }
 0x53b   : > { %v2291_v29 = vpop.xlane.xlu0 %2290  ;;  %16728 = vpow2.f32 %v2336_v63  ;;  %2365 = vadd.xlane.f32.xlu1 %v2364_v42  ;;  %v2361_v35 = vsel %vm1259_vm3, %v18026_v54, 0.0 }
 0x53c   : > { %v2307_v55 = vsub.f32 %v17965_v17, %v2291_v29  ;;  %16730 = vpow2.f32 %v2334_v0  ;;  %2362 = vadd.xlane.f32.xlu0 %v2361_v35 }
 0x53d   : > { %v18033_v33 = vpop.eup %16720 }
 0x53e   : > { %v2338_v39 = vmul.f32 1.442695, %v2307_v55  ;;  %v18035_v8 = vpop.eup %16722  ;;  %v2370_v20 = vsel %vm1259_vm3, %v18033_v33, 0.0  ;;  %v18103_v49 = vpop.permute.xlu1 %2757 }
 0x53f   : > { %2371 = vadd.xlane.f32.xlu1 %v2370_v20  ;;  %v2367_v10 = vsel %vm1259_vm3, %v18035_v8, 0.0  ;;  %v2617_v1 = vpop.permute.xlu0 %2616 }
 0x540   : > { %16732 = vpow2.f32 %v2338_v39  ;;  %2368 = vadd.xlane.f32.xlu0 %v2367_v10 }
 0x541   : > { %v18041_v17 = vpop.eup %16724 }
 0x542   : > { %v18043_v45 = vpop.eup %16726  ;;  %v2376_v48 = vsel %vm1259_vm3, %v18041_v17, 0.0 }
 0x543   : > { %2377 = vadd.xlane.f32.xlu1 %v2376_v48  ;;  %v2373_v14 = vsel %vm1259_vm3, %v18043_v45, 0.0  ;;  %v18105_v51 = vpop.permute.xlu0 %2710 }
 0x544   : > { %2374 = vadd.xlane.f32.xlu0 %v2373_v14 }
 0x545   : > { %v18049_v13 = vpop.eup %16728 }
 0x546   : > { %v18051_v53 = vpop.eup %16730  ;;  %v2382_v11 = vsel %vm1259_vm3, %v18049_v13, 0.0 }
 0x547   : > { %2383 = vadd.xlane.f32.xlu1 %v2382_v11  ;;  %v2379_v16 = vsel %vm1259_vm3, %v18051_v53, 0.0 }
 0x548   : > { %2380 = vadd.xlane.f32.xlu0 %v2379_v16 }
 0x54a   : > { %v18057_v5 = vpop.eup %16732 }
 0x54b   : > { %v2385_v59 = vsel %vm1259_vm3, %v18057_v5, 0.0 }
 0x54c   : > { %2386 = vadd.xlane.f32.xlu0 %v2385_v59 }
 0x558   : > { %2857 = vrot.lane.b32.xlu1 %v17485_v36, %s22093_s30 }
 0x55c   : > { %2908 = vrot.lane.b32.xlu1 %v17495_v47, %s22093_s30 }
 0x560   : > { %2959 = vrot.lane.b32.xlu1 %v17493_v46, %s22093_s30 }
 0x562   : > { %2806 = vrot.lane.b32.xlu0 %v17487_v37, %s22093_s30 }
 0x564   : > { %3010 = vrot.lane.b32.xlu1 %v17503_v57, %s22093_s30 }
 0x566   : > { %2804 = vrot.lane.b32.xlu0 %v17487_v37, %s22091_s5 }
 0x568   : > { %3061 = vrot.lane.b32.xlu1 %v17501_v56, %s22093_s30 }
 0x56a   : > { %2855 = vrot.lane.b32.xlu0 %v17485_v36, %s22091_s5 }
 0x56c   : > { %3112 = vrot.lane.b32.xlu1 %v17511_v3, %s22093_s30 }
 0x56e   : > { %2906 = vrot.lane.b32.xlu0 %v17495_v47, %s22091_s5 }
 0x570   : > { %3163 = vrot.lane.b32.xlu1 %v17509_v2, %s22093_s30  ;;  %s22216_s30 = smov 96  }
 0x572   : > { %2957 = vrot.lane.b32.xlu0 %v17493_v46, %s22091_s5 }
 0x574   : > { %3161 = vrot.lane.b32.xlu1 %v17509_v2, %s22091_s5 }
 0x576   : > { %3008 = vrot.lane.b32.xlu0 %v17503_v57, %s22091_s5 }
 0x578   : > { %3412 = vrot.lane.b32.xlu1 %v17487_v37, %s22089_s23 }
 0x57a   : > { %3059 = vrot.lane.b32.xlu0 %v17501_v56, %s22091_s5 }
 0x57c   : > { %3506 = vrot.lane.b32.xlu1 %v17495_v47, %s22089_s23 }
 0x57e   : > { %3110 = vrot.lane.b32.xlu0 %v17511_v3, %s22091_s5  ;;  %s22174_s5 = sld [smem:[#allocation49_spill]] }
 0x580   : > { %3553 = vrot.lane.b32.xlu1 %v17493_v46, %s22089_s23 }
 0x582   : > { %3459 = vrot.lane.b32.xlu0 %v17485_v36, %s22089_s23 }
 0x5b8   : > { %v2342_v44 = vpop.xlane.xlu1 %2341 }
 0x5b9   : > { %16734 = vrcp.f32 %v2342_v44 }
 0x5ba   : > { %v2345_v31 = vpop.xlane.xlu0 %2344 }
 0x5bb   : > { %16736 = vrcp.f32 %v2345_v31 }
 0x5bc   : > { %v2348_v21 = vpop.xlane.xlu1 %2347 }
 0x5bd   : > { %16738 = vrcp.f32 %v2348_v21 }
 0x5c0   : > { %v2354_v63 = vpop.xlane.xlu1 %2353 }
 0x5c1   : > { %v2351_v0 = vpop.xlane.xlu0 %2350 }
 0x5c2   : > { %16740 = vrcp.f32 %v2351_v0 }
 0x5c3   : > { %v16735_v29 = vpop.eup %16734  ;;  %16742 = vrcp.f32 %v2354_v63 }
 0x5c4   : > { %v2360_v42 = vpop.xlane.xlu1 %2359  ;;  %v2404_v39 = vmul.f32 %v16735_v29, %v17988_v9 }
 0x5c5   : > { %v16737_v55 = vpop.eup %16736  ;;  %v2357_v35 = vpop.xlane.xlu0 %2356 }
 0x5c6   : > { %v2405_v20 = vmul.f32 %v16737_v55, %v17992_v52  ;;  %16744 = vrcp.f32 %v2357_v35 }
 0x5c7   : > { %16746 = vrcp.f32 %v2360_v42  ;;  %v16739_v11 = vpop.eup %16738 }
 0x5c8   : > { %v2366_v10 = vpop.xlane.xlu1 %2365  ;;  %v2420_v48 = vpack.c.bf16 %v2405_v20, %v2404_v39  ;;  %v2406_v9 = vmul.f32 %v16739_v11, %v17998_v30 }
 0x5c9   : > { %v2363_v14 = vpop.xlane.xlu0 %2362 }
 0x5ca   : > { %16748 = vrcp.f32 %v2363_v14  ;;  %15199 = vmatmul.mubr.msk.bf16.vlgmr.msra.gmra.mrb[60].mxu0 %vm1259_vm3, %v2420_v48 }
 0x5cb   : > { %15209 = vmatpush3.bf16.msra.mxu0 %v17977_v60  ;;  %15210 = vmatprep.mubr.msk.bf16.mxu0 %vm17303_vm1, %v22079_v26  ;;  %16750 = vrcp.f32 %v2366_v10 }
 0x5cc   : > { %v16741_v16 = vpop.eup %16740  ;;  %v2372_v59 = vpop.xlane.xlu1 %2371  ;;  %15220 = vmatprep.subr.bf16.mxu0 %v22079_v26 }
 0x5cd   : > { %v2407_v52 = vmul.f32 %v16741_v16, %v18006_v50  ;;  %v2369_v44 = vpop.xlane.xlu0 %2368  ;;  %v16743_v31 = vpop.eup %16742 }
 0x5ce   : > { %16752 = vrcp.f32 %v2369_v44  ;;  %v2408_v60 = vmul.f32 %v16743_v31, %v18004_v40 }
 0x5cf   : > { %v2421_v21 = vpack.c.bf16 %v2407_v52, %v2406_v9  ;;  %16754 = vrcp.f32 %v2372_v59 }
 0x5d0   : > { %v16745_v63 = vpop.eup %16744  ;;  %v2378_v0 = vpop.xlane.xlu1 %2377 }
 0x5d1   : > { %v2409_v29 = vmul.f32 %v16745_v63, %v18016_v62  ;;  %15205 = vmatmul.mubr.msk.bf16.vlgmr.msra.gmra.mrb[52].mxu1 %vm1259_vm3, %v2421_v21  ;;  %v2375_v42 = vpop.xlane.xlu0 %2374  ;;  %v16747_v55 = vpop.eup %16746 }
 0x5d2   : > { %15215 = vmatpush3.bf16.msra.mxu1 %v17979_v23  ;;  %16756 = vrcp.f32 %v2375_v42  ;;  %15216 = vmatprep.mubr.msk.bf16.mxu1 %vm17303_vm1, %v22079_v26  ;;  %v2410_v40 = vmul.f32 %v16747_v55, %v18014_v41 }
 0x5d3   : > { %v2422_v30 = vpack.c.bf16 %v2409_v29, %v2408_v60  ;;  %15226 = vmatprep.subr.bf16.mxu1 %v22079_v26  ;;  %16758 = vrcp.f32 %v2378_v0 }
 0x5d4   : > { %v16749_v50 = vpop.eup %16748  ;;  %v2384_v35 = vpop.xlane.xlu1 %2383 }
 0x5d5   : > { %v2411_v62 = vmul.f32 %v16749_v50, %v18026_v54  ;;  %15211 = vmatmul.mubr.msk.bf16.vlgmr.msra.gmra.mrb[64].mxu0 %vm1259_vm3, %v2422_v30  ;;  %v2381_v39 = vpop.xlane.xlu0 %2380  ;;  %v16751_v20 = vpop.eup %16750 }
 0x5d6   : > { %15221 = vmatpush3.bf16.msra.mxu0 %v2617_v1  ;;  %16760 = vrcp.f32 %v2381_v39  ;;  %15222 = vmatprep.mubr.msk.bf16.mxu0 %vm17303_vm1, %v22079_v26  ;;  %v2412_v14 = vmul.f32 %v16751_v20, %v18024_v6 }
 0x5d7   : > { %v2423_v23 = vpack.c.bf16 %v2411_v62, %v2410_v40  ;;  %15232 = vmatprep.subr.bf16.mxu0 %v22079_v26  ;;  %16762 = vrcp.f32 %v2384_v35 }
 0x5d8   : > { %v16753_v10 = vpop.eup %16752  ;;  %v2858_v48 = vpop.permute.xlu1 %2857 }
 0x5d9   : > { %v2413_v41 = vmul.f32 %v16753_v10, %v18035_v8  ;;  %15217 = vmatmul.mubr.msk.bf16.vlgmr.msra.gmra.mrb[56].mxu1 %vm1259_vm3, %v2423_v23  ;;  %v2387_v54 = vpop.xlane.xlu0 %2386  ;;  %v16755_v11 = vpop.eup %16754  ;;  %v2863_v55 = vsel %vm845_vm2, %v2858_v48, 0 }
 0x5da   : > { %15227 = vmatpush3.bf16.msra.mxu1 %v18101_v18  ;;  %16764 = vrcp.f32 %v2387_v54  ;;  %15228 = vmatprep.mubr.msk.bf16.mxu1 %vm17303_vm1, %v22079_v26  ;;  %v2414_v9 = vmul.f32 %v16755_v11, %v18033_v33 }
 0x5db   : > { %v2424_v1 = vpack.c.bf16 %v2413_v41, %v2412_v14  ;;  %15238 = vmatprep.subr.bf16.mxu1 %v22079_v26 }
 0x5dc   : > { %v16757_v16 = vpop.eup %16756  ;;  %v2909_v59 = vpop.permute.xlu1 %2908 }
 0x5dd   : > { %v2415_v6 = vmul.f32 %v16757_v16, %v18043_v45  ;;  %15223 = vmatmul.mubr.msk.bf16.vlgmr.msra.gmra.mrb[68].mxu0 %vm1259_vm3, %v2424_v1  ;;  %v2807_v8 = vpop.permute.xlu0 %2806  ;;  %v16759_v52 = vpop.eup %16758 }
 0x5de   : > { %15233 = vmatpush3.bf16.msra.mxu0 %v18105_v51  ;;  %15234 = vmatprep.mubr.msk.bf16.mxu0 %vm17303_vm1, %v22079_v26  ;;  %v2416_v31 = vmul.f32 %v16759_v52, %v18041_v17 }
 0x5df   : > { %v2425_v18 = vpack.c.bf16 %v2415_v6, %v2414_v9  ;;  %15244 = vmatprep.subr.bf16.mxu0 %v22079_v26 }
 0x5e0   : > { %v16761_v44 = vpop.eup %16760  ;;  %v2960_v63 = vpop.permute.xlu1 %2959 }
 0x5e1   : > { %v2417_v21 = vmul.f32 %v16761_v44, %v18051_v53  ;;  %15229 = vmatmul.mubr.msk.bf16.vlgmr.msra.gmra.mrb[60].mxu1 %vm1259_vm3, %v2425_v18  ;;  %v2805_v33 = vpop.permute.xlu0 %2804  ;;  %v16763_v45 = vpop.eup %16762  ;;  %v2812_v53 = vsel %vm845_vm2, %v2807_v8, 0  ;;  %v2965_v50 = vsel %vm845_vm2, %v2960_v63, 0 }
 0x5e2   : > { %15239 = vmatpush3.bf16.msra.mxu1 %v18103_v49  ;;  %15240 = vmatprep.mubr.msk.bf16.mxu1 %vm17303_vm1, %v22079_v26  ;;  %v2418_v60 = vmul.f32 %v16763_v45, %v18049_v13 }
 0x5e3   : > { %v2426_v51 = vpack.c.bf16 %v2417_v21, %v2416_v31  ;;  %15250 = vmatprep.subr.bf16.mxu1 %v22079_v26 }
 0x5e4   : > { %v16765_v0 = vpop.eup %16764  ;;  %v3011_v42 = vpop.permute.xlu1 %3010 }
 0x5e5   : > { %v2419_v17 = vmul.f32 %v16765_v0, %v18057_v5  ;;  %15235 = vmatmul.mubr.msk.bf16.vlgmr.msra.gmra.mrb[72].mxu0 %vm1259_vm3, %v2426_v51  ;;  %v2856_v29 = vpop.permute.xlu0 %2855  ;;  %v2914_v5 = vsel %vm845_vm2, %v2909_v59, 0  ;;  %v3016_v62 = vsel %vm845_vm2, %v3011_v42, 0 }
 0x5e6   : > { %15246 = vmatprep.mubr.msk.bf16.mxu0 %vm17303_vm1, %v22079_v26 }
 0x5e7   : > { %15245 = vmatpush3.bf16.xpose.msra.mxu0 %v2812_v53  ;;  %v2427_v49 = vpack.c.bf16 %v2419_v17, %v2418_v60 }
 0x5e8   : > { %15256 = vmatprep.subr.bf16.mxu0 %v22079_v26  ;;  %v3062_v30 = vpop.permute.xlu1 %3061 }
 0x5e9   : > { %15241 = vmatmul.mubr.msk.bf16.vlgmr.msra.gmra.mrb[64].mxu1 %vm1259_vm3, %v2427_v49  ;;  %v2907_v13 = vpop.permute.xlu0 %2906  ;;  %v3067_v20 = vsel %vm845_vm2, %v3062_v30, 0 }
 0x5ea   : > { %15252 = vmatprep.mubr.msk.bf16.mxu1 %vm17303_vm1, %v22079_v26 }
 0x5eb   : > { %15251 = vmatpush3.bf16.xpose.msra.mxu1 %v2863_v55 }
 0x5ec   : > { %15262 = vmatprep.subr.bf16.mxu1 %v22079_v26  ;;  %v3113_v40 = vpop.permute.xlu1 %3112 }
 0x5ed   : > { %v2958_v35 = vpop.permute.xlu0 %2957  ;;  %v3118_v10 = vsel %vm845_vm2, %v3113_v40, 0 }
 0x5ee   : > { %15247 = vmatmul.mubr.msk.bf16.vlgmr.msra.gmra.mrb[76].mxu0 %vm845_vm2, %v2805_v33 }
 0x5ef   : > { %15257 = vmatpush3.bf16.xpose.msra.mxu0 %v2914_v5  ;;  %15258 = vmatprep.mubr.msk.bf16.mxu0 %vm17303_vm1, %v22079_v26 }
 0x5f0   : > { %15268 = vmatprep.subr.bf16.mxu0 %v22079_v26  ;;  %v3164_v23 = vpop.permute.xlu1 %3163 }
 0x5f1   : > { %v3009_v39 = vpop.permute.xlu0 %3008  ;;  %v3169_v41 = vsel %vm845_vm2, %v3164_v23, 0 }
 0x5f2   : > { %15253 = vmatmul.mubr.msk.bf16.vlgmr.msra.gmra.mrb[68].mxu1 %vm845_vm2, %v2856_v29 }
 0x5f3   : > { %15263 = vmatpush3.bf16.xpose.msra.mxu1 %v2965_v50  ;;  %15264 = vmatprep.mubr.msk.bf16.mxu1 %vm17303_vm1, %v22079_v26 }
 0x5f4   : > { %15274 = vmatprep.subr.bf16.mxu1 %v22079_v26  ;;  %v3162_v14 = vpop.permute.xlu1 %3161 }
 0x5f5   : > { %v3060_v48 = vpop.permute.xlu0 %3059 }
 0x5f6   : > { %15259 = vmatmul.mubr.msk.bf16.vlgmr.msra.gmra.mrb[80].mxu0 %vm845_vm2, %v2907_v13 }
 0x5f7   : > { %15269 = vmatpush3.bf16.xpose.msra.mxu0 %v3016_v62  ;;  %15270 = vmatprep.mubr.msk.bf16.mxu0 %vm17303_vm1, %v22079_v26 }
 0x5f8   : > { %15280 = vmatprep.subr.bf16.mxu0 %v22079_v26  ;;  %v3413_v11 = vpop.permute.xlu1 %3412 }
 0x5f9   : > { %v3111_v54 = vpop.permute.xlu0 %3110 }
 0x5fa   : > { %15265 = vmatmul.mubr.msk.bf16.vlgmr.msra.gmra.mrb[72].mxu1 %vm845_vm2, %v2958_v35 }
 0x5fb   : > { %15275 = vmatpush3.bf16.xpose.msra.mxu1 %v3067_v20  ;;  %15276 = vmatprep.mubr.msk.bf16.mxu1 %vm17303_vm1, %v22079_v26 }
 0x5fc   : > { %15286 = vmatprep.subr.bf16.mxu1 %v22079_v26 }
 0x5fd   : > { %v3460_v1 = vpop.permute.xlu0 %3459 }
 0x5fe   : > { %15271 = vmatmul.mubr.msk.bf16.vlgmr.msra.gmra.mrb[84].mxu0 %vm845_vm2, %v3009_v39 }
 0x5ff   : > { %15281 = vmatpush3.bf16.xpose.msra.mxu0 %v3118_v10  ;;  %15282 = vmatprep.mubr.msk.bf16.mxu0 %vm17303_vm1, %v22079_v26 }
 0x600   : > { %15292 = vmatprep.subr.bf16.mxu0 %v22079_v26 }
 0x602   : > { %15277 = vmatmul.mubr.msk.bf16.vlgmr.msra.gmra.mrb[76].mxu1 %vm845_vm2, %v3060_v48 }
 0x603   : > { %15287 = vmatpush3.bf16.xpose.msra.mxu1 %v3169_v41  ;;  %15288 = vmatprep.mubr.msk.bf16.mxu1 %vm17303_vm1, %v22079_v26 }
 0x604   : > { %15298 = vmatprep.subr.bf16.mxu1 %v22079_v26 }
 0x606   : > { %15283 = vmatmul.mubr.msk.bf16.vlgmr.msra.gmra.mrb[88].mxu0 %vm845_vm2, %v3111_v54 }
 0x607   : > { %15293 = vmatpush3.bf16.msra.mxu0 %v3413_v11  ;;  %15294 = vmatprep.mubr.msk.bf16.mxu0 %vm17303_vm1, %v22079_v26 }
 0x608   : > { %15304 = vmatprep.subr.bf16.mxu0 %v22079_v26 }
 0x60a   : > { %15289 = vmatmul.mubr.msk.bf16.vlgmr.msra.gmra.mrb[80].mxu1 %vm845_vm2, %v3162_v14 }
 0x60b   : > { %15299 = vmatpush3.bf16.msra.mxu1 %v3460_v1  ;;  %15300 = vmatprep.mubr.msk.bf16.mxu1 %vm17303_vm1, %v22079_v26 }
 0x60c   : > { %15310 = vmatprep.subr.bf16.mxu1 %v22079_v26 }
 0x69d   : > { %v18200_v16 = vpop.f32.mrb[60].mxu0 }
 0x69e   : > { %v15200_v59 = vpop.f32.mrb[61].mxu0 }
 0x69f   : > { %v18202_v9 = vpop.f32.mrb[62].mxu0 }
 0x6a0   : > { %v15201_v8 = vpop.f32.mrb[63].mxu0 }
 0x6a4   : > { %v18206_v52 = vpop.f32.mrb[52].mxu1 }
 0x6a5   : > { %v15206_v18 = vpop.f32.mrb[53].mxu1 }
 0x6a6   : > { %v18208_v44 = vpop.f32.mrb[54].mxu1 }
 0x6a7   : > { %v15207_v21 = vpop.f32.mrb[55].mxu1 }
 0x6a8   : > { %v18212_v33 = vpop.f32.mrb[64].mxu0 }
 0x6a9   : > { %v15212_v45 = vpop.f32.mrb[65].mxu0 }
 0x6aa   : > { %v18214_v63 = vpop.f32.mrb[66].mxu0 }
 0x6ab   : > { %v15213_v0 = vpop.f32.mrb[67].mxu0 }
 0x6ac   : > { %v18218_v60 = vpop.f32.mrb[56].mxu1 }
 0x6ad   : > { %v15218_v17 = vpop.f32.mrb[57].mxu1 }
 0x6ae   : > { %v18220_v53 = vpop.f32.mrb[58].mxu1 }
 0x6af   : > { %v15219_v49 = vpop.f32.mrb[59].mxu1 }
 0x6b0   : > { %v18224_v42 = vpop.f32.mrb[68].mxu0 }
 0x6b1   : > { %v15224_v55 = vpop.f32.mrb[69].mxu0 }
 0x6b2   : > { %v18226_v13 = vpop.f32.mrb[70].mxu0 }
 0x6b3   : > { %v15225_v30 = vpop.f32.mrb[71].mxu0 }
 0x6b4   : > { %v18230_v50 = vpop.f32.mrb[60].mxu1 }
 0x6b5   : > { %v15230_v35 = vpop.f32.mrb[61].mxu1 }
 0x6b6   : > { %v18232_v40 = vpop.f32.mrb[62].mxu1 }
 0x6b7   : > { %v15231_v39 = vpop.f32.mrb[63].mxu1 }
 0x6b8   : > { %v18236_v20 = vpop.f32.mrb[72].mxu0 }
 0x6b9   : > { %v15236_v23 = vpop.f32.mrb[73].mxu0 }
 0x6ba   : > { %v18238_v10 = vpop.f32.mrb[74].mxu0 }
 0x6bb   : > { %v15237_v14 = vpop.f32.mrb[75].mxu0 }
 0x6bc   : > { %v18242_v41 = vpop.f32.mrb[64].mxu1 }
 0x6bd   : > { %v15242_v54 = vpop.f32.mrb[65].mxu1 }
 0x6be   : > { %v18244_v11 = vpop.f32.mrb[66].mxu1 }
 0x6bf   : > { %v15243_v59 = vpop.f32.mrb[67].mxu1 }
 0x6c1   : > { %v2848_v8 = vpop.f32.mrb[76].mxu0 }
 0x6c2   : > { %v18248_v18 = vmul.f32 0.35355338, %v2848_v8  ;;  %v15248_v21 = vpop.f32.mrb[77].mxu0 }
 0x6c3   : > { %v2851_v45 = vpop.f32.mrb[78].mxu0 }
 0x6c4   : > { %v18250_v0 = vmul.f32 0.35355338, %v2851_v45  ;;  %v15249_v17 = vpop.f32.mrb[79].mxu0  ;;  %v3228_v49 = vsel %vm1259_vm3, %v18248_v18, -inf }
 0x6c5   : > { %3229 = vmax.xlane.f32.xlu0 %v3228_v49  ;;  %v2899_v55 = vpop.f32.mrb[68].mxu1 }
 0x6c6   : > { %v18254_v30 = vmul.f32 0.35355338, %v2899_v55  ;;  %v15254_v35 = vpop.f32.mrb[69].mxu1  ;;  %v3231_v39 = vsel %vm1259_vm3, %v18250_v0, -inf }
 0x6c7   : > { %3232 = vmax.xlane.f32.xlu1 %v3231_v39  ;;  %v2902_v23 = vpop.f32.mrb[70].mxu1 }
 0x6c8   : > { %v18258_v14 = vmul.f32 0.35355338, %v2902_v23  ;;  %v15255_v54 = vpop.f32.mrb[71].mxu1  ;;  %v3234_v59 = vsel %vm1259_vm3, %v18254_v30, -inf }
 0x6c9   : > { %3235 = vmax.xlane.f32.xlu0 %v3234_v59  ;;  %v2950_v8 = vpop.f32.mrb[80].mxu0 }
 0x6ca   : > { %v18262_v21 = vmul.f32 0.35355338, %v2950_v8  ;;  %v15260_v45 = vpop.f32.mrb[81].mxu0  ;;  %v3237_v35 = vsel %vm1259_vm3, %v18258_v14, -inf }
 0x6cb   : > { %v2953_v17 = vpop.f32.mrb[82].mxu0 }
 0x6cc   : > { %v18264_v49 = vmul.f32 0.35355338, %v2953_v17  ;;  %v15261_v55 = vpop.f32.mrb[83].mxu0  ;;  %v3240_v39 = vsel %vm1259_vm3, %v18262_v21, -inf }
 0x6cd   : > { %3238 = vmax.xlane.f32.xlu0 %v3237_v35  ;;  %3241 = vmax.xlane.f32.xlu1 %v3240_v39  ;;  %v3001_v23 = vpop.f32.mrb[72].mxu1 }
 0x6ce   : > { %v18270_v54 = vmul.f32 0.35355338, %v3001_v23  ;;  %v15266_v59 = vpop.f32.mrb[73].mxu1  ;;  %v3243_v17 = vsel %vm1259_vm3, %v18264_v49, -inf }
 0x6cf   : > { %v3004_v1 = vpop.f32.mrb[74].mxu1 }
 0x6d0   : > { %v18272_v8 = vmul.f32 0.35355338, %v3004_v1  ;;  %v15267_v45 = vpop.f32.mrb[75].mxu1  ;;  %v3246_v55 = vsel %vm1259_vm3, %v18270_v54, -inf }
 0x6d1   : > { %3244 = vmax.xlane.f32.xlu0 %v3243_v17  ;;  %3247 = vmax.xlane.f32.xlu1 %v3246_v55  ;;  %v3052_v48 = vpop.f32.mrb[84].mxu0 }
 0x6d2   : > { %v18278_v5 = vmul.f32 0.35355338, %v3052_v48  ;;  %v15272_v35 = vpop.f32.mrb[85].mxu0  ;;  %v3249_v1 = vsel %vm1259_vm3, %v18272_v8, -inf }
 0x6d3   : > { %v3055_v39 = vpop.f32.mrb[86].mxu0 }
 0x6d4   : > { %v18280_v23 = vmul.f32 0.35355338, %v3055_v39  ;;  %v15273_v59 = vpop.f32.mrb[87].mxu0  ;;  %v3252_v45 = vsel %vm1259_vm3, %v18278_v5, -inf }
 0x6d5   : > { %3250 = vmax.xlane.f32.xlu0 %v3249_v1  ;;  %3253 = vmax.xlane.f32.xlu1 %v3252_v45  ;;  %v3103_v51 = vpop.f32.mrb[76].mxu1 }
 0x6d6   : > { %v18286_v62 = vmul.f32 0.35355338, %v3103_v51  ;;  %v15278_v17 = vpop.f32.mrb[77].mxu1  ;;  %v3255_v39 = vsel %vm1259_vm3, %v18280_v23, -inf }
 0x6d7   : > { %v3106_v55 = vpop.f32.mrb[78].mxu1 }
 0x6d8   : > { %v18288_v48 = vmul.f32 0.35355338, %v3106_v55  ;;  %v15279_v35 = vpop.f32.mrb[79].mxu1  ;;  %v3258_v59 = vsel %vm1259_vm3, %v18286_v62, -inf }
 0x6d9   : > { %3256 = vmax.xlane.f32.xlu0 %v3255_v39  ;;  %3259 = vmax.xlane.f32.xlu1 %v3258_v59  ;;  %v3154_v6 = vpop.f32.mrb[88].mxu0 }
 0x6da   : > { %v18294_v29 = vmul.f32 0.35355338, %v3154_v6  ;;  %v15284_v1 = vpop.f32.mrb[89].mxu0  ;;  %v3261_v55 = vsel %vm1259_vm3, %v18288_v48, -inf }
 0x6db   : > { %v3157_v45 = vpop.f32.mrb[90].mxu0 }
 0x6dc   : > { %v18296_v51 = vmul.f32 0.35355338, %v3157_v45  ;;  %v15285_v17 = vpop.f32.mrb[91].mxu0  ;;  %v3264_v35 = vsel %vm1259_vm3, %v18294_v29, -inf }
 0x6dd   : > { %3262 = vmax.xlane.f32.xlu0 %v3261_v55  ;;  %v3205_v31 = vpop.f32.mrb[80].mxu1  ;;  %3265 = vmax.xlane.f32.xlu1 %v3264_v35 }
 0x6de   : > { %v18302_v26 = vmul.f32 0.35355338, %v3205_v31  ;;  %v15290_v39 = vpop.f32.mrb[81].mxu1  ;;  %v3267_v17 = vsel %vm1259_vm3, %v18296_v51, -inf  ;;  %v18320_v31 = vpop.permute.xlu1 %3506 }
 0x6df   : > { %v3208_v59 = vpop.f32.mrb[82].mxu1 }
 0x6e0   : > { %v18304_v6 = vmul.f32 0.35355338, %v3208_v59  ;;  %v15291_v1 = vpop.f32.mrb[83].mxu1  ;;  %v3270_v45 = vsel %vm1259_vm3, %v18302_v26, -inf }
 0x6e1   : > { %3271 = vmax.xlane.f32.xlu1 %v3270_v45  ;;  %3268 = vmax.xlane.f32.xlu0 %v3267_v17 }
 0x6e2   : > { %v3273_v55 = vsel %vm1259_vm3, %v18304_v6, -inf  ;;  %v18322_v35 = vpop.permute.xlu1 %3553 }
 0x6e5   : > { %3274 = vmax.xlane.f32.xlu0 %v3273_v55 }
 0x6f2   : > { %3647 = vrot.lane.b32.xlu1 %v17501_v56, %s22089_s23 }
 0x6f6   : > { %3741 = vrot.lane.b32.xlu1 %v17509_v2, %s22089_s23 }
 0x6fb   : > { %3600 = vrot.lane.b32.xlu0 %v17503_v57, %s22089_s23 }
 0x6ff   : > { %3694 = vrot.lane.b32.xlu0 %v17511_v3, %s22089_s23  ;;  %s22198_s23 = sld [smem:[#allocation46_spill]] }
 0x752   : > { %v3230_v39 = vpop.xlane.xlu0 %3229 }
 0x753   : > { %v3276_v59 = vsub.f32 %v18248_v18, %v3230_v39 }
 0x754   : > { %v3233_v1 = vpop.xlane.xlu1 %3232 }
 0x755   : > { %v3292_v45 = vmul.f32 1.442695, %v3276_v59  ;;  %v3277_v17 = vsub.f32 %v18250_v0, %v3233_v1 }
 0x756   : > { %v3236_v55 = vpop.xlane.xlu0 %3235 }
 0x757   : > { %16766 = vpow2.f32 %v3292_v45  ;;  %v3294_v28 = vmul.f32 1.442695, %v3277_v17  ;;  %v3278_v4 = vsub.f32 %v18254_v30, %v3236_v55 }
 0x759   : > { %16768 = vpow2.f32 %v3294_v28  ;;  %v3296_v25 = vmul.f32 1.442695, %v3278_v4 }
 0x75a   : > { %v3242_v32 = vpop.xlane.xlu1 %3241  ;;  %v3239_v12 = vpop.xlane.xlu0 %3238 }
 0x75b   : > { %16770 = vpow2.f32 %v3296_v25  ;;  %v3280_v22 = vsub.f32 %v18262_v21, %v3242_v32  ;;  %v3279_v15 = vsub.f32 %v18258_v14, %v3239_v12 }
 0x75d   : > { %v3300_v61 = vmul.f32 1.442695, %v3280_v22  ;;  %v3298_v18 = vmul.f32 1.442695, %v3279_v15 }
 0x75e   : > { %v3248_v39 = vpop.xlane.xlu1 %3247  ;;  %v3245_v59 = vpop.xlane.xlu0 %3244 }
 0x75f   : > { %16772 = vpow2.f32 %v3300_v61  ;;  %v3282_v0 = vsub.f32 %v18270_v54, %v3248_v39  ;;  %v3281_v1 = vsub.f32 %v18264_v49, %v3245_v59 }
 0x760   : > { %16774 = vpow2.f32 %v3298_v18 }
 0x761   : > { %v18331_v30 = vpop.eup %16766  ;;  %v3304_v28 = vmul.f32 1.442695, %v3282_v0  ;;  %v3302_v4 = vmul.f32 1.442695, %v3281_v1 }
 0x762   : > { %v3254_v45 = vpop.xlane.xlu1 %3253  ;;  %v3251_v25 = vpop.xlane.xlu0 %3250  ;;  %v3324_v32 = vsel %vm1259_vm3, %v18331_v30, 0.0 }
 0x763   : > { %v18335_v12 = vpop.eup %16768  ;;  %16776 = vpow2.f32 %v3304_v28  ;;  %v3284_v15 = vsub.f32 %v18278_v5, %v3254_v45  ;;  %v3283_v61 = vsub.f32 %v18272_v8, %v3251_v25  ;;  %3325 = vadd.xlane.f32.xlu1 %v3324_v32 }
 0x764   : > { %16778 = vpow2.f32 %v3302_v4  ;;  %v3327_v22 = vsel %vm1259_vm3, %v18335_v12, 0.0 }
 0x765   : > { %v18341_v14 = vpop.eup %16770  ;;  %v3308_v21 = vmul.f32 1.442695, %v3284_v15  ;;  %v3306_v49 = vmul.f32 1.442695, %v3283_v61  ;;  %3328 = vadd.xlane.f32.xlu0 %v3327_v22 }
 0x766   : > { %v3260_v54 = vpop.xlane.xlu1 %3259  ;;  %v3257_v17 = vpop.xlane.xlu0 %3256  ;;  %v3330_v55 = vsel %vm1259_vm3, %v18341_v14, 0.0 }
 0x767   : > { %16780 = vpow2.f32 %v3308_v21  ;;  %v3286_v5 = vsub.f32 %v18286_v62, %v3260_v54  ;;  %v3285_v8 = vsub.f32 %v18280_v23, %v3257_v17  ;;  %3331 = vadd.xlane.f32.xlu1 %v3330_v55 }
 0x768   : > { %16782 = vpow2.f32 %v3306_v49 }
 0x769   : > { %v18347_v18 = vpop.eup %16772  ;;  %v3312_v39 = vmul.f32 1.442695, %v3286_v5  ;;  %v3310_v59 = vmul.f32 1.442695, %v3285_v8 }
 0x76a   : > { %v18349_v0 = vpop.eup %16774  ;;  %v3266_v1 = vpop.xlane.xlu1 %3265  ;;  %v3336_v4 = vsel %vm1259_vm3, %v18347_v18, 0.0 }
 0x76b   : > { %v3263_v28 = vpop.xlane.xlu0 %3262  ;;  %16784 = vpow2.f32 %v3312_v39  ;;  %v3288_v45 = vsub.f32 %v18294_v29, %v3266_v1  ;;  %3337 = vadd.xlane.f32.xlu1 %v3336_v4  ;;  %v3333_v23 = vsel %vm1259_vm3, %v18349_v0, 0.0 }
 0x76c   : > { %v3287_v62 = vsub.f32 %v18288_v48, %v3263_v28  ;;  %16786 = vpow2.f32 %v3310_v59  ;;  %3334 = vadd.xlane.f32.xlu0 %v3333_v23 }
 0x76d   : > { %v18357_v25 = vpop.eup %16776  ;;  %v3316_v32 = vmul.f32 1.442695, %v3288_v45 }
 0x76e   : > { %v3314_v15 = vmul.f32 1.442695, %v3287_v62  ;;  %v18359_v61 = vpop.eup %16778  ;;  %v3272_v22 = vpop.xlane.xlu1 %3271  ;;  %v3342_v49 = vsel %vm1259_vm3, %v18357_v25, 0.0 }
 0x76f   : > { %v3269_v21 = vpop.xlane.xlu0 %3268  ;;  %16788 = vpow2.f32 %v3316_v32  ;;  %v3290_v29 = vsub.f32 %v18302_v26, %v3272_v22  ;;  %3343 = vadd.xlane.f32.xlu1 %v3342_v49  ;;  %v3339_v54 = vsel %vm1259_vm3, %v18359_v61, 0.0 }
 0x770   : > { %v3289_v48 = vsub.f32 %v18296_v51, %v3269_v21  ;;  %16790 = vpow2.f32 %v3314_v15  ;;  %3340 = vadd.xlane.f32.xlu0 %v3339_v54 }
 0x771   : > { %v18367_v17 = vpop.eup %16780  ;;  %v3320_v55 = vmul.f32 1.442695, %v3290_v29 }
 0x772   : > { %v3318_v5 = vmul.f32 1.442695, %v3289_v48  ;;  %v18369_v8 = vpop.eup %16782  ;;  %v3348_v59 = vsel %vm1259_vm3, %v18367_v17, 0.0 }
 0x773   : > { %v3275_v39 = vpop.xlane.xlu0 %3274  ;;  %16792 = vpow2.f32 %v3320_v55  ;;  %3349 = vadd.xlane.f32.xlu1 %v3348_v59  ;;  %v3345_v51 = vsel %vm1259_vm3, %v18369_v8, 0.0  ;;  %v18438_v55 = vpop.permute.xlu1 %3647 }
 0x774   : > { %v3291_v26 = vsub.f32 %v18304_v6, %v3275_v39  ;;  %16794 = vpow2.f32 %v3318_v5  ;;  %3346 = vadd.xlane.f32.xlu0 %v3345_v51 }
 0x775   : > { %v18376_v1 = vpop.eup %16784 }
 0x776   : > { %v3322_v28 = vmul.f32 1.442695, %v3291_v26  ;;  %v18378_v4 = vpop.eup %16786  ;;  %v3354_v45 = vsel %vm1259_vm3, %v18376_v1, 0.0 }
 0x777   : > { %3355 = vadd.xlane.f32.xlu1 %v3354_v45  ;;  %v3351_v62 = vsel %vm1259_vm3, %v18378_v4, 0.0  ;;  %v3601_v5 = vpop.permute.xlu0 %3600  ;;  %v18440_v39 = vpop.permute.xlu1 %3741 }
 0x778   : > { %16796 = vpow2.f32 %v3322_v28  ;;  %3352 = vadd.xlane.f32.xlu0 %v3351_v62 }
 0x779   : > { %v18384_v6 = vpop.eup %16788 }
 0x77a   : > { %v18386_v23 = vpop.eup %16790  ;;  %v3360_v32 = vsel %vm1259_vm3, %v18384_v6, 0.0 }
 0x77b   : > { %3361 = vadd.xlane.f32.xlu1 %v3360_v32  ;;  %v3357_v15 = vsel %vm1259_vm3, %v18386_v23, 0.0  ;;  %v18442_v59 = vpop.permute.xlu0 %3694 }
 0x77c   : > { %3358 = vadd.xlane.f32.xlu0 %v3357_v15 }
 0x77d   : > { %v18392_v22 = vpop.eup %16792 }
 0x77e   : > { %v18394_v21 = vpop.eup %16794  ;;  %v3366_v49 = vsel %vm1259_vm3, %v18392_v22, 0.0 }
 0x77f   : > { %3367 = vadd.xlane.f32.xlu1 %v3366_v49  ;;  %v3363_v29 = vsel %vm1259_vm3, %v18394_v21, 0.0 }
 0x780   : > { %3364 = vadd.xlane.f32.xlu0 %v3363_v29 }
 0x782   : > { %v18400_v48 = vpop.eup %16796 }
 0x783   : > { %v3369_v54 = vsel %vm1259_vm3, %v18400_v48, 0.0 }
 0x784   : > { %3370 = vadd.xlane.f32.xlu0 %v3369_v54 }
 0x790   : > { %3841 = vrot.lane.b32.xlu1 %v17485_v36, %s22085_s1 }
 0x794   : > { %3892 = vrot.lane.b32.xlu1 %v17495_v47, %s22085_s1 }
 0x798   : > { %3943 = vrot.lane.b32.xlu1 %v17493_v46, %s22085_s1 }
 0x79a   : > { %3790 = vrot.lane.b32.xlu0 %v17487_v37, %s22085_s1 }
 0x79c   : > { %3994 = vrot.lane.b32.xlu1 %v17503_v57, %s22085_s1 }
 0x79e   : > { %3788 = vrot.lane.b32.xlu0 %v17487_v37, %s22083_s24 }
 0x7a0   : > { %4045 = vrot.lane.b32.xlu1 %v17501_v56, %s22085_s1 }
 0x7a2   : > { %3839 = vrot.lane.b32.xlu0 %v17485_v36, %s22083_s24 }
 0x7a4   : > { %4096 = vrot.lane.b32.xlu1 %v17511_v3, %s22085_s1 }
 0x7a6   : > { %3890 = vrot.lane.b32.xlu0 %v17495_v47, %s22083_s24 }
 0x7a8   : > { %4147 = vrot.lane.b32.xlu1 %v17509_v2, %s22085_s1  ;;  %s22101_s1 = smov 16  }
 0x7aa   : > { %3941 = vrot.lane.b32.xlu0 %v17493_v46, %s22083_s24 }
 0x7ac   : > { %4145 = vrot.lane.b32.xlu1 %v17509_v2, %s22083_s24 }
 0x7ae   : > { %3992 = vrot.lane.b32.xlu0 %v17503_v57, %s22083_s24 }
 0x7b0   : > { %4396 = vrot.lane.b32.xlu1 %v17487_v37, %s22087_s0 }
 0x7b2   : > { %4043 = vrot.lane.b32.xlu0 %v17501_v56, %s22083_s24 }
 0x7b6   : > { %4094 = vrot.lane.b32.xlu0 %v17511_v3, %s22083_s24  ;;  %s22103_s24 = smov 8  }
 0x7f0   : > { %v3326_v26 = vpop.xlane.xlu1 %3325 }
 0x7f1   : > { %16798 = vrcp.f32 %v3326_v26 }
 0x7f2   : > { %v3329_v51 = vpop.xlane.xlu0 %3328 }
 0x7f3   : > { %16800 = vrcp.f32 %v3329_v51 }
 0x7f4   : > { %v3332_v28 = vpop.xlane.xlu1 %3331 }
 0x7f5   : > { %16802 = vrcp.f32 %v3332_v28  ;;  %v22162_v28 = vmov 0.0  }
 0x7f8   : > { %v3338_v37 = vpop.xlane.xlu1 %3337 }
 0x7f9   : > { %v3335_v45 = vpop.xlane.xlu0 %3334 }
 0x7fa   : > { %16804 = vrcp.f32 %v3335_v45 }
 0x7fb   : > { %v16799_v62 = vpop.eup %16798  ;;  %16806 = vrcp.f32 %v3338_v37 }
 0x7fc   : > { %v3344_v32 = vpop.xlane.xlu1 %3343  ;;  %v3388_v29 = vmul.f32 %v16799_v62, %v18331_v30 }
 0x7fd   : > { %v16801_v15 = vpop.eup %16800  ;;  %v3341_v49 = vpop.xlane.xlu0 %3340 }
 0x7fe   : > { %v3389_v54 = vmul.f32 %v16801_v15, %v18335_v12  ;;  %16808 = vrcp.f32 %v3341_v49 }
 0x7ff   : > { %16810 = vrcp.f32 %v3344_v32  ;;  %v16803_v51 = vpop.eup %16802 }
 0x800   : > { %v3350_v7 = vpop.xlane.xlu1 %3349  ;;  %v3404_v26 = vpack.c.bf16 %v3389_v54, %v3388_v29  ;;  %v3390_v30 = vmul.f32 %v16803_v51, %v18341_v14 }
 0x801   : > { %v3347_v43 = vpop.xlane.xlu0 %3346 }
 0x802   : > { %16812 = vrcp.f32 %v3347_v43  ;;  %15295 = vmatmul.mubr.msk.bf16.vlgmr.msra.gmra.mrb[92].mxu0 %vm1259_vm3, %v3404_v26 }
 0x803   : > { %15305 = vmatpush3.bf16.msra.mxu0 %v18320_v31  ;;  %15306 = vmatprep.mubr.msk.bf16.mxu0 %vm17303_vm1, %v22162_v28  ;;  %16814 = vrcp.f32 %v3350_v7 }
 0x804   : > { %v16805_v37 = vpop.eup %16804  ;;  %v3356_v45 = vpop.xlane.xlu1 %3355  ;;  %15316 = vmatprep.subr.bf16.mxu0 %v22162_v28 }
 0x805   : > { %v3391_v12 = vmul.f32 %v16805_v37, %v18349_v0  ;;  %v3353_v62 = vpop.xlane.xlu0 %3352  ;;  %v16807_v32 = vpop.eup %16806 }
 0x806   : > { %16816 = vrcp.f32 %v3353_v62  ;;  %v3392_v31 = vmul.f32 %v16807_v32, %v18347_v18 }
 0x807   : > { %v3405_v43 = vpack.c.bf16 %v3391_v12, %v3390_v30  ;;  %16818 = vrcp.f32 %v3356_v45 }
 0x808   : > { %v16809_v15 = vpop.eup %16808  ;;  %v3362_v49 = vpop.xlane.xlu1 %3361 }
 0x809   : > { %v3393_v29 = vmul.f32 %v16809_v15, %v18359_v61  ;;  %15301 = vmatmul.mubr.msk.bf16.vlgmr.msra.gmra.mrb[84].mxu1 %vm1259_vm3, %v3405_v43  ;;  %v3359_v7 = vpop.xlane.xlu0 %3358  ;;  %v16811_v54 = vpop.eup %16810 }
 0x80a   : > { %15311 = vmatpush3.bf16.msra.mxu1 %v18322_v35  ;;  %16820 = vrcp.f32 %v3359_v7  ;;  %15312 = vmatprep.mubr.msk.bf16.mxu1 %vm17303_vm1, %v22162_v28  ;;  %v3394_v18 = vmul.f32 %v16811_v54, %v18357_v25 }
 0x80b   : > { %v3406_v14 = vpack.c.bf16 %v3393_v29, %v3392_v31  ;;  %15322 = vmatprep.subr.bf16.mxu1 %v22162_v28  ;;  %16822 = vrcp.f32 %v3362_v49 }
 0x80c   : > { %v16813_v0 = vpop.eup %16812  ;;  %v3368_v26 = vpop.xlane.xlu1 %3367 }
 0x80d   : > { %v3395_v61 = vmul.f32 %v16813_v0, %v18369_v8  ;;  %15307 = vmatmul.mubr.msk.bf16.vlgmr.msra.gmra.mrb[96].mxu0 %vm1259_vm3, %v3406_v14  ;;  %v3365_v51 = vpop.xlane.xlu0 %3364  ;;  %v16815_v37 = vpop.eup %16814 }
 0x80e   : > { %15317 = vmatpush3.bf16.msra.mxu0 %v3601_v5  ;;  %16824 = vrcp.f32 %v3365_v51  ;;  %15318 = vmatprep.mubr.msk.bf16.mxu0 %vm17303_vm1, %v22162_v28  ;;  %v3396_v12 = vmul.f32 %v16815_v37, %v18367_v17 }
 0x80f   : > { %v3407_v35 = vpack.c.bf16 %v3395_v61, %v3394_v18  ;;  %15328 = vmatprep.subr.bf16.mxu0 %v22162_v28  ;;  %16826 = vrcp.f32 %v3368_v26 }
 0x810   : > { %v16817_v45 = vpop.eup %16816  ;;  %v3842_v30 = vpop.permute.xlu1 %3841 }
 0x811   : > { %v3397_v25 = vmul.f32 %v16817_v45, %v18378_v4  ;;  %15313 = vmatmul.mubr.msk.bf16.vlgmr.msra.gmra.mrb[88].mxu1 %vm1259_vm3, %v3407_v35  ;;  %v3371_v8 = vpop.xlane.xlu0 %3370  ;;  %v16819_v62 = vpop.eup %16818  ;;  %v3847_v61 = vsel %vm845_vm2, %v3842_v30, 0 }
 0x812   : > { %15323 = vmatpush3.bf16.msra.mxu1 %v18438_v55  ;;  %16828 = vrcp.f32 %v3371_v8  ;;  %15324 = vmatprep.mubr.msk.bf16.mxu1 %vm17303_vm1, %v22162_v28  ;;  %v3398_v15 = vmul.f32 %v16819_v62, %v18376_v1 }
 0x813   : > { %v3408_v5 = vpack.c.bf16 %v3397_v25, %v3396_v12  ;;  %15334 = vmatprep.subr.bf16.mxu1 %v22162_v28 }
 0x814   : > { %v16821_v32 = vpop.eup %16820  ;;  %v3893_v43 = vpop.permute.xlu1 %3892 }
 0x815   : > { %v3399_v17 = vmul.f32 %v16821_v32, %v18386_v23  ;;  %15319 = vmatmul.mubr.msk.bf16.vlgmr.msra.gmra.mrb[100].mxu0 %vm1259_vm3, %v3408_v5  ;;  %v3791_v4 = vpop.permute.xlu0 %3790  ;;  %v16823_v49 = vpop.eup %16822 }
 0x816   : > { %15329 = vmatpush3.bf16.msra.mxu0 %v18442_v59  ;;  %15330 = vmatprep.mubr.msk.bf16.mxu0 %vm17303_vm1, %v22162_v28  ;;  %v3400_v29 = vmul.f32 %v16823_v49, %v18384_v6 }
 0x817   : > { %v3409_v55 = vpack.c.bf16 %v3399_v17, %v3398_v15  ;;  %15340 = vmatprep.subr.bf16.mxu0 %v22162_v28 }
 0x818   : > { %v16825_v31 = vpop.eup %16824  ;;  %v3944_v54 = vpop.permute.xlu1 %3943 }
 0x819   : > { %v3401_v7 = vmul.f32 %v16825_v31, %v18394_v21  ;;  %15325 = vmatmul.mubr.msk.bf16.vlgmr.msra.gmra.mrb[92].mxu1 %vm1259_vm3, %v3409_v55  ;;  %v3789_v1 = vpop.permute.xlu0 %3788  ;;  %v16827_v23 = vpop.eup %16826  ;;  %v3796_v21 = vsel %vm845_vm2, %v3791_v4, 0  ;;  %v3949_v37 = vsel %vm845_vm2, %v3944_v54, 0 }
 0x81a   : > { %15335 = vmatpush3.bf16.msra.mxu1 %v18440_v39  ;;  %15336 = vmatprep.mubr.msk.bf16.mxu1 %vm17303_vm1, %v22162_v28  ;;  %v3402_v0 = vmul.f32 %v16827_v23, %v18392_v22 }
 0x81b   : > { %v3410_v59 = vpack.c.bf16 %v3401_v7, %v3400_v29  ;;  %15346 = vmatprep.subr.bf16.mxu1 %v22162_v28 }
 0x81c   : > { %v16829_v14 = vpop.eup %16828  ;;  %v3995_v18 = vpop.permute.xlu1 %3994 }
 0x81d   : > { %v3403_v6 = vmul.f32 %v16829_v14, %v18400_v48  ;;  %15331 = vmatmul.mubr.msk.bf16.vlgmr.msra.gmra.mrb[104].mxu0 %vm1259_vm3, %v3410_v59  ;;  %v3840_v26 = vpop.permute.xlu0 %3839  ;;  %v3898_v48 = vsel %vm845_vm2, %v3893_v43, 0  ;;  %v4000_v30 = vsel %vm845_vm2, %v3995_v18, 0 }
 0x81e   : > { %15342 = vmatprep.mubr.msk.bf16.mxu0 %vm17303_vm1, %v22162_v28 }
 0x81f   : > { %15341 = vmatpush3.bf16.xpose.msra.mxu0 %v3796_v21  ;;  %v3411_v39 = vpack.c.bf16 %v3403_v6, %v3402_v0 }
 0x820   : > { %15352 = vmatprep.subr.bf16.mxu0 %v22162_v28  ;;  %v4046_v51 = vpop.permute.xlu1 %4045 }
 0x821   : > { %15337 = vmatmul.mubr.msk.bf16.vlgmr.msra.gmra.mrb[96].mxu1 %vm1259_vm3, %v3411_v39  ;;  %v3891_v22 = vpop.permute.xlu0 %3890  ;;  %v4051_v25 = vsel %vm845_vm2, %v4046_v51, 0 }
 0x822   : > { %15348 = vmatprep.mubr.msk.bf16.mxu1 %vm17303_vm1, %v22162_v28 }
 0x823   : > { %15347 = vmatpush3.bf16.xpose.msra.mxu1 %v3847_v61 }
 0x824   : > { %15358 = vmatprep.subr.bf16.mxu1 %v22162_v28  ;;  %v4097_v45 = vpop.permute.xlu1 %4096 }
 0x825   : > { %v3942_v35 = vpop.permute.xlu0 %3941  ;;  %v4102_v62 = vsel %vm845_vm2, %v4097_v45, 0 }
 0x826   : > { %15343 = vmatmul.mubr.msk.bf16.vlgmr.msra.gmra.mrb[108].mxu0 %vm845_vm2, %v3789_v1 }
 0x827   : > { %15353 = vmatpush3.bf16.xpose.msra.mxu0 %v3898_v48  ;;  %15354 = vmatprep.mubr.msk.bf16.mxu0 %vm17303_vm1, %v22162_v28 }
 0x828   : > { %15364 = vmatprep.subr.bf16.mxu0 %v22162_v28  ;;  %v4148_v8 = vpop.permute.xlu1 %4147 }
 0x829   : > { %v3993_v12 = vpop.permute.xlu0 %3992  ;;  %v4153_v43 = vsel %vm845_vm2, %v4148_v8, 0 }
 0x82a   : > { %15349 = vmatmul.mubr.msk.bf16.vlgmr.msra.gmra.mrb[100].mxu1 %vm845_vm2, %v3840_v26 }
 0x82b   : > { %15359 = vmatpush3.bf16.xpose.msra.mxu1 %v3949_v37  ;;  %15360 = vmatprep.mubr.msk.bf16.mxu1 %vm17303_vm1, %v22162_v28 }
 0x82c   : > { %15370 = vmatprep.subr.bf16.mxu1 %v22162_v28  ;;  %v4146_v32 = vpop.permute.xlu1 %4145 }
 0x82d   : > { %v4044_v5 = vpop.permute.xlu0 %4043 }
 0x82e   : > { %15355 = vmatmul.mubr.msk.bf16.vlgmr.msra.gmra.mrb[112].mxu0 %vm845_vm2, %v3891_v22 }
 0x82f   : > { %15365 = vmatpush3.bf16.xpose.msra.mxu0 %v4000_v30  ;;  %15366 = vmatprep.mubr.msk.bf16.mxu0 %vm17303_vm1, %v22162_v28 }
 0x830   : > { %15376 = vmatprep.subr.bf16.mxu0 %v22162_v28  ;;  %v4397_v17 = vpop.permute.xlu1 %4396 }
 0x831   : > { %v4095_v15 = vpop.permute.xlu0 %4094 }
 0x832   : > { %15361 = vmatmul.mubr.msk.bf16.vlgmr.msra.gmra.mrb[104].mxu1 %vm845_vm2, %v3942_v35 }
 0x833   : > { %15371 = vmatpush3.bf16.xpose.msra.mxu1 %v4051_v25  ;;  %15372 = vmatprep.mubr.msk.bf16.mxu1 %vm17303_vm1, %v22162_v28 }
 0x834   : > { %15382 = vmatprep.subr.bf16.mxu1 %v22162_v28 }
 0x836   : > { %15367 = vmatmul.mubr.msk.bf16.vlgmr.msra.gmra.mrb[116].mxu0 %vm845_vm2, %v3993_v12 }
 0x837   : > { %15377 = vmatpush3.bf16.xpose.msra.mxu0 %v4102_v62  ;;  %15378 = vmatprep.mubr.msk.bf16.mxu0 %vm17303_vm1, %v22162_v28 }
 0x838   : > { %15388 = vmatprep.subr.bf16.mxu0 %v22162_v28 }
 0x83a   : > { %15373 = vmatmul.mubr.msk.bf16.vlgmr.msra.gmra.mrb[108].mxu1 %vm845_vm2, %v4044_v5 }
 0x83b   : > { %15383 = vmatpush3.bf16.xpose.msra.mxu1 %v4153_v43  ;;  %15384 = vmatprep.mubr.msk.bf16.mxu1 %vm17303_vm1, %v22162_v28 }
 0x83c   : > { %15394 = vmatprep.subr.bf16.mxu1 %v22162_v28 }
 0x83e   : > { %15379 = vmatmul.mubr.msk.bf16.vlgmr.msra.gmra.mrb[120].mxu0 %vm845_vm2, %v4095_v15 }
 0x83f   : > { %15389 = vmatpush3.bf16.msra.mxu0 %v4397_v17  ;;  %15390 = vmatprep.mubr.msk.bf16.mxu0 %vm17303_vm1, %v22162_v28 }
 0x840   : > { %15400 = vmatprep.subr.bf16.mxu0 %v22162_v28 }
 0x842   : > { %15385 = vmatmul.mubr.msk.bf16.vlgmr.msra.gmra.mrb[112].mxu1 %vm845_vm2, %v4146_v32 }
 0x843   : > { %15396 = vmatprep.mubr.msk.bf16.mxu1 %vm17303_vm1, %v22162_v28 }
 0x8d5   : > { %v18536_v4 = vpop.f32.mrb[92].mxu0 }
 0x8d6   : > { %v15296_v49 = vpop.f32.mrb[93].mxu0 }
 0x8d7   : > { %v18538_v55 = vpop.f32.mrb[94].mxu0 }
 0x8d8   : > { %v15297_v29 = vpop.f32.mrb[95].mxu0 }
 0x8dc   : > { %v18542_v7 = vpop.f32.mrb[84].mxu1 }
 0x8dd   : > { %v15302_v1 = vpop.f32.mrb[85].mxu1 }
 0x8de   : > { %v18544_v23 = vpop.f32.mrb[86].mxu1 }
 0x8df   : > { %v15303_v59 = vpop.f32.mrb[87].mxu1 }
 0x8e0   : > { %v18548_v14 = vpop.f32.mrb[96].mxu0 }
 0x8e1   : > { %v15308_v0 = vpop.f32.mrb[97].mxu0 }
 0x8e2   : > { %v18550_v6 = vpop.f32.mrb[98].mxu0 }
 0x8e3   : > { %v15309_v26 = vpop.f32.mrb[99].mxu0 }
 0x8e4   : > { %v18554_v39 = vpop.f32.mrb[88].mxu1 }
 0x8e5   : > { %v15314_v18 = vpop.f32.mrb[89].mxu1 }
 0x8e6   : > { %v18556_v61 = vpop.f32.mrb[90].mxu1 }
 0x8e7   : > { %v15315_v48 = vpop.f32.mrb[91].mxu1 }
 0x8e8   : > { %v18560_v51 = vpop.f32.mrb[100].mxu0 }
 0x8e9   : > { %v15320_v37 = vpop.f32.mrb[101].mxu0 }
 0x8ea   : > { %v18562_v35 = vpop.f32.mrb[102].mxu0 }
 0x8eb   : > { %v15321_v30 = vpop.f32.mrb[103].mxu0 }
 0x8ec   : > { %v18566_v12 = vpop.f32.mrb[92].mxu1 }
 0x8ed   : > { %v15326_v25 = vpop.f32.mrb[93].mxu1 }
 0x8ee   : > { %v18568_v8 = vpop.f32.mrb[94].mxu1 }
 0x8ef   : > { %v15327_v5 = vpop.f32.mrb[95].mxu1 }
 0x8f0   : > { %v18572_v32 = vpop.f32.mrb[104].mxu0 }
 0x8f1   : > { %v15332_v43 = vpop.f32.mrb[105].mxu0 }
 0x8f2   : > { %v18574_v15 = vpop.f32.mrb[106].mxu0 }
 0x8f3   : > { %v15333_v49 = vpop.f32.mrb[107].mxu0 }
 0x8f4   : > { %v18578_v29 = vpop.f32.mrb[96].mxu1 }
 0x8f5   : > { %22163 = vst [vmem:[#allocation18_spill] sm:$0xff] %v18578_v29  ;;  %v15338_v1 = vpop.f32.mrb[97].mxu1 }
 0x8f6   : > { %v18580_v59 = vpop.f32.mrb[98].mxu1 }
 0x8f7   : > { %v15339_v26 = vpop.f32.mrb[99].mxu1 }
 0x8f9   : > { %v3832_v18 = vpop.f32.mrb[108].mxu0 }
 0x8fa   : > { %v18584_v48 = vmul.f32 0.35355338, %v3832_v18  ;;  %v15344_v37 = vpop.f32.mrb[109].mxu0 }
 0x8fb   : > { %v3835_v30 = vpop.f32.mrb[110].mxu0 }
 0x8fc   : > { %v18586_v25 = vmul.f32 0.35355338, %v3835_v30  ;;  %v15345_v5 = vpop.f32.mrb[111].mxu0  ;;  %v4212_v43 = vsel %vm1259_vm3, %v18584_v48, -inf }
 0x8fd   : > { %4213 = vmax.xlane.f32.xlu0 %v4212_v43  ;;  %v3883_v49 = vpop.f32.mrb[100].mxu1 }
 0x8fe   : > { %v18590_v1 = vmul.f32 0.35355338, %v3883_v49  ;;  %v15350_v17 = vpop.f32.mrb[101].mxu1  ;;  %v4215_v0 = vsel %vm1259_vm3, %v18586_v25, -inf }
 0x8ff   : > { %4216 = vmax.xlane.f32.xlu1 %v4215_v0  ;;  %v3886_v26 = vpop.f32.mrb[102].mxu1 }
 0x900   : > { %v18594_v18 = vmul.f32 0.35355338, %v3886_v26  ;;  %v15351_v37 = vpop.f32.mrb[103].mxu1  ;;  %v4218_v30 = vsel %vm1259_vm3, %v18590_v1, -inf }
 0x901   : > { %4219 = vmax.xlane.f32.xlu0 %v4218_v30  ;;  %v3934_v5 = vpop.f32.mrb[112].mxu0 }
 0x902   : > { %v18598_v62 = vmul.f32 0.35355338, %v3934_v5  ;;  %v15356_v43 = vpop.f32.mrb[113].mxu0  ;;  %v4221_v21 = vsel %vm1259_vm3, %v18594_v18, -inf }
 0x903   : > { %v3937_v45 = vpop.f32.mrb[114].mxu0 }
 0x904   : > { %v18600_v49 = vmul.f32 0.35355338, %v3937_v45  ;;  %v15357_v17 = vpop.f32.mrb[115].mxu0  ;;  %v4224_v0 = vsel %vm1259_vm3, %v18598_v62, -inf }
 0x905   : > { %4222 = vmax.xlane.f32.xlu0 %v4221_v21  ;;  %4225 = vmax.xlane.f32.xlu1 %v4224_v0  ;;  %v3985_v26 = vpop.f32.mrb[104].mxu1 }
 0x906   : > { %v18606_v37 = vmul.f32 0.35355338, %v3985_v26  ;;  %v15362_v30 = vpop.f32.mrb[105].mxu1  ;;  %v4227_v45 = vsel %vm1259_vm3, %v18600_v49, -inf }
 0x907   : > { %v3988_v31 = vpop.f32.mrb[106].mxu1 }
 0x908   : > { %v18608_v5 = vmul.f32 0.35355338, %v3988_v31  ;;  %v15363_v43 = vpop.f32.mrb[107].mxu1  ;;  %v4230_v17 = vsel %vm1259_vm3, %v18606_v37, -inf }
 0x909   : > { %4228 = vmax.xlane.f32.xlu0 %v4227_v45  ;;  %4231 = vmax.xlane.f32.xlu1 %v4230_v17  ;;  %v4036_v22 = vpop.f32.mrb[116].mxu0 }
 0x90a   : > { %v18614_v54 = vmul.f32 0.35355338, %v4036_v22  ;;  %v15368_v21 = vpop.f32.mrb[117].mxu0  ;;  %v4233_v31 = vsel %vm1259_vm3, %v18608_v5, -inf }
 0x90b   : > { %v4039_v0 = vpop.f32.mrb[118].mxu0 }
 0x90c   : > { %v18616_v26 = vmul.f32 0.35355338, %v4039_v0  ;;  %v15369_v30 = vpop.f32.mrb[119].mxu0  ;;  %v4236_v43 = vsel %vm1259_vm3, %v18614_v54, -inf }
 0x90d   : > { %4234 = vmax.xlane.f32.xlu0 %v4233_v31  ;;  %4237 = vmax.xlane.f32.xlu1 %v4236_v43  ;;  %v4087_v38 = vpop.f32.mrb[108].mxu1 }
 0x90e   : > { %v18622_v19 = vmul.f32 0.35355338, %v4087_v38  ;;  %v15374_v45 = vpop.f32.mrb[109].mxu1  ;;  %v4239_v0 = vsel %vm1259_vm3, %v18616_v26, -inf }
 0x90f   : > { %v4090_v17 = vpop.f32.mrb[110].mxu1 }
 0x910   : > { %v18624_v22 = vmul.f32 0.35355338, %v4090_v17  ;;  %v15375_v21 = vpop.f32.mrb[111].mxu1  ;;  %v4242_v30 = vsel %vm1259_vm3, %v18622_v19, -inf }
 0x911   : > { %4240 = vmax.xlane.f32.xlu0 %v4239_v0  ;;  %4243 = vmax.xlane.f32.xlu1 %v4242_v30  ;;  %v4138_v58 = vpop.f32.mrb[120].mxu0 }
 0x912   : > { %v18630_v24 = vmul.f32 0.35355338, %v4138_v58  ;;  %v15380_v31 = vpop.f32.mrb[121].mxu0  ;;  %v4245_v17 = vsel %vm1259_vm3, %v18624_v22, -inf }
 0x913   : > { %v4141_v43 = vpop.f32.mrb[122].mxu0 }
 0x914   : > { %v18632_v38 = vmul.f32 0.35355338, %v4141_v43  ;;  %v15381_v45 = vpop.f32.mrb[123].mxu0  ;;  %v4248_v21 = vsel %vm1259_vm3, %v18630_v24, -inf }
 0x915   : > { %4246 = vmax.xlane.f32.xlu0 %v4245_v17  ;;  %v4189_v27 = vpop.f32.mrb[112].mxu1  ;;  %4249 = vmax.xlane.f32.xlu1 %v4248_v21 }
 0x916   : > { %v18638_v34 = vmul.f32 0.35355338, %v4189_v27  ;;  %v15386_v0 = vpop.f32.mrb[113].mxu1  ;;  %v4251_v45 = vsel %vm1259_vm3, %v18632_v38, -inf }
 0x917   : > { %v4192_v30 = vpop.f32.mrb[114].mxu1 }
 0x918   : > { %v18640_v58 = vmul.f32 0.35355338, %v4192_v30  ;;  %v15387_v31 = vpop.f32.mrb[115].mxu1  ;;  %v4254_v43 = vsel %vm1259_vm3, %v18638_v34, -inf }
 0x919   : > { %4255 = vmax.xlane.f32.xlu1 %v4254_v43  ;;  %4252 = vmax.xlane.f32.xlu0 %v4251_v45 }
 0x91a   : > { %v4257_v17 = vsel %vm1259_vm3, %v18640_v58, -inf }
 0x91d   : > { %4258 = vmax.xlane.f32.xlu0 %v4257_v17 }
 0x92a   : > { %4490 = vrot.lane.b32.xlu1 %v17495_v47, %s22087_s0 }
 0x92e   : > { %4537 = vrot.lane.b32.xlu1 %v17493_v46, %s22087_s0 }
 0x932   : > { %4631 = vrot.lane.b32.xlu1 %v17501_v56, %s22087_s0 }
 0x933   : > { %4443 = vrot.lane.b32.xlu0 %v17485_v36, %s22087_s0 }
 0x937   : > { %4584 = vrot.lane.b32.xlu0 %v17503_v57, %s22087_s0 }
 0x98a   : > { %v4214_v27 = vpop.xlane.xlu0 %4213 }
 0x98b   : > { %v4260_v21 = vsub.f32 %v18584_v48, %v4214_v27 }
 0x98c   : > { %v4217_v0 = vpop.xlane.xlu1 %4216 }
 0x98d   : > { %v4276_v30 = vmul.f32 1.442695, %v4260_v21  ;;  %v4261_v31 = vsub.f32 %v18586_v25, %v4217_v0 }
 0x98e   : > { %v4220_v47 = vpop.xlane.xlu0 %4219 }
 0x98f   : > { %16830 = vpow2.f32 %v4276_v30  ;;  %v4278_v43 = vmul.f32 1.442695, %v4261_v31  ;;  %v4262_v46 = vsub.f32 %v18590_v1, %v4220_v47 }
 0x991   : > { %16832 = vpow2.f32 %v4278_v43  ;;  %v4280_v56 = vmul.f32 1.442695, %v4262_v46 }
 0x992   : > { %v4226_v45 = vpop.xlane.xlu1 %4225  ;;  %v4223_v17 = vpop.xlane.xlu0 %4222 }
 0x993   : > { %16834 = vpow2.f32 %v4280_v56  ;;  %v4264_v36 = vsub.f32 %v18598_v62, %v4226_v45  ;;  %v4263_v57 = vsub.f32 %v18594_v18, %v4223_v17 }
 0x995   : > { %v4284_v29 = vmul.f32 1.442695, %v4264_v36  ;;  %v4282_v48 = vmul.f32 1.442695, %v4263_v57 }
 0x996   : > { %v4232_v27 = vpop.xlane.xlu1 %4231  ;;  %v4229_v21 = vpop.xlane.xlu0 %4228 }
 0x997   : > { %16836 = vpow2.f32 %v4284_v29  ;;  %v4266_v25 = vsub.f32 %v18606_v37, %v4232_v27  ;;  %v4265_v0 = vsub.f32 %v18600_v49, %v4229_v21 }
 0x998   : > { %16838 = vpow2.f32 %v4282_v48 }
 0x999   : > { %v18665_v1 = vpop.eup %16830  ;;  %v4288_v30 = vmul.f32 1.442695, %v4266_v25  ;;  %v4286_v31 = vmul.f32 1.442695, %v4265_v0 }
 0x99a   : > { %v4238_v47 = vpop.xlane.xlu1 %4237  ;;  %v4235_v43 = vpop.xlane.xlu0 %4234  ;;  %v4308_v62 = vsel %vm1259_vm3, %v18665_v1, 0.0 }
 0x99b   : > { %v18669_v18 = vpop.eup %16832  ;;  %16840 = vpow2.f32 %v4288_v30  ;;  %v4268_v46 = vsub.f32 %v18614_v54, %v4238_v47  ;;  %v4267_v29 = vsub.f32 %v18608_v5, %v4235_v43  ;;  %4309 = vadd.xlane.f32.xlu1 %v4308_v62 }
 0x99c   : > { %16842 = vpow2.f32 %v4286_v31  ;;  %v4311_v49 = vsel %vm1259_vm3, %v18669_v18, 0.0 }
 0x99d   : > { %v18675_v37 = vpop.eup %16834  ;;  %v4292_v56 = vmul.f32 1.442695, %v4268_v46  ;;  %v4290_v45 = vmul.f32 1.442695, %v4267_v29  ;;  %4312 = vadd.xlane.f32.xlu0 %v4311_v49 }
 0x99e   : > { %v4244_v17 = vpop.xlane.xlu1 %4243  ;;  %v4241_v36 = vpop.xlane.xlu0 %4240  ;;  %v4314_v57 = vsel %vm1259_vm3, %v18675_v37, 0.0 }
 0x99f   : > { %16844 = vpow2.f32 %v4292_v56  ;;  %v4270_v54 = vsub.f32 %v18622_v19, %v4244_v17  ;;  %v4269_v5 = vsub.f32 %v18616_v26, %v4241_v36  ;;  %4315 = vadd.xlane.f32.xlu1 %v4314_v57 }
 0x9a0   : > { %16846 = vpow2.f32 %v4290_v45 }
 0x9a1   : > { %v18681_v48 = vpop.eup %16836  ;;  %v4296_v27 = vmul.f32 1.442695, %v4270_v54  ;;  %v4294_v21 = vmul.f32 1.442695, %v4269_v5 }
 0x9a2   : > { %v18683_v25 = vpop.eup %16838  ;;  %v4250_v0 = vpop.xlane.xlu1 %4249  ;;  %v4320_v31 = vsel %vm1259_vm3, %v18681_v48, 0.0 }
 0x9a3   : > { %v4247_v30 = vpop.xlane.xlu0 %4246  ;;  %16848 = vpow2.f32 %v4296_v27  ;;  %v4272_v47 = vsub.f32 %v18630_v24, %v4250_v0  ;;  %4321 = vadd.xlane.f32.xlu1 %v4320_v31  ;;  %v4317_v26 = vsel %vm1259_vm3, %v18683_v25, 0.0 }
 0x9a4   : > { %v4271_v19 = vsub.f32 %v18624_v22, %v4247_v30  ;;  %16850 = vpow2.f32 %v4294_v21  ;;  %4318 = vadd.xlane.f32.xlu0 %v4317_v26 }
 0x9a5   : > { %v18691_v43 = vpop.eup %16840  ;;  %v4300_v62 = vmul.f32 1.442695, %v4272_v47 }
 0x9a6   : > { %v4298_v46 = vmul.f32 1.442695, %v4271_v19  ;;  %v18693_v29 = vpop.eup %16842  ;;  %v4256_v49 = vpop.xlane.xlu1 %4255  ;;  %v4326_v45 = vsel %vm1259_vm3, %v18691_v43, 0.0 }
 0x9a7   : > { %v4253_v56 = vpop.xlane.xlu0 %4252  ;;  %16852 = vpow2.f32 %v4300_v62  ;;  %v4274_v24 = vsub.f32 %v18638_v34, %v4256_v49  ;;  %4327 = vadd.xlane.f32.xlu1 %v4326_v45  ;;  %v4323_v17 = vsel %vm1259_vm3, %v18693_v29, 0.0 }
 0x9a8   : > { %v4273_v22 = vsub.f32 %v18632_v38, %v4253_v56  ;;  %16854 = vpow2.f32 %v4298_v46  ;;  %4324 = vadd.xlane.f32.xlu0 %v4323_v17 }
 0x9a9   : > { %v18701_v36 = vpop.eup %16844  ;;  %v4304_v57 = vmul.f32 1.442695, %v4274_v24 }
 0x9aa   : > { %v4302_v54 = vmul.f32 1.442695, %v4273_v22  ;;  %v18703_v5 = vpop.eup %16846  ;;  %v4332_v21 = vsel %vm1259_vm3, %v18701_v36, 0.0 }
 0x9ab   : > { %v4259_v27 = vpop.xlane.xlu0 %4258  ;;  %16856 = vpow2.f32 %v4304_v57  ;;  %4333 = vadd.xlane.f32.xlu1 %v4332_v21  ;;  %v4329_v38 = vsel %vm1259_vm3, %v18703_v5, 0.0  ;;  %v22166_v21 = vpack.i.bf16 %v18220_v53, %v18218_v60  ;;  %v22173_v60 = vpack.i.bf16 %v18226_v13, %v18224_v42  ;;  %v4491_v53 = vpop.permute.xlu1 %4490 }
 0x9ac   : > { %v4275_v34 = vsub.f32 %v18640_v58, %v4259_v27  ;;  %16858 = vpow2.f32 %v4302_v54  ;;  %4330 = vadd.xlane.f32.xlu0 %v4329_v38  ;;  %v22164_v54 = vpack.i.bf16 %v18208_v44, %v18206_v52  ;;  %v22165_v27 = vpack.i.bf16 %v18544_v23, %v18542_v7 }
 0x9ad   : > { %v18710_v0 = vpop.eup %16848  ;;  %v22168_v52 = vpack.i.bf16 %v18556_v61, %v18554_v39  ;;  %v22169_v44 = vpack.i.bf16 %v18538_v55, %v18536_v4 }
 0x9ae   : > { %v4306_v30 = vmul.f32 1.442695, %v4275_v34  ;;  %v18712_v31 = vpop.eup %16850  ;;  %v4338_v19 = vsel %vm1259_vm3, %v18710_v0, 0.0 }
 0x9af   : > { %v4444_v47 = vpop.permute.xlu0 %4443  ;;  %4339 = vadd.xlane.f32.xlu1 %v4338_v19  ;;  %v4335_v58 = vsel %vm1259_vm3, %v18712_v31, 0.0  ;;  %v4538_v4 = vpop.permute.xlu1 %4537 }
 0x9b0   : > { %16860 = vpow2.f32 %v4306_v30  ;;  %15395 = vmatpush3.bf16.msra.mxu1 %v4444_v47  ;;  %4336 = vadd.xlane.f32.xlu0 %v4335_v58 }
 0x9b1   : > { %15406 = vmatprep.subr.bf16.mxu1 %v22162_v28  ;;  %v18719_v26 = vpop.eup %16852 }
 0x9b2   : > { %v18721_v62 = vpop.eup %16854  ;;  %v4344_v46 = vsel %vm1259_vm3, %v18719_v26, 0.0 }
 0x9b3   : > { %4345 = vadd.xlane.f32.xlu1 %v4344_v46  ;;  %v4341_v49 = vsel %vm1259_vm3, %v18721_v62, 0.0  ;;  %v18783_v55 = vpop.permute.xlu1 %4631 }
 0x9b4   : > { %4342 = vadd.xlane.f32.xlu0 %v4341_v49 }
 0x9b5   : > { %v18727_v56 = vpop.eup %16856 }
 0x9b6   : > { %v18729_v45 = vpop.eup %16858  ;;  %v4350_v24 = vsel %vm1259_vm3, %v18727_v56, 0.0 }
 0x9b7   : > { %4351 = vadd.xlane.f32.xlu1 %v4350_v24  ;;  %v4347_v22 = vsel %vm1259_vm3, %v18729_v45, 0.0 }
 0x9b8   : > { %4348 = vadd.xlane.f32.xlu0 %v4347_v22 }
 0x9ba   : > { %v18735_v17 = vpop.eup %16860 }
 0x9bb   : > { %v4353_v57 = vsel %vm1259_vm3, %v18735_v17, 0.0 }
 0x9bc   : > { %4354 = vadd.xlane.f32.xlu0 %v4353_v57 }
 0x9c8   : > { %4725 = vrot.lane.b32.xlu1 %v17509_v2, %s22087_s0  ;;  %v22167_v2 = vpack.i.bf16 %v18202_v9, %v18200_v16  ;;  %v22171_v16 = vpack.i.bf16 %v18214_v63, %v18212_v33  ;;  %v22172_v9 = vpack.i.bf16 %v18550_v6, %v18548_v14 }
 0x9cc   : > { %16378 = vrot.lane.b32.xlu1 %v22164_v54, %s22103_s24 }
 0x9d0   : > { %16388 = vrot.lane.b32.xlu1 %v22165_v27, %s22101_s1 }
 0x9d2   : > { %4678 = vrot.lane.b32.xlu0 %v17511_v3, %s22087_s0  ;;  %v22170_v3 = vpack.i.bf16 %v18232_v40, %v18230_v50  ;;  %v4585_v50 = vpop.permute.xlu0 %4584  ;;  %s22199_s0 = sld [smem:[#allocation45_spill]] }
 0x9d4   : > { %16398 = vrot.lane.b32.xlu1 %v22166_v21, %s22103_s24 }
 0x9d6   : > { %16373 = vrot.lane.b32.xlu0 %v22167_v2, %s22103_s24 }
 0x9d8   : > { %16408 = vrot.lane.b32.xlu1 %v22168_v52, %s22101_s1 }
 0x9da   : > { %16383 = vrot.lane.b32.xlu0 %v22169_v44, %s22101_s1 }
 0x9dc   : > { %16418 = vrot.lane.b32.xlu1 %v22170_v3, %s22103_s24 }
 0x9de   : > { %16393 = vrot.lane.b32.xlu0 %v22171_v16, %s22103_s24 }
 0x9e2   : > { %16403 = vrot.lane.b32.xlu0 %v22172_v9, %s22101_s1 }
 0x9e6   : > { %16413 = vrot.lane.b32.xlu0 %v22173_v60, %s22103_s24 }
 0xa28   : > { %v4310_v40 = vpop.xlane.xlu1 %4309 }
 0xa29   : > { %16862 = vrcp.f32 %v4310_v40 }
 0xa2a   : > { %v4313_v7 = vpop.xlane.xlu0 %4312 }
 0xa2b   : > { %16864 = vrcp.f32 %v4313_v7 }
 0xa2c   : > { %v4316_v33 = vpop.xlane.xlu1 %4315 }
 0xa2d   : > { %16866 = vrcp.f32 %v4316_v33 }
 0xa30   : > { %v4322_v63 = vpop.xlane.xlu1 %4321 }
 0xa31   : > { %v4319_v23 = vpop.xlane.xlu0 %4318 }
 0xa32   : > { %16868 = vrcp.f32 %v4319_v23 }
 0xa33   : > { %v16863_v14 = vpop.eup %16862  ;;  %16870 = vrcp.f32 %v4322_v63 }
 0xa34   : > { %v4328_v6 = vpop.xlane.xlu1 %4327  ;;  %v4372_v13 = vmul.f32 %v16863_v14, %v18665_v1 }
 0xa35   : > { %v16865_v39 = vpop.eup %16864  ;;  %v4325_v42 = vpop.xlane.xlu0 %4324 }
 0xa36   : > { %v4373_v61 = vmul.f32 %v16865_v39, %v18669_v18  ;;  %16872 = vrcp.f32 %v4325_v42 }
 0xa37   : > { %16874 = vrcp.f32 %v4328_v6  ;;  %v16867_v47 = vpop.eup %16866 }
 0xa38   : > { %v4334_v34 = vpop.xlane.xlu1 %4333  ;;  %v4388_v38 = vpack.c.bf16 %v4373_v61, %v4372_v13  ;;  %v4374_v1 = vmul.f32 %v16867_v47, %v18675_v37 }
 0xa39   : > { %v4331_v30 = vpop.xlane.xlu0 %4330 }
 0xa3a   : > { %16876 = vrcp.f32 %v4331_v30  ;;  %15391 = vmatmul.mubr.msk.bf16.vlgmr.msra.gmra.mrb[124].mxu0 %vm1259_vm3, %v4388_v38 }
 0xa3b   : > { %15401 = vmatpush3.bf16.msra.mxu0 %v4491_v53  ;;  %15402 = vmatprep.mubr.msk.bf16.mxu0 %vm17303_vm1, %v22162_v28  ;;  %16878 = vrcp.f32 %v4334_v34 }
 0xa3c   : > { %v16869_v19 = vpop.eup %16868  ;;  %v4340_v58 = vpop.xlane.xlu1 %4339  ;;  %15412 = vmatprep.subr.bf16.mxu0 %v22162_v28 }
 0xa3d   : > { %v4375_v18 = vmul.f32 %v16869_v19, %v18683_v25  ;;  %v4337_v46 = vpop.xlane.xlu0 %4336  ;;  %v16871_v49 = vpop.eup %16870 }
 0xa3e   : > { %16880 = vrcp.f32 %v4337_v46  ;;  %v4376_v54 = vmul.f32 %v16871_v49, %v18681_v48 }
 0xa3f   : > { %v4389_v24 = vpack.c.bf16 %v4375_v18, %v4374_v1  ;;  %16882 = vrcp.f32 %v4340_v58  ;;  %v22175_v58 = vpack.i.bf16 %v18562_v35, %v18560_v51 }
 0xa40   : > { %v16873_v22 = vpop.eup %16872  ;;  %v4346_v57 = vpop.xlane.xlu1 %4345 }
 0xa41   : > { %v4377_v27 = vmul.f32 %v16873_v22, %v18693_v29  ;;  %15397 = vmatmul.mubr.msk.bf16.vlgmr.msra.gmra.mrb[116].mxu1 %vm1259_vm3, %v4389_v24  ;;  %v4343_v21 = vpop.xlane.xlu0 %4342  ;;  %v16875_v2 = vpop.eup %16874 }
 0xa42   : > { %15407 = vmatpush3.bf16.msra.mxu1 %v4538_v4  ;;  %16884 = vrcp.f32 %v4343_v21  ;;  %15408 = vmatprep.mubr.msk.bf16.mxu1 %vm17303_vm1, %v22162_v28  ;;  %v4378_v52 = vmul.f32 %v16875_v2, %v18691_v43 }
 0xa43   : > { %v4390_v37 = vpack.c.bf16 %v4377_v27, %v4376_v54  ;;  %15418 = vmatprep.subr.bf16.mxu1 %v22162_v28  ;;  %16886 = vrcp.f32 %v4346_v57  ;;  %v22176_v27 = vpack.i.bf16 %v18568_v8, %v18566_v12  ;;  %v22178_v8 = vpack.i.bf16 %v18244_v11, %v18242_v41  ;;  %v22180_v11 = vld [vmem:[#allocation18_spill] sm:$0xff] }
 0xa44   : > { %v16877_v25 = vpop.eup %16876  ;;  %v4352_v44 = vpop.xlane.xlu1 %4351 }
 0xa45   : > { %v4379_v48 = vmul.f32 %v16877_v25, %v18703_v5  ;;  %15403 = vmatmul.mubr.msk.bf16.vlgmr.msra.gmra.mrb[128].mxu0 %vm1259_vm3, %v4390_v37  ;;  %v4349_v29 = vpop.xlane.xlu0 %4348  ;;  %v16879_v3 = vpop.eup %16878  ;;  %v22177_v25 = vpack.i.bf16 %v18238_v10, %v18236_v20  ;;  %v22179_v10 = vpack.i.bf16 %v18574_v15, %v18572_v32 }
 0xa46   : > { %15413 = vmatpush3.bf16.msra.mxu0 %v4585_v50  ;;  %16888 = vrcp.f32 %v4349_v29  ;;  %15414 = vmatprep.mubr.msk.bf16.mxu0 %vm17303_vm1, %v22162_v28  ;;  %v4380_v60 = vmul.f32 %v16879_v3, %v18701_v36 }
 0xa47   : > { %v4391_v16 = vpack.c.bf16 %v4379_v48, %v4378_v52  ;;  %15424 = vmatprep.subr.bf16.mxu0 %v22162_v28  ;;  %16890 = vrcp.f32 %v4352_v44 }
 0xa48   : > { %v16881_v9 = vpop.eup %16880  ;;  %v4726_v14 = vpop.permute.xlu1 %4725 }
 0xa49   : > { %v4381_v43 = vmul.f32 %v16881_v9, %v18712_v31  ;;  %15409 = vmatmul.mubr.msk.bf16.vlgmr.msra.gmra.mrb[120].mxu1 %vm1259_vm3, %v4391_v16  ;;  %v4355_v5 = vpop.xlane.xlu0 %4354  ;;  %v16883_v53 = vpop.eup %16882 }
 0xa4a   : > { %15419 = vmatpush3.bf16.msra.mxu1 %v18783_v55  ;;  %16892 = vrcp.f32 %v4355_v5  ;;  %15420 = vmatprep.mubr.msk.bf16.mxu1 %vm17303_vm1, %v22162_v28  ;;  %v4382_v40 = vmul.f32 %v16883_v53, %v18710_v0 }
 0xa4b   : > { %v4392_v4 = vpack.c.bf16 %v4381_v43, %v4380_v60  ;;  %15430 = vmatprep.subr.bf16.mxu1 %v22162_v28 }
 0xa4c   : > { %v16885_v50 = vpop.eup %16884 }
 0xa4d   : > { %v4383_v36 = vmul.f32 %v16885_v50, %v18721_v62  ;;  %15415 = vmatmul.mubr.msk.bf16.vlgmr.msra.gmra.mrb[132].mxu0 %vm1259_vm3, %v4392_v4  ;;  %v4679_v31 = vpop.permute.xlu0 %4678  ;;  %v16887_v7 = vpop.eup %16886  ;;  %v22181_v50 = vpack.i.bf16 %v18580_v59, %v22180_v11 }
 0xa4e   : > { %15425 = vmatpush3.bf16.msra.mxu0 %v4679_v31  ;;  %15426 = vmatprep.mubr.msk.bf16.mxu0 %vm17303_vm1, %v22162_v28  ;;  %v4384_v63 = vmul.f32 %v16887_v7, %v18719_v26  ;;  %v16614_v26 = vld [vmem:[%s22174_s5] sm:$0xff]  }
 0xa4f   : > { %v4393_v55 = vpack.c.bf16 %v4383_v36, %v4382_v40  ;;  %15436 = vmatprep.subr.bf16.mxu0 %v16614_v26 }
 0xa50   : > { %v16889_v33 = vpop.eup %16888 }
 0xa51   : > { %v4385_v23 = vmul.f32 %v16889_v33, %v18729_v45  ;;  %15421 = vmatmul.mubr.msk.bf16.vlgmr.msra.gmra.mrb[124].mxu1 %vm1259_vm3, %v4393_v55  ;;  %v16891_v0 = vpop.eup %16890  ;;  %v16615_v45 = vld [vmem:[%s22174_s5 + $0x8] sm:$0xff]   ;;  %v16374_v32 = vpop.permute.xlu0 %16373 }
 0xa52   : > { %15431 = vmatpush3.bf16.msra.mxu1 %v4726_v14  ;;  %15432 = vmatprep.mubr.msk.bf16.mxu1 %vm17303_vm1, %v22162_v28  ;;  %v4386_v39 = vmul.f32 %v16891_v0, %v18727_v56  ;;  %v16379_v55 = vpop.permute.xlu1 %16378  ;;  %v16375_v59 = vunpack.i.l.bf16 %v16374_v32 }
 0xa53   : > { %v4394_v62 = vpack.c.bf16 %v4385_v23, %v4384_v63 }
 0xa54   : > { %v16893_v6 = vpop.eup %16892 }
 0xa55   : > { %v4387_v42 = vmul.f32 %v16893_v6, %v18735_v17  ;;  %15427 = vmatmul.mubr.msk.bf16.vlgmr.msra.gmra.mrb[136].mxu0 %vm1259_vm3, %v4394_v62  ;;  %v16384_v15 = vpop.permute.xlu0 %16383  ;;  %v16376_v62 = vunpack.i.h.bf16 %v16374_v32  ;;  %v22188_v32 = vld [vmem:[#allocation9_spill] sm:$0xff] }
 0xa56   : > { %15437 = vmatpush3.bf16.msra.mxu0 %v16614_v26  ;;  %v16389_v63 = vpop.permute.xlu1 %16388  ;;  %v22182_v26 = vld [vmem:[#allocation5_spill] sm:$0xff] }
 0xa57   : > { %v4395_v13 = vpack.c.bf16 %v4387_v42, %v4386_v39  ;;  %15438 = vmatprep.subr.bf16.mxu0 %v16615_v45  ;;  %v16386_v39 = vunpack.i.h.bf16 %v16384_v15  ;;  %v16385_v42 = vunpack.i.l.bf16 %v16384_v15 }
 0xa59   : > { %15433 = vmatmul.mubr.msk.bf16.vlgmr.msra.gmra.mrb[128].mxu1 %vm1259_vm3, %v4395_v13  ;;  %v16394_v33 = vpop.permute.xlu0 %16393 }
 0xa5a   : > { %15439 = vmatpush3.bf16.msra.mxu0 %v16615_v45  ;;  %v16399_v14 = vpop.permute.xlu1 %16398  ;;  %v4965_v45 = vsel %vm845_vm2, %v22182_v26, %v16376_v62 }
 0xa5d   : > { %v16404_v23 = vpop.permute.xlu0 %16403 }
 0xa5e   : > { %v16409_v6 = vpop.permute.xlu1 %16408 }
 0xa5f   : > { %v16411_v11 = vunpack.i.h.bf16 %v16409_v6 }
 0xa61   : > { %v18864_v0 = vpop.permute.xlu0 %16413 }
 0xa62   : > { %v16416_v62 = vunpack.i.h.bf16 %v18864_v0 }
 0xb0d   : > { %v4436_v61 = vpop.f32.mrb[124].mxu0 }
 0xb0e   : > { %v15392_v34 = vpop.f32.mrb[125].mxu0 }
 0xb0f   : > { %v4439_v56 = vpop.f32.mrb[126].mxu0 }
 0xb10   : > { %v16422_v17 = vpack.i.bf16 %v4439_v56, %v4436_v61  ;;  %v15393_v38 = vpop.f32.mrb[127].mxu0  ;;  %v22183_v61 = vld [vmem:[#allocation4_spill] sm:$0xff] }
 0xb11   : > { %v4964_v34 = vsel %vm845_vm2, %v22183_v61, %v16375_v59  ;;  %v16415_v59 = vunpack.i.l.bf16 %v18864_v0 }
 0xb12   : > { %16423 = vrot.lane.b32.xlu0 %v16422_v17, %s22099_s29  ;;  %v4980_v38 = vsel %vm1259_vm3, %v4964_v34, %v16385_v42 }
 0xb14   : > { %v4483_v30 = vpop.f32.mrb[116].mxu1 }
 0xb15   : > { %v15398_v47 = vpop.f32.mrb[117].mxu1 }
 0xb16   : > { %v4486_v19 = vpop.f32.mrb[118].mxu1  ;;  %16428 = vrot.lane.b32.xlu0 %v22175_v58, %s22101_s1  ;;  %v16381_v47 = vunpack.i.h.bf16 %v16379_v55  ;;  %v18872_v58 = vpop.permute.xlu1 %16418 }
 0xb17   : > { %v16432_v1 = vpack.i.bf16 %v4486_v19, %v4483_v30  ;;  %v15399_v18 = vpop.f32.mrb[119].mxu1  ;;  %v4981_v30 = vsel %vm1259_vm3, %v4965_v45, %v16386_v39  ;;  %v16380_v19 = vunpack.i.l.bf16 %v16379_v55  ;;  %v22189_v55 = vld [vmem:[#allocation7_spill] sm:$0xff] }
 0xb18   : > { %v4530_v46 = vpop.f32.mrb[128].mxu0 }
 0xb19   : > { %16433 = vrot.lane.b32.xlu1 %v16432_v1, %s22099_s29  ;;  %v15404_v49 = vpop.f32.mrb[129].mxu0 }
 0xb1a   : > { %v4533_v24 = vpop.f32.mrb[130].mxu0  ;;  %v16391_v49 = vunpack.i.h.bf16 %v16389_v63 }
 0xb1b   : > { %v16442_v22 = vpack.i.bf16 %v4533_v24, %v4530_v46  ;;  %v15405_v57 = vpop.f32.mrb[131].mxu0  ;;  %v16390_v24 = vunpack.i.l.bf16 %v16389_v63 }
 0xb1c   : > { %v4577_v54 = vpop.f32.mrb[120].mxu1 }
 0xb1d   : > { %16438 = vrot.lane.b32.xlu1 %v22176_v27, %s22101_s1  ;;  %16443 = vrot.lane.b32.xlu0 %v16442_v22, %s22099_s29  ;;  %v15410_v21 = vpop.f32.mrb[121].mxu1  ;;  %v22184_v22 = vld [vmem:[#allocation3_spill] sm:$0xff] }
 0xb1e   : > { %v4580_v51 = vpop.f32.mrb[122].mxu1  ;;  %v4967_v57 = vsel %vm845_vm2, %v22184_v22, %v16381_v47  ;;  %v22190_v47 = vld [vmem:[#allocation12_spill] sm:$0xff] }
 0xb1f   : > { %v16452_v35 = vpack.i.bf16 %v4580_v51, %v4577_v54  ;;  %v15411_v2 = vpop.f32.mrb[123].mxu1  ;;  %v22185_v54 = vld [vmem:[#allocation2_spill] sm:$0xff] }
 0xb20   : > { %v4624_v37 = vpop.f32.mrb[132].mxu0  ;;  %v4966_v27 = vsel %vm845_vm2, %v22185_v54, %v16380_v19  ;;  %v16395_v2 = vunpack.i.l.bf16 %v16394_v33  ;;  %v4973_v19 = vsel %vm845_vm2, %v22190_v47, %v16416_v62  ;;  %v22196_v62 = vld [vmem:[#allocation17_spill] sm:$0xff] }
 0xb21   : > { %16448 = vrot.lane.b32.xlu0 %v22177_v25, %s22103_s24  ;;  %16453 = vrot.lane.b32.xlu1 %v16452_v35, %s22099_s29  ;;  %v15416_v52 = vpop.f32.mrb[133].mxu0  ;;  %v16396_v35 = vunpack.i.h.bf16 %v16394_v33 }
 0xb22   : > { %v4627_v48 = vpop.f32.mrb[134].mxu0  ;;  %v4982_v52 = vsel %vm1259_vm3, %v4966_v27, %v16390_v24 }
 0xb23   : > { %v16462_v44 = vpack.i.bf16 %v4627_v48, %v4624_v37  ;;  %v15417_v29 = vpop.f32.mrb[135].mxu0  ;;  %v4983_v48 = vsel %vm1259_vm3, %v4967_v57, %v16391_v49 }
 0xb24   : > { %v4671_v12 = vpop.f32.mrb[124].mxu1  ;;  %v16405_v29 = vunpack.i.l.bf16 %v16404_v23 }
 0xb25   : > { %16458 = vrot.lane.b32.xlu1 %v22178_v8, %s22103_s24  ;;  %16463 = vrot.lane.b32.xlu0 %v16462_v44, %s22099_s29  ;;  %v15422_v3 = vpop.f32.mrb[125].mxu1  ;;  %v16406_v44 = vunpack.i.h.bf16 %v16404_v23  ;;  %s22220_s24 = smov 56  }
 0xb26   : > { %v4674_v16 = vpop.f32.mrb[126].mxu1  ;;  %v16401_v3 = vunpack.i.h.bf16 %v16399_v14 }
 0xb27   : > { %v16472_v9 = vpack.i.bf16 %v4674_v16, %v4671_v12  ;;  %v15423_v60 = vpop.f32.mrb[127].mxu1  ;;  %v16400_v16 = vunpack.i.l.bf16 %v16399_v14 }
 0xb28   : > { %v4718_v20 = vpop.f32.mrb[136].mxu0  ;;  %v4971_v15 = vsel %vm845_vm2, %v22188_v32, %v16401_v3 }
 0xb29   : > { %16468 = vrot.lane.b32.xlu0 %v22179_v10, %s22101_s1  ;;  %16473 = vrot.lane.b32.xlu1 %v16472_v9, %s22099_s29  ;;  %v15428_v43 = vpop.f32.mrb[137].mxu0  ;;  %v22186_v10 = vld [vmem:[#allocation8_spill] sm:$0xff]  ;;  %v4970_v33 = vsel %vm845_vm2, %v22189_v55, %v16400_v16 }
 0xb2a   : > { %v4721_v5 = vpop.f32.mrb[138].mxu0  ;;  %v4969_v43 = vsel %vm845_vm2, %v22186_v10, %v16396_v35  ;;  %v22194_v10 = vld [vmem:[#allocation16_spill] sm:$0xff] }
 0xb2b   : > { %v16482_v53 = vpack.i.bf16 %v4721_v5, %v4718_v20  ;;  %v15429_v4 = vpop.f32.mrb[139].mxu0  ;;  %v22187_v5 = vld [vmem:[#allocation6_spill] sm:$0xff] }
 0xb2c   : > { %v4765_v41 = vpop.f32.mrb[128].mxu1 }
 0xb2d   : > { %16478 = vrot.lane.b32.xlu1 %v22181_v50, %s22101_s1  ;;  %v15434_v40 = vpop.f32.mrb[129].mxu1  ;;  %16483 = vrot.lane.b32.xlu0 %v16482_v53, %s22099_s29  ;;  %v4968_v53 = vsel %vm845_vm2, %v22187_v5, %v16395_v2  ;;  %v16410_v50 = vunpack.i.l.bf16 %v16409_v6  ;;  %v22195_v5 = vld [vmem:[#allocation14_spill] sm:$0xff]  ;;  %s22219_s1 = smov 120  }
 0xb2e   : > { %v4768_v36 = vpop.f32.mrb[130].mxu1  ;;  %v4984_v40 = vsel %vm1259_vm3, %v4968_v53, %v16405_v29 }
 0xb2f   : > { %v16487_v31 = vpack.i.bf16 %v4768_v36, %v4765_v41  ;;  %v15435_v7 = vpop.f32.mrb[131].mxu1  ;;  %v4985_v36 = vsel %vm1259_vm3, %v4969_v43, %v16406_v44  ;;  %v4986_v42 = vsel %vm1259_vm3, %v4970_v33, %v16410_v50 }
 0xb31   : > { %16488 = vrot.lane.b32.xlu1 %v16487_v31, %s22099_s29  ;;  %s22218_s29 = smov 88  }
 0xb84   : > { %v16424_v13 = vpop.permute.xlu0 %16423 }
 0xb85   : > { %v16426_v56 = vunpack.i.h.bf16 %v16424_v13  ;;  %v16425_v17 = vunpack.i.l.bf16 %v16424_v13  ;;  %v4987_v13 = vsel %vm1259_vm3, %v4971_v15, %v16411_v11 }
 0xb87   : > { %v4997_v1 = vsel %vm4996_vm4, %v4980_v38, %v16425_v17  ;;  %v4998_v18 = vsel %vm4996_vm4, %v4981_v30, %v16426_v56  ;;  %v16421_v56 = vunpack.i.h.bf16 %v18872_v58  ;;  %v16420_v17 = vunpack.i.l.bf16 %v18872_v58 }
 0xb88   : > { %v5013_v46 = vpack.c.bf16 %v4998_v18, %v4997_v1  ;;  %v16429_v21 = vpop.permute.xlu0 %16428  ;;  %v22191_v1 = vld [vmem:[#allocation10_spill] sm:$0xff] }
 0xb89   : > { %v16431_v26 = vunpack.i.h.bf16 %v16429_v21  ;;  %v16430_v45 = vunpack.i.l.bf16 %v16429_v21  ;;  %v4972_v18 = vsel %vm845_vm2, %v22191_v1, %v16415_v59 }
 0xb8a   : > { %15440 = vmatprep.mubr.msk.bf16.mxu0 %vm712_vm0, %v5013_v46 }
 0xb8b   : > { %v16434_v51 = vpop.permute.xlu1 %16433  ;;  %v4988_v24 = vsel %vm1259_vm3, %v4972_v18, %v16430_v45  ;;  %v4989_v22 = vsel %vm1259_vm3, %v4973_v19, %v16431_v26 }
 0xb8c   : > { %v16436_v37 = vunpack.i.h.bf16 %v16434_v51  ;;  %v16435_v25 = vunpack.i.l.bf16 %v16434_v51 }
 0xb8e   : > { %v5000_v12 = vsel %vm4996_vm4, %v4983_v48, %v16436_v37  ;;  %v4999_v8 = vsel %vm4996_vm4, %v4982_v52, %v16435_v25  ;;  %v22192_v25 = vld [vmem:[#allocation13_spill] sm:$0xff]  ;;  %v22193_v48 = vld [vmem:[#allocation11_spill] sm:$0xff] }
 0xb8f   : > { %v5014_v9 = vpack.c.bf16 %v5000_v12, %v4999_v8  ;;  %v16439_v60 = vpop.permute.xlu1 %16438  ;;  %v16444_v20 = vpop.permute.xlu0 %16443  ;;  %v4975_v52 = vsel %vm845_vm2, %v22192_v25, %v16421_v56  ;;  %v4974_v44 = vsel %vm845_vm2, %v22193_v48, %v16420_v17  ;;  %v18947_v17 = vld [vmem:[%s22060_s6] ss:$0 sm:$0xff]  ;;  %v17281_v48 = vld [vmem:[%s17450_s22 + $0x18] sm:$0xff] }
 0xb90   : > { %v16446_v4 = vunpack.i.h.bf16 %v16444_v20  ;;  %v16445_v41 = vunpack.i.l.bf16 %v16444_v20  ;;  %v16441_v57 = vunpack.i.h.bf16 %v16439_v60  ;;  %v16440_v54 = vunpack.i.l.bf16 %v16439_v60 }
 0xb91   : > { %15441 = vmatmul.mubr.msk.bf16.vlgmr.msra.gmra.mrb[140].mxu0 %vm712_vm0, %v5014_v9 }
 0xb92   : > { %v5001_v31 = vsel %vm4996_vm4, %v4984_v40, %v16445_v41  ;;  %v5002_v7 = vsel %vm4996_vm4, %v4985_v36, %v16446_v4  ;;  %v4991_v8 = vsel %vm1259_vm3, %v4975_v52, %v16441_v57  ;;  %v4990_v3 = vsel %vm1259_vm3, %v4974_v44, %v16440_v54  ;;  %v17279_v57 = vld [vmem:[%s17450_s22 + $0x8] sm:$0xff] }
 0xb93   : > { %v16454_v63 = vpop.permute.xlu1 %16453  ;;  %v16449_v23 = vpop.permute.xlu0 %16448  ;;  %v5015_v14 = vpack.c.bf16 %v5002_v7, %v5001_v31 }
 0xb94   : > { %v16456_v6 = vunpack.i.h.bf16 %v16454_v63  ;;  %v16455_v39 = vunpack.i.l.bf16 %v16454_v63  ;;  %v16451_v21 = vunpack.i.h.bf16 %v16449_v23  ;;  %v16450_v51 = vunpack.i.l.bf16 %v16449_v23 }
 0xb95   : > { %15444 = vmatprep.mubr.msk.bf16.mxu0 %vm712_vm0, %v5015_v14 }
 0xb96   : > { %v5004_v61 = vsel %vm4996_vm4, %v4987_v13, %v16456_v6  ;;  %v5003_v34 = vsel %vm4996_vm4, %v4986_v42, %v16455_v39  ;;  %v4977_v43 = vsel %vm845_vm2, %v22194_v10, %v16451_v21  ;;  %v4976_v53 = vsel %vm845_vm2, %v22195_v5, %v16450_v51  ;;  %v22197_v6 = vld [vmem:[#allocation15_spill] sm:$0xff] }
 0xb97   : > { %v16459_v38 = vpop.permute.xlu1 %16458  ;;  %v16464_v0 = vpop.permute.xlu0 %16463  ;;  %v5016_v30 = vpack.c.bf16 %v5004_v61, %v5003_v34 }
 0xb98   : > { %v16466_v46 = vunpack.i.h.bf16 %v16464_v0  ;;  %v16465_v49 = vunpack.i.l.bf16 %v16464_v0  ;;  %v16461_v50 = vunpack.i.h.bf16 %v16459_v38  ;;  %v16460_v40 = vunpack.i.l.bf16 %v16459_v38 }
 0xb99   : > { %15445 = vmatmul.mubr.msk.bf16.gmra.mrb[144].mxu0 %vm712_vm0, %v5016_v30 }
 0xb9a   : > { %v5005_v58 = vsel %vm4996_vm4, %v4988_v24, %v16465_v49  ;;  %v5006_v27 = vsel %vm4996_vm4, %v4989_v22, %v16466_v46  ;;  %v4979_v59 = vsel %vm845_vm2, %v22196_v62, %v16461_v50  ;;  %v4978_v39 = vsel %vm845_vm2, %v22197_v6, %v16460_v40  ;;  %v17278_v46 = vld [vmem:[%s17450_s22] sm:$0xff]  ;;  %v17287_v62 = vld [vmem:[%s17450_s22 + $0x50] sm:$0xff]  ;;  %v17288_v6 = vld [vmem:[%s17450_s22 + $0x48] sm:$0xff] }
 0xb9b   : > { %v16474_v35 = vpop.permute.xlu1 %16473  ;;  %v16469_v2 = vpop.permute.xlu0 %16468  ;;  %v5017_v37 = vpack.c.bf16 %v5006_v27, %v5005_v58  ;;  %v17280_v58 = vld [vmem:[%s17450_s22 + $0x10] sm:$0xff] }
 0xb9c   : > { %v16476_v29 = vunpack.i.h.bf16 %v16474_v35  ;;  %v16475_v12 = vunpack.i.l.bf16 %v16474_v35  ;;  %v16471_v16 = vunpack.i.h.bf16 %v16469_v2  ;;  %v16470_v9 = vunpack.i.l.bf16 %v16469_v2 }
 0xb9d   : > { %15448 = vmatprep.mubr.msk.bf16.mxu0 %vm712_vm0, %v5017_v37 }
 0xb9e   : > { %v5008_v60 = vsel %vm4996_vm4, %v4991_v8, %v16476_v29  ;;  %v5007_v20 = vsel %vm4996_vm4, %v4990_v3, %v16475_v12  ;;  %v4992_v7 = vsel %vm1259_vm3, %v4976_v53, %v16470_v9  ;;  %v4993_v32 = vsel %vm1259_vm3, %v4977_v43, %v16471_v16  ;;  %v17282_v8 = vld [vmem:[%s17450_s22 + $0x20] sm:$0xff]  ;;  %v17283_v16 = vld [vmem:[%s17450_s22 + $0x30] sm:$0xff]  ;;  %v17284_v43 = vld [vmem:[%s17450_s22 + $0x28] sm:$0xff] }
 0xb9f   : > { %v16479_v4 = vpop.permute.xlu1 %16478  ;;  %v16484_v41 = vpop.permute.xlu0 %16483  ;;  %v5018_v11 = vpack.c.bf16 %v5008_v60, %v5007_v20 }
 0xba0   : > { %v16486_v36 = vunpack.i.h.bf16 %v16484_v41  ;;  %v16485_v31 = vunpack.i.l.bf16 %v16484_v41  ;;  %v16481_v15 = vunpack.i.h.bf16 %v16479_v4  ;;  %v16480_v55 = vunpack.i.l.bf16 %v16479_v4 }
 0xba1   : > { %15449 = vmatmul.mubr.msk.bf16.gmra.mrb[148].mxu0 %vm712_vm0, %v5018_v11 }
 0xba2   : > { %v5009_v33 = vsel %vm4996_vm4, %v4992_v7, %v16485_v31  ;;  %v5010_v63 = vsel %vm4996_vm4, %v4993_v32, %v16486_v36  ;;  %v4995_v26 = vsel %vm1259_vm3, %v4979_v59, %v16481_v15  ;;  %v4994_v45 = vsel %vm1259_vm3, %v4978_v39, %v16480_v55  ;;  %v17285_v31 = vld [vmem:[%s17450_s22 + $0x38] sm:$0xff]  ;;  %v17286_v55 = vld [vmem:[%s17450_s22 + $0x40] sm:$0xff] }
 0xba3   : > { %v16489_v23 = vpop.permute.xlu1 %16488  ;;  %v5019_v14 = vpack.c.bf16 %v5010_v63, %v5009_v33 }
 0xba4   : > { %v16491_v42 = vunpack.i.h.bf16 %v16489_v23  ;;  %v16490_v13 = vunpack.i.l.bf16 %v16489_v23 }
 0xba5   : > { %15452 = vmatprep.mubr.msk.bf16.mxu0 %vm712_vm0, %v5019_v14 }
 0xba6   : > { %v5012_v61 = vsel %vm4996_vm4, %v4995_v26, %v16491_v42  ;;  %v5011_v34 = vsel %vm4996_vm4, %v4994_v45, %v16490_v13  ;;  %v17289_v26 = vld [vmem:[%s17450_s22 + $0x58] sm:$0xff] }
 0xba7   : > { %v5020_v56 = vpack.c.bf16 %v5012_v61, %v5011_v34 }
 0xba9   : > { %15453 = vmatmul.mubr.msk.bf16.gmra.mrb[152].mxu0 %vm712_vm0, %v5020_v56 }
 0xc64   : > { %v15442_v38 = vpop.f32.mrb[140].mxu0 }
 0xc65   : > { %v5097_v0 = vpop.f32.mrb[141].mxu0  ;;  %v5106_v30 = vadd.f32 %v15442_v38, %v18947_v17 }
 0xc66   : > { %v5098_v47 = vadd.f32 %v18947_v17, %v5097_v0  ;;  %v15443_v19 = vpop.f32.mrb[142].mxu0 }
 0xc67   : > { %v5100_v1 = vpop.f32.mrb[143].mxu0  ;;  %v5109_v24 = vadd.f32 %v15443_v19, %v18947_v17  ;;  %v18962_v27 = vadd.f32 %v17280_v58, %v5106_v30  ;;  %v17290_v19 = vld [vmem:[%s17450_s22 + $0x60] sm:$0xff]  ;;  %v17292_v58 = vld [vmem:[%s17450_s22 + $0x68] sm:$0xff] }
 0xc68   : > { %v5101_v18 = vadd.f32 %v18947_v17, %v5100_v1  ;;  %v18953_v49 = vadd.f32 %v17278_v46, %v5098_v47 }
 0xc69   : > { %v5182_v52 = vsel %vm712_vm0, %v18962_v27, 0.0  ;;  %v18971_v44 = vadd.f32 %v17281_v48, %v5109_v24 }
 0xc6a   : > { %v5176_v22 = vsel %vm712_vm0, %v18953_v49, 0.0  ;;  %v18959_v54 = vadd.f32 %v17279_v57, %v5101_v18 }
 0xc6b   : > { %5177 = vadd.xlane.f32.xlu0 %v5176_v22  ;;  %v5185_v10 = vsel %vm712_vm0, %v18971_v44, 0.0  ;;  %v17291_v22 = vld [vmem:[%s17450_s22 + $0x70] sm:$0xff] }
 0xc6c   : > { %v15446_v21 = vpop.f32.mrb[144].mxu0  ;;  %v5179_v51 = vsel %vm712_vm0, %v18959_v54, 0.0 }
 0xc6d   : > { %v5122_v35 = vadd.f32 %v15446_v21, %v18947_v17  ;;  %v5113_v2 = vpop.f32.mrb[145].mxu0  ;;  %5180 = vadd.xlane.f32.xlu1 %v5179_v51 }
 0xc6e   : > { %v5114_v37 = vadd.f32 %v18947_v17, %v5113_v2  ;;  %v15447_v25 = vpop.f32.mrb[146].mxu0  ;;  %v17293_v2 = vld [vmem:[%s17450_s22 + $0x78] sm:$0xff]  ;;  %s22250_s22 = smov 104  }
 0xc6f   : > { %v5116_v29 = vpop.f32.mrb[147].mxu0  ;;  %5183 = vadd.xlane.f32.xlu0 %v5182_v52  ;;  %v18978_v9 = vadd.f32 %v17283_v16, %v5122_v35  ;;  %v5125_v60 = vadd.f32 %v15447_v25, %v18947_v17 }
 0xc70   : > { %v5117_v12 = vadd.f32 %v18947_v17, %v5116_v29  ;;  %v18975_v3 = vadd.f32 %v17282_v8, %v5114_v37 }
 0xc71   : > { %v5194_v41 = vsel %vm712_vm0, %v18978_v9, 0.0  ;;  %v18995_v7 = vadd.f32 %v17285_v31, %v5125_v60 }
 0xc72   : > { %v5188_v20 = vsel %vm712_vm0, %v18975_v3, 0.0  ;;  %v18986_v5 = vadd.f32 %v17284_v43, %v5117_v12 }
 0xc73   : > { %5189 = vadd.xlane.f32.xlu1 %v5188_v20  ;;  %5186 = vadd.xlane.f32.xlu0 %v5185_v10  ;;  %v5197_v14 = vsel %vm712_vm0, %v18995_v7, 0.0 }
 0xc74   : > { %v15450_v53 = vpop.f32.mrb[148].mxu0  ;;  %v5191_v36 = vsel %vm712_vm0, %v18986_v5, 0.0 }
 0xc75   : > { %v5129_v4 = vpop.f32.mrb[149].mxu0  ;;  %v5138_v11 = vadd.f32 %v15450_v53, %v18947_v17 }
 0xc76   : > { %v5130_v50 = vadd.f32 %v18947_v17, %v5129_v4  ;;  %v15451_v40 = vpop.f32.mrb[150].mxu0 }
 0xc77   : > { %v5132_v32 = vpop.f32.mrb[151].mxu0  ;;  %5195 = vadd.xlane.f32.xlu1 %v5194_v41  ;;  %5192 = vadd.xlane.f32.xlu0 %v5191_v36  ;;  %v5141_v63 = vadd.f32 %v15451_v40, %v18947_v17  ;;  %v19007_v59 = vadd.f32 %v17287_v62, %v5138_v11 }
 0xc78   : > { %v5133_v15 = vadd.f32 %v18947_v17, %v5132_v32  ;;  %v18999_v33 = vadd.f32 %v17286_v55, %v5130_v50 }
 0xc79   : > { %v19013_v45 = vadd.f32 %v17289_v26, %v5141_v63  ;;  %v5206_v38 = vsel %vm712_vm0, %v19007_v59, 0.0 }
 0xc7a   : > { %v5200_v23 = vsel %vm712_vm0, %v18999_v33, 0.0  ;;  %v19010_v39 = vadd.f32 %v17288_v6, %v5133_v15 }
 0xc7b   : > { %5201 = vadd.xlane.f32.xlu1 %v5200_v23  ;;  %5198 = vadd.xlane.f32.xlu0 %v5197_v14  ;;  %v5209_v18 = vsel %vm712_vm0, %v19013_v45, 0.0 }
 0xc7c   : > { %v15454_v42 = vpop.f32.mrb[152].mxu0  ;;  %v5203_v0 = vsel %vm712_vm0, %v19010_v39, 0.0 }
 0xc7d   : > { %v5145_v13 = vpop.f32.mrb[153].mxu0  ;;  %v5154_v61 = vadd.f32 %v15454_v42, %v18947_v17 }
 0xc7e   : > { %v5146_v34 = vadd.f32 %v18947_v17, %v5145_v13  ;;  %v15455_v56 = vpop.f32.mrb[154].mxu0 }
 0xc7f   : > { %v5148_v30 = vpop.f32.mrb[155].mxu0  ;;  %5207 = vadd.xlane.f32.xlu1 %v5206_v38  ;;  %5204 = vadd.xlane.f32.xlu0 %v5203_v0  ;;  %v5157_v46 = vadd.f32 %v15455_v56, %v18947_v17  ;;  %v19031_v57 = vadd.f32 %v17291_v22, %v5154_v61 }
 0xc80   : > { %v5149_v47 = vadd.f32 %v18947_v17, %v5148_v30  ;;  %v19023_v1 = vadd.f32 %v17290_v19, %v5146_v34 }
 0xc81   : > { %v5218_v51 = vsel %vm712_vm0, %v19031_v57, 0.0  ;;  %v19041_v37 = vadd.f32 %v17293_v2, %v5157_v46 }
 0xc82   : > { %v5212_v24 = vsel %vm712_vm0, %v19023_v1, 0.0  ;;  %v19034_v21 = vadd.f32 %v17292_v58, %v5149_v47 }
 0xc83   : > { %5213 = vadd.xlane.f32.xlu1 %v5212_v24  ;;  %5210 = vadd.xlane.f32.xlu0 %v5209_v18  ;;  %v5221_v17 = vsel %vm712_vm0, %v19041_v37, 0.0 }
 0xc84   : > { %v5215_v35 = vsel %vm712_vm0, %v19034_v21, 0.0 }
 0xc87   : > { %5219 = vadd.xlane.f32.xlu1 %v5218_v51  ;;  %5216 = vadd.xlane.f32.xlu0 %v5215_v35 }
 0xc8b   : > { %5222 = vadd.xlane.f32.xlu0 %v5221_v17 }
 0xcf8   : > { %v5178_v25 = vpop.xlane.xlu0 %5177 }
 0xcf9   : > { %v5225_v52 = vmul.f32 0.03125, %v5178_v25 }
 0xcfa   : > { %v5181_v48 = vpop.xlane.xlu1 %5180 }
 0xcfb   : > { %v19046_v29 = vsub.f32 %v18953_v49, %v5225_v52  ;;  %v5226_v12 = vmul.f32 0.03125, %v5181_v48 }
 0xcfc   : > { %v5184_v8 = vpop.xlane.xlu0 %5183 }
 0xcfd   : > { %v19049_v16 = vsub.f32 %v18959_v54, %v5226_v12  ;;  %v5227_v60 = vmul.f32 0.03125, %v5184_v8  ;;  %v5257_v20 = vmul.f32 %v19046_v29, %v19046_v29 }
 0xcff   : > { %v19054_v10 = vsub.f32 %v18962_v27, %v5227_v60  ;;  %v5273_v43 = vsel %vm712_vm0, %v5257_v20, 0.0  ;;  %v5258_v53 = vmul.f32 %v19049_v16, %v19049_v16 }
 0xd00   : > { %v5190_v4 = vpop.xlane.xlu1 %5189  ;;  %5274 = vadd.xlane.f32.xlu1 %v5273_v43  ;;  %v5187_v49 = vpop.xlane.xlu0 %5186 }
 0xd01   : > { %v5229_v41 = vmul.f32 0.03125, %v5190_v4  ;;  %v5228_v11 = vmul.f32 0.03125, %v5187_v49  ;;  %v5276_v54 = vsel %vm712_vm0, %v5258_v53, 0.0  ;;  %v5259_v50 = vmul.f32 %v19054_v10, %v19054_v10 }
 0xd02   : > { %5277 = vadd.xlane.f32.xlu0 %v5276_v54 }
 0xd03   : > { %v19063_v40 = vsub.f32 %v18975_v3, %v5229_v41  ;;  %v19066_v27 = vsub.f32 %v18971_v44, %v5228_v11  ;;  %v5279_v36 = vsel %vm712_vm0, %v5259_v50, 0.0 }
 0xd04   : > { %v5196_v31 = vpop.xlane.xlu1 %5195  ;;  %5280 = vadd.xlane.f32.xlu1 %v5279_v36  ;;  %v5193_v32 = vpop.xlane.xlu0 %5192 }
 0xd05   : > { %v5231_v15 = vmul.f32 0.03125, %v5196_v31  ;;  %v5230_v55 = vmul.f32 0.03125, %v5193_v32  ;;  %v5261_v63 = vmul.f32 %v19063_v40, %v19063_v40  ;;  %v5260_v23 = vmul.f32 %v19066_v27, %v19066_v27 }
 0xd07   : > { %v19074_v14 = vsub.f32 %v18978_v9, %v5231_v15  ;;  %v19077_v3 = vsub.f32 %v18986_v5, %v5230_v55  ;;  %v5285_v44 = vsel %vm712_vm0, %v5261_v63, 0.0  ;;  %v5282_v62 = vsel %vm712_vm0, %v5260_v23, 0.0  ;;  %v16616_v15 = vld [vmem:[%s22198_s23] sm:$0xff]  }
 0xd08   : > { %v5202_v6 = vpop.xlane.xlu1 %5201  ;;  %5286 = vadd.xlane.f32.xlu1 %v5285_v44  ;;  %5283 = vadd.xlane.f32.xlu0 %v5282_v62  ;;  %v5199_v42 = vpop.xlane.xlu0 %5198 }
 0xd09   : > { %v5233_v13 = vmul.f32 0.03125, %v5202_v6  ;;  %v5232_v26 = vmul.f32 0.03125, %v5199_v42  ;;  %v5263_v61 = vmul.f32 %v19074_v14, %v19074_v14  ;;  %v5262_v9 = vmul.f32 %v19077_v3, %v19077_v3  ;;  %15472 = vmatprep.mubr.bf16.mxu1 %v16616_v15 }
 0xd0b   : > { %v19086_v34 = vsub.f32 %v18999_v33, %v5233_v13  ;;  %v19089_v5 = vsub.f32 %v18995_v7, %v5232_v26  ;;  %v5291_v56 = vsel %vm712_vm0, %v5263_v61, 0.0  ;;  %v5288_v38 = vsel %vm712_vm0, %v5262_v9, 0.0 }
 0xd0c   : > { %v5208_v0 = vpop.xlane.xlu1 %5207  ;;  %5292 = vadd.xlane.f32.xlu1 %v5291_v56  ;;  %5289 = vadd.xlane.f32.xlu0 %v5288_v38  ;;  %v5205_v30 = vpop.xlane.xlu0 %5204 }
 0xd0d   : > { %v5235_v47 = vmul.f32 0.03125, %v5208_v0  ;;  %v5234_v19 = vmul.f32 0.03125, %v5205_v30  ;;  %v5265_v18 = vmul.f32 %v19086_v34, %v19086_v34  ;;  %v5264_v33 = vmul.f32 %v19089_v5, %v19089_v5 }
 0xd0f   : > { %v19098_v46 = vsub.f32 %v19007_v59, %v5235_v47  ;;  %v19101_v7 = vsub.f32 %v19010_v39, %v5234_v19  ;;  %v5297_v24 = vsel %vm712_vm0, %v5265_v18, 0.0  ;;  %v5294_v22 = vsel %vm712_vm0, %v5264_v33, 0.0 }
 0xd10   : > { %v5214_v58 = vpop.xlane.xlu1 %5213  ;;  %5298 = vadd.xlane.f32.xlu1 %v5297_v24  ;;  %5295 = vadd.xlane.f32.xlu0 %v5294_v22  ;;  %v5211_v51 = vpop.xlane.xlu0 %5210 }
 0xd11   : > { %v5237_v35 = vmul.f32 0.03125, %v5214_v58  ;;  %v5236_v2 = vmul.f32 0.03125, %v5211_v51  ;;  %v5267_v17 = vmul.f32 %v19098_v46, %v19098_v46  ;;  %v5266_v59 = vmul.f32 %v19101_v7, %v19101_v7  ;;  %v19147_v58 = vld [vmem:[%s22061_s7] ss:$0 sm:$0xff] }
 0xd13   : > { %v19110_v25 = vsub.f32 %v19023_v1, %v5237_v35  ;;  %v19113_v39 = vsub.f32 %v19013_v45, %v5236_v2  ;;  %v5303_v52 = vsel %vm712_vm0, %v5267_v17, 0.0  ;;  %v5300_v48 = vsel %vm712_vm0, %v5266_v59, 0.0 }
 0xd14   : > { %v5220_v12 = vpop.xlane.xlu1 %5219  ;;  %5304 = vadd.xlane.f32.xlu1 %v5303_v52  ;;  %5301 = vadd.xlane.f32.xlu0 %v5300_v48  ;;  %v5217_v8 = vpop.xlane.xlu0 %5216 }
 0xd15   : > { %v5239_v60 = vmul.f32 0.03125, %v5220_v12  ;;  %v5238_v20 = vmul.f32 0.03125, %v5217_v8  ;;  %v5269_v43 = vmul.f32 %v19110_v25, %v19110_v25  ;;  %v5268_v1 = vmul.f32 %v19113_v39, %v19113_v39 }
 0xd17   : > { %v19122_v53 = vsub.f32 %v19031_v57, %v5239_v60  ;;  %v19125_v45 = vsub.f32 %v19034_v21, %v5238_v20  ;;  %v5309_v4 = vsel %vm712_vm0, %v5269_v43, 0.0  ;;  %v5306_v49 = vsel %vm712_vm0, %v5268_v1, 0.0  ;;  %v19155_v43 = vld [vmem:[%s22062_s8] ss:$0 sm:$0xff] }
 0xd18   : > { %5310 = vadd.xlane.f32.xlu1 %v5309_v4  ;;  %5307 = vadd.xlane.f32.xlu0 %v5306_v49  ;;  %v5223_v41 = vpop.xlane.xlu0 %5222 }
 0xd19   : > { %v5240_v11 = vmul.f32 0.03125, %v5223_v41  ;;  %v5271_v54 = vmul.f32 %v19122_v53, %v19122_v53  ;;  %v5270_v50 = vmul.f32 %v19125_v45, %v19125_v45 }
 0xd1b   : > { %v19134_v57 = vsub.f32 %v19041_v37, %v5240_v11  ;;  %v5315_v21 = vsel %vm712_vm0, %v5271_v54, 0.0  ;;  %v5312_v36 = vsel %vm712_vm0, %v5270_v50, 0.0 }
 0xd1c   : > { %5316 = vadd.xlane.f32.xlu1 %v5315_v21  ;;  %5313 = vadd.xlane.f32.xlu0 %v5312_v36 }
 0xd1d   : > { %v5272_v31 = vmul.f32 %v19134_v57, %v19134_v57 }
 0xd1f   : > { %v5318_v32 = vsel %vm712_vm0, %v5272_v31, 0.0 }
 0xd20   : > { %5319 = vadd.xlane.f32.xlu0 %v5318_v32 }
 0xd8d   : > { %v5275_v55 = vpop.xlane.xlu1 %5274 }
 0xd8e   : > { %v5321_v37 = vmul.f32 0.03125, %v5275_v55 }
 0xd8f   : > { %v5278_v63 = vpop.xlane.xlu0 %5277 }
 0xd90   : > { %v5337_v23 = vadd.f32 1e-05, %v5321_v37  ;;  %v5322_v44 = vmul.f32 0.03125, %v5278_v63 }
 0xd91   : > { %v5281_v62 = vpop.xlane.xlu1 %5280 }
 0xd92   : > { %16894 = vrsqrt.f32 %v5337_v23  ;;  %v5338_v6 = vadd.f32 1e-05, %v5322_v44  ;;  %v5323_v42 = vmul.f32 0.03125, %v5281_v62 }
 0xd94   : > { %16896 = vrsqrt.f32 %v5338_v6  ;;  %v5339_v13 = vadd.f32 1e-05, %v5323_v42 }
 0xd95   : > { %v5287_v26 = vpop.xlane.xlu1 %5286  ;;  %v5284_v61 = vpop.xlane.xlu0 %5283 }
 0xd96   : > { %16898 = vrsqrt.f32 %v5339_v13  ;;  %v5325_v9 = vmul.f32 0.03125, %v5287_v26  ;;  %v5324_v56 = vmul.f32 0.03125, %v5284_v61 }
 0xd98   : > { %v5341_v38 = vadd.f32 1e-05, %v5325_v9  ;;  %v5340_v0 = vadd.f32 1e-05, %v5324_v56 }
 0xd99   : > { %v5293_v30 = vpop.xlane.xlu1 %5292  ;;  %v5290_v47 = vpop.xlane.xlu0 %5289 }
 0xd9a   : > { %16900 = vrsqrt.f32 %v5341_v38  ;;  %v5327_v19 = vmul.f32 0.03125, %v5293_v30  ;;  %v5326_v18 = vmul.f32 0.03125, %v5290_v47 }
 0xd9b   : > { %16902 = vrsqrt.f32 %v5340_v0 }
 0xd9c   : > { %v16895_v33 = vpop.eup %16894  ;;  %v5343_v24 = vadd.f32 1e-05, %v5327_v19  ;;  %v5342_v22 = vadd.f32 1e-05, %v5326_v18 }
 0xd9d   : > { %v5299_v51 = vpop.xlane.xlu1 %5298  ;;  %v5296_v35 = vpop.xlane.xlu0 %5295  ;;  %v5369_v2 = vmul.f32 %v16895_v33, %v19046_v29 }
 0xd9e   : > { %v16897_v17 = vpop.eup %16896  ;;  %16904 = vrsqrt.f32 %v5343_v24  ;;  %v5329_v59 = vmul.f32 0.03125, %v5299_v51  ;;  %v5328_v52 = vmul.f32 0.03125, %v5296_v35 }
 0xd9f   : > { %16906 = vrsqrt.f32 %v5342_v22  ;;  %v5370_v48 = vmul.f32 %v16897_v17, %v19049_v16  ;;  %v5391_v12 = vmul.f32 %v19147_v58, %v5369_v2 }
 0xda0   : > { %v16899_v8 = vpop.eup %16898  ;;  %v5345_v60 = vadd.f32 1e-05, %v5329_v59  ;;  %v5344_v20 = vadd.f32 1e-05, %v5328_v52 }
 0xda1   : > { %v5305_v1 = vpop.xlane.xlu1 %5304  ;;  %v5302_v4 = vpop.xlane.xlu0 %5301  ;;  %v5392_v29 = vmul.f32 %v19147_v58, %v5370_v48  ;;  %v5371_v49 = vmul.f32 %v16899_v8, %v19054_v10  ;;  %v5413_v16 = vadd.f32 %v19155_v43, %v5391_v12 }
 0xda2   : > { %16908 = vrsqrt.f32 %v5345_v60  ;;  %v5331_v41 = vmul.f32 0.03125, %v5305_v1  ;;  %v5330_v11 = vmul.f32 0.03125, %v5302_v4 }
 0xda3   : > { %16910 = vrsqrt.f32 %v5344_v20  ;;  %v5414_v54 = vadd.f32 %v19155_v43, %v5392_v29  ;;  %v5393_v37 = vmul.f32 %v19147_v58, %v5371_v49 }
 0xda4   : > { %v16901_v50 = vpop.eup %16900  ;;  %v5347_v21 = vadd.f32 1e-05, %v5331_v41  ;;  %v5346_v36 = vadd.f32 1e-05, %v5330_v11 }
 0xda5   : > { %v16903_v31 = vpop.eup %16902  ;;  %v5311_v32 = vpop.xlane.xlu1 %5310  ;;  %v5445_v55 = vpack.c.bf16 %v5414_v54, %v5413_v16  ;;  %v5373_v44 = vmul.f32 %v16901_v50, %v19063_v40  ;;  %v5415_v56 = vadd.f32 %v19155_v43, %v5393_v37 }
 0xda6   : > { %v5308_v15 = vpop.xlane.xlu0 %5307  ;;  %16912 = vrsqrt.f32 %v5347_v21  ;;  %v5333_v63 = vmul.f32 0.03125, %v5311_v32  ;;  %v5372_v23 = vmul.f32 %v16903_v31, %v19066_v27 }
 0xda7   : > { %v5332_v10 = vmul.f32 0.03125, %v5308_v15  ;;  %16914 = vrsqrt.f32 %v5346_v36  ;;  %15456 = vmatprep.subr.bf16.mxu1 %v5445_v55  ;;  %v5395_v47 = vmul.f32 %v19147_v58, %v5373_v44 }
 0xda8   : > { %v16905_v62 = vpop.eup %16904  ;;  %v5349_v6 = vadd.f32 1e-05, %v5333_v63  ;;  %15457 = vmatpush3.bf16.msra.mxu1 %v5445_v55  ;;  %v5394_v13 = vmul.f32 %v19147_v58, %v5372_v23 }
 0xda9   : > { %v5348_v42 = vadd.f32 1e-05, %v5332_v10  ;;  %v16907_v26 = vpop.eup %16906  ;;  %v5317_v61 = vpop.xlane.xlu1 %5316  ;;  %v5375_v38 = vmul.f32 %v16905_v62, %v19074_v14 }
 0xdaa   : > { %v5314_v9 = vpop.xlane.xlu0 %5313  ;;  %16916 = vrsqrt.f32 %v5349_v6  ;;  %v5335_v0 = vmul.f32 0.03125, %v5317_v61  ;;  %v5416_v30 = vadd.f32 %v19155_v43, %v5394_v13  ;;  %v5374_v40 = vmul.f32 %v16907_v26, %v19077_v3 }
 0xdab   : > { %v5334_v27 = vmul.f32 0.03125, %v5314_v9  ;;  %16918 = vrsqrt.f32 %v5348_v42  ;;  %v5397_v14 = vmul.f32 %v19147_v58, %v5375_v38  ;;  %v5417_v3 = vadd.f32 %v19155_v43, %v5395_v47  ;;  %v16621_v38 = vld [vmem:[%s22198_s23 + $0x28] sm:$0xff]  }
 0xdac   : > { %v16909_v19 = vpop.eup %16908  ;;  %v5351_v18 = vadd.f32 1e-05, %v5335_v0  ;;  %v5446_v24 = vpack.c.bf16 %v5416_v30, %v5415_v56  ;;  %v5396_v35 = vmul.f32 %v19147_v58, %v5374_v40  ;;  %v16618_v56 = vld [vmem:[%s22198_s23 + $0x10] sm:$0xff]   ;;  %v16624_v30 = vld [vmem:[%s22063_s9] sm:$0xff]   ;;  %v16625_v40 = vld [vmem:[%s22063_s9 + $0x8] sm:$0xff]  }
 0xdad   : > { %v5350_v33 = vadd.f32 1e-05, %v5334_v27  ;;  %v16911_v22 = vpop.eup %16910  ;;  %v5377_v2 = vmul.f32 %v16909_v19, %v19086_v34  ;;  %v5419_v1 = vadd.f32 %v19155_v43, %v5397_v14  ;;  %v16622_v0 = vld [vmem:[%s22198_s23 + $0x30] sm:$0xff]   ;;  %v16623_v27 = vld [vmem:[%s22198_s23 + $0x38] sm:$0xff]   ;;  %15488 = vmatprep.subr.bf16.mxu0 %v16624_v30  ;;  %v5598_v19 = vld [vmem:[%s22199_s0] sm:$0xff]  ;;  %s22239_s0 = smov 48  }
 0xdae   : > { %v5320_v51 = vpop.xlane.xlu0 %5319  ;;  %16920 = vrsqrt.f32 %v5351_v18  ;;  %15458 = vmatprep.subr.bf16.mxu1 %v5446_v24  ;;  %v5376_v59 = vmul.f32 %v16911_v22, %v19089_v5  ;;  %v5418_v52 = vadd.f32 %v19155_v43, %v5396_v35  ;;  %15489 = vmatpush3.bf16.msra.mxu0 %v16624_v30 }
 0xdaf   : > { %v5336_v17 = vmul.f32 0.03125, %v5320_v51  ;;  %16922 = vrsqrt.f32 %v5350_v33  ;;  %15459 = vmatpush3.bf16.msra.mxu1 %v5446_v24  ;;  %v5399_v34 = vmul.f32 %v19147_v58, %v5377_v2  ;;  %15490 = vmatprep.subr.bf16.mxu0 %v16625_v40 }
 0xdb0   : > { %v16913_v48 = vpop.eup %16912  ;;  %v5398_v8 = vmul.f32 %v19147_v58, %v5376_v59  ;;  %v5447_v20 = vpack.c.bf16 %v5418_v52, %v5417_v3 }
 0xdb1   : > { %v5352_v12 = vadd.f32 1e-05, %v5336_v17  ;;  %v16915_v60 = vpop.eup %16914  ;;  %v5379_v29 = vmul.f32 %v16913_v48, %v19098_v46  ;;  %v5421_v54 = vadd.f32 %v19155_v43, %v5399_v34 }
 0xdb2   : > { %v5420_v4 = vadd.f32 %v19155_v43, %v5398_v8  ;;  %v5378_v5 = vmul.f32 %v16915_v60, %v19101_v7  ;;  %15460 = vmatprep.subr.bf16.mxu1 %v5447_v20  ;;  %15491 = vmatpush3.bf16.msra.mxu0 %v16625_v40 }
 0xdb3   : > { %16924 = vrsqrt.f32 %v5352_v12  ;;  %15461 = vmatpush3.bf16.msra.mxu1 %v5447_v20  ;;  %v5401_v36 = vmul.f32 %v19147_v58, %v5379_v29  ;;  %15514 = vmatprep.subr.bf16.mxu0 %v22162_v28 }
 0xdb4   : > { %v16917_v49 = vpop.eup %16916  ;;  %v5448_v41 = vpack.c.bf16 %v5420_v4, %v5419_v1  ;;  %v5400_v11 = vmul.f32 %v19147_v58, %v5378_v5 }
 0xdb5   : > { %v16919_v16 = vpop.eup %16918  ;;  %v5381_v7 = vmul.f32 %v16917_v49, %v19110_v25  ;;  %v5423_v37 = vadd.f32 %v19155_v43, %v5401_v36 }
 0xdb6   : > { %15462 = vmatprep.subr.bf16.mxu1 %v5448_v41  ;;  %v5422_v50 = vadd.f32 %v19155_v43, %v5400_v11  ;;  %v5380_v21 = vmul.f32 %v16919_v16, %v19113_v39 }
 0xdb7   : > { %15463 = vmatpush3.bf16.msra.mxu1 %v5448_v41  ;;  %v5403_v39 = vmul.f32 %v19147_v58, %v5381_v7 }
 0xdb8   : > { %v16921_v31 = vpop.eup %16920  ;;  %v5449_v46 = vpack.c.bf16 %v5422_v50, %v5421_v54  ;;  %v5402_v32 = vmul.f32 %v19147_v58, %v5380_v21 }
 0xdb9   : > { %v16923_v15 = vpop.eup %16922  ;;  %v5383_v55 = vmul.f32 %v16921_v31, %v19122_v53  ;;  %v5425_v53 = vadd.f32 %v19155_v43, %v5403_v39  ;;  %v14388_v39 = vld [vmem:[%s22064_s10] ss:$0 sm:$0xff] }
 0xdba   : > { %15464 = vmatprep.subr.bf16.mxu1 %v5449_v46  ;;  %v5424_v63 = vadd.f32 %v19155_v43, %v5402_v32  ;;  %v5382_v10 = vmul.f32 %v16923_v15, %v19125_v45 }
 0xdbb   : > { %15465 = vmatpush3.bf16.msra.mxu1 %v5449_v46  ;;  %v5405_v6 = vmul.f32 %v19147_v58, %v5383_v55 }
 0xdbc   : > { %v5450_v25 = vpack.c.bf16 %v5424_v63, %v5423_v37  ;;  %v5404_v44 = vmul.f32 %v19147_v58, %v5382_v10 }
 0xdbd   : > { %v16925_v23 = vpop.eup %16924  ;;  %v5427_v26 = vadd.f32 %v19155_v43, %v5405_v6 }
 0xdbe   : > { %v5384_v62 = vmul.f32 %v16925_v23, %v19134_v57  ;;  %15466 = vmatprep.subr.bf16.mxu1 %v5450_v25  ;;  %v5426_v42 = vadd.f32 %v19155_v43, %v5404_v44  ;;  %v16617_v57 = vld [vmem:[%s22198_s23 + $0x8] sm:$0xff]  }
 0xdbf   : > { %15467 = vmatpush3.bf16.msra.mxu1 %v5450_v25 }
 0xdc0   : > { %v5406_v13 = vmul.f32 %v19147_v58, %v5384_v62  ;;  %v5451_v45 = vpack.c.bf16 %v5426_v42, %v5425_v53  ;;  %v16619_v58 = vld [vmem:[%s22198_s23 + $0x18] sm:$0xff]  }
 0xdc2   : > { %v5428_v61 = vadd.f32 %v19155_v43, %v5406_v13  ;;  %15468 = vmatprep.subr.bf16.mxu1 %v5451_v45  ;;  %v16620_v43 = vld [vmem:[%s22198_s23 + $0x20] sm:$0xff]  }
 0xdc3   : > { %15469 = vmatpush3.bf16.msra.mxu1 %v5451_v45 }
 0xdc4   : > { %v5452_v9 = vpack.c.bf16 %v5428_v61, %v5427_v26 }
 0xdc6   : > { %15470 = vmatprep.subr.bf16.mxu1 %v5452_v9 }
 0xdc7   : > { %15471 = vmatpush3.bf16.msra.mxu1 %v5452_v9 }
 0xdc8   : > { %15508 = vmatprep.subr.bf16.mxu1 %v22162_v28 }
 0xdca   : > { %15473 = vmatmul.mubr.bf16.vlgmr.msra.gmra.mrb[132].mxu1 %v16617_v57 }
 0xdcb   : > { %15476 = vmatprep.mubr.bf16.mxu1 %v16618_v56 }
 0xdd2   : > { %15477 = vmatmul.mubr.bf16.gmra.mrb[136].mxu1 %v16619_v58 }
 0xdd3   : > { %15480 = vmatprep.mubr.bf16.mxu1 %v16620_v43 }
 0xdda   : > { %15481 = vmatmul.mubr.bf16.gmra.mrb[140].mxu1 %v16621_v38 }
 0xddb   : > { %15484 = vmatprep.mubr.bf16.mxu1 %v16622_v0 }
 0xde2   : > { %15485 = vmatmul.mubr.bf16.gmra.mrb[144].mxu1 %v16623_v27 }
 0xde3   : > { %15510 = vmatprep.mubr.msk.bf16.mxu1 %vm17303_vm1, %v22162_v28 }
 0xe9d   : > { %v15474_v47 = vpop.f32.mrb[132].mxu1 }
 0xe9e   : > { %v5535_v18 = vpop.f32.mrb[133].mxu1  ;;  %v19242_v14 = vadd.f32 %v15474_v47, %v5598_v19 }
 0xe9f   : > { %v15475_v33 = vpop.f32.mrb[134].mxu1  ;;  %v19238_v51 = vadd.f32 %v5598_v19, %v5535_v18 }
 0xea0   : > { %v19236_v24 = vadd.f32 %v15475_v33, %v5598_v19  ;;  %v5538_v22 = vpop.f32.mrb[135].mxu1  ;;  %22203 = vst [vmem:[#allocation3_spill] sm:$0xff] %v19242_v14 }
 0xea1   : > { %22201 = vst [vmem:[#allocation5_spill] sm:$0xff] %v19238_v51  ;;  %v19240_v35 = vadd.f32 %v5598_v19, %v5538_v22 }
 0xea2   : > { %22200 = vst [vmem:[#allocation18_spill] sm:$0xff] %v19236_v24  ;;  %v5628_v17 = vpack.c.bf16 %v19236_v24, %v19242_v14 }
 0xea3   : > { %22202 = vst [vmem:[#allocation4_spill] sm:$0xff] %v19240_v35  ;;  %v5627_v2 = vpack.c.bf16 %v19240_v35, %v19238_v51 }
 0xea5   : > { %v15478_v59 = vpop.f32.mrb[136].mxu1  ;;  %15492 = vmatprep.mubr.msk.bf16.mxu0 %vm712_vm0, %v5627_v2 }
 0xea6   : > { %v19249_v3 = vadd.f32 %v15478_v59, %v5598_v19  ;;  %v5551_v52 = vpop.f32.mrb[137].mxu1  ;;  %15493 = vmatmul.mubr.msk.bf16.vlgmr.msra.gmra.mrb[156].mxu0 %vm712_vm0, %v5628_v17 }
 0xea7   : > { %v19252_v48 = vadd.f32 %v5598_v19, %v5551_v52  ;;  %v15479_v12 = vpop.f32.mrb[138].mxu1 }
 0xea8   : > { %22204 = vst [vmem:[#allocation2_spill] sm:$0xff] %v19249_v3  ;;  %v19254_v8 = vadd.f32 %v15479_v12, %v5598_v19  ;;  %v5554_v60 = vpop.f32.mrb[139].mxu1 }
 0xea9   : > { %22205 = vst [vmem:[#allocation8_spill] sm:$0xff] %v19252_v48  ;;  %v19256_v20 = vadd.f32 %v5598_v19, %v5554_v60 }
 0xeaa   : > { %22206 = vst [vmem:[#allocation6_spill] sm:$0xff] %v19254_v8  ;;  %v5630_v1 = vpack.c.bf16 %v19254_v8, %v19249_v3 }
 0xeab   : > { %22207 = vst [vmem:[#allocation9_spill] sm:$0xff] %v19256_v20  ;;  %v5629_v34 = vpack.c.bf16 %v19256_v20, %v19252_v48 }
 0xead   : > { %v15482_v4 = vpop.f32.mrb[140].mxu1  ;;  %15496 = vmatprep.mubr.msk.bf16.mxu0 %vm712_vm0, %v5629_v34 }
 0xeae   : > { %v19263_v5 = vadd.f32 %v15482_v4, %v5598_v19  ;;  %v5567_v29 = vpop.f32.mrb[141].mxu1  ;;  %15497 = vmatmul.mubr.msk.bf16.gmra.mrb[160].mxu0 %vm712_vm0, %v5630_v1 }
 0xeaf   : > { %v19266_v49 = vadd.f32 %v5598_v19, %v5567_v29  ;;  %v15483_v41 = vpop.f32.mrb[142].mxu1 }
 0xeb0   : > { %22208 = vst [vmem:[#allocation7_spill] sm:$0xff] %v19263_v5  ;;  %v19268_v11 = vadd.f32 %v15483_v41, %v5598_v19  ;;  %v5570_v16 = vpop.f32.mrb[143].mxu1 }
 0xeb1   : > { %22209 = vst [vmem:[#allocation12_spill] sm:$0xff] %v19266_v49  ;;  %v19270_v54 = vadd.f32 %v5598_v19, %v5570_v16 }
 0xeb2   : > { %22210 = vst [vmem:[#allocation10_spill] sm:$0xff] %v19268_v11  ;;  %v5632_v50 = vpack.c.bf16 %v19268_v11, %v19263_v5 }
 0xeb3   : > { %22211 = vst [vmem:[#allocation13_spill] sm:$0xff] %v19270_v54  ;;  %v5631_v21 = vpack.c.bf16 %v19270_v54, %v19266_v49 }
 0xeb5   : > { %v15486_v36 = vpop.f32.mrb[144].mxu1  ;;  %15500 = vmatprep.mubr.msk.bf16.mxu0 %vm712_vm0, %v5631_v21 }
 0xeb6   : > { %v19277_v7 = vadd.f32 %v15486_v36, %v5598_v19  ;;  %v5583_v31 = vpop.f32.mrb[145].mxu1  ;;  %15501 = vmatmul.mubr.msk.bf16.gmra.mrb[164].mxu0 %vm712_vm0, %v5632_v50 }
 0xeb7   : > { %v19280_v46 = vadd.f32 %v5598_v19, %v5583_v31  ;;  %v15487_v32 = vpop.f32.mrb[146].mxu1 }
 0xeb8   : > { %22212 = vst [vmem:[#allocation11_spill] sm:$0xff] %v19277_v7  ;;  %v19282_v15 = vadd.f32 %v15487_v32, %v5598_v19  ;;  %v5586_v55 = vpop.f32.mrb[147].mxu1 }
 0xeb9   : > { %22213 = vst [vmem:[#allocation16_spill] sm:$0xff] %v19280_v46  ;;  %v19284_v37 = vadd.f32 %v5598_v19, %v5586_v55 }
 0xeba   : > { %22214 = vst [vmem:[#allocation14_spill] sm:$0xff] %v19282_v15  ;;  %v5634_v63 = vpack.c.bf16 %v19282_v15, %v19277_v7 }
 0xebb   : > { %22215 = vst [vmem:[#allocation17_spill] sm:$0xff] %v19284_v37  ;;  %v5633_v10 = vpack.c.bf16 %v19284_v37, %v19280_v46 }
 0xebd   : > { %15504 = vmatprep.mubr.msk.bf16.mxu0 %vm712_vm0, %v5633_v10 }
 0xebe   : > { %15505 = vmatmul.mubr.msk.bf16.gmra.mrb[168].mxu0 %vm712_vm0, %v5634_v63 }
 0xebf   : > { %15516 = vmatprep.mubr.msk.bf16.mxu0 %vm17303_vm1, %v22162_v28 }
 0xf79   : > { %v15494_v23 = vpop.f32.mrb[156].mxu0 }
 0xf7a   : > { %v5711_v25 = vpop.f32.mrb[157].mxu0  ;;  %v5720_v53 = vadd.f32 %v15494_v23, %v14388_v39 }
 0xf7b   : > { %v5712_v44 = vadd.f32 %v14388_v39, %v5711_v25  ;;  %v15495_v62 = vpop.f32.mrb[158].mxu0 }
 0xf7c   : > { %v5714_v6 = vpop.f32.mrb[159].mxu0  ;;  %v19303_v26 = vpack.c.bf16 %v5720_v53, %v5720_v53  ;;  %v5723_v61 = vadd.f32 %v15495_v62, %v14388_v39 }
 0xf7d   : > { %v19297_v42 = vpack.c.bf16 %v5712_v44, %v5712_v44  ;;  %v5715_v13 = vadd.f32 %v14388_v39, %v5714_v6 }
 0xf7e   : > { %v19309_v0 = vpack.c.bf16 %v5723_v61, %v5723_v61 }
 0xf7f   : > { %v19299_v45 = vpack.c.bf16 %v5715_v13, %v5715_v13  ;;  %5791 = vrot.lane.b32.xlu1 %v19297_v42, %s22216_s30 }
 0xf81   : > { %5840 = vrot.lane.b32.xlu0 %v19299_v45, %s22216_s30  ;;  %v15498_v9 = vpop.f32.mrb[160].mxu0 }
 0xf82   : > { %v5727_v57 = vpop.f32.mrb[161].mxu0  ;;  %v5736_v56 = vadd.f32 %v15498_v9, %v14388_v39 }
 0xf83   : > { %v5728_v58 = vadd.f32 %v14388_v39, %v5727_v57  ;;  %5889 = vrot.lane.b32.xlu1 %v19303_v26, %s22216_s30  ;;  %v15499_v43 = vpop.f32.mrb[162].mxu0 }
 0xf84   : > { %v5730_v38 = vpop.f32.mrb[163].mxu0  ;;  %v19313_v40 = vpack.c.bf16 %v5736_v56, %v5736_v56  ;;  %v5739_v19 = vadd.f32 %v15499_v43, %v14388_v39 }
 0xf85   : > { %v19311_v27 = vpack.c.bf16 %v5728_v58, %v5728_v58  ;;  %v5731_v30 = vadd.f32 %v14388_v39, %v5730_v38 }
 0xf86   : > { %v19325_v52 = vpack.c.bf16 %v5739_v19, %v5739_v19 }
 0xf87   : > { %v19315_v47 = vpack.c.bf16 %v5731_v30, %v5731_v30  ;;  %5938 = vrot.lane.b32.xlu1 %v19309_v0, %s22216_s30  ;;  %5987 = vrot.lane.b32.xlu0 %v19311_v27, %s22216_s30 }
 0xf89   : > { %v15502_v18 = vpop.f32.mrb[164].mxu0 }
 0xf8a   : > { %v5743_v33 = vpop.f32.mrb[165].mxu0  ;;  %v5752_v22 = vadd.f32 %v15502_v18, %v14388_v39 }
 0xf8b   : > { %v5744_v2 = vadd.f32 %v14388_v39, %v5743_v33  ;;  %6036 = vrot.lane.b32.xlu1 %v19315_v47, %s22216_s30  ;;  %6085 = vrot.lane.b32.xlu0 %v19313_v40, %s22216_s30  ;;  %v15503_v17 = vpop.f32.mrb[166].mxu0 }
 0xf8c   : > { %v5746_v59 = vpop.f32.mrb[167].mxu0  ;;  %v19329_v1 = vpack.c.bf16 %v5752_v22, %v5752_v22  ;;  %v5755_v34 = vadd.f32 %v15503_v17, %v14388_v39 }
 0xf8d   : > { %v19327_v12 = vpack.c.bf16 %v5744_v2, %v5744_v2  ;;  %v5747_v60 = vadd.f32 %v14388_v39, %v5746_v59 }
 0xf8e   : > { %v19337_v16 = vpack.c.bf16 %v5755_v34, %v5755_v34 }
 0xf8f   : > { %v19331_v4 = vpack.c.bf16 %v5747_v60, %v5747_v60  ;;  %6134 = vrot.lane.b32.xlu1 %v19325_v52, %s22216_s30  ;;  %6183 = vrot.lane.b32.xlu0 %v19327_v12, %s22216_s30 }
 0xf91   : > { %v15506_v29 = vpop.f32.mrb[168].mxu0 }
 0xf92   : > { %v5759_v41 = vpop.f32.mrb[169].mxu0  ;;  %v5768_v50 = vadd.f32 %v15506_v29, %v14388_v39 }
 0xf93   : > { %v5760_v21 = vadd.f32 %v14388_v39, %v5759_v41  ;;  %6232 = vrot.lane.b32.xlu1 %v19331_v4, %s22216_s30  ;;  %6281 = vrot.lane.b32.xlu0 %v19329_v1, %s22216_s30  ;;  %v15507_v36 = vpop.f32.mrb[170].mxu0 }
 0xf94   : > { %v5762_v31 = vpop.f32.mrb[171].mxu0  ;;  %v19345_v63 = vpack.c.bf16 %v5768_v50, %v5768_v50  ;;  %v5771_v10 = vadd.f32 %v15507_v36, %v14388_v39 }
 0xf95   : > { %v19343_v32 = vpack.c.bf16 %v5760_v21, %v5760_v21  ;;  %v5763_v55 = vadd.f32 %v14388_v39, %v5762_v31 }
 0xf96   : > { %v19353_v25 = vpack.c.bf16 %v5771_v10, %v5771_v10 }
 0xf97   : > { %v19347_v23 = vpack.c.bf16 %v5763_v55, %v5763_v55  ;;  %6330 = vrot.lane.b32.xlu1 %v19337_v16, %s22216_s30  ;;  %6379 = vrot.lane.b32.xlu0 %v19343_v32, %s22216_s30 }
 0xf9b   : > { %6428 = vrot.lane.b32.xlu1 %v19347_v23, %s22216_s30  ;;  %6477 = vrot.lane.b32.xlu0 %v19345_v63, %s22216_s30 }
 0xf9f   : > { %6526 = vrot.lane.b32.xlu1 %v19353_v25, %s22216_s30  ;;  %6831 = vrot.lane.b32.xlu0 %v19299_v45, %s22217_s28  ;;  %s22251_s30 = smov 40  }
 0xfa3   : > { %6782 = vrot.lane.b32.xlu1 %v19297_v42, %s22217_s28  ;;  %6927 = vrot.lane.b32.xlu0 %v19309_v0, %s22217_s28 }
 0xfa7   : > { %6879 = vrot.lane.b32.xlu1 %v19303_v26, %s22217_s28  ;;  %7023 = vrot.lane.b32.xlu0 %v19315_v47, %s22217_s28 }
 0xfab   : > { %6975 = vrot.lane.b32.xlu1 %v19311_v27, %s22217_s28  ;;  %7119 = vrot.lane.b32.xlu0 %v19325_v52, %s22217_s28 }
 0xfaf   : > { %7071 = vrot.lane.b32.xlu1 %v19313_v40, %s22217_s28  ;;  %7215 = vrot.lane.b32.xlu0 %v19331_v4, %s22217_s28 }
 0xfb3   : > { %7167 = vrot.lane.b32.xlu1 %v19327_v12, %s22217_s28 }
 0xfb7   : > { %7263 = vrot.lane.b32.xlu1 %v19329_v1, %s22217_s28 }
 0xfbb   : > { %7311 = vrot.lane.b32.xlu1 %v19337_v16, %s22217_s28 }
 0xff1   : > { %v5792_v39 = vpop.permute.xlu1 %5791 }
 0xff2   : > { %v5797_v44 = vsel %vm845_vm2, %v5792_v39, 0 }
 0xff3   : > { %v5841_v62 = vpop.permute.xlu0 %5840  ;;  %15509 = vmatpush3.bf16.xpose.msra.mxu1 %v5797_v44 }
 0xff4   : > { %v5846_v6 = vsel %vm845_vm2, %v5841_v62, 0  ;;  %15520 = vmatprep.subr.bf16.mxu1 %v22162_v28 }
 0xff5   : > { %15515 = vmatpush3.bf16.xpose.msra.mxu0 %v5846_v6  ;;  %v5890_v53 = vpop.permute.xlu1 %5889 }
 0xff6   : > { %15526 = vmatprep.subr.bf16.mxu0 %v22162_v28  ;;  %v5895_v61 = vsel %vm845_vm2, %v5890_v53, 0 }
 0xff9   : > { %v5939_v13 = vpop.permute.xlu1 %5938  ;;  %v5988_v57 = vpop.permute.xlu0 %5987 }
 0xffa   : > { %15511 = vmatmul.mubr.msk.bf16.vlgmr.msra.gmra.mrb[148].mxu1 %vm845_vm2, %v19297_v42  ;;  %v5944_v9 = vsel %vm845_vm2, %v5939_v13, 0  ;;  %v5993_v58 = vsel %vm845_vm2, %v5988_v57, 0 }
 0xffb   : > { %15521 = vmatpush3.bf16.xpose.msra.mxu1 %v5895_v61  ;;  %15522 = vmatprep.mubr.msk.bf16.mxu1 %vm17303_vm1, %v22162_v28 }
 0xffc   : > { %15517 = vmatmul.mubr.msk.bf16.vlgmr.msra.gmra.mrb[172].mxu0 %vm845_vm2, %v19299_v45  ;;  %15532 = vmatprep.subr.bf16.mxu1 %v22162_v28 }
 0xffd   : > { %15527 = vmatpush3.bf16.xpose.msra.mxu0 %v5944_v9  ;;  %15528 = vmatprep.mubr.msk.bf16.mxu0 %vm17303_vm1, %v22162_v28  ;;  %v6037_v56 = vpop.permute.xlu1 %6036  ;;  %v6086_v38 = vpop.permute.xlu0 %6085 }
 0xffe   : > { %15538 = vmatprep.subr.bf16.mxu0 %v22162_v28  ;;  %v6042_v43 = vsel %vm845_vm2, %v6037_v56, 0  ;;  %v6091_v19 = vsel %vm845_vm2, %v6086_v38, 0 }
0x1001   : > { %v6135_v30 = vpop.permute.xlu1 %6134  ;;  %v6184_v33 = vpop.permute.xlu0 %6183 }
0x1002   : > { %15523 = vmatmul.mubr.msk.bf16.vlgmr.msra.gmra.mrb[152].mxu1 %vm845_vm2, %v19303_v26  ;;  %v6140_v18 = vsel %vm845_vm2, %v6135_v30, 0  ;;  %v6189_v22 = vsel %vm845_vm2, %v6184_v33, 0 }
0x1003   : > { %15533 = vmatpush3.bf16.xpose.msra.mxu1 %v5993_v58  ;;  %15534 = vmatprep.mubr.msk.bf16.mxu1 %vm17303_vm1, %v22162_v28 }
0x1004   : > { %15529 = vmatmul.mubr.msk.bf16.vlgmr.msra.gmra.mrb[176].mxu0 %vm845_vm2, %v19309_v0  ;;  %15544 = vmatprep.subr.bf16.mxu1 %v22162_v28 }
0x1005   : > { %15539 = vmatpush3.bf16.xpose.msra.mxu0 %v6042_v43  ;;  %15540 = vmatprep.mubr.msk.bf16.mxu0 %vm17303_vm1, %v22162_v28  ;;  %v6233_v2 = vpop.permute.xlu1 %6232  ;;  %v6282_v59 = vpop.permute.xlu0 %6281 }
0x1006   : > { %15550 = vmatprep.subr.bf16.mxu0 %v22162_v28  ;;  %v6238_v17 = vsel %vm845_vm2, %v6233_v2, 0  ;;  %v6287_v60 = vsel %vm845_vm2, %v6282_v59, 0 }
0x1009   : > { %v6331_v34 = vpop.permute.xlu1 %6330  ;;  %v6380_v41 = vpop.permute.xlu0 %6379 }
0x100a   : > { %15535 = vmatmul.mubr.msk.bf16.vlgmr.msra.gmra.mrb[156].mxu1 %vm845_vm2, %v19311_v27  ;;  %v6336_v29 = vsel %vm845_vm2, %v6331_v34, 0  ;;  %v6385_v50 = vsel %vm845_vm2, %v6380_v41, 0 }
0x100b   : > { %15545 = vmatpush3.bf16.xpose.msra.mxu1 %v6091_v19  ;;  %15546 = vmatprep.mubr.msk.bf16.mxu1 %vm17303_vm1, %v22162_v28 }
0x100c   : > { %15541 = vmatmul.mubr.msk.bf16.vlgmr.msra.gmra.mrb[180].mxu0 %vm845_vm2, %v19315_v47  ;;  %15556 = vmatprep.subr.bf16.mxu1 %v22162_v28 }
0x100d   : > { %15551 = vmatpush3.bf16.xpose.msra.mxu0 %v6140_v18  ;;  %15552 = vmatprep.mubr.msk.bf16.mxu0 %vm17303_vm1, %v22162_v28  ;;  %v6429_v21 = vpop.permute.xlu1 %6428  ;;  %v6478_v31 = vpop.permute.xlu0 %6477 }
0x100e   : > { %15562 = vmatprep.subr.bf16.mxu0 %v22162_v28  ;;  %v6434_v36 = vsel %vm845_vm2, %v6429_v21, 0  ;;  %v6483_v10 = vsel %vm845_vm2, %v6478_v31, 0 }
0x1011   : > { %v6527_v55 = vpop.permute.xlu1 %6526  ;;  %v6832_v62 = vpop.permute.xlu0 %6831 }
0x1012   : > { %15547 = vmatmul.mubr.msk.bf16.vlgmr.msra.gmra.mrb[160].mxu1 %vm845_vm2, %v19313_v40  ;;  %v6532_v39 = vsel %vm845_vm2, %v6527_v55, 0  ;;  %v6837_v53 = vsel %vm6787_vm5, %v6832_v62, 0 }
0x1013   : > { %15557 = vmatpush3.bf16.xpose.msra.mxu1 %v6189_v22  ;;  %15558 = vmatprep.mubr.msk.bf16.mxu1 %vm17303_vm1, %v22162_v28 }
0x1014   : > { %15553 = vmatmul.mubr.msk.bf16.vlgmr.msra.gmra.mrb[184].mxu0 %vm845_vm2, %v19325_v52  ;;  %15568 = vmatprep.subr.bf16.mxu1 %v22162_v28 }
0x1015   : > { %15563 = vmatpush3.bf16.xpose.msra.mxu0 %v6238_v17  ;;  %15564 = vmatprep.mubr.msk.bf16.mxu0 %vm17303_vm1, %v22162_v28  ;;  %v6783_v44 = vpop.permute.xlu1 %6782 }
0x1016   : > { %15574 = vmatprep.subr.bf16.mxu0 %v22162_v28  ;;  %v6789_v6 = vsel %vm6787_vm5, %v6783_v44, 0 }
0x101a   : > { %15559 = vmatmul.mubr.msk.bf16.vlgmr.msra.gmra.mrb[164].mxu1 %vm845_vm2, %v19327_v12 }
0x101b   : > { %15569 = vmatpush3.bf16.xpose.msra.mxu1 %v6287_v60  ;;  %15570 = vmatprep.mubr.msk.bf16.mxu1 %vm17303_vm1, %v22162_v28 }
0x101c   : > { %15565 = vmatmul.mubr.msk.bf16.vlgmr.msra.gmra.mrb[188].mxu0 %vm845_vm2, %v19331_v4  ;;  %15580 = vmatprep.subr.bf16.mxu1 %v22162_v28 }
0x101d   : > { %15575 = vmatpush3.bf16.xpose.msra.mxu0 %v6336_v29  ;;  %15576 = vmatprep.mubr.msk.bf16.mxu0 %vm17303_vm1, %v22162_v28 }
0x101e   : > { %15586 = vmatprep.subr.bf16.mxu0 %v22162_v28 }
0x1022   : > { %15571 = vmatmul.mubr.msk.bf16.vlgmr.msra.gmra.mrb[168].mxu1 %vm845_vm2, %v19329_v1 }
0x1023   : > { %15581 = vmatpush3.bf16.xpose.msra.mxu1 %v6385_v50  ;;  %15582 = vmatprep.mubr.msk.bf16.mxu1 %vm17303_vm1, %v22162_v28 }
0x1024   : > { %15577 = vmatmul.mubr.msk.bf16.vlgmr.msra.gmra.mrb[192].mxu0 %vm845_vm2, %v19337_v16  ;;  %15592 = vmatprep.subr.bf16.mxu1 %v22162_v28 }
0x1025   : > { %15587 = vmatpush3.bf16.xpose.msra.mxu0 %v6434_v36  ;;  %15588 = vmatprep.mubr.msk.bf16.mxu0 %vm17303_vm1, %v22162_v28 }
0x1026   : > { %15598 = vmatprep.subr.bf16.mxu0 %v22162_v28 }
0x102a   : > { %15583 = vmatmul.mubr.msk.bf16.vlgmr.msra.gmra.mrb[172].mxu1 %vm845_vm2, %v19343_v32 }
0x102b   : > { %15593 = vmatpush3.bf16.xpose.msra.mxu1 %v6483_v10  ;;  %15594 = vmatprep.mubr.msk.bf16.mxu1 %vm17303_vm1, %v22162_v28 }
0x102c   : > { %15589 = vmatmul.mubr.msk.bf16.vlgmr.msra.gmra.mrb[196].mxu0 %vm845_vm2, %v19347_v23  ;;  %15604 = vmatprep.subr.bf16.mxu1 %v22162_v28 }
0x102d   : > { %15599 = vmatpush3.bf16.xpose.msra.mxu0 %v6532_v39  ;;  %15600 = vmatprep.mubr.msk.bf16.mxu0 %vm17303_vm1, %v22162_v28 }
0x102e   : > { %15610 = vmatprep.subr.bf16.mxu0 %v22162_v28 }
0x1032   : > { %15595 = vmatmul.mubr.msk.bf16.vlgmr.msra.gmra.mrb[176].mxu1 %vm845_vm2, %v19345_v63 }
0x1033   : > { %15605 = vmatpush3.bf16.msra.mxu1 %v6789_v6  ;;  %15606 = vmatprep.mubr.msk.bf16.mxu1 %vm17303_vm1, %v22162_v28 }
0x1034   : > { %15601 = vmatmul.mubr.msk.bf16.vlgmr.msra.gmra.mrb[200].mxu0 %vm845_vm2, %v19353_v25  ;;  %15616 = vmatprep.subr.bf16.mxu1 %v22162_v28 }
0x1035   : > { %15611 = vmatpush3.bf16.msra.mxu0 %v6837_v53  ;;  %15612 = vmatprep.mubr.msk.bf16.mxu0 %vm17303_vm1, %v22162_v28 }
0x1036   : > { %15622 = vmatprep.subr.bf16.mxu0 %v22162_v28 }
0x10cd   : > { %v5833_v13 = vpop.f32.mrb[148].mxu1 }
0x10ce   : > { %v19485_v61 = vmul.f32 0.35355338, %v5833_v13  ;;  %v15512_v9 = vpop.f32.mrb[149].mxu1 }
0x10cf   : > { %v5836_v57 = vpop.f32.mrb[150].mxu1  ;;  %v5882_v56 = vpop.f32.mrb[172].mxu0 }
0x10d0   : > { %v19487_v58 = vmul.f32 0.35355338, %v5882_v56  ;;  %v15513_v43 = vpop.f32.mrb[151].mxu1  ;;  %v15518_v38 = vpop.f32.mrb[173].mxu0  ;;  %v6590_v30 = vsel %vm845_vm2, %v19485_v61, -inf }
0x10d1   : > { %v5885_v19 = vpop.f32.mrb[174].mxu0  ;;  %6591 = vmax.xlane.f32.xlu0 %v6590_v30 }
0x10d2   : > { %v15519_v18 = vpop.f32.mrb[175].mxu0  ;;  %v6593_v33 = vsel %vm845_vm2, %v19487_v58, -inf }
0x10d3   : > { %6594 = vmax.xlane.f32.xlu1 %v6593_v33 }
0x10d5   : > { %v5931_v22 = vpop.f32.mrb[152].mxu1 }
0x10d6   : > { %v19493_v2 = vmul.f32 0.35355338, %v5931_v22  ;;  %v15524_v17 = vpop.f32.mrb[153].mxu1 }
0x10d7   : > { %v5934_v59 = vpop.f32.mrb[154].mxu1  ;;  %v5980_v60 = vpop.f32.mrb[176].mxu0 }
0x10d8   : > { %v19495_v34 = vmul.f32 0.35355338, %v5980_v60  ;;  %v15525_v29 = vpop.f32.mrb[155].mxu1  ;;  %v15530_v41 = vpop.f32.mrb[177].mxu0  ;;  %v6596_v50 = vsel %vm845_vm2, %v19493_v2, -inf }
0x10d9   : > { %v5983_v21 = vpop.f32.mrb[178].mxu0  ;;  %6597 = vmax.xlane.f32.xlu0 %v6596_v50 }
0x10da   : > { %v15531_v36 = vpop.f32.mrb[179].mxu0  ;;  %v6599_v31 = vsel %vm845_vm2, %v19495_v34, -inf }
0x10dd   : > { %v6029_v55 = vpop.f32.mrb[156].mxu1  ;;  %6600 = vmax.xlane.f32.xlu0 %v6599_v31 }
0x10de   : > { %v19501_v10 = vmul.f32 0.35355338, %v6029_v55  ;;  %v15536_v39 = vpop.f32.mrb[157].mxu1 }
0x10df   : > { %v6032_v44 = vpop.f32.mrb[158].mxu1  ;;  %v6078_v62 = vpop.f32.mrb[180].mxu0 }
0x10e0   : > { %v19503_v6 = vmul.f32 0.35355338, %v6078_v62  ;;  %v15537_v53 = vpop.f32.mrb[159].mxu1  ;;  %v15542_v13 = vpop.f32.mrb[181].mxu0  ;;  %v6602_v9 = vsel %vm845_vm2, %v19501_v10, -inf }
0x10e1   : > { %v6081_v57 = vpop.f32.mrb[182].mxu0  ;;  %6603 = vmax.xlane.f32.xlu1 %v6602_v9 }
0x10e2   : > { %v15543_v56 = vpop.f32.mrb[183].mxu0  ;;  %v6605_v43 = vsel %vm845_vm2, %v19503_v6, -inf }
0x10e3   : > { %6606 = vmax.xlane.f32.xlu0 %v6605_v43 }
0x10e5   : > { %v6127_v38 = vpop.f32.mrb[160].mxu1 }
0x10e6   : > { %v19509_v30 = vmul.f32 0.35355338, %v6127_v38  ;;  %v15548_v19 = vpop.f32.mrb[161].mxu1 }
0x10e7   : > { %v6130_v18 = vpop.f32.mrb[162].mxu1  ;;  %v6176_v33 = vpop.f32.mrb[184].mxu0 }
0x10e8   : > { %v19511_v22 = vmul.f32 0.35355338, %v6176_v33  ;;  %v15549_v17 = vpop.f32.mrb[163].mxu1  ;;  %v15554_v59 = vpop.f32.mrb[185].mxu0  ;;  %v6608_v60 = vsel %vm845_vm2, %v19509_v30, -inf }
0x10e9   : > { %v6179_v29 = vpop.f32.mrb[186].mxu0  ;;  %6609 = vmax.xlane.f32.xlu1 %v6608_v60 }
0x10ea   : > { %v15555_v41 = vpop.f32.mrb[187].mxu0  ;;  %v6611_v50 = vsel %vm845_vm2, %v19511_v22, -inf }
0x10eb   : > { %6612 = vmax.xlane.f32.xlu0 %v6611_v50 }
0x10ed   : > { %v6225_v21 = vpop.f32.mrb[164].mxu1 }
0x10ee   : > { %v19517_v36 = vmul.f32 0.35355338, %v6225_v21  ;;  %v15560_v31 = vpop.f32.mrb[165].mxu1 }
0x10ef   : > { %v6228_v55 = vpop.f32.mrb[166].mxu1  ;;  %v6274_v39 = vpop.f32.mrb[188].mxu0 }
0x10f0   : > { %v19519_v44 = vmul.f32 0.35355338, %v6274_v39  ;;  %v15561_v62 = vpop.f32.mrb[167].mxu1  ;;  %v15566_v53 = vpop.f32.mrb[189].mxu0  ;;  %v6614_v13 = vsel %vm845_vm2, %v19517_v36, -inf }
0x10f1   : > { %v6277_v9 = vpop.f32.mrb[190].mxu0  ;;  %6615 = vmax.xlane.f32.xlu1 %v6614_v13 }
0x10f2   : > { %v15567_v57 = vpop.f32.mrb[191].mxu0  ;;  %v6617_v56 = vsel %vm845_vm2, %v19519_v44, -inf }
0x10f3   : > { %6618 = vmax.xlane.f32.xlu0 %v6617_v56 }
0x10f5   : > { %v6323_v43 = vpop.f32.mrb[168].mxu1 }
0x10f6   : > { %v19525_v38 = vmul.f32 0.35355338, %v6323_v43  ;;  %v15572_v19 = vpop.f32.mrb[169].mxu1 }
0x10f7   : > { %v6326_v18 = vpop.f32.mrb[170].mxu1  ;;  %v6372_v33 = vpop.f32.mrb[192].mxu0 }
0x10f8   : > { %v19527_v17 = vmul.f32 0.35355338, %v6372_v33  ;;  %v15573_v59 = vpop.f32.mrb[171].mxu1  ;;  %v15578_v60 = vpop.f32.mrb[193].mxu0  ;;  %v6620_v29 = vsel %vm845_vm2, %v19525_v38, -inf }
0x10f9   : > { %v6375_v41 = vpop.f32.mrb[194].mxu0  ;;  %6621 = vmax.xlane.f32.xlu1 %v6620_v29 }
0x10fa   : > { %v15579_v50 = vpop.f32.mrb[195].mxu0  ;;  %v6623_v21 = vsel %vm845_vm2, %v19527_v17, -inf }
0x10fb   : > { %6624 = vmax.xlane.f32.xlu0 %v6623_v21 }
0x10fd   : > { %v6421_v31 = vpop.f32.mrb[172].mxu1 }
0x10fe   : > { %v19533_v55 = vmul.f32 0.35355338, %v6421_v31  ;;  %v15584_v39 = vpop.f32.mrb[173].mxu1 }
0x10ff   : > { %v6424_v62 = vpop.f32.mrb[174].mxu1  ;;  %v6470_v53 = vpop.f32.mrb[196].mxu0 }
0x1100   : > { %v19535_v13 = vmul.f32 0.35355338, %v6470_v53  ;;  %v15585_v9 = vpop.f32.mrb[175].mxu1  ;;  %v15590_v57 = vpop.f32.mrb[197].mxu0  ;;  %v6626_v56 = vsel %vm845_vm2, %v19533_v55, -inf }
0x1101   : > { %v6473_v43 = vpop.f32.mrb[198].mxu0  ;;  %6627 = vmax.xlane.f32.xlu1 %v6626_v56  ;;  %v19553_v57 = vpop.permute.xlu1 %6879 }
0x1102   : > { %v15591_v19 = vpop.f32.mrb[199].mxu0  ;;  %v6629_v18 = vsel %vm845_vm2, %v19535_v13, -inf  ;;  %v19557_v43 = vpop.permute.xlu0 %6927 }
0x1103   : > { %6630 = vmax.xlane.f32.xlu0 %v6629_v18 }
0x1105   : > { %v6519_v33 = vpop.f32.mrb[176].mxu1  ;;  %v19555_v56 = vpop.permute.xlu1 %6975 }
0x1106   : > { %v19541_v59 = vmul.f32 0.35355338, %v6519_v33  ;;  %v15596_v60 = vpop.f32.mrb[177].mxu1  ;;  %v19561_v18 = vpop.permute.xlu0 %7023 }
0x1107   : > { %v6522_v29 = vpop.f32.mrb[178].mxu1  ;;  %v6568_v41 = vpop.f32.mrb[200].mxu0 }
0x1108   : > { %v19543_v50 = vmul.f32 0.35355338, %v6568_v41  ;;  %v15597_v21 = vpop.f32.mrb[179].mxu1  ;;  %v15602_v31 = vpop.f32.mrb[201].mxu0  ;;  %v6632_v39 = vsel %vm845_vm2, %v19541_v59, -inf }
0x1109   : > { %v6571_v62 = vpop.f32.mrb[202].mxu0  ;;  %6633 = vmax.xlane.f32.xlu1 %v6632_v39  ;;  %v19559_v19 = vpop.permute.xlu1 %7071 }
0x110a   : > { %v15603_v53 = vpop.f32.mrb[203].mxu0  ;;  %v6635_v9 = vsel %vm845_vm2, %v19543_v50, -inf  ;;  %v19565_v60 = vpop.permute.xlu0 %7119 }
0x110b   : > { %6636 = vmax.xlane.f32.xlu0 %v6635_v9 }
0x110d   : > { %v19563_v33 = vpop.permute.xlu1 %7167 }
0x110e   : > { %v19569_v41 = vpop.permute.xlu0 %7215 }
0x1111   : > { %v19567_v29 = vpop.permute.xlu1 %7263 }
0x1115   : > { %v19571_v21 = vpop.permute.xlu1 %7311 }
0x111a   : > { %7407 = vrot.lane.b32.xlu1 %v19347_v23, %s22217_s28 }
0x1121   : > { %7359 = vrot.lane.b32.xlu0 %v19343_v32, %s22217_s28 }
0x115e   : > { %v6592_v31 = vpop.xlane.xlu0 %6591 }
0x115f   : > { %v6638_v39 = vsub.f32 %v19485_v61, %v6592_v31 }
0x1160   : > { %v6595_v62 = vpop.xlane.xlu1 %6594 }
0x1161   : > { %v6654_v53 = vmul.f32 1.442695, %v6638_v39  ;;  %v6639_v9 = vsub.f32 %v19487_v58, %v6595_v62 }
0x1163   : > { %16926 = vpow2.f32 %v6654_v53  ;;  %v6656_v15 = vmul.f32 1.442695, %v6639_v9 }
0x1165   : > { %16928 = vpow2.f32 %v6656_v15 }
0x1166   : > { %v6598_v37 = vpop.xlane.xlu0 %6597 }
0x1167   : > { %v6640_v7 = vsub.f32 %v19493_v2, %v6598_v37 }
0x1169   : > { %v6658_v46 = vmul.f32 1.442695, %v6640_v7 }
0x116a   : > { %v6601_v11 = vpop.xlane.xlu0 %6600 }
0x116b   : > { %16930 = vpow2.f32 %v6658_v46  ;;  %v6641_v54 = vsub.f32 %v19495_v34, %v6601_v11 }
0x116d   : > { %v19577_v5 = vpop.eup %16926  ;;  %v6660_v49 = vmul.f32 1.442695, %v6641_v54 }
0x116e   : > { %v6604_v8 = vpop.xlane.xlu1 %6603  ;;  %v6686_v61 = vsel %vm845_vm2, %v19577_v5, 0.0 }
0x116f   : > { %v19581_v31 = vpop.eup %16928  ;;  %16932 = vpow2.f32 %v6660_v49  ;;  %v6642_v15 = vsub.f32 %v19501_v10, %v6604_v8  ;;  %6687 = vadd.xlane.f32.xlu1 %v6686_v61 }
0x1170   : > { %v6607_v58 = vpop.xlane.xlu0 %6606  ;;  %v6689_v7 = vsel %vm845_vm2, %v19581_v31, 0.0 }
0x1171   : > { %v6662_v46 = vmul.f32 1.442695, %v6642_v15  ;;  %v6643_v11 = vsub.f32 %v19503_v6, %v6607_v58  ;;  %6690 = vadd.xlane.f32.xlu0 %v6689_v7 }
0x1173   : > { %16934 = vpow2.f32 %v6662_v46  ;;  %v6664_v54 = vmul.f32 1.442695, %v6643_v11 }
0x1175   : > { %v19587_v37 = vpop.eup %16930  ;;  %16936 = vpow2.f32 %v6664_v54 }
0x1176   : > { %v6610_v2 = vpop.xlane.xlu1 %6609  ;;  %v6692_v49 = vsel %vm845_vm2, %v19587_v37, 0.0 }
0x1177   : > { %v6644_v8 = vsub.f32 %v19509_v30, %v6610_v2  ;;  %6693 = vadd.xlane.f32.xlu1 %v6692_v49 }
0x1178   : > { %v6613_v34 = vpop.xlane.xlu0 %6612 }
0x1179   : > { %v19592_v10 = vpop.eup %16932  ;;  %v6666_v39 = vmul.f32 1.442695, %v6644_v8  ;;  %v6645_v62 = vsub.f32 %v19511_v22, %v6613_v34 }
0x117a   : > { %v6695_v6 = vsel %vm845_vm2, %v19592_v10, 0.0 }
0x117b   : > { %16938 = vpow2.f32 %v6666_v39  ;;  %v6668_v53 = vmul.f32 1.442695, %v6645_v62  ;;  %6696 = vadd.xlane.f32.xlu0 %v6695_v6 }
0x117d   : > { %v19597_v9 = vpop.eup %16934  ;;  %16940 = vpow2.f32 %v6668_v53 }
0x117e   : > { %v6616_v61 = vpop.xlane.xlu1 %6615  ;;  %v6698_v30 = vsel %vm845_vm2, %v19597_v9, 0.0 }
0x117f   : > { %v19601_v15 = vpop.eup %16936  ;;  %v6646_v58 = vsub.f32 %v19517_v36, %v6616_v61  ;;  %6699 = vadd.xlane.f32.xlu1 %v6698_v30 }
0x1180   : > { %v6619_v7 = vpop.xlane.xlu0 %6618  ;;  %v6701_v22 = vsel %vm845_vm2, %v19601_v15, 0.0 }
0x1181   : > { %v6670_v46 = vmul.f32 1.442695, %v6646_v58  ;;  %v6647_v11 = vsub.f32 %v19519_v44, %v6619_v7  ;;  %6702 = vadd.xlane.f32.xlu0 %v6701_v22 }
0x1183   : > { %16942 = vpow2.f32 %v6670_v46  ;;  %v6672_v54 = vmul.f32 1.442695, %v6647_v11 }
0x1185   : > { %v19607_v2 = vpop.eup %16938  ;;  %16944 = vpow2.f32 %v6672_v54 }
0x1186   : > { %v6622_v49 = vpop.xlane.xlu1 %6621  ;;  %v6704_v8 = vsel %vm845_vm2, %v19607_v2, 0.0 }
0x1187   : > { %v19611_v34 = vpop.eup %16940  ;;  %v6648_v36 = vsub.f32 %v19525_v38, %v6622_v49  ;;  %6705 = vadd.xlane.f32.xlu1 %v6704_v8 }
0x1188   : > { %v6625_v39 = vpop.xlane.xlu0 %6624  ;;  %v6707_v62 = vsel %vm845_vm2, %v19611_v34, 0.0 }
0x1189   : > { %v6674_v44 = vmul.f32 1.442695, %v6648_v36  ;;  %v6649_v6 = vsub.f32 %v19527_v17, %v6625_v39  ;;  %6708 = vadd.xlane.f32.xlu0 %v6707_v62 }
0x118b   : > { %16946 = vpow2.f32 %v6674_v44  ;;  %v6676_v53 = vmul.f32 1.442695, %v6649_v6 }
0x118d   : > { %v19617_v61 = vpop.eup %16942  ;;  %16948 = vpow2.f32 %v6676_v53 }
0x118e   : > { %v6628_v30 = vpop.xlane.xlu1 %6627  ;;  %v6710_v58 = vsel %vm845_vm2, %v19617_v61, 0.0 }
0x118f   : > { %v19621_v7 = vpop.eup %16944  ;;  %v6650_v38 = vsub.f32 %v19533_v55, %v6628_v30  ;;  %6711 = vadd.xlane.f32.xlu1 %v6710_v58 }
0x1190   : > { %v6631_v22 = vpop.xlane.xlu0 %6630  ;;  %v6713_v46 = vsel %vm845_vm2, %v19621_v7, 0.0 }
0x1191   : > { %v6678_v17 = vmul.f32 1.442695, %v6650_v38  ;;  %v6651_v11 = vsub.f32 %v19535_v13, %v6631_v22  ;;  %6714 = vadd.xlane.f32.xlu0 %v6713_v46 }
0x1193   : > { %16950 = vpow2.f32 %v6678_v17  ;;  %v6680_v54 = vmul.f32 1.442695, %v6651_v11 }
0x1195   : > { %v19627_v49 = vpop.eup %16946  ;;  %16952 = vpow2.f32 %v6680_v54 }
0x1196   : > { %v6716_v8 = vsel %vm845_vm2, %v19627_v49, 0.0  ;;  %v6634_v6 = vpop.xlane.xlu1 %6633 }
0x1197   : > { %v19631_v36 = vpop.eup %16948  ;;  %6717 = vadd.xlane.f32.xlu1 %v6716_v8  ;;  %v6652_v30 = vsub.f32 %v19541_v59, %v6634_v6 }
0x1198   : > { %v6719_v55 = vsel %vm845_vm2, %v19631_v36, 0.0  ;;  %v6637_v53 = vpop.xlane.xlu0 %6636 }
0x1199   : > { %6720 = vadd.xlane.f32.xlu0 %v6719_v55  ;;  %v6653_v58 = vsub.f32 %v19543_v50, %v6637_v53  ;;  %v6682_v38 = vmul.f32 1.442695, %v6652_v30 }
0x119a   : > { %v19673_v59 = vpop.permute.xlu1 %7407 }
0x119b   : > { %v6684_v22 = vmul.f32 1.442695, %v6653_v58  ;;  %16954 = vpow2.f32 %v6682_v38 }
0x119c   : > { %v19679_v50 = vpop.permute.xlu0 %7359 }
0x119d   : > { %v19635_v39 = vpop.eup %16950  ;;  %16956 = vpow2.f32 %v6684_v22  ;;  %v6885_v22 = vsel %vm6787_vm5, %v19553_v57, 0 }
0x119e   : > { %v6722_v13 = vsel %vm845_vm2, %v19635_v39, 0.0 }
0x119f   : > { %v19639_v62 = vpop.eup %16952  ;;  %6723 = vadd.xlane.f32.xlu1 %v6722_v13 }
0x11a0   : > { %v6725_v44 = vsel %vm845_vm2, %v19639_v62, 0.0 }
0x11a1   : > { %6726 = vadd.xlane.f32.xlu0 %v6725_v44 }
0x11a5   : > { %v19649_v46 = vpop.eup %16954 }
0x11a6   : > { %v6728_v11 = vsel %vm845_vm2, %v19649_v46, 0.0 }
0x11a7   : > { %v19651_v17 = vpop.eup %16956 }
0x11a8   : > { %v6731_v54 = vsel %vm845_vm2, %v19651_v17, 0.0 }
0x11b0   : > { %7503 = vrot.lane.b32.xlu1 %v19353_v25, %s22217_s28 }
0x11b7   : > { %7455 = vrot.lane.b32.xlu0 %v19345_v63, %s22217_s28  ;;  %s22253_s28 = smov 8  }
0x11d4   : > { %6729 = vadd.xlane.f32.xlu1 %v6728_v11 }
0x11d6   : > { %6732 = vadd.xlane.f32.xlu0 %v6731_v54 }
0x11e5   : > { %7603 = vrot.lane.b32.xlu1 %v19299_v45, %s22218_s29 }
0x11e9   : > { %7601 = vrot.lane.b32.xlu1 %v19299_v45, %s22219_s1 }
0x11ec   : > { %7553 = vrot.lane.b32.xlu0 %v19297_v42, %s22218_s29 }
0x11ed   : > { %7703 = vrot.lane.b32.xlu1 %v19309_v0, %s22218_s29 }
0x11f0   : > { %7551 = vrot.lane.b32.xlu0 %v19297_v42, %s22219_s1 }
0x11f1   : > { %7701 = vrot.lane.b32.xlu1 %v19309_v0, %s22219_s1 }
0x11f4   : > { %7653 = vrot.lane.b32.xlu0 %v19303_v26, %s22218_s29 }
0x11f5   : > { %7803 = vrot.lane.b32.xlu1 %v19315_v47, %s22218_s29 }
0x11f8   : > { %7651 = vrot.lane.b32.xlu0 %v19303_v26, %s22219_s1 }
0x11f9   : > { %7801 = vrot.lane.b32.xlu1 %v19315_v47, %s22219_s1 }
0x11fc   : > { %v6688_v8 = vpop.xlane.xlu1 %6687  ;;  %7753 = vrot.lane.b32.xlu0 %v19311_v27, %s22218_s29 }
0x11fd   : > { %16958 = vrcp.f32 %v6688_v8  ;;  %7903 = vrot.lane.b32.xlu1 %v19325_v52, %s22218_s29 }
0x11fe   : > { %v6691_v55 = vpop.xlane.xlu0 %6690 }
0x11ff   : > { %16960 = vrcp.f32 %v6691_v55 }
0x1200   : > { %7751 = vrot.lane.b32.xlu0 %v19311_v27, %s22219_s1 }
0x1201   : > { %7901 = vrot.lane.b32.xlu1 %v19325_v52, %s22219_s1 }
0x1204   : > { %v6694_v13 = vpop.xlane.xlu1 %6693  ;;  %7853 = vrot.lane.b32.xlu0 %v19313_v40, %s22218_s29 }
0x1205   : > { %16962 = vrcp.f32 %v6694_v13  ;;  %8003 = vrot.lane.b32.xlu1 %v19331_v4, %s22218_s29  ;;  %v6981_v13 = vsel %vm6787_vm5, %v19555_v56, 0 }
0x1207   : > { %v16959_v44 = vpop.eup %16958 }
0x1208   : > { %7851 = vrot.lane.b32.xlu0 %v19313_v40, %s22219_s1  ;;  %v6697_v6 = vpop.xlane.xlu0 %6696  ;;  %v6750_v53 = vmul.f32 %v16959_v44, %v19577_v5  ;;  %v6933_v5 = vsel %vm6787_vm5, %v19557_v43, 0 }
0x1209   : > { %v16961_v30 = vpop.eup %16960  ;;  %16964 = vrcp.f32 %v6697_v6  ;;  %8001 = vrot.lane.b32.xlu1 %v19331_v4, %s22219_s1 }
0x120a   : > { %v6766_v58 = vpack.c.bf16 %v6750_v53, %v6750_v53  ;;  %v6751_v38 = vmul.f32 %v16961_v30, %v19581_v31  ;;  %v7029_v30 = vsel %vm6787_vm5, %v19561_v18, 0 }
0x120c   : > { %15607 = vmatmul.mubr.msk.bf16.vlgmr.msra.gmra.mrb[180].mxu1 %vm845_vm2, %v6766_v58  ;;  %v6700_v11 = vpop.xlane.xlu1 %6699  ;;  %7953 = vrot.lane.b32.xlu0 %v19327_v12, %s22218_s29  ;;  %v6767_v54 = vpack.c.bf16 %v6751_v38, %v6751_v38 }
0x120d   : > { %15617 = vmatpush3.bf16.msra.mxu1 %v6885_v22  ;;  %16966 = vrcp.f32 %v6700_v11  ;;  %8103 = vrot.lane.b32.xlu1 %v19337_v16, %s22218_s29  ;;  %v7077_v22 = vsel %vm6787_vm5, %v19559_v19, 0  ;;  %v7125_v19 = vsel %vm6787_vm5, %v19565_v60, 0 }
0x120e   : > { %15613 = vmatmul.mubr.msk.bf16.vlgmr.msra.gmra.mrb[204].mxu0 %vm845_vm2, %v6767_v54  ;;  %v6703_v31 = vpop.xlane.xlu0 %6702  ;;  %15618 = vmatprep.mubr.msk.bf16.mxu1 %vm17303_vm1, %v22162_v28 }
0x120f   : > { %v16963_v57 = vpop.eup %16962  ;;  %15623 = vmatpush3.bf16.msra.mxu0 %v6933_v5  ;;  %16968 = vrcp.f32 %v6703_v31  ;;  %15628 = vmatprep.subr.bf16.mxu1 %v22162_v28 }
0x1210   : > { %7951 = vrot.lane.b32.xlu0 %v19327_v12, %s22219_s1  ;;  %v6752_v8 = vmul.f32 %v16963_v57, %v19587_v37  ;;  %15624 = vmatprep.mubr.msk.bf16.mxu0 %vm17303_vm1, %v22162_v28 }
0x1211   : > { %8101 = vrot.lane.b32.xlu1 %v19337_v16, %s22219_s1  ;;  %15634 = vmatprep.subr.bf16.mxu0 %v22162_v28 }
0x1212   : > { %v6768_v43 = vpack.c.bf16 %v6752_v8, %v6752_v8  ;;  %v7173_v8 = vsel %vm6787_vm5, %v19563_v33, 0  ;;  %v7221_v33 = vsel %vm6787_vm5, %v19569_v41, 0 }
0x1213   : > { %v16965_v55 = vpop.eup %16964 }
0x1214   : > { %15619 = vmatmul.mubr.msk.bf16.vlgmr.msra.gmra.mrb[184].mxu1 %vm845_vm2, %v6768_v43  ;;  %v6706_v44 = vpop.xlane.xlu1 %6705  ;;  %8053 = vrot.lane.b32.xlu0 %v19329_v1, %s22218_s29  ;;  %v6753_v37 = vmul.f32 %v16965_v55, %v19592_v10 }
0x1215   : > { %15629 = vmatpush3.bf16.msra.mxu1 %v6981_v13  ;;  %16970 = vrcp.f32 %v6706_v44  ;;  %8203 = vrot.lane.b32.xlu1 %v19347_v23, %s22218_s29 }
0x1216   : > { %v6709_v6 = vpop.xlane.xlu0 %6708  ;;  %v6769_v53 = vpack.c.bf16 %v6753_v37, %v6753_v37  ;;  %15630 = vmatprep.mubr.msk.bf16.mxu1 %vm17303_vm1, %v22162_v28  ;;  %15640 = vmatprep.subr.bf16.mxu1 %v22162_v28 }
0x1217   : > { %v16967_v56 = vpop.eup %16966  ;;  %16972 = vrcp.f32 %v6709_v6  ;;  %v7269_v6 = vsel %vm6787_vm5, %v19567_v29, 0  ;;  %v7317_v29 = vsel %vm6787_vm5, %v19571_v21, 0 }
0x1218   : > { %8051 = vrot.lane.b32.xlu0 %v19329_v1, %s22219_s1  ;;  %15625 = vmatmul.mubr.msk.bf16.vlgmr.msra.gmra.mrb[208].mxu0 %vm845_vm2, %v6769_v53  ;;  %v6754_v10 = vmul.f32 %v16967_v56, %v19597_v9 }
0x1219   : > { %v16969_v58 = vpop.eup %16968  ;;  %15635 = vmatpush3.bf16.msra.mxu0 %v7029_v30  ;;  %8201 = vrot.lane.b32.xlu1 %v19347_v23, %s22219_s1 }
0x121a   : > { %v6770_v38 = vpack.c.bf16 %v6754_v10, %v6754_v10  ;;  %15636 = vmatprep.mubr.msk.bf16.mxu0 %vm17303_vm1, %v22162_v28  ;;  %15646 = vmatprep.subr.bf16.mxu0 %v22162_v28  ;;  %v6755_v18 = vmul.f32 %v16969_v58, %v19601_v15 }
0x121c   : > { %15631 = vmatmul.mubr.msk.bf16.vlgmr.msra.gmra.mrb[188].mxu1 %vm845_vm2, %v6770_v38  ;;  %v6712_v11 = vpop.xlane.xlu1 %6711  ;;  %8153 = vrot.lane.b32.xlu0 %v19343_v32, %s22218_s29  ;;  %v6771_v54 = vpack.c.bf16 %v6755_v18, %v6755_v18  ;;  %v7365_v38 = vsel %vm6787_vm5, %v19679_v50, 0 }
0x121d   : > { %15641 = vmatpush3.bf16.msra.mxu1 %v7077_v22  ;;  %16974 = vrcp.f32 %v6712_v11  ;;  %8303 = vrot.lane.b32.xlu1 %v19353_v25, %s22218_s29 }
0x121e   : > { %v6715_v9 = vpop.xlane.xlu0 %6714  ;;  %15642 = vmatprep.mubr.msk.bf16.mxu1 %vm17303_vm1, %v22162_v28  ;;  %15652 = vmatprep.subr.bf16.mxu1 %v22162_v28 }
0x121f   : > { %v16971_v15 = vpop.eup %16970  ;;  %16976 = vrcp.f32 %v6715_v9 }
0x1220   : > { %8151 = vrot.lane.b32.xlu0 %v19343_v32, %s22219_s1  ;;  %15637 = vmatmul.mubr.msk.bf16.vlgmr.msra.gmra.mrb[212].mxu0 %vm845_vm2, %v6771_v54  ;;  %v6756_v5 = vmul.f32 %v16971_v15, %v19607_v2 }
0x1221   : > { %v16973_v31 = vpop.eup %16972  ;;  %15647 = vmatpush3.bf16.msra.mxu0 %v7125_v19  ;;  %8301 = vrot.lane.b32.xlu1 %v19353_v25, %s22219_s1 }
0x1222   : > { %v6772_v57 = vpack.c.bf16 %v6756_v5, %v6756_v5  ;;  %15648 = vmatprep.mubr.msk.bf16.mxu0 %vm17303_vm1, %v22162_v28  ;;  %15658 = vmatprep.subr.bf16.mxu0 %v22162_v28  ;;  %v6757_v60 = vmul.f32 %v16973_v31, %v19611_v34 }
0x1224   : > { %15643 = vmatmul.mubr.msk.bf16.vlgmr.msra.gmra.mrb[192].mxu1 %vm845_vm2, %v6772_v57  ;;  %v6718_v43 = vpop.xlane.xlu1 %6717  ;;  %8253 = vrot.lane.b32.xlu0 %v19345_v63, %s22218_s29  ;;  %v6773_v55 = vpack.c.bf16 %v6757_v60, %v6757_v60  ;;  %s22255_s29 = smov 16  }
0x1225   : > { %15653 = vmatpush3.bf16.msra.mxu1 %v7173_v8  ;;  %16978 = vrcp.f32 %v6718_v43  ;;  %8559 = vrot.lane.b32.xlu1 %v19297_v42, %s22220_s24 }
0x1226   : > { %v6721_v2 = vpop.xlane.xlu0 %6720  ;;  %15654 = vmatprep.mubr.msk.bf16.mxu1 %vm17303_vm1, %v22162_v28  ;;  %15664 = vmatprep.subr.bf16.mxu1 %v22162_v28 }
0x1227   : > { %v16975_v34 = vpop.eup %16974  ;;  %16980 = vrcp.f32 %v6721_v2 }
0x1228   : > { %8251 = vrot.lane.b32.xlu0 %v19345_v63, %s22219_s1  ;;  %15649 = vmatmul.mubr.msk.bf16.vlgmr.msra.gmra.mrb[216].mxu0 %vm845_vm2, %v6773_v55  ;;  %v6758_v13 = vmul.f32 %v16975_v34, %v19617_v61 }
0x1229   : > { %v16977_v44 = vpop.eup %16976  ;;  %15659 = vmatpush3.bf16.msra.mxu0 %v7221_v33  ;;  %8655 = vrot.lane.b32.xlu1 %v19303_v26, %s22220_s24 }
0x122a   : > { %v6774_v37 = vpack.c.bf16 %v6758_v13, %v6758_v13  ;;  %15660 = vmatprep.mubr.msk.bf16.mxu0 %vm17303_vm1, %v22162_v28  ;;  %15670 = vmatprep.subr.bf16.mxu0 %v22162_v28  ;;  %v6759_v41 = vmul.f32 %v16977_v44, %v19621_v7 }
0x122c   : > { %15655 = vmatmul.mubr.msk.bf16.vlgmr.msra.gmra.mrb[196].mxu1 %vm845_vm2, %v6774_v37  ;;  %v6724_v53 = vpop.xlane.xlu1 %6723  ;;  %8607 = vrot.lane.b32.xlu0 %v19299_v45, %s22220_s24  ;;  %v6775_v56 = vpack.c.bf16 %v6759_v41, %v6759_v41 }
0x122d   : > { %15665 = vmatpush3.bf16.msra.mxu1 %v7269_v6  ;;  %16982 = vrcp.f32 %v6724_v53  ;;  %8751 = vrot.lane.b32.xlu1 %v19311_v27, %s22220_s24 }
0x122e   : > { %v6727_v61 = vpop.xlane.xlu0 %6726  ;;  %15666 = vmatprep.mubr.msk.bf16.mxu1 %vm17303_vm1, %v22162_v28  ;;  %15676 = vmatprep.subr.bf16.mxu1 %v22162_v28 }
0x122f   : > { %v16979_v7 = vpop.eup %16978  ;;  %16984 = vrcp.f32 %v6727_v61 }
0x1230   : > { %8703 = vrot.lane.b32.xlu0 %v19309_v0, %s22220_s24  ;;  %15661 = vmatmul.mubr.msk.bf16.vlgmr.msra.gmra.mrb[220].mxu0 %vm845_vm2, %v6775_v56  ;;  %v6760_v30 = vmul.f32 %v16979_v7, %v19627_v49 }
0x1231   : > { %v16981_v10 = vpop.eup %16980  ;;  %15671 = vmatpush3.bf16.msra.mxu0 %v7317_v29  ;;  %8847 = vrot.lane.b32.xlu1 %v19313_v40, %s22220_s24 }
0x1232   : > { %v6776_v58 = vpack.c.bf16 %v6760_v30, %v6760_v30  ;;  %15672 = vmatprep.mubr.msk.bf16.mxu0 %vm17303_vm1, %v22162_v28  ;;  %15682 = vmatprep.subr.bf16.mxu0 %v22162_v28  ;;  %v6761_v21 = vmul.f32 %v16981_v10, %v19631_v36  ;;  %v7413_v36 = vsel %vm6787_vm5, %v19673_v59, 0  ;;  %v7456_v11 = vpop.permute.xlu0 %7455 }
0x1233   : > { %v7461_v54 = vsel %vm6787_vm5, %v7456_v11, 0 }
0x1234   : > { %15667 = vmatmul.mubr.msk.bf16.vlgmr.msra.gmra.mrb[200].mxu1 %vm845_vm2, %v6776_v58  ;;  %8799 = vrot.lane.b32.xlu0 %v19315_v47, %s22220_s24  ;;  %v6777_v49 = vpack.c.bf16 %v6761_v21, %v6761_v21 }
0x1235   : > { %15677 = vmatpush3.bf16.msra.mxu1 %v7365_v38  ;;  %8943 = vrot.lane.b32.xlu1 %v19327_v12, %s22220_s24 }
0x1236   : > { %15678 = vmatprep.mubr.msk.bf16.mxu1 %vm17303_vm1, %v22162_v28  ;;  %15688 = vmatprep.subr.bf16.mxu1 %v22162_v28 }
0x1237   : > { %v16983_v18 = vpop.eup %16982 }
0x1238   : > { %8895 = vrot.lane.b32.xlu0 %v19325_v52, %s22220_s24  ;;  %15673 = vmatmul.mubr.msk.bf16.vlgmr.msra.gmra.mrb[224].mxu0 %vm845_vm2, %v6777_v49  ;;  %v6762_v50 = vmul.f32 %v16983_v18, %v19635_v39  ;;  %v7504_v39 = vpop.permute.xlu1 %7503 }
0x1239   : > { %v16985_v22 = vpop.eup %16984  ;;  %15683 = vmatpush3.bf16.msra.mxu0 %v7413_v36  ;;  %9039 = vrot.lane.b32.xlu1 %v19329_v1, %s22220_s24 }
0x123a   : > { %v6778_v9 = vpack.c.bf16 %v6762_v50, %v6762_v50  ;;  %15684 = vmatprep.mubr.msk.bf16.mxu0 %vm17303_vm1, %v22162_v28  ;;  %15694 = vmatprep.subr.bf16.mxu0 %v22162_v28  ;;  %v6763_v59 = vmul.f32 %v16985_v22, %v19639_v62  ;;  %v7509_v62 = vsel %vm6787_vm5, %v7504_v39, 0 }
0x123c   : > { %8991 = vrot.lane.b32.xlu0 %v19331_v4, %s22220_s24  ;;  %15679 = vmatmul.mubr.msk.bf16.vlgmr.msra.gmra.mrb[204].mxu1 %vm845_vm2, %v6778_v9  ;;  %v6779_v15 = vpack.c.bf16 %v6763_v59, %v6763_v59 }
0x123d   : > { %15689 = vmatpush3.bf16.msra.mxu1 %v7461_v54  ;;  %9087 = vrot.lane.b32.xlu1 %v19337_v16, %s22220_s24 }
0x123e   : > { %15690 = vmatprep.mubr.msk.bf16.mxu1 %vm17303_vm1, %v22162_v28  ;;  %15700 = vmatprep.subr.bf16.mxu1 %v22162_v28 }
0x1240   : > { %15685 = vmatmul.mubr.msk.bf16.vlgmr.msra.gmra.mrb[228].mxu0 %vm845_vm2, %v6779_v15 }
0x1241   : > { %15695 = vmatpush3.bf16.msra.mxu0 %v7509_v62  ;;  %15696 = vmatprep.mubr.msk.bf16.mxu0 %vm17303_vm1, %v22162_v28 }
0x1242   : > { %15706 = vmatprep.subr.bf16.mxu0 %v22162_v28 }
0x1261   : > { %v6730_v19 = vpop.xlane.xlu1 %6729 }
0x1262   : > { %16986 = vrcp.f32 %v6730_v19 }
0x1263   : > { %v6733_v5 = vpop.xlane.xlu0 %6732 }
0x1264   : > { %16988 = vrcp.f32 %v6733_v5 }
0x1265   : > { %v7604_v31 = vpop.permute.xlu1 %7603 }
0x1266   : > { %v7609_v53 = vsel %vm845_vm2, %v7604_v31, 0 }
0x1267   : > { %v7554_v57 = vpop.permute.xlu0 %7553 }
0x1268   : > { %v7559_v37 = vsel %vm845_vm2, %v7554_v57, 0 }
0x1269   : > { %v7602_v60 = vpop.permute.xlu1 %7601 }
0x126b   : > { %v7552_v8 = vpop.permute.xlu0 %7551 }
0x126c   : > { %v16987_v43 = vpop.eup %16986 }
0x126d   : > { %v7704_v2 = vpop.permute.xlu1 %7703  ;;  %v6764_v55 = vmul.f32 %v16987_v43, %v19649_v46 }
0x126e   : > { %v16989_v34 = vpop.eup %16988  ;;  %v7709_v29 = vsel %vm845_vm2, %v7704_v2, 0 }
0x126f   : > { %v7654_v33 = vpop.permute.xlu0 %7653  ;;  %v6780_v13 = vpack.c.bf16 %v6764_v55, %v6764_v55  ;;  %v6765_v44 = vmul.f32 %v16989_v34, %v19651_v17 }
0x1270   : > { %v7659_v56 = vsel %vm845_vm2, %v7654_v33, 0 }
0x1271   : > { %v7702_v41 = vpop.permute.xlu1 %7701  ;;  %15691 = vmatmul.mubr.msk.bf16.vlgmr.msra.gmra.mrb[208].mxu1 %vm845_vm2, %v6780_v13  ;;  %v6781_v6 = vpack.c.bf16 %v6765_v44, %v6765_v44 }
0x1272   : > { %15701 = vmatpush3.bf16.xpose.msra.mxu1 %v7559_v37  ;;  %15702 = vmatprep.mubr.msk.bf16.mxu1 %vm17303_vm1, %v22162_v28 }
0x1273   : > { %15697 = vmatmul.mubr.msk.bf16.vlgmr.msra.gmra.mrb[232].mxu0 %vm845_vm2, %v6781_v6  ;;  %v7652_v46 = vpop.permute.xlu0 %7651  ;;  %15712 = vmatprep.subr.bf16.mxu1 %v22162_v28 }
0x1274   : > { %15707 = vmatpush3.bf16.xpose.msra.mxu0 %v7609_v53  ;;  %15708 = vmatprep.mubr.msk.bf16.mxu0 %vm17303_vm1, %v22162_v28 }
0x1275   : > { %v7804_v17 = vpop.permute.xlu1 %7803  ;;  %15718 = vmatprep.subr.bf16.mxu0 %v22162_v28 }
0x1276   : > { %v7809_v49 = vsel %vm845_vm2, %v7804_v17, 0 }
0x1277   : > { %v7754_v61 = vpop.permute.xlu0 %7753 }
0x1278   : > { %v7759_v21 = vsel %vm845_vm2, %v7754_v61, 0 }
0x1279   : > { %v7802_v7 = vpop.permute.xlu1 %7801  ;;  %15703 = vmatmul.mubr.msk.bf16.vlgmr.msra.gmra.mrb[212].mxu1 %vm845_vm2, %v7552_v8 }
0x127a   : > { %15713 = vmatpush3.bf16.xpose.msra.mxu1 %v7659_v56  ;;  %15714 = vmatprep.mubr.msk.bf16.mxu1 %vm17303_vm1, %v22162_v28 }
0x127b   : > { %15709 = vmatmul.mubr.msk.bf16.vlgmr.msra.gmra.mrb[236].mxu0 %vm845_vm2, %v7602_v60  ;;  %v7752_v30 = vpop.permute.xlu0 %7751  ;;  %15724 = vmatprep.subr.bf16.mxu1 %v22162_v28 }
0x127c   : > { %15719 = vmatpush3.bf16.xpose.msra.mxu0 %v7709_v29  ;;  %15720 = vmatprep.mubr.msk.bf16.mxu0 %vm17303_vm1, %v22162_v28 }
0x127d   : > { %v7904_v10 = vpop.permute.xlu1 %7903  ;;  %15730 = vmatprep.subr.bf16.mxu0 %v22162_v28 }
0x127e   : > { %v7909_v9 = vsel %vm845_vm2, %v7904_v10, 0 }
0x127f   : > { %v7854_v58 = vpop.permute.xlu0 %7853 }
0x1280   : > { %v7859_v22 = vsel %vm845_vm2, %v7854_v58, 0 }
0x1281   : > { %v7902_v38 = vpop.permute.xlu1 %7901  ;;  %15715 = vmatmul.mubr.msk.bf16.vlgmr.msra.gmra.mrb[216].mxu1 %vm845_vm2, %v7652_v46 }
0x1282   : > { %15725 = vmatpush3.bf16.xpose.msra.mxu1 %v7759_v21  ;;  %15726 = vmatprep.mubr.msk.bf16.mxu1 %vm17303_vm1, %v22162_v28 }
0x1283   : > { %15721 = vmatmul.mubr.msk.bf16.vlgmr.msra.gmra.mrb[240].mxu0 %vm845_vm2, %v7702_v41  ;;  %v7852_v18 = vpop.permute.xlu0 %7851  ;;  %15736 = vmatprep.subr.bf16.mxu1 %v22162_v28 }
0x1284   : > { %15731 = vmatpush3.bf16.xpose.msra.mxu0 %v7809_v49  ;;  %15732 = vmatprep.mubr.msk.bf16.mxu0 %vm17303_vm1, %v22162_v28 }
0x1285   : > { %v8004_v36 = vpop.permute.xlu1 %8003  ;;  %15742 = vmatprep.subr.bf16.mxu0 %v22162_v28 }
0x1286   : > { %v8009_v19 = vsel %vm845_vm2, %v8004_v36, 0 }
0x1287   : > { %v7954_v50 = vpop.permute.xlu0 %7953 }
0x1288   : > { %v7959_v15 = vsel %vm845_vm2, %v7954_v50, 0 }
0x1289   : > { %v8002_v11 = vpop.permute.xlu1 %8001  ;;  %15727 = vmatmul.mubr.msk.bf16.vlgmr.msra.gmra.mrb[220].mxu1 %vm845_vm2, %v7752_v30 }
0x128a   : > { %15737 = vmatpush3.bf16.xpose.msra.mxu1 %v7859_v22  ;;  %15738 = vmatprep.mubr.msk.bf16.mxu1 %vm17303_vm1, %v22162_v28 }
0x128b   : > { %15733 = vmatmul.mubr.msk.bf16.vlgmr.msra.gmra.mrb[244].mxu0 %vm845_vm2, %v7802_v7  ;;  %v7952_v59 = vpop.permute.xlu0 %7951  ;;  %15748 = vmatprep.subr.bf16.mxu1 %v22162_v28 }
0x128c   : > { %15743 = vmatpush3.bf16.xpose.msra.mxu0 %v7909_v9  ;;  %15744 = vmatprep.mubr.msk.bf16.mxu0 %vm17303_vm1, %v22162_v28 }
0x128d   : > { %v8104_v54 = vpop.permute.xlu1 %8103  ;;  %15754 = vmatprep.subr.bf16.mxu0 %v22162_v28 }
0x128e   : > { %v8109_v8 = vsel %vm845_vm2, %v8104_v54, 0 }
0x128f   : > { %v8054_v39 = vpop.permute.xlu0 %8053 }
0x1290   : > { %v8059_v60 = vsel %vm845_vm2, %v8054_v39, 0 }
0x1291   : > { %v8102_v62 = vpop.permute.xlu1 %8101  ;;  %15739 = vmatmul.mubr.msk.bf16.vlgmr.msra.gmra.mrb[224].mxu1 %vm845_vm2, %v7852_v18 }
0x1292   : > { %15749 = vmatpush3.bf16.xpose.msra.mxu1 %v7959_v15  ;;  %15750 = vmatprep.mubr.msk.bf16.mxu1 %vm17303_vm1, %v22162_v28 }
0x1293   : > { %15745 = vmatmul.mubr.msk.bf16.vlgmr.msra.gmra.mrb[248].mxu0 %vm845_vm2, %v7902_v38  ;;  %v8052_v5 = vpop.permute.xlu0 %8051  ;;  %15760 = vmatprep.subr.bf16.mxu1 %v22162_v28 }
0x1294   : > { %15755 = vmatpush3.bf16.xpose.msra.mxu0 %v8009_v19  ;;  %15756 = vmatprep.mubr.msk.bf16.mxu0 %vm17303_vm1, %v22162_v28 }
0x1295   : > { %15766 = vmatprep.subr.bf16.mxu0 %v22162_v28  ;;  %v8204_v31 = vpop.permute.xlu1 %8203 }
0x1296   : > { %v8209_v33 = vsel %vm845_vm2, %v8204_v31, 0 }
0x1297   : > { %v8154_v57 = vpop.permute.xlu0 %8153 }
0x1298   : > { %v8159_v55 = vsel %vm845_vm2, %v8154_v57, 0 }
0x1299   : > { %15751 = vmatmul.mubr.msk.bf16.vlgmr.msra.gmra.mrb[228].mxu1 %vm845_vm2, %v7952_v59  ;;  %v8202_v43 = vpop.permute.xlu1 %8201 }
0x129a   : > { %15761 = vmatpush3.bf16.xpose.msra.mxu1 %v8059_v60  ;;  %15762 = vmatprep.mubr.msk.bf16.mxu1 %vm17303_vm1, %v22162_v28 }
0x129b   : > { %15757 = vmatmul.mubr.msk.bf16.vlgmr.msra.gmra.mrb[252].mxu0 %vm845_vm2, %v8002_v11  ;;  %15772 = vmatprep.subr.bf16.mxu1 %v22162_v28  ;;  %v8152_v2 = vpop.permute.xlu0 %8151 }
0x129c   : > { %15767 = vmatpush3.bf16.xpose.msra.mxu0 %v8109_v8  ;;  %15768 = vmatprep.mubr.msk.bf16.mxu0 %vm17303_vm1, %v22162_v28 }
0x129d   : > { %15778 = vmatprep.subr.bf16.mxu0 %v22162_v28  ;;  %v8304_v34 = vpop.permute.xlu1 %8303 }
0x129e   : > { %v8309_v6 = vsel %vm845_vm2, %v8304_v34, 0 }
0x129f   : > { %v8254_v13 = vpop.permute.xlu0 %8253 }
0x12a0   : > { %v8259_v37 = vsel %vm845_vm2, %v8254_v13, 0 }
0x12a1   : > { %15763 = vmatmul.mubr.msk.bf16.vlgmr.msra.gmra.mrb[232].mxu1 %vm845_vm2, %v8052_v5  ;;  %v8302_v44 = vpop.permute.xlu1 %8301 }
0x12a2   : > { %15773 = vmatpush3.bf16.xpose.msra.mxu1 %v8159_v55  ;;  %15774 = vmatprep.mubr.msk.bf16.mxu1 %vm17303_vm1, %v22162_v28 }
0x12a3   : > { %15769 = vmatmul.mubr.msk.bf16.vlgmr.msra.gmra.mrb[0].mxu0 %vm845_vm2, %v8102_v62  ;;  %15784 = vmatprep.subr.bf16.mxu1 %v22162_v28  ;;  %v8252_v41 = vpop.permute.xlu0 %8251 }
0x12a4   : > { %15779 = vmatpush3.bf16.xpose.msra.mxu0 %v8209_v33  ;;  %15780 = vmatprep.mubr.msk.bf16.mxu0 %vm17303_vm1, %v22162_v28 }
0x12a5   : > { %15790 = vmatprep.subr.bf16.mxu0 %v22162_v28  ;;  %v8560_v53 = vpop.permute.xlu1 %8559 }
0x12a6   : > { %v8565_v17 = vsel %vm6787_vm5, %v8560_v53, 0 }
0x12a7   : > { %v8608_v46 = vpop.permute.xlu0 %8607 }
0x12a8   : > { %v8613_v61 = vsel %vm6787_vm5, %v8608_v46, 0 }
0x12a9   : > { %15775 = vmatmul.mubr.msk.bf16.vlgmr.msra.gmra.mrb[236].mxu1 %vm845_vm2, %v8152_v2 }
0x12aa   : > { %15785 = vmatpush3.bf16.xpose.msra.mxu1 %v8259_v37  ;;  %15786 = vmatprep.mubr.msk.bf16.mxu1 %vm17303_vm1, %v22162_v28 }
0x12ab   : > { %15781 = vmatmul.mubr.msk.bf16.vlgmr.msra.gmra.mrb[4].mxu0 %vm845_vm2, %v8202_v43  ;;  %15796 = vmatprep.subr.bf16.mxu1 %v22162_v28 }
0x12ac   : > { %15791 = vmatpush3.bf16.xpose.msra.mxu0 %v8309_v6  ;;  %15792 = vmatprep.mubr.msk.bf16.mxu0 %vm17303_vm1, %v22162_v28 }
0x12ad   : > { %15802 = vmatprep.subr.bf16.mxu0 %v22162_v28 }
0x12b1   : > { %15787 = vmatmul.mubr.msk.bf16.vlgmr.msra.gmra.mrb[240].mxu1 %vm845_vm2, %v8252_v41 }
0x12b2   : > { %15797 = vmatpush3.bf16.msra.mxu1 %v8565_v17  ;;  %15798 = vmatprep.mubr.msk.bf16.mxu1 %vm17303_vm1, %v22162_v28 }
0x12b3   : > { %15793 = vmatmul.mubr.msk.bf16.vlgmr.msra.gmra.mrb[8].mxu0 %vm845_vm2, %v8302_v44  ;;  %15808 = vmatprep.subr.bf16.mxu1 %v22162_v28 }
0x12b4   : > { %15803 = vmatpush3.bf16.msra.mxu0 %v8613_v61  ;;  %15804 = vmatprep.mubr.msk.bf16.mxu0 %vm17303_vm1, %v22162_v28 }
0x12b5   : > { %15814 = vmatprep.subr.bf16.mxu0 %v22162_v28 }
0x12df   : > { %v19937_v56 = vpop.f32.mrb[180].mxu1 }
0x12e0   : > { %22221 = vst [vmem:[#allocation15_spill] sm:$0xff] %v19937_v56  ;;  %v15608_v7 = vpop.f32.mrb[181].mxu1 }
0x12e1   : > { %v6828_v29 = vpop.f32.mrb[182].mxu1  ;;  %v19939_v30 = vpop.f32.mrb[204].mxu0 }
0x12e2   : > { %22222 = vst [vmem:[#allocation19_spill] sm:$0xff] %v19939_v30  ;;  %v15609_v10 = vpop.f32.mrb[183].mxu1  ;;  %v15614_v58 = vpop.f32.mrb[205].mxu0 }
0x12e3   : > { %v6876_v21 = vpop.f32.mrb[206].mxu0 }
0x12e4   : > { %v15615_v38 = vpop.f32.mrb[207].mxu0 }
0x12e7   : > { %v19941_v49 = vpop.f32.mrb[184].mxu1 }
0x12e8   : > { %22223 = vst [vmem:[#allocation20_spill] sm:$0xff] %v19941_v49  ;;  %v15620_v18 = vpop.f32.mrb[185].mxu1 }
0x12e9   : > { %v6924_v36 = vpop.f32.mrb[186].mxu1 }
0x12ea   : > { %v15621_v50 = vpop.f32.mrb[187].mxu1 }
0x12eb   : > { %v19943_v22 = vpop.f32.mrb[208].mxu0 }
0x12ec   : > { %22224 = vst [vmem:[#allocation21_spill] sm:$0xff] %v19943_v22  ;;  %v15626_v11 = vpop.f32.mrb[209].mxu0 }
0x12ed   : > { %v6972_v9 = vpop.f32.mrb[210].mxu0 }
0x12ee   : > { %v15627_v59 = vpop.f32.mrb[211].mxu0 }
0x12ef   : > { %v19945_v54 = vpop.f32.mrb[188].mxu1 }
0x12f0   : > { %22225 = vst [vmem:[#allocation22_spill] sm:$0xff] %v19945_v54  ;;  %v15632_v39 = vpop.f32.mrb[189].mxu1 }
0x12f1   : > { %v7020_v15 = vpop.f32.mrb[190].mxu1 }
0x12f2   : > { %v15633_v62 = vpop.f32.mrb[191].mxu1 }
0x12f3   : > { %v19947_v19 = vpop.f32.mrb[212].mxu0 }
0x12f4   : > { %22226 = vst [vmem:[#allocation23_spill] sm:$0xff] %v19947_v19  ;;  %v15638_v5 = vpop.f32.mrb[213].mxu0 }
0x12f5   : > { %v7068_v31 = vpop.f32.mrb[214].mxu0 }
0x12f6   : > { %v15639_v57 = vpop.f32.mrb[215].mxu0 }
0x12f7   : > { %v19949_v60 = vpop.f32.mrb[192].mxu1 }
0x12f8   : > { %22227 = vst [vmem:[#allocation24_spill] sm:$0xff] %v19949_v60  ;;  %v15644_v8 = vpop.f32.mrb[193].mxu1 }
0x12f9   : > { %v7116_v43 = vpop.f32.mrb[194].mxu1 }
0x12fa   : > { %v15645_v2 = vpop.f32.mrb[195].mxu1 }
0x12fb   : > { %v19951_v55 = vpop.f32.mrb[216].mxu0 }
0x12fc   : > { %22228 = vst [vmem:[#allocation25_spill] sm:$0xff] %v19951_v55  ;;  %v15650_v34 = vpop.f32.mrb[217].mxu0 }
0x12fd   : > { %v7164_v33 = vpop.f32.mrb[218].mxu0 }
0x12fe   : > { %v15651_v13 = vpop.f32.mrb[219].mxu0 }
0x12ff   : > { %v19953_v44 = vpop.f32.mrb[196].mxu1 }
0x1300   : > { %22229 = vst [vmem:[#allocation26_spill] sm:$0xff] %v19953_v44  ;;  %v15656_v37 = vpop.f32.mrb[197].mxu1 }
0x1301   : > { %v7212_v41 = vpop.f32.mrb[198].mxu1 }
0x1302   : > { %v15657_v6 = vpop.f32.mrb[199].mxu1 }
0x1303   : > { %v19955_v53 = vpop.f32.mrb[220].mxu0 }
0x1304   : > { %22230 = vst [vmem:[#allocation27_spill] sm:$0xff] %v19955_v53  ;;  %v15662_v46 = vpop.f32.mrb[221].mxu0 }
0x1305   : > { %v7260_v17 = vpop.f32.mrb[222].mxu0 }
0x1306   : > { %v15663_v61 = vpop.f32.mrb[223].mxu0 }
0x1307   : > { %v19957_v7 = vpop.f32.mrb[200].mxu1 }
0x1308   : > { %22231 = vst [vmem:[#allocation28_spill] sm:$0xff] %v19957_v7  ;;  %v15668_v29 = vpop.f32.mrb[201].mxu1 }
0x1309   : > { %v7308_v10 = vpop.f32.mrb[202].mxu1 }
0x130a   : > { %v15669_v58 = vpop.f32.mrb[203].mxu1 }
0x130b   : > { %v19959_v21 = vpop.f32.mrb[224].mxu0 }
0x130c   : > { %22232 = vst [vmem:[#allocation29_spill] sm:$0xff] %v19959_v21  ;;  %v15674_v38 = vpop.f32.mrb[225].mxu0 }
0x130d   : > { %v7356_v18 = vpop.f32.mrb[226].mxu0 }
0x130e   : > { %v15675_v36 = vpop.f32.mrb[227].mxu0 }
0x130f   : > { %v19961_v50 = vpop.f32.mrb[204].mxu1 }
0x1310   : > { %22233 = vst [vmem:[#allocation30_spill] sm:$0xff] %v19961_v50  ;;  %v15680_v11 = vpop.f32.mrb[205].mxu1 }
0x1311   : > { %v7404_v9 = vpop.f32.mrb[206].mxu1 }
0x1312   : > { %v15681_v59 = vpop.f32.mrb[207].mxu1 }
0x1313   : > { %v19963_v39 = vpop.f32.mrb[228].mxu0 }
0x1314   : > { %22234 = vst [vmem:[#allocation31_spill] sm:$0xff] %v19963_v39  ;;  %v15686_v15 = vpop.f32.mrb[229].mxu0 }
0x1315   : > { %v7452_v62 = vpop.f32.mrb[230].mxu0 }
0x1316   : > { %v15687_v5 = vpop.f32.mrb[231].mxu0 }
0x1344   : > { %v19965_v31 = vpop.f32.mrb[208].mxu1 }
0x1345   : > { %22235 = vst [vmem:[#allocation32_spill] sm:$0xff] %v19965_v31  ;;  %v15692_v57 = vpop.f32.mrb[209].mxu1 }
0x1346   : > { %v7500_v8 = vpop.f32.mrb[210].mxu1  ;;  %v19967_v43 = vpop.f32.mrb[232].mxu0 }
0x1347   : > { %22236 = vst [vmem:[#allocation33_spill] sm:$0xff] %v19967_v43  ;;  %v15693_v2 = vpop.f32.mrb[211].mxu1  ;;  %v15698_v34 = vpop.f32.mrb[233].mxu0 }
0x1348   : > { %v7548_v33 = vpop.f32.mrb[234].mxu0 }
0x1349   : > { %v15699_v13 = vpop.f32.mrb[235].mxu0 }
0x134c   : > { %v7595_v37 = vpop.f32.mrb[212].mxu1 }
0x134d   : > { %v19969_v41 = vmul.f32 0.35355338, %v7595_v37  ;;  %v15704_v6 = vpop.f32.mrb[213].mxu1 }
0x134e   : > { %v7598_v46 = vpop.f32.mrb[214].mxu1  ;;  %v7645_v17 = vpop.f32.mrb[236].mxu0 }
0x134f   : > { %v19971_v61 = vmul.f32 0.35355338, %v7645_v17  ;;  %v15705_v29 = vpop.f32.mrb[215].mxu1  ;;  %v15710_v10 = vpop.f32.mrb[237].mxu0  ;;  %v8367_v58 = vsel %vm845_vm2, %v19969_v41, -inf }
0x1350   : > { %v7648_v38 = vpop.f32.mrb[238].mxu0  ;;  %8368 = vmax.xlane.f32.xlu0 %v8367_v58 }
0x1351   : > { %v15711_v18 = vpop.f32.mrb[239].mxu0  ;;  %v8370_v36 = vsel %vm845_vm2, %v19971_v61, -inf }
0x1352   : > { %8371 = vmax.xlane.f32.xlu1 %v8370_v36 }
0x1354   : > { %v7695_v11 = vpop.f32.mrb[216].mxu1 }
0x1355   : > { %v19977_v9 = vmul.f32 0.35355338, %v7695_v11  ;;  %v15716_v59 = vpop.f32.mrb[217].mxu1 }
0x1356   : > { %v7698_v15 = vpop.f32.mrb[218].mxu1  ;;  %v7745_v62 = vpop.f32.mrb[240].mxu0 }
0x1357   : > { %v19979_v5 = vmul.f32 0.35355338, %v7745_v62  ;;  %v15717_v57 = vpop.f32.mrb[219].mxu1  ;;  %v15722_v8 = vpop.f32.mrb[241].mxu0  ;;  %v8373_v2 = vsel %vm845_vm2, %v19977_v9, -inf }
0x1358   : > { %v7748_v34 = vpop.f32.mrb[242].mxu0  ;;  %8374 = vmax.xlane.f32.xlu0 %v8373_v2 }
0x1359   : > { %v15723_v33 = vpop.f32.mrb[243].mxu0  ;;  %v8376_v13 = vsel %vm845_vm2, %v19979_v5, -inf }
0x135c   : > { %8377 = vmax.xlane.f32.xlu0 %v8376_v13  ;;  %v7795_v37 = vpop.f32.mrb[220].mxu1 }
0x135d   : > { %v19985_v6 = vmul.f32 0.35355338, %v7795_v37  ;;  %v15728_v46 = vpop.f32.mrb[221].mxu1 }
0x135e   : > { %v7798_v17 = vpop.f32.mrb[222].mxu1  ;;  %v7845_v29 = vpop.f32.mrb[244].mxu0 }
0x135f   : > { %v19987_v10 = vmul.f32 0.35355338, %v7845_v29  ;;  %v15729_v58 = vpop.f32.mrb[223].mxu1  ;;  %v15734_v38 = vpop.f32.mrb[245].mxu0  ;;  %v8379_v18 = vsel %vm845_vm2, %v19985_v6, -inf }
0x1360   : > { %v7848_v36 = vpop.f32.mrb[246].mxu0  ;;  %8380 = vmax.xlane.f32.xlu1 %v8379_v18 }
0x1361   : > { %v15735_v11 = vpop.f32.mrb[247].mxu0  ;;  %v8382_v59 = vsel %vm845_vm2, %v19987_v10, -inf }
0x1362   : > { %8383 = vmax.xlane.f32.xlu0 %v8382_v59 }
0x1364   : > { %v7895_v15 = vpop.f32.mrb[224].mxu1 }
0x1365   : > { %v19993_v62 = vmul.f32 0.35355338, %v7895_v15  ;;  %v15740_v57 = vpop.f32.mrb[225].mxu1 }
0x1366   : > { %v7898_v8 = vpop.f32.mrb[226].mxu1  ;;  %v7945_v2 = vpop.f32.mrb[248].mxu0 }
0x1367   : > { %v19995_v34 = vmul.f32 0.35355338, %v7945_v2  ;;  %v15741_v33 = vpop.f32.mrb[227].mxu1  ;;  %v15746_v13 = vpop.f32.mrb[249].mxu0  ;;  %v8385_v37 = vsel %vm845_vm2, %v19993_v62, -inf }
0x1368   : > { %v7948_v46 = vpop.f32.mrb[250].mxu0  ;;  %8386 = vmax.xlane.f32.xlu1 %v8385_v37 }
0x1369   : > { %v15747_v17 = vpop.f32.mrb[251].mxu0  ;;  %v8388_v29 = vsel %vm845_vm2, %v19995_v34, -inf }
0x136a   : > { %8389 = vmax.xlane.f32.xlu0 %v8388_v29 }
0x136c   : > { %v7995_v58 = vpop.f32.mrb[228].mxu1 }
0x136d   : > { %v20001_v38 = vmul.f32 0.35355338, %v7995_v58  ;;  %v15752_v18 = vpop.f32.mrb[229].mxu1 }
0x136e   : > { %v7998_v36 = vpop.f32.mrb[230].mxu1  ;;  %v8045_v11 = vpop.f32.mrb[252].mxu0 }
0x136f   : > { %v20003_v59 = vmul.f32 0.35355338, %v8045_v11  ;;  %v15753_v15 = vpop.f32.mrb[231].mxu1  ;;  %v15758_v57 = vpop.f32.mrb[253].mxu0  ;;  %v8391_v8 = vsel %vm845_vm2, %v20001_v38, -inf }
0x1370   : > { %v8048_v2 = vpop.f32.mrb[254].mxu0  ;;  %8392 = vmax.xlane.f32.xlu1 %v8391_v8 }
0x1371   : > { %v15759_v33 = vpop.f32.mrb[255].mxu0  ;;  %v8394_v13 = vsel %vm845_vm2, %v20003_v59, -inf }
0x1372   : > { %8395 = vmax.xlane.f32.xlu0 %v8394_v13 }
0x1374   : > { %v8095_v37 = vpop.f32.mrb[232].mxu1 }
0x1375   : > { %v20009_v46 = vmul.f32 0.35355338, %v8095_v37  ;;  %v15764_v17 = vpop.f32.mrb[233].mxu1 }
0x1376   : > { %v8098_v29 = vpop.f32.mrb[234].mxu1  ;;  %v8145_v58 = vpop.f32.mrb[0].mxu0 }
0x1377   : > { %v20011_v18 = vmul.f32 0.35355338, %v8145_v58  ;;  %v15765_v36 = vpop.f32.mrb[235].mxu1  ;;  %v15770_v11 = vpop.f32.mrb[1].mxu0  ;;  %v8397_v15 = vsel %vm845_vm2, %v20009_v46, -inf }
0x1378   : > { %v8148_v57 = vpop.f32.mrb[2].mxu0  ;;  %8398 = vmax.xlane.f32.xlu1 %v8397_v15 }
0x1379   : > { %v15771_v8 = vpop.f32.mrb[3].mxu0  ;;  %v8400_v2 = vsel %vm845_vm2, %v20011_v18, -inf }
0x137a   : > { %8401 = vmax.xlane.f32.xlu0 %v8400_v2 }
0x137c   : > { %v8195_v33 = vpop.f32.mrb[236].mxu1 }
0x137d   : > { %v20017_v13 = vmul.f32 0.35355338, %v8195_v33  ;;  %v15776_v37 = vpop.f32.mrb[237].mxu1 }
0x137e   : > { %v8198_v17 = vpop.f32.mrb[238].mxu1  ;;  %v8245_v29 = vpop.f32.mrb[4].mxu0 }
0x137f   : > { %v20019_v58 = vmul.f32 0.35355338, %v8245_v29  ;;  %v15777_v36 = vpop.f32.mrb[239].mxu1  ;;  %v15782_v11 = vpop.f32.mrb[5].mxu0  ;;  %v8403_v20 = vsel %vm845_vm2, %v20017_v13, -inf }
0x1380   : > { %v8248_v57 = vpop.f32.mrb[6].mxu0  ;;  %8404 = vmax.xlane.f32.xlu1 %v8403_v20 }
0x1381   : > { %v15783_v15 = vpop.f32.mrb[7].mxu0  ;;  %v8406_v8 = vsel %vm845_vm2, %v20019_v58, -inf }
0x1382   : > { %8407 = vmax.xlane.f32.xlu0 %v8406_v8 }
0x1384   : > { %v8295_v2 = vpop.f32.mrb[240].mxu1 }
0x1385   : > { %v20025_v33 = vmul.f32 0.35355338, %v8295_v2  ;;  %v15788_v37 = vpop.f32.mrb[241].mxu1  ;;  %v20041_v2 = vpop.permute.xlu0 %8703 }
0x1386   : > { %v8298_v17 = vpop.f32.mrb[242].mxu1  ;;  %v8345_v3 = vpop.f32.mrb[8].mxu0 }
0x1387   : > { %v20027_v29 = vmul.f32 0.35355338, %v8345_v3  ;;  %v15789_v36 = vpop.f32.mrb[243].mxu1  ;;  %v15794_v11 = vpop.f32.mrb[9].mxu0  ;;  %v8409_v48 = vsel %vm845_vm2, %v20025_v33, -inf }
0x1388   : > { %v8348_v57 = vpop.f32.mrb[10].mxu0  ;;  %8410 = vmax.xlane.f32.xlu1 %v8409_v48  ;;  %v20037_v3 = vpop.permute.xlu1 %8655 }
0x1389   : > { %v15795_v20 = vpop.f32.mrb[11].mxu0  ;;  %v8412_v15 = vsel %vm845_vm2, %v20027_v29, -inf  ;;  %v20045_v48 = vpop.permute.xlu0 %8799 }
0x138a   : > { %8413 = vmax.xlane.f32.xlu0 %v8412_v15 }
0x138c   : > { %v20039_v8 = vpop.permute.xlu1 %8751 }
0x138d   : > { %v20049_v36 = vpop.permute.xlu0 %8895 }
0x1390   : > { %v20043_v37 = vpop.permute.xlu1 %8847 }
0x1391   : > { %v20053_v57 = vpop.permute.xlu0 %8991 }
0x1394   : > { %v20047_v17 = vpop.permute.xlu1 %8943 }
0x1398   : > { %v20051_v11 = vpop.permute.xlu1 %9039 }
0x1399   : > { %9183 = vrot.lane.b32.xlu1 %v19347_v23, %s22220_s24 }
0x139c   : > { %v20055_v20 = vpop.permute.xlu1 %9087 }
0x13a0   : > { %9135 = vrot.lane.b32.xlu0 %v19343_v32, %s22220_s24 }
0x13dd   : > { %v8369_v15 = vpop.xlane.xlu0 %8368 }
0x13de   : > { %v8415_v24 = vsub.f32 %v19969_v41, %v8369_v15 }
0x13df   : > { %v8372_v35 = vpop.xlane.xlu1 %8371 }
0x13e0   : > { %v8431_v14 = vmul.f32 1.442695, %v8415_v24  ;;  %v8416_v51 = vsub.f32 %v19971_v61, %v8372_v35 }
0x13e2   : > { %16990 = vpow2.f32 %v8431_v14  ;;  %v8433_v31 = vmul.f32 1.442695, %v8416_v51 }
0x13e4   : > { %16992 = vpow2.f32 %v8433_v31 }
0x13e5   : > { %v8375_v43 = vpop.xlane.xlu0 %8374 }
0x13e6   : > { %v8417_v50 = vsub.f32 %v19977_v9, %v8375_v43 }
0x13e8   : > { %v8435_v39 = vmul.f32 1.442695, %v8417_v50 }
0x13e9   : > { %v8378_v7 = vpop.xlane.xlu0 %8377 }
0x13ea   : > { %16994 = vpow2.f32 %v8435_v39  ;;  %v8418_v21 = vsub.f32 %v19979_v5, %v8378_v7 }
0x13ec   : > { %v20061_v44 = vpop.eup %16990  ;;  %v8437_v53 = vmul.f32 1.442695, %v8418_v21 }
0x13ed   : > { %v8381_v60 = vpop.xlane.xlu1 %8380  ;;  %v8463_v24 = vsel %vm845_vm2, %v20061_v44, 0.0 }
0x13ee   : > { %v20065_v41 = vpop.eup %16992  ;;  %16996 = vpow2.f32 %v8437_v53  ;;  %v8419_v51 = vsub.f32 %v19985_v6, %v8381_v60  ;;  %8464 = vadd.xlane.f32.xlu1 %v8463_v24 }
0x13ef   : > { %v8384_v35 = vpop.xlane.xlu0 %8383  ;;  %v8466_v14 = vsel %vm845_vm2, %v20065_v41, 0.0 }
0x13f0   : > { %v8439_v50 = vmul.f32 1.442695, %v8419_v51  ;;  %v8420_v7 = vsub.f32 %v19987_v10, %v8384_v35  ;;  %8467 = vadd.xlane.f32.xlu0 %v8466_v14 }
0x13f2   : > { %16998 = vpow2.f32 %v8439_v50  ;;  %v8441_v21 = vmul.f32 1.442695, %v8420_v7 }
0x13f4   : > { %v20071_v39 = vpop.eup %16994  ;;  %17000 = vpow2.f32 %v8441_v21 }
0x13f5   : > { %v8387_v31 = vpop.xlane.xlu1 %8386  ;;  %v8469_v53 = vsel %vm845_vm2, %v20071_v39, 0.0 }
0x13f6   : > { %v8421_v60 = vsub.f32 %v19993_v62, %v8387_v31  ;;  %8470 = vadd.xlane.f32.xlu1 %v8469_v53 }
0x13f7   : > { %v8390_v43 = vpop.xlane.xlu0 %8389 }
0x13f8   : > { %v20076_v61 = vpop.eup %16996  ;;  %v8443_v9 = vmul.f32 1.442695, %v8421_v60  ;;  %v8422_v5 = vsub.f32 %v19995_v34, %v8390_v43 }
0x13f9   : > { %v8472_v6 = vsel %vm845_vm2, %v20076_v61, 0.0 }
0x13fa   : > { %17002 = vpow2.f32 %v8443_v9  ;;  %v8445_v10 = vmul.f32 1.442695, %v8422_v5  ;;  %8473 = vadd.xlane.f32.xlu0 %v8472_v6 }
0x13fc   : > { %v20081_v15 = vpop.eup %16998  ;;  %17004 = vpow2.f32 %v8445_v10 }
0x13fd   : > { %v8393_v24 = vpop.xlane.xlu1 %8392  ;;  %v8475_v62 = vsel %vm845_vm2, %v20081_v15, 0.0 }
0x13fe   : > { %v20085_v51 = vpop.eup %17000  ;;  %v8423_v35 = vsub.f32 %v20001_v38, %v8393_v24  ;;  %8476 = vadd.xlane.f32.xlu1 %v8475_v62 }
0x13ff   : > { %v8396_v14 = vpop.xlane.xlu0 %8395  ;;  %v8478_v34 = vsel %vm845_vm2, %v20085_v51, 0.0 }
0x1400   : > { %v8447_v50 = vmul.f32 1.442695, %v8423_v35  ;;  %v8424_v7 = vsub.f32 %v20003_v59, %v8396_v14  ;;  %8479 = vadd.xlane.f32.xlu0 %v8478_v34 }
0x1402   : > { %17006 = vpow2.f32 %v8447_v50  ;;  %v8449_v21 = vmul.f32 1.442695, %v8424_v7 }
0x1404   : > { %v20091_v31 = vpop.eup %17002  ;;  %17008 = vpow2.f32 %v8449_v21 }
0x1405   : > { %v8399_v53 = vpop.xlane.xlu1 %8398  ;;  %v8481_v60 = vsel %vm845_vm2, %v20091_v31, 0.0 }
0x1406   : > { %v20095_v43 = vpop.eup %17004  ;;  %v8425_v38 = vsub.f32 %v20009_v46, %v8399_v53  ;;  %8482 = vadd.xlane.f32.xlu1 %v8481_v60 }
0x1407   : > { %v8402_v9 = vpop.xlane.xlu0 %8401  ;;  %v8484_v5 = vsel %vm845_vm2, %v20095_v43, 0.0 }
0x1408   : > { %v8451_v59 = vmul.f32 1.442695, %v8425_v38  ;;  %v8426_v6 = vsub.f32 %v20011_v18, %v8402_v9  ;;  %8485 = vadd.xlane.f32.xlu0 %v8484_v5 }
0x140a   : > { %17010 = vpow2.f32 %v8451_v59  ;;  %v8453_v10 = vmul.f32 1.442695, %v8426_v6 }
0x140c   : > { %v20101_v24 = vpop.eup %17006  ;;  %17012 = vpow2.f32 %v8453_v10 }
0x140d   : > { %v8405_v62 = vpop.xlane.xlu1 %8404  ;;  %v8487_v35 = vsel %vm845_vm2, %v20101_v24, 0.0 }
0x140e   : > { %v20105_v14 = vpop.eup %17008  ;;  %v8427_v46 = vsub.f32 %v20017_v13, %v8405_v62  ;;  %8488 = vadd.xlane.f32.xlu1 %v8487_v35 }
0x140f   : > { %v8408_v34 = vpop.xlane.xlu0 %8407  ;;  %v8490_v50 = vsel %vm845_vm2, %v20105_v14, 0.0 }
0x1410   : > { %v8455_v18 = vmul.f32 1.442695, %v8427_v46  ;;  %v8428_v7 = vsub.f32 %v20019_v58, %v8408_v34  ;;  %8491 = vadd.xlane.f32.xlu0 %v8490_v50 }
0x1412   : > { %17014 = vpow2.f32 %v8455_v18  ;;  %v8457_v21 = vmul.f32 1.442695, %v8428_v7 }
0x1414   : > { %v20111_v53 = vpop.eup %17010  ;;  %17016 = vpow2.f32 %v8457_v21 }
0x1415   : > { %v8493_v60 = vsel %vm845_vm2, %v20111_v53, 0.0  ;;  %v8411_v6 = vpop.xlane.xlu1 %8410 }
0x1416   : > { %v20115_v38 = vpop.eup %17012  ;;  %8494 = vadd.xlane.f32.xlu1 %v8493_v60  ;;  %v8429_v62 = vsub.f32 %v20025_v33, %v8411_v6 }
0x1417   : > { %v8496_v13 = vsel %vm845_vm2, %v20115_v38, 0.0  ;;  %v8414_v10 = vpop.xlane.xlu0 %8413 }
0x1418   : > { %8497 = vadd.xlane.f32.xlu0 %v8496_v13  ;;  %v8430_v35 = vsub.f32 %v20027_v29, %v8414_v10  ;;  %v8459_v46 = vmul.f32 1.442695, %v8429_v62 }
0x1419   : > { %v20157_v33 = vpop.permute.xlu1 %9183 }
0x141a   : > { %v8461_v34 = vmul.f32 1.442695, %v8430_v35  ;;  %17018 = vpow2.f32 %v8459_v46 }
0x141b   : > { %v20163_v29 = vpop.permute.xlu0 %9135 }
0x141c   : > { %v20119_v9 = vpop.eup %17014  ;;  %17020 = vpow2.f32 %v8461_v34  ;;  %v8661_v34 = vsel %vm6787_vm5, %v20037_v3, 0 }
0x141d   : > { %v8499_v58 = vsel %vm845_vm2, %v20119_v9, 0.0 }
0x141e   : > { %v20123_v5 = vpop.eup %17016  ;;  %8500 = vadd.xlane.f32.xlu1 %v8499_v58 }
0x141f   : > { %v8502_v59 = vsel %vm845_vm2, %v20123_v5, 0.0 }
0x1420   : > { %8503 = vadd.xlane.f32.xlu0 %v8502_v59 }
0x1424   : > { %v20133_v50 = vpop.eup %17018 }
0x1425   : > { %v8505_v7 = vsel %vm845_vm2, %v20133_v50, 0.0 }
0x1426   : > { %v20135_v18 = vpop.eup %17020 }
0x1427   : > { %v8508_v21 = vsel %vm845_vm2, %v20135_v18, 0.0 }
0x142f   : > { %9279 = vrot.lane.b32.xlu1 %v19353_v25, %s22220_s24 }
0x1436   : > { %9231 = vrot.lane.b32.xlu0 %v19345_v63, %s22220_s24 }
0x1453   : > { %8506 = vadd.xlane.f32.xlu1 %v8505_v7 }
0x1455   : > { %8509 = vadd.xlane.f32.xlu0 %v8508_v21 }
0x1464   : > { %9379 = vrot.lane.b32.xlu1 %v19299_v45, %s22237_s26 }
0x1468   : > { %9377 = vrot.lane.b32.xlu1 %v19299_v45, %s22238_s27 }
0x146b   : > { %9329 = vrot.lane.b32.xlu0 %v19297_v42, %s22237_s26 }
0x146c   : > { %9479 = vrot.lane.b32.xlu1 %v19309_v0, %s22237_s26 }
0x146f   : > { %9327 = vrot.lane.b32.xlu0 %v19297_v42, %s22238_s27 }
0x1470   : > { %9477 = vrot.lane.b32.xlu1 %v19309_v0, %s22238_s27 }
0x1473   : > { %9429 = vrot.lane.b32.xlu0 %v19303_v26, %s22237_s26 }
0x1474   : > { %9579 = vrot.lane.b32.xlu1 %v19315_v47, %s22237_s26 }
0x1477   : > { %9427 = vrot.lane.b32.xlu0 %v19303_v26, %s22238_s27 }
0x1478   : > { %9577 = vrot.lane.b32.xlu1 %v19315_v47, %s22238_s27 }
0x147b   : > { %v8465_v60 = vpop.xlane.xlu1 %8464  ;;  %9529 = vrot.lane.b32.xlu0 %v19311_v27, %s22237_s26 }
0x147c   : > { %17022 = vrcp.f32 %v8465_v60  ;;  %9679 = vrot.lane.b32.xlu1 %v19325_v52, %s22237_s26 }
0x147d   : > { %v8468_v13 = vpop.xlane.xlu0 %8467 }
0x147e   : > { %17024 = vrcp.f32 %v8468_v13 }
0x147f   : > { %9527 = vrot.lane.b32.xlu0 %v19311_v27, %s22238_s27 }
0x1480   : > { %9677 = vrot.lane.b32.xlu1 %v19325_v52, %s22238_s27 }
0x1483   : > { %v8471_v58 = vpop.xlane.xlu1 %8470  ;;  %9629 = vrot.lane.b32.xlu0 %v19313_v40, %s22237_s26 }
0x1484   : > { %17026 = vrcp.f32 %v8471_v58  ;;  %9779 = vrot.lane.b32.xlu1 %v19331_v4, %s22237_s26  ;;  %v8757_v58 = vsel %vm6787_vm5, %v20039_v8, 0 }
0x1486   : > { %v17023_v59 = vpop.eup %17022 }
0x1487   : > { %9627 = vrot.lane.b32.xlu0 %v19313_v40, %s22238_s27  ;;  %v8474_v6 = vpop.xlane.xlu0 %8473  ;;  %v8527_v10 = vmul.f32 %v17023_v59, %v20061_v44  ;;  %v8709_v44 = vsel %vm6787_vm5, %v20041_v2, 0 }
0x1488   : > { %v17025_v62 = vpop.eup %17024  ;;  %17028 = vrcp.f32 %v8474_v6  ;;  %9777 = vrot.lane.b32.xlu1 %v19331_v4, %s22238_s27 }
0x1489   : > { %v8528_v35 = vmul.f32 %v17025_v62, %v20065_v41  ;;  %v8543_v46 = vpack.c.bf16 %v8527_v10, %v8527_v10 }
0x148b   : > { %v8544_v7 = vpack.c.bf16 %v8528_v35, %v8528_v35  ;;  %15799 = vmatmul.mubr.msk.bf16.vlgmr.msra.gmra.mrb[244].mxu1 %vm845_vm2, %v8543_v46  ;;  %v8477_v21 = vpop.xlane.xlu1 %8476  ;;  %9729 = vrot.lane.b32.xlu0 %v19327_v12, %s22237_s26 }
0x148c   : > { %15809 = vmatpush3.bf16.msra.mxu1 %v8661_v34  ;;  %17030 = vrcp.f32 %v8477_v21  ;;  %9879 = vrot.lane.b32.xlu1 %v19337_v16, %s22237_s26 }
0x148d   : > { %15805 = vmatmul.mubr.msk.bf16.vlgmr.msra.gmra.mrb[12].mxu0 %vm845_vm2, %v8544_v7  ;;  %v8480_v41 = vpop.xlane.xlu0 %8479  ;;  %15810 = vmatprep.mubr.msk.bf16.mxu1 %vm17303_vm1, %v22162_v28 }
0x148e   : > { %v17027_v3 = vpop.eup %17026  ;;  %15815 = vmatpush3.bf16.msra.mxu0 %v8709_v44  ;;  %17032 = vrcp.f32 %v8480_v41  ;;  %15820 = vmatprep.subr.bf16.mxu1 %v22162_v28 }
0x148f   : > { %9727 = vrot.lane.b32.xlu0 %v19327_v12, %s22238_s27  ;;  %v8529_v60 = vmul.f32 %v17027_v3, %v20071_v39  ;;  %15816 = vmatprep.mubr.msk.bf16.mxu0 %vm17303_vm1, %v22162_v28 }
0x1490   : > { %9877 = vrot.lane.b32.xlu1 %v19337_v16, %s22238_s27  ;;  %15826 = vmatprep.subr.bf16.mxu0 %v22162_v28 }
0x1491   : > { %v8545_v2 = vpack.c.bf16 %v8529_v60, %v8529_v60 }
0x1492   : > { %v17029_v13 = vpop.eup %17028 }
0x1493   : > { %v8530_v59 = vmul.f32 %v17029_v13, %v20076_v61  ;;  %15811 = vmatmul.mubr.msk.bf16.vlgmr.msra.gmra.mrb[248].mxu1 %vm845_vm2, %v8545_v2  ;;  %v8483_v6 = vpop.xlane.xlu1 %8482  ;;  %9829 = vrot.lane.b32.xlu0 %v19329_v1, %s22237_s26  ;;  %v8805_v61 = vsel %vm6787_vm5, %v20045_v48, 0  ;;  %v8853_v48 = vsel %vm6787_vm5, %v20043_v37, 0  ;;  %v8901_v37 = vsel %vm6787_vm5, %v20049_v36, 0 }
0x1494   : > { %15821 = vmatpush3.bf16.msra.mxu1 %v8757_v58  ;;  %17034 = vrcp.f32 %v8483_v6  ;;  %9979 = vrot.lane.b32.xlu1 %v19347_v23, %s22237_s26  ;;  %v8949_v36 = vsel %vm6787_vm5, %v20047_v17, 0  ;;  %v8997_v17 = vsel %vm6787_vm5, %v20053_v57, 0  ;;  %v9045_v57 = vsel %vm6787_vm5, %v20051_v11, 0 }
0x1495   : > { %v8546_v39 = vpack.c.bf16 %v8530_v59, %v8530_v59  ;;  %v8486_v10 = vpop.xlane.xlu0 %8485  ;;  %15822 = vmatprep.mubr.msk.bf16.mxu1 %vm17303_vm1, %v22162_v28  ;;  %15832 = vmatprep.subr.bf16.mxu1 %v22162_v28  ;;  %v9093_v11 = vsel %vm6787_vm5, %v20055_v20, 0  ;;  %v9141_v20 = vsel %vm6787_vm5, %v20163_v29, 0 }
0x1496   : > { %v17031_v8 = vpop.eup %17030  ;;  %17036 = vrcp.f32 %v8486_v10 }
0x1497   : > { %9827 = vrot.lane.b32.xlu0 %v19329_v1, %s22238_s27  ;;  %15817 = vmatmul.mubr.msk.bf16.vlgmr.msra.gmra.mrb[16].mxu0 %vm845_vm2, %v8546_v39  ;;  %v8531_v62 = vmul.f32 %v17031_v8, %v20081_v15 }
0x1498   : > { %v17033_v35 = vpop.eup %17032  ;;  %15827 = vmatpush3.bf16.msra.mxu0 %v8805_v61  ;;  %9977 = vrot.lane.b32.xlu1 %v19347_v23, %s22238_s27 }
0x1499   : > { %v8532_v46 = vmul.f32 %v17033_v35, %v20085_v51  ;;  %v8547_v34 = vpack.c.bf16 %v8531_v62, %v8531_v62  ;;  %15828 = vmatprep.mubr.msk.bf16.mxu0 %vm17303_vm1, %v22162_v28  ;;  %15838 = vmatprep.subr.bf16.mxu0 %v22162_v28 }
0x149b   : > { %15823 = vmatmul.mubr.msk.bf16.vlgmr.msra.gmra.mrb[252].mxu1 %vm845_vm2, %v8547_v34  ;;  %v8489_v7 = vpop.xlane.xlu1 %8488  ;;  %9929 = vrot.lane.b32.xlu0 %v19343_v32, %s22237_s26  ;;  %v8548_v15 = vpack.c.bf16 %v8532_v46, %v8532_v46  ;;  %v9189_v34 = vsel %vm6787_vm5, %v20157_v33, 0 }
0x149c   : > { %15833 = vmatpush3.bf16.msra.mxu1 %v8853_v48  ;;  %17038 = vrcp.f32 %v8489_v7  ;;  %10079 = vrot.lane.b32.xlu1 %v19353_v25, %s22237_s26 }
0x149d   : > { %v8492_v51 = vpop.xlane.xlu0 %8491  ;;  %15834 = vmatprep.mubr.msk.bf16.mxu1 %vm17303_vm1, %v22162_v28  ;;  %15844 = vmatprep.subr.bf16.mxu1 %v22162_v28 }
0x149e   : > { %v17035_v21 = vpop.eup %17034  ;;  %17040 = vrcp.f32 %v8492_v51 }
0x149f   : > { %v8533_v44 = vmul.f32 %v17035_v21, %v20091_v31  ;;  %9927 = vrot.lane.b32.xlu0 %v19343_v32, %s22238_s27  ;;  %15829 = vmatmul.mubr.msk.bf16.vlgmr.msra.gmra.mrb[20].mxu0 %vm845_vm2, %v8548_v15 }
0x14a0   : > { %v17037_v41 = vpop.eup %17036  ;;  %15839 = vmatpush3.bf16.msra.mxu0 %v8901_v37  ;;  %10077 = vrot.lane.b32.xlu1 %v19353_v25, %s22238_s27 }
0x14a1   : > { %v8549_v3 = vpack.c.bf16 %v8533_v44, %v8533_v44  ;;  %v8534_v60 = vmul.f32 %v17037_v41, %v20095_v43  ;;  %15840 = vmatprep.mubr.msk.bf16.mxu0 %vm17303_vm1, %v22162_v28  ;;  %15850 = vmatprep.subr.bf16.mxu0 %v22162_v28 }
0x14a3   : > { %15835 = vmatmul.mubr.msk.bf16.vlgmr.msra.gmra.mrb[0].mxu1 %vm845_vm2, %v8549_v3  ;;  %v8495_v31 = vpop.xlane.xlu1 %8494  ;;  %10029 = vrot.lane.b32.xlu0 %v19345_v63, %s22237_s26  ;;  %v8550_v43 = vpack.c.bf16 %v8534_v60, %v8534_v60 }
0x14a4   : > { %15845 = vmatpush3.bf16.msra.mxu1 %v8949_v36  ;;  %17042 = vrcp.f32 %v8495_v31  ;;  %10335 = vrot.lane.b32.xlu1 %v19297_v42, %s22239_s0 }
0x14a5   : > { %v8498_v2 = vpop.xlane.xlu0 %8497  ;;  %15846 = vmatprep.mubr.msk.bf16.mxu1 %vm17303_vm1, %v22162_v28  ;;  %15856 = vmatprep.subr.bf16.mxu1 %v22162_v28 }
0x14a6   : > { %v17039_v13 = vpop.eup %17038  ;;  %17044 = vrcp.f32 %v8498_v2 }
0x14a7   : > { %v8535_v58 = vmul.f32 %v17039_v13, %v20101_v24  ;;  %10027 = vrot.lane.b32.xlu0 %v19345_v63, %s22238_s27  ;;  %15841 = vmatmul.mubr.msk.bf16.vlgmr.msra.gmra.mrb[24].mxu0 %vm845_vm2, %v8550_v43 }
0x14a8   : > { %v17041_v59 = vpop.eup %17040  ;;  %15851 = vmatpush3.bf16.msra.mxu0 %v8997_v17  ;;  %10431 = vrot.lane.b32.xlu1 %v19303_v26, %s22239_s0 }
0x14a9   : > { %v8551_v6 = vpack.c.bf16 %v8535_v58, %v8535_v58  ;;  %v8536_v39 = vmul.f32 %v17041_v59, %v20105_v14  ;;  %15852 = vmatprep.mubr.msk.bf16.mxu0 %vm17303_vm1, %v22162_v28  ;;  %15862 = vmatprep.subr.bf16.mxu0 %v22162_v28 }
0x14ab   : > { %15847 = vmatmul.mubr.msk.bf16.vlgmr.msra.gmra.mrb[4].mxu1 %vm845_vm2, %v8551_v6  ;;  %v8501_v24 = vpop.xlane.xlu1 %8500  ;;  %10383 = vrot.lane.b32.xlu0 %v19299_v45, %s22239_s0  ;;  %v8552_v14 = vpack.c.bf16 %v8536_v39, %v8536_v39 }
0x14ac   : > { %15857 = vmatpush3.bf16.msra.mxu1 %v9045_v57  ;;  %17046 = vrcp.f32 %v8501_v24  ;;  %10527 = vrot.lane.b32.xlu1 %v19311_v27, %s22239_s0 }
0x14ad   : > { %v8504_v10 = vpop.xlane.xlu0 %8503  ;;  %15858 = vmatprep.mubr.msk.bf16.mxu1 %vm17303_vm1, %v22162_v28  ;;  %15868 = vmatprep.subr.bf16.mxu1 %v22162_v28 }
0x14ae   : > { %v17043_v8 = vpop.eup %17042  ;;  %17048 = vrcp.f32 %v8504_v10 }
0x14af   : > { %v8537_v61 = vmul.f32 %v17043_v8, %v20111_v53  ;;  %10479 = vrot.lane.b32.xlu0 %v19309_v0, %s22239_s0  ;;  %15853 = vmatmul.mubr.msk.bf16.vlgmr.msra.gmra.mrb[28].mxu0 %vm845_vm2, %v8552_v14  ;;  %v9280_v33 = vpop.permute.xlu1 %9279 }
0x14b0   : > { %v17045_v62 = vpop.eup %17044  ;;  %15863 = vmatpush3.bf16.msra.mxu0 %v9093_v11  ;;  %10623 = vrot.lane.b32.xlu1 %v19313_v40, %s22239_s0 }
0x14b1   : > { %v8553_v35 = vpack.c.bf16 %v8537_v61, %v8537_v61  ;;  %v8538_v46 = vmul.f32 %v17045_v62, %v20115_v38  ;;  %15864 = vmatprep.mubr.msk.bf16.mxu0 %vm17303_vm1, %v22162_v28  ;;  %15874 = vmatprep.subr.bf16.mxu0 %v22162_v28  ;;  %v9232_v7 = vpop.permute.xlu0 %9231 }
0x14b3   : > { %15859 = vmatmul.mubr.msk.bf16.vlgmr.msra.gmra.mrb[8].mxu1 %vm845_vm2, %v8553_v35  ;;  %10575 = vrot.lane.b32.xlu0 %v19315_v47, %s22239_s0  ;;  %v8554_v53 = vpack.c.bf16 %v8538_v46, %v8538_v46 }
0x14b4   : > { %15869 = vmatpush3.bf16.msra.mxu1 %v9141_v20  ;;  %10719 = vrot.lane.b32.xlu1 %v19327_v12, %s22239_s0 }
0x14b5   : > { %15870 = vmatprep.mubr.msk.bf16.mxu1 %vm17303_vm1, %v22162_v28  ;;  %15880 = vmatprep.subr.bf16.mxu1 %v22162_v28 }
0x14b6   : > { %v17047_v38 = vpop.eup %17046 }
0x14b7   : > { %v8539_v29 = vmul.f32 %v17047_v38, %v20119_v9  ;;  %10671 = vrot.lane.b32.xlu0 %v19325_v52, %s22239_s0  ;;  %15865 = vmatmul.mubr.msk.bf16.vlgmr.msra.gmra.mrb[32].mxu0 %vm845_vm2, %v8554_v53  ;;  %v9237_v9 = vsel %vm6787_vm5, %v9232_v7, 0 }
0x14b8   : > { %v17049_v48 = vpop.eup %17048  ;;  %15875 = vmatpush3.bf16.msra.mxu0 %v9189_v34  ;;  %10815 = vrot.lane.b32.xlu1 %v19329_v1, %s22239_s0 }
0x14b9   : > { %v8555_v15 = vpack.c.bf16 %v8539_v29, %v8539_v29  ;;  %v8540_v51 = vmul.f32 %v17049_v48, %v20123_v5  ;;  %15876 = vmatprep.mubr.msk.bf16.mxu0 %vm17303_vm1, %v22162_v28  ;;  %15886 = vmatprep.subr.bf16.mxu0 %v22162_v28  ;;  %v9285_v5 = vsel %vm6787_vm5, %v9280_v33, 0 }
0x14bb   : > { %10767 = vrot.lane.b32.xlu0 %v19331_v4, %s22239_s0  ;;  %15871 = vmatmul.mubr.msk.bf16.vlgmr.msra.gmra.mrb[12].mxu1 %vm845_vm2, %v8555_v15  ;;  %v8556_v21 = vpack.c.bf16 %v8540_v51, %v8540_v51 }
0x14bc   : > { %15881 = vmatpush3.bf16.msra.mxu1 %v9237_v9  ;;  %10863 = vrot.lane.b32.xlu1 %v19337_v16, %s22239_s0 }
0x14bd   : > { %15882 = vmatprep.mubr.msk.bf16.mxu1 %vm17303_vm1, %v22162_v28  ;;  %15892 = vmatprep.subr.bf16.mxu1 %v22162_v28 }
0x14bf   : > { %15877 = vmatmul.mubr.msk.bf16.vlgmr.msra.gmra.mrb[36].mxu0 %vm845_vm2, %v8556_v21 }
0x14c0   : > { %15887 = vmatpush3.bf16.msra.mxu0 %v9285_v5  ;;  %15888 = vmatprep.mubr.msk.bf16.mxu0 %vm17303_vm1, %v22162_v28 }
0x14c1   : > { %15898 = vmatprep.subr.bf16.mxu0 %v22162_v28 }
0x14e0   : > { %v8507_v37 = vpop.xlane.xlu1 %8506 }
0x14e1   : > { %17050 = vrcp.f32 %v8507_v37 }
0x14e2   : > { %v8510_v44 = vpop.xlane.xlu0 %8509 }
0x14e3   : > { %17052 = vrcp.f32 %v8510_v44 }
0x14e4   : > { %v9380_v41 = vpop.permute.xlu1 %9379 }
0x14e5   : > { %v9385_v24 = vsel %vm845_vm2, %v9380_v41, 0 }
0x14e6   : > { %v9330_v3 = vpop.permute.xlu0 %9329 }
0x14e7   : > { %v9335_v39 = vsel %vm845_vm2, %v9330_v3, 0 }
0x14e8   : > { %v9378_v60 = vpop.permute.xlu1 %9377 }
0x14ea   : > { %v9328_v36 = vpop.permute.xlu0 %9327 }
0x14eb   : > { %v17051_v31 = vpop.eup %17050 }
0x14ec   : > { %v8541_v43 = vmul.f32 %v17051_v31, %v20133_v50  ;;  %v9480_v2 = vpop.permute.xlu1 %9479 }
0x14ed   : > { %v17053_v13 = vpop.eup %17052  ;;  %v9485_v11 = vsel %vm845_vm2, %v9480_v2, 0 }
0x14ee   : > { %v8557_v17 = vpack.c.bf16 %v8541_v43, %v8541_v43  ;;  %v8542_v58 = vmul.f32 %v17053_v13, %v20135_v18  ;;  %v9430_v59 = vpop.permute.xlu0 %9429 }
0x14ef   : > { %v9435_v10 = vsel %vm845_vm2, %v9430_v59, 0 }
0x14f0   : > { %v8558_v6 = vpack.c.bf16 %v8542_v58, %v8542_v58  ;;  %v9478_v57 = vpop.permute.xlu1 %9477  ;;  %15883 = vmatmul.mubr.msk.bf16.vlgmr.msra.gmra.mrb[16].mxu1 %vm845_vm2, %v8557_v17 }
0x14f1   : > { %15893 = vmatpush3.bf16.xpose.msra.mxu1 %v9335_v39  ;;  %15894 = vmatprep.mubr.msk.bf16.mxu1 %vm17303_vm1, %v22162_v28 }
0x14f2   : > { %15889 = vmatmul.mubr.msk.bf16.vlgmr.msra.gmra.mrb[40].mxu0 %vm845_vm2, %v8558_v6  ;;  %v9428_v50 = vpop.permute.xlu0 %9427  ;;  %15904 = vmatprep.subr.bf16.mxu1 %v22162_v28 }
0x14f3   : > { %15899 = vmatpush3.bf16.xpose.msra.mxu0 %v9385_v24  ;;  %15900 = vmatprep.mubr.msk.bf16.mxu0 %vm17303_vm1, %v22162_v28 }
0x14f4   : > { %v9580_v18 = vpop.permute.xlu1 %9579  ;;  %15910 = vmatprep.subr.bf16.mxu0 %v22162_v28 }
0x14f5   : > { %v9585_v53 = vsel %vm845_vm2, %v9580_v18, 0 }
0x14f6   : > { %v9530_v14 = vpop.permute.xlu0 %9529 }
0x14f7   : > { %v9535_v46 = vsel %vm845_vm2, %v9530_v14, 0 }
0x14f8   : > { %v9578_v8 = vpop.permute.xlu1 %9577  ;;  %15895 = vmatmul.mubr.msk.bf16.vlgmr.msra.gmra.mrb[20].mxu1 %vm845_vm2, %v9328_v36 }
0x14f9   : > { %15905 = vmatpush3.bf16.xpose.msra.mxu1 %v9435_v10  ;;  %15906 = vmatprep.mubr.msk.bf16.mxu1 %vm17303_vm1, %v22162_v28 }
0x14fa   : > { %15901 = vmatmul.mubr.msk.bf16.vlgmr.msra.gmra.mrb[44].mxu0 %vm845_vm2, %v9378_v60  ;;  %v9528_v61 = vpop.permute.xlu0 %9527  ;;  %15916 = vmatprep.subr.bf16.mxu1 %v22162_v28 }
0x14fb   : > { %15911 = vmatpush3.bf16.xpose.msra.mxu0 %v9485_v11  ;;  %15912 = vmatprep.mubr.msk.bf16.mxu0 %vm17303_vm1, %v22162_v28 }
0x14fc   : > { %v9680_v62 = vpop.permute.xlu1 %9679  ;;  %15922 = vmatprep.subr.bf16.mxu0 %v22162_v28 }
0x14fd   : > { %v9685_v15 = vsel %vm845_vm2, %v9680_v62, 0 }
0x14fe   : > { %v9630_v35 = vpop.permute.xlu0 %9629 }
0x14ff   : > { %v9635_v48 = vsel %vm845_vm2, %v9630_v35, 0 }
0x1500   : > { %v9678_v20 = vpop.permute.xlu1 %9677  ;;  %15907 = vmatmul.mubr.msk.bf16.vlgmr.msra.gmra.mrb[24].mxu1 %vm845_vm2, %v9428_v50 }
0x1501   : > { %15917 = vmatpush3.bf16.xpose.msra.mxu1 %v9535_v46  ;;  %15918 = vmatprep.mubr.msk.bf16.mxu1 %vm17303_vm1, %v22162_v28 }
0x1502   : > { %15913 = vmatmul.mubr.msk.bf16.vlgmr.msra.gmra.mrb[48].mxu0 %vm845_vm2, %v9478_v57  ;;  %v9628_v38 = vpop.permute.xlu0 %9627  ;;  %15928 = vmatprep.subr.bf16.mxu1 %v22162_v28 }
0x1503   : > { %15923 = vmatpush3.bf16.xpose.msra.mxu0 %v9585_v53  ;;  %15924 = vmatprep.mubr.msk.bf16.mxu0 %vm17303_vm1, %v22162_v28 }
0x1504   : > { %v9780_v34 = vpop.permute.xlu1 %9779  ;;  %15934 = vmatprep.subr.bf16.mxu0 %v22162_v28 }
0x1505   : > { %v9785_v37 = vsel %vm845_vm2, %v9780_v34, 0 }
0x1506   : > { %v9730_v29 = vpop.permute.xlu0 %9729 }
0x1507   : > { %v9735_v21 = vsel %vm845_vm2, %v9730_v29, 0 }
0x1508   : > { %v9778_v7 = vpop.permute.xlu1 %9777  ;;  %15919 = vmatmul.mubr.msk.bf16.vlgmr.msra.gmra.mrb[28].mxu1 %vm845_vm2, %v9528_v61 }
0x1509   : > { %15929 = vmatpush3.bf16.xpose.msra.mxu1 %v9635_v48  ;;  %15930 = vmatprep.mubr.msk.bf16.mxu1 %vm17303_vm1, %v22162_v28 }
0x150a   : > { %15925 = vmatmul.mubr.msk.bf16.vlgmr.msra.gmra.mrb[52].mxu0 %vm845_vm2, %v9578_v8  ;;  %v9728_v51 = vpop.permute.xlu0 %9727  ;;  %15940 = vmatprep.subr.bf16.mxu1 %v22162_v28 }
0x150b   : > { %15935 = vmatpush3.bf16.xpose.msra.mxu0 %v9685_v15  ;;  %15936 = vmatprep.mubr.msk.bf16.mxu0 %vm17303_vm1, %v22162_v28 }
0x150c   : > { %v9880_v9 = vpop.permute.xlu1 %9879  ;;  %15946 = vmatprep.subr.bf16.mxu0 %v22162_v28 }
0x150d   : > { %v9885_v36 = vsel %vm845_vm2, %v9880_v9, 0 }
0x150e   : > { %v9830_v33 = vpop.permute.xlu0 %9829 }
0x150f   : > { %v9835_v60 = vsel %vm845_vm2, %v9830_v33, 0 }
0x1510   : > { %v9878_v5 = vpop.permute.xlu1 %9877  ;;  %15931 = vmatmul.mubr.msk.bf16.vlgmr.msra.gmra.mrb[32].mxu1 %vm845_vm2, %v9628_v38 }
0x1511   : > { %15941 = vmatpush3.bf16.xpose.msra.mxu1 %v9735_v21  ;;  %15942 = vmatprep.mubr.msk.bf16.mxu1 %vm17303_vm1, %v22162_v28 }
0x1512   : > { %15937 = vmatmul.mubr.msk.bf16.vlgmr.msra.gmra.mrb[56].mxu0 %vm845_vm2, %v9678_v20  ;;  %v9828_v44 = vpop.permute.xlu0 %9827  ;;  %15952 = vmatprep.subr.bf16.mxu1 %v22162_v28 }
0x1513   : > { %15947 = vmatpush3.bf16.xpose.msra.mxu0 %v9785_v37  ;;  %15948 = vmatprep.mubr.msk.bf16.mxu0 %vm17303_vm1, %v22162_v28 }
0x1514   : > { %15958 = vmatprep.subr.bf16.mxu0 %v22162_v28  ;;  %v9980_v41 = vpop.permute.xlu1 %9979 }
0x1515   : > { %v9985_v17 = vsel %vm845_vm2, %v9980_v41, 0 }
0x1516   : > { %v9930_v3 = vpop.permute.xlu0 %9929 }
0x1517   : > { %v9935_v2 = vsel %vm845_vm2, %v9930_v3, 0 }
0x1518   : > { %15943 = vmatmul.mubr.msk.bf16.vlgmr.msra.gmra.mrb[36].mxu1 %vm845_vm2, %v9728_v51  ;;  %v9978_v31 = vpop.permute.xlu1 %9977 }
0x1519   : > { %15953 = vmatpush3.bf16.xpose.msra.mxu1 %v9835_v60  ;;  %15954 = vmatprep.mubr.msk.bf16.mxu1 %vm17303_vm1, %v22162_v28 }
0x151a   : > { %15949 = vmatmul.mubr.msk.bf16.vlgmr.msra.gmra.mrb[60].mxu0 %vm845_vm2, %v9778_v7  ;;  %15964 = vmatprep.subr.bf16.mxu1 %v22162_v28  ;;  %v9928_v43 = vpop.permute.xlu0 %9927 }
0x151b   : > { %15959 = vmatpush3.bf16.xpose.msra.mxu0 %v9885_v36  ;;  %15960 = vmatprep.mubr.msk.bf16.mxu0 %vm17303_vm1, %v22162_v28 }
0x151c   : > { %15970 = vmatprep.subr.bf16.mxu0 %v22162_v28  ;;  %v10080_v13 = vpop.permute.xlu1 %10079 }
0x151d   : > { %v10085_v57 = vsel %vm845_vm2, %v10080_v13, 0 }
0x151e   : > { %v10030_v58 = vpop.permute.xlu0 %10029 }
0x151f   : > { %v10035_v6 = vsel %vm845_vm2, %v10030_v58, 0 }
0x1520   : > { %15955 = vmatmul.mubr.msk.bf16.vlgmr.msra.gmra.mrb[40].mxu1 %vm845_vm2, %v9828_v44  ;;  %v10078_v59 = vpop.permute.xlu1 %10077 }
0x1521   : > { %15965 = vmatpush3.bf16.xpose.msra.mxu1 %v9935_v2  ;;  %15966 = vmatprep.mubr.msk.bf16.mxu1 %vm17303_vm1, %v22162_v28 }
0x1522   : > { %15961 = vmatmul.mubr.msk.bf16.vlgmr.msra.gmra.mrb[64].mxu0 %vm845_vm2, %v9878_v5  ;;  %15976 = vmatprep.subr.bf16.mxu1 %v22162_v28  ;;  %v10028_v39 = vpop.permute.xlu0 %10027 }
0x1523   : > { %15971 = vmatpush3.bf16.xpose.msra.mxu0 %v9985_v17  ;;  %15972 = vmatprep.mubr.msk.bf16.mxu0 %vm17303_vm1, %v22162_v28 }
0x1524   : > { %15982 = vmatprep.subr.bf16.mxu0 %v22162_v28  ;;  %v10336_v24 = vpop.permute.xlu1 %10335 }
0x1525   : > { %v10341_v18 = vsel %vm6787_vm5, %v10336_v24, 0 }
0x1526   : > { %v10384_v50 = vpop.permute.xlu0 %10383 }
0x1527   : > { %v10389_v14 = vsel %vm6787_vm5, %v10384_v50, 0 }
0x1528   : > { %15967 = vmatmul.mubr.msk.bf16.vlgmr.msra.gmra.mrb[44].mxu1 %vm845_vm2, %v9928_v43 }
0x1529   : > { %15977 = vmatpush3.bf16.xpose.msra.mxu1 %v10035_v6  ;;  %15978 = vmatprep.mubr.msk.bf16.mxu1 %vm17303_vm1, %v22162_v28 }
0x152a   : > { %15973 = vmatmul.mubr.msk.bf16.vlgmr.msra.gmra.mrb[68].mxu0 %vm845_vm2, %v9978_v31  ;;  %15988 = vmatprep.subr.bf16.mxu1 %v22162_v28 }
0x152b   : > { %15983 = vmatpush3.bf16.xpose.msra.mxu0 %v10085_v57  ;;  %15984 = vmatprep.mubr.msk.bf16.mxu0 %vm17303_vm1, %v22162_v28 }
0x152c   : > { %15994 = vmatprep.subr.bf16.mxu0 %v22162_v28 }
0x1530   : > { %15979 = vmatmul.mubr.msk.bf16.vlgmr.msra.gmra.mrb[48].mxu1 %vm845_vm2, %v10028_v39 }
0x1531   : > { %15989 = vmatpush3.bf16.msra.mxu1 %v10341_v18  ;;  %15990 = vmatprep.mubr.msk.bf16.mxu1 %vm17303_vm1, %v22162_v28 }
0x1532   : > { %15985 = vmatmul.mubr.msk.bf16.vlgmr.msra.gmra.mrb[72].mxu0 %vm845_vm2, %v10078_v59  ;;  %16000 = vmatprep.subr.bf16.mxu1 %v22162_v28 }
0x1533   : > { %15995 = vmatpush3.bf16.msra.mxu0 %v10389_v14  ;;  %15996 = vmatprep.mubr.msk.bf16.mxu0 %vm17303_vm1, %v22162_v28 }
0x1534   : > { %16006 = vmatprep.subr.bf16.mxu0 %v22162_v28 }
0x155e   : > { %v20421_v10 = vpop.f32.mrb[244].mxu1 }
0x155f   : > { %v15800_v8 = vpop.f32.mrb[245].mxu1 }
0x1560   : > { %v8604_v11 = vpop.f32.mrb[246].mxu1  ;;  %v20423_v61 = vpop.f32.mrb[12].mxu0 }
0x1561   : > { %v15801_v35 = vpop.f32.mrb[247].mxu1  ;;  %v15806_v46 = vpop.f32.mrb[13].mxu0 }
0x1562   : > { %v8652_v20 = vpop.f32.mrb[14].mxu0 }
0x1563   : > { %v15807_v53 = vpop.f32.mrb[15].mxu0 }
0x1566   : > { %v20427_v38 = vpop.f32.mrb[248].mxu1 }
0x1567   : > { %v15812_v34 = vpop.f32.mrb[249].mxu1 }
0x1568   : > { %v8700_v29 = vpop.f32.mrb[250].mxu1 }
0x1569   : > { %v15813_v48 = vpop.f32.mrb[251].mxu1 }
0x156a   : > { %v20429_v7 = vpop.f32.mrb[16].mxu0 }
0x156b   : > { %v15818_v51 = vpop.f32.mrb[17].mxu0 }
0x156c   : > { %v8748_v9 = vpop.f32.mrb[18].mxu0 }
0x156d   : > { %v15819_v33 = vpop.f32.mrb[19].mxu0 }
0x156e   : > { %v20433_v21 = vpop.f32.mrb[252].mxu1 }
0x156f   : > { %22240 = vst [vmem:[#allocation34_spill] sm:$0xff] %v20433_v21  ;;  %v15824_v5 = vpop.f32.mrb[253].mxu1 }
0x1570   : > { %v8796_v37 = vpop.f32.mrb[254].mxu1 }
0x1571   : > { %v15825_v44 = vpop.f32.mrb[255].mxu1 }
0x1572   : > { %v20435_v41 = vpop.f32.mrb[20].mxu0 }
0x1573   : > { %v15830_v60 = vpop.f32.mrb[21].mxu0 }
0x1574   : > { %v8844_v36 = vpop.f32.mrb[22].mxu0 }
0x1575   : > { %v15831_v31 = vpop.f32.mrb[23].mxu0 }
0x1576   : > { %v20439_v43 = vpop.f32.mrb[0].mxu1 }
0x1577   : > { %v15836_v2 = vpop.f32.mrb[1].mxu1 }
0x1578   : > { %v8892_v13 = vpop.f32.mrb[2].mxu1 }
0x1579   : > { %v15837_v17 = vpop.f32.mrb[3].mxu1 }
0x157a   : > { %v20441_v58 = vpop.f32.mrb[24].mxu0 }
0x157b   : > { %v15842_v6 = vpop.f32.mrb[25].mxu0 }
0x157c   : > { %v8940_v39 = vpop.f32.mrb[26].mxu0 }
0x157d   : > { %v15843_v57 = vpop.f32.mrb[27].mxu0 }
0x157e   : > { %v20445_v24 = vpop.f32.mrb[4].mxu1 }
0x157f   : > { %22241 = vst [vmem:[#allocation35_spill] sm:$0xff] %v20445_v24  ;;  %v15848_v50 = vpop.f32.mrb[5].mxu1 }
0x1580   : > { %v8988_v18 = vpop.f32.mrb[6].mxu1 }
0x1581   : > { %v15849_v14 = vpop.f32.mrb[7].mxu1 }
0x1582   : > { %v20447_v8 = vpop.f32.mrb[28].mxu0 }
0x1583   : > { %22242 = vst [vmem:[#allocation36_spill] sm:$0xff] %v20447_v8  ;;  %v15854_v35 = vpop.f32.mrb[29].mxu0 }
0x1584   : > { %v9036_v46 = vpop.f32.mrb[30].mxu0 }
0x1585   : > { %v15855_v20 = vpop.f32.mrb[31].mxu0 }
0x1586   : > { %v20451_v53 = vpop.f32.mrb[8].mxu1 }
0x1587   : > { %22243 = vst [vmem:[#allocation37_spill] sm:$0xff] %v20451_v53  ;;  %v15860_v34 = vpop.f32.mrb[9].mxu1 }
0x1588   : > { %v9084_v29 = vpop.f32.mrb[10].mxu1 }
0x1589   : > { %v15861_v48 = vpop.f32.mrb[11].mxu1 }
0x158a   : > { %v20453_v51 = vpop.f32.mrb[32].mxu0 }
0x158b   : > { %22244 = vst [vmem:[#allocation38_spill] sm:$0xff] %v20453_v51  ;;  %v15866_v33 = vpop.f32.mrb[33].mxu0 }
0x158c   : > { %v9132_v5 = vpop.f32.mrb[34].mxu0 }
0x158d   : > { %v15867_v37 = vpop.f32.mrb[35].mxu0 }
0x158e   : > { %v20457_v44 = vpop.f32.mrb[12].mxu1 }
0x158f   : > { %22245 = vst [vmem:[#allocation39_spill] sm:$0xff] %v20457_v44  ;;  %v15872_v60 = vpop.f32.mrb[13].mxu1 }
0x1590   : > { %v9180_v36 = vpop.f32.mrb[14].mxu1 }
0x1591   : > { %v15873_v31 = vpop.f32.mrb[15].mxu1 }
0x1592   : > { %v20459_v2 = vpop.f32.mrb[36].mxu0 }
0x1593   : > { %22246 = vst [vmem:[#allocation40_spill] sm:$0xff] %v20459_v2  ;;  %v15878_v17 = vpop.f32.mrb[37].mxu0 }
0x1594   : > { %v9228_v6 = vpop.f32.mrb[38].mxu0 }
0x1595   : > { %v15879_v39 = vpop.f32.mrb[39].mxu0 }
0x15c3   : > { %v20463_v57 = vpop.f32.mrb[16].mxu1 }
0x15c4   : > { %22247 = vst [vmem:[#allocation41_spill] sm:$0xff] %v20463_v57  ;;  %v15884_v50 = vpop.f32.mrb[17].mxu1 }
0x15c5   : > { %v9276_v18 = vpop.f32.mrb[18].mxu1  ;;  %v20465_v14 = vpop.f32.mrb[40].mxu0 }
0x15c6   : > { %22248 = vst [vmem:[#allocation42_spill] sm:$0xff] %v20465_v14  ;;  %v15885_v46 = vpop.f32.mrb[19].mxu1  ;;  %v15890_v20 = vpop.f32.mrb[41].mxu0 }
0x15c7   : > { %v9324_v34 = vpop.f32.mrb[42].mxu0 }
0x15c8   : > { %v15891_v29 = vpop.f32.mrb[43].mxu0 }
0x15cb   : > { %v9371_v48 = vpop.f32.mrb[20].mxu1 }
0x15cc   : > { %v20469_v33 = vmul.f32 0.35355338, %v9371_v48  ;;  %v15896_v5 = vpop.f32.mrb[21].mxu1 }
0x15cd   : > { %v9374_v37 = vpop.f32.mrb[22].mxu1  ;;  %v9421_v60 = vpop.f32.mrb[44].mxu0 }
0x15ce   : > { %v20471_v36 = vmul.f32 0.35355338, %v9421_v60  ;;  %v15897_v31 = vpop.f32.mrb[23].mxu1  ;;  %v15902_v17 = vpop.f32.mrb[45].mxu0  ;;  %v10143_v6 = vsel %vm845_vm2, %v20469_v33, -inf }
0x15cf   : > { %v9424_v39 = vpop.f32.mrb[46].mxu0  ;;  %10144 = vmax.xlane.f32.xlu0 %v10143_v6 }
0x15d0   : > { %v15903_v50 = vpop.f32.mrb[47].mxu0  ;;  %v10146_v18 = vsel %vm845_vm2, %v20471_v36, -inf }
0x15d1   : > { %10147 = vmax.xlane.f32.xlu1 %v10146_v18 }
0x15d3   : > { %v9471_v46 = vpop.f32.mrb[24].mxu1 }
0x15d4   : > { %v20477_v20 = vmul.f32 0.35355338, %v9471_v46  ;;  %v15908_v34 = vpop.f32.mrb[25].mxu1 }
0x15d5   : > { %v9474_v29 = vpop.f32.mrb[26].mxu1  ;;  %v9521_v48 = vpop.f32.mrb[48].mxu0 }
0x15d6   : > { %v20479_v5 = vmul.f32 0.35355338, %v9521_v48  ;;  %v15909_v37 = vpop.f32.mrb[27].mxu1  ;;  %v15914_v60 = vpop.f32.mrb[49].mxu0  ;;  %v10149_v31 = vsel %vm845_vm2, %v20477_v20, -inf }
0x15d7   : > { %v9524_v17 = vpop.f32.mrb[50].mxu0  ;;  %10150 = vmax.xlane.f32.xlu0 %v10149_v31 }
0x15d8   : > { %v15915_v6 = vpop.f32.mrb[51].mxu0  ;;  %v10152_v39 = vsel %vm845_vm2, %v20479_v5, -inf }
0x15db   : > { %10153 = vmax.xlane.f32.xlu0 %v10152_v39  ;;  %v9571_v50 = vpop.f32.mrb[28].mxu1 }
0x15dc   : > { %v20485_v18 = vmul.f32 0.35355338, %v9571_v50  ;;  %v15920_v46 = vpop.f32.mrb[29].mxu1 }
0x15dd   : > { %v9574_v34 = vpop.f32.mrb[30].mxu1  ;;  %v9621_v29 = vpop.f32.mrb[52].mxu0 }
0x15de   : > { %v20487_v48 = vmul.f32 0.35355338, %v9621_v29  ;;  %v15921_v37 = vpop.f32.mrb[31].mxu1  ;;  %v15926_v60 = vpop.f32.mrb[53].mxu0  ;;  %v10155_v35 = vsel %vm845_vm2, %v20485_v18, -inf }
0x15df   : > { %v9624_v17 = vpop.f32.mrb[54].mxu0  ;;  %10156 = vmax.xlane.f32.xlu1 %v10155_v35 }
0x15e0   : > { %v15927_v31 = vpop.f32.mrb[55].mxu0  ;;  %v10158_v6 = vsel %vm845_vm2, %v20487_v48, -inf }
0x15e1   : > { %10159 = vmax.xlane.f32.xlu0 %v10158_v6 }
0x15e3   : > { %v9671_v39 = vpop.f32.mrb[32].mxu1 }
0x15e4   : > { %v20493_v50 = vmul.f32 0.35355338, %v9671_v39  ;;  %v15932_v46 = vpop.f32.mrb[33].mxu1 }
0x15e5   : > { %v9674_v34 = vpop.f32.mrb[34].mxu1  ;;  %v9721_v13 = vpop.f32.mrb[56].mxu0 }
0x15e6   : > { %v20495_v29 = vmul.f32 0.35355338, %v9721_v13  ;;  %v15933_v37 = vpop.f32.mrb[35].mxu1  ;;  %v15938_v60 = vpop.f32.mrb[57].mxu0  ;;  %v10161_v11 = vsel %vm845_vm2, %v20493_v50, -inf }
0x15e7   : > { %v9724_v17 = vpop.f32.mrb[58].mxu0  ;;  %10162 = vmax.xlane.f32.xlu1 %v10161_v11 }
0x15e8   : > { %v15939_v35 = vpop.f32.mrb[59].mxu0  ;;  %v10164_v31 = vsel %vm845_vm2, %v20495_v29, -inf }
0x15e9   : > { %10165 = vmax.xlane.f32.xlu0 %v10164_v31 }
0x15eb   : > { %v9771_v6 = vpop.f32.mrb[36].mxu1 }
0x15ec   : > { %v20501_v39 = vmul.f32 0.35355338, %v9771_v6  ;;  %v15944_v46 = vpop.f32.mrb[37].mxu1 }
0x15ed   : > { %v9774_v34 = vpop.f32.mrb[38].mxu1  ;;  %v9821_v9 = vpop.f32.mrb[60].mxu0 }
0x15ee   : > { %v20503_v13 = vmul.f32 0.35355338, %v9821_v9  ;;  %v15945_v37 = vpop.f32.mrb[39].mxu1  ;;  %v15950_v60 = vpop.f32.mrb[61].mxu0  ;;  %v10167_v3 = vsel %vm845_vm2, %v20501_v39, -inf }
0x15ef   : > { %v9824_v17 = vpop.f32.mrb[62].mxu0  ;;  %10168 = vmax.xlane.f32.xlu1 %v10167_v3 }
0x15f0   : > { %v15951_v11 = vpop.f32.mrb[63].mxu0  ;;  %v10170_v35 = vsel %vm845_vm2, %v20503_v13, -inf }
0x15f1   : > { %10171 = vmax.xlane.f32.xlu0 %v10170_v35 }
0x15f3   : > { %v9871_v31 = vpop.f32.mrb[40].mxu1 }
0x15f4   : > { %v20509_v6 = vmul.f32 0.35355338, %v9871_v31  ;;  %v15956_v46 = vpop.f32.mrb[41].mxu1 }
0x15f5   : > { %v9874_v34 = vpop.f32.mrb[42].mxu1  ;;  %v9921_v59 = vpop.f32.mrb[64].mxu0 }
0x15f6   : > { %v20511_v9 = vmul.f32 0.35355338, %v9921_v59  ;;  %v15957_v37 = vpop.f32.mrb[43].mxu1  ;;  %v15962_v60 = vpop.f32.mrb[65].mxu0  ;;  %v10173_v62 = vsel %vm845_vm2, %v20509_v6, -inf }
0x15f7   : > { %v9924_v17 = vpop.f32.mrb[66].mxu0  ;;  %10174 = vmax.xlane.f32.xlu1 %v10173_v62 }
0x15f8   : > { %v15963_v3 = vpop.f32.mrb[67].mxu0  ;;  %v10176_v11 = vsel %vm845_vm2, %v20511_v9, -inf }
0x15f9   : > { %10177 = vmax.xlane.f32.xlu0 %v10176_v11 }
0x15fb   : > { %v9971_v35 = vpop.f32.mrb[44].mxu1 }
0x15fc   : > { %v20517_v31 = vmul.f32 0.35355338, %v9971_v35  ;;  %v15968_v46 = vpop.f32.mrb[45].mxu1 }
0x15fd   : > { %v9974_v34 = vpop.f32.mrb[46].mxu1  ;;  %v10021_v15 = vpop.f32.mrb[68].mxu0 }
0x15fe   : > { %v20519_v59 = vmul.f32 0.35355338, %v10021_v15  ;;  %v15969_v37 = vpop.f32.mrb[47].mxu1  ;;  %v15974_v60 = vpop.f32.mrb[69].mxu0  ;;  %v10179_v55 = vsel %vm845_vm2, %v20517_v31, -inf }
0x15ff   : > { %v10024_v17 = vpop.f32.mrb[70].mxu0  ;;  %10180 = vmax.xlane.f32.xlu1 %v10179_v55 }
0x1600   : > { %v15975_v62 = vpop.f32.mrb[71].mxu0  ;;  %v10182_v3 = vsel %vm845_vm2, %v20519_v59, -inf }
0x1601   : > { %10183 = vmax.xlane.f32.xlu0 %v10182_v3 }
0x1603   : > { %v10071_v11 = vpop.f32.mrb[48].mxu1 }
0x1604   : > { %v20525_v35 = vmul.f32 0.35355338, %v10071_v11  ;;  %v15980_v46 = vpop.f32.mrb[49].mxu1  ;;  %v20541_v11 = vpop.permute.xlu0 %10479 }
0x1605   : > { %v10074_v34 = vpop.f32.mrb[50].mxu1  ;;  %v10121_v54 = vpop.f32.mrb[72].mxu0 }
0x1606   : > { %v20527_v15 = vmul.f32 0.35355338, %v10121_v54  ;;  %v15981_v37 = vpop.f32.mrb[51].mxu1  ;;  %v15986_v60 = vpop.f32.mrb[73].mxu0  ;;  %v10185_v19 = vsel %vm845_vm2, %v20525_v35, -inf }
0x1607   : > { %v10124_v17 = vpop.f32.mrb[74].mxu0  ;;  %10186 = vmax.xlane.f32.xlu1 %v10185_v19  ;;  %v20537_v54 = vpop.permute.xlu1 %10431 }
0x1608   : > { %v15987_v55 = vpop.f32.mrb[75].mxu0  ;;  %v10188_v62 = vsel %vm845_vm2, %v20527_v15, -inf  ;;  %v20545_v19 = vpop.permute.xlu0 %10575 }
0x1609   : > { %10189 = vmax.xlane.f32.xlu0 %v10188_v62 }
0x160b   : > { %v20539_v3 = vpop.permute.xlu1 %10527 }
0x160c   : > { %v20549_v37 = vpop.permute.xlu0 %10671 }
0x160f   : > { %v20543_v46 = vpop.permute.xlu1 %10623 }
0x1610   : > { %v20553_v17 = vpop.permute.xlu0 %10767 }
0x1613   : > { %v20547_v34 = vpop.permute.xlu1 %10719 }
0x1617   : > { %v20551_v60 = vpop.permute.xlu1 %10815 }
0x1618   : > { %10959 = vrot.lane.b32.xlu1 %v19347_v23, %s22239_s0 }
0x161b   : > { %v20555_v55 = vpop.permute.xlu1 %10863 }
0x161f   : > { %10911 = vrot.lane.b32.xlu0 %v19343_v32, %s22239_s0 }
0x165c   : > { %v10145_v62 = vpop.xlane.xlu0 %10144 }
0x165d   : > { %v10191_v49 = vsub.f32 %v20469_v33, %v10145_v62 }
0x165e   : > { %v10148_v22 = vpop.xlane.xlu1 %10147 }
0x165f   : > { %v10207_v56 = vmul.f32 1.442695, %v10191_v49  ;;  %v10192_v30 = vsub.f32 %v20471_v36, %v10148_v22 }
0x1661   : > { %17054 = vpow2.f32 %v10207_v56  ;;  %v10209_v57 = vmul.f32 1.442695, %v10192_v30 }
0x1663   : > { %17056 = vpow2.f32 %v10209_v57 }
0x1664   : > { %v10151_v14 = vpop.xlane.xlu0 %10150 }
0x1665   : > { %v10193_v44 = vsub.f32 %v20477_v20, %v10151_v14 }
0x1667   : > { %v10211_v2 = vmul.f32 1.442695, %v10193_v44 }
0x1668   : > { %v10154_v24 = vpop.xlane.xlu0 %10153 }
0x1669   : > { %17058 = vpow2.f32 %v10211_v2  ;;  %v10194_v8 = vsub.f32 %v20479_v5, %v10154_v24 }
0x166b   : > { %v20561_v53 = vpop.eup %17054  ;;  %v10213_v51 = vmul.f32 1.442695, %v10194_v8 }
0x166c   : > { %v10157_v21 = vpop.xlane.xlu1 %10156  ;;  %v10239_v49 = vsel %vm845_vm2, %v20561_v53, 0.0 }
0x166d   : > { %v20565_v33 = vpop.eup %17056  ;;  %17060 = vpow2.f32 %v10213_v51  ;;  %v10195_v56 = vsub.f32 %v20485_v18, %v10157_v21  ;;  %10240 = vadd.xlane.f32.xlu1 %v10239_v49 }
0x166e   : > { %v10160_v30 = vpop.xlane.xlu0 %10159  ;;  %v10242_v22 = vsel %vm845_vm2, %v20565_v33, 0.0 }
0x166f   : > { %v10215_v44 = vmul.f32 1.442695, %v10195_v56  ;;  %v10196_v24 = vsub.f32 %v20487_v48, %v10160_v30  ;;  %10243 = vadd.xlane.f32.xlu0 %v10242_v22 }
0x1671   : > { %17062 = vpow2.f32 %v10215_v44  ;;  %v10217_v8 = vmul.f32 1.442695, %v10196_v24 }
0x1673   : > { %v20571_v2 = vpop.eup %17058  ;;  %17064 = vpow2.f32 %v10217_v8 }
0x1674   : > { %v10163_v57 = vpop.xlane.xlu1 %10162  ;;  %v10245_v51 = vsel %vm845_vm2, %v20571_v2, 0.0 }
0x1675   : > { %v10197_v21 = vsub.f32 %v20493_v50, %v10163_v57  ;;  %10246 = vadd.xlane.f32.xlu1 %v10245_v51 }
0x1676   : > { %v10166_v14 = vpop.xlane.xlu0 %10165 }
0x1677   : > { %v20576_v36 = vpop.eup %17060  ;;  %v10219_v20 = vmul.f32 1.442695, %v10197_v21  ;;  %v10198_v5 = vsub.f32 %v20495_v29, %v10166_v14 }
0x1678   : > { %v10248_v18 = vsel %vm845_vm2, %v20576_v36, 0.0 }
0x1679   : > { %17066 = vpow2.f32 %v10219_v20  ;;  %v10221_v48 = vmul.f32 1.442695, %v10198_v5  ;;  %10249 = vadd.xlane.f32.xlu0 %v10248_v18 }
0x167b   : > { %v20581_v62 = vpop.eup %17062  ;;  %17068 = vpow2.f32 %v10221_v48 }
0x167c   : > { %v10169_v49 = vpop.xlane.xlu1 %10168  ;;  %v10251_v50 = vsel %vm845_vm2, %v20581_v62, 0.0 }
0x167d   : > { %v20585_v56 = vpop.eup %17064  ;;  %v10199_v30 = vsub.f32 %v20501_v39, %v10169_v49  ;;  %10252 = vadd.xlane.f32.xlu1 %v10251_v50 }
0x167e   : > { %v10172_v22 = vpop.xlane.xlu0 %10171  ;;  %v10254_v29 = vsel %vm845_vm2, %v20585_v56, 0.0 }
0x167f   : > { %v10223_v44 = vmul.f32 1.442695, %v10199_v30  ;;  %v10200_v24 = vsub.f32 %v20503_v13, %v10172_v22  ;;  %10255 = vadd.xlane.f32.xlu0 %v10254_v29 }
0x1681   : > { %17070 = vpow2.f32 %v10223_v44  ;;  %v10225_v8 = vmul.f32 1.442695, %v10200_v24 }
0x1683   : > { %v20591_v57 = vpop.eup %17066  ;;  %17072 = vpow2.f32 %v10225_v8 }
0x1684   : > { %v10175_v51 = vpop.xlane.xlu1 %10174  ;;  %v10257_v21 = vsel %vm845_vm2, %v20591_v57, 0.0 }
0x1685   : > { %v20595_v14 = vpop.eup %17068  ;;  %v10201_v39 = vsub.f32 %v20509_v6, %v10175_v51  ;;  %10258 = vadd.xlane.f32.xlu1 %v10257_v21 }
0x1686   : > { %v10178_v20 = vpop.xlane.xlu0 %10177  ;;  %v10260_v5 = vsel %vm845_vm2, %v20595_v14, 0.0 }
0x1687   : > { %v10227_v13 = vmul.f32 1.442695, %v10201_v39  ;;  %v10202_v18 = vsub.f32 %v20511_v9, %v10178_v20  ;;  %10261 = vadd.xlane.f32.xlu0 %v10260_v5 }
0x1689   : > { %17074 = vpow2.f32 %v10227_v13  ;;  %v10229_v48 = vmul.f32 1.442695, %v10202_v18 }
0x168b   : > { %v20601_v49 = vpop.eup %17070  ;;  %17076 = vpow2.f32 %v10229_v48 }
0x168c   : > { %v10181_v50 = vpop.xlane.xlu1 %10180  ;;  %v10263_v30 = vsel %vm845_vm2, %v20601_v49, 0.0 }
0x168d   : > { %v20605_v22 = vpop.eup %17072  ;;  %v10203_v6 = vsub.f32 %v20517_v31, %v10181_v50  ;;  %10264 = vadd.xlane.f32.xlu1 %v10263_v30 }
0x168e   : > { %v10184_v29 = vpop.xlane.xlu0 %10183  ;;  %v10266_v44 = vsel %vm845_vm2, %v20605_v22, 0.0 }
0x168f   : > { %v10231_v9 = vmul.f32 1.442695, %v10203_v6  ;;  %v10204_v24 = vsub.f32 %v20519_v59, %v10184_v29  ;;  %10267 = vadd.xlane.f32.xlu0 %v10266_v44 }
0x1691   : > { %17078 = vpow2.f32 %v10231_v9  ;;  %v10233_v8 = vmul.f32 1.442695, %v10204_v24 }
0x1693   : > { %v20611_v51 = vpop.eup %17074  ;;  %17080 = vpow2.f32 %v10233_v8 }
0x1694   : > { %v10269_v21 = vsel %vm845_vm2, %v20611_v51, 0.0  ;;  %v10187_v18 = vpop.xlane.xlu1 %10186 }
0x1695   : > { %v20615_v39 = vpop.eup %17076  ;;  %10270 = vadd.xlane.f32.xlu1 %v10269_v21  ;;  %v10205_v50 = vsub.f32 %v20525_v35, %v10187_v18 }
0x1696   : > { %v10272_v31 = vsel %vm845_vm2, %v20615_v39, 0.0  ;;  %v10190_v48 = vpop.xlane.xlu0 %10189 }
0x1697   : > { %10273 = vadd.xlane.f32.xlu0 %v10272_v31  ;;  %v10206_v30 = vsub.f32 %v20527_v15, %v10190_v48  ;;  %v10235_v6 = vmul.f32 1.442695, %v10205_v50 }
0x1698   : > { %v20657_v35 = vpop.permute.xlu1 %10959 }
0x1699   : > { %v10237_v29 = vmul.f32 1.442695, %v10206_v30  ;;  %17082 = vpow2.f32 %v10235_v6 }
0x169a   : > { %v20663_v15 = vpop.permute.xlu0 %10911 }
0x169b   : > { %v20619_v20 = vpop.eup %17078  ;;  %17084 = vpow2.f32 %v10237_v29  ;;  %v10437_v29 = vsel %vm6787_vm5, %v20537_v54, 0 }
0x169c   : > { %v10275_v59 = vsel %vm845_vm2, %v20619_v20, 0.0 }
0x169d   : > { %v20623_v5 = vpop.eup %17080  ;;  %10276 = vadd.xlane.f32.xlu1 %v10275_v59 }
0x169e   : > { %v10278_v13 = vsel %vm845_vm2, %v20623_v5, 0.0 }
0x169f   : > { %10279 = vadd.xlane.f32.xlu0 %v10278_v13 }
0x16a3   : > { %v20633_v44 = vpop.eup %17082 }
0x16a4   : > { %v10281_v24 = vsel %vm845_vm2, %v20633_v44, 0.0 }
0x16a5   : > { %v20635_v9 = vpop.eup %17084 }
0x16a6   : > { %v10284_v8 = vsel %vm845_vm2, %v20635_v9, 0.0 }
0x16ae   : > { %11055 = vrot.lane.b32.xlu1 %v19353_v25, %s22239_s0 }
0x16b5   : > { %11007 = vrot.lane.b32.xlu0 %v19345_v63, %s22239_s0  ;;  %s22270_s0 = smov 24  }
0x16d2   : > { %10282 = vadd.xlane.f32.xlu1 %v10281_v24 }
0x16d4   : > { %10285 = vadd.xlane.f32.xlu0 %v10284_v8 }
0x16e3   : > { %11155 = vrot.lane.b32.xlu1 %v19299_v45, %s22249_s4 }
0x16e7   : > { %11153 = vrot.lane.b32.xlu1 %v19299_v45, %s22250_s22 }
0x16ea   : > { %11105 = vrot.lane.b32.xlu0 %v19297_v42, %s22249_s4 }
0x16eb   : > { %11255 = vrot.lane.b32.xlu1 %v19309_v0, %s22249_s4 }
0x16ee   : > { %11103 = vrot.lane.b32.xlu0 %v19297_v42, %s22250_s22 }
0x16ef   : > { %11253 = vrot.lane.b32.xlu1 %v19309_v0, %s22250_s22 }
0x16f2   : > { %11205 = vrot.lane.b32.xlu0 %v19303_v26, %s22249_s4 }
0x16f3   : > { %11355 = vrot.lane.b32.xlu1 %v19315_v47, %s22249_s4 }
0x16f6   : > { %11203 = vrot.lane.b32.xlu0 %v19303_v26, %s22250_s22 }
0x16f7   : > { %11353 = vrot.lane.b32.xlu1 %v19315_v47, %s22250_s22 }
0x16fa   : > { %v10241_v21 = vpop.xlane.xlu1 %10240  ;;  %11305 = vrot.lane.b32.xlu0 %v19311_v27, %s22249_s4 }
0x16fb   : > { %17086 = vrcp.f32 %v10241_v21  ;;  %11455 = vrot.lane.b32.xlu1 %v19325_v52, %s22249_s4 }
0x16fc   : > { %v10244_v31 = vpop.xlane.xlu0 %10243 }
0x16fd   : > { %17088 = vrcp.f32 %v10244_v31 }
0x16fe   : > { %11303 = vrot.lane.b32.xlu0 %v19311_v27, %s22250_s22 }
0x16ff   : > { %11453 = vrot.lane.b32.xlu1 %v19325_v52, %s22250_s22 }
0x1702   : > { %v10247_v59 = vpop.xlane.xlu1 %10246  ;;  %11405 = vrot.lane.b32.xlu0 %v19313_v40, %s22249_s4 }
0x1703   : > { %17090 = vrcp.f32 %v10247_v59  ;;  %11555 = vrot.lane.b32.xlu1 %v19331_v4, %s22249_s4  ;;  %v10533_v59 = vsel %vm6787_vm5, %v20539_v3, 0 }
0x1705   : > { %v17087_v13 = vpop.eup %17086 }
0x1706   : > { %v10303_v18 = vmul.f32 %v17087_v13, %v20561_v53  ;;  %11403 = vrot.lane.b32.xlu0 %v19313_v40, %s22250_s22  ;;  %v10250_v48 = vpop.xlane.xlu0 %10249  ;;  %v10485_v53 = vsel %vm6787_vm5, %v20541_v11, 0 }
0x1707   : > { %v17089_v50 = vpop.eup %17088  ;;  %17092 = vrcp.f32 %v10250_v48  ;;  %11553 = vrot.lane.b32.xlu1 %v19331_v4, %s22250_s22 }
0x1708   : > { %v10319_v30 = vpack.c.bf16 %v10303_v18, %v10303_v18  ;;  %v10304_v6 = vmul.f32 %v17089_v50, %v20565_v33 }
0x170a   : > { %v10320_v24 = vpack.c.bf16 %v10304_v6, %v10304_v6  ;;  %15991 = vmatmul.mubr.msk.bf16.vlgmr.msra.gmra.mrb[52].mxu1 %vm845_vm2, %v10319_v30  ;;  %v10253_v8 = vpop.xlane.xlu1 %10252  ;;  %11505 = vrot.lane.b32.xlu0 %v19327_v12, %s22249_s4 }
0x170b   : > { %16001 = vmatpush3.bf16.msra.mxu1 %v10437_v29  ;;  %17094 = vrcp.f32 %v10253_v8  ;;  %11655 = vrot.lane.b32.xlu1 %v19337_v16, %s22249_s4 }
0x170c   : > { %15997 = vmatmul.mubr.msk.bf16.vlgmr.msra.gmra.mrb[76].mxu0 %vm845_vm2, %v10320_v24  ;;  %v10256_v33 = vpop.xlane.xlu0 %10255  ;;  %16002 = vmatprep.mubr.msk.bf16.mxu1 %vm17303_vm1, %v22162_v28 }
0x170d   : > { %v17091_v54 = vpop.eup %17090  ;;  %16007 = vmatpush3.bf16.msra.mxu0 %v10485_v53  ;;  %17096 = vrcp.f32 %v10256_v33  ;;  %16012 = vmatprep.subr.bf16.mxu1 %v22162_v28 }
0x170e   : > { %v10305_v21 = vmul.f32 %v17091_v54, %v20571_v2  ;;  %11503 = vrot.lane.b32.xlu0 %v19327_v12, %s22250_s22  ;;  %16008 = vmatprep.mubr.msk.bf16.mxu0 %vm17303_vm1, %v22162_v28 }
0x170f   : > { %11653 = vrot.lane.b32.xlu1 %v19337_v16, %s22250_s22  ;;  %16018 = vmatprep.subr.bf16.mxu0 %v22162_v28 }
0x1710   : > { %v10321_v11 = vpack.c.bf16 %v10305_v21, %v10305_v21 }
0x1711   : > { %v17093_v31 = vpop.eup %17092 }
0x1712   : > { %v10306_v13 = vmul.f32 %v17093_v31, %v20576_v36  ;;  %16003 = vmatmul.mubr.msk.bf16.vlgmr.msra.gmra.mrb[56].mxu1 %vm845_vm2, %v10321_v11  ;;  %v10259_v2 = vpop.xlane.xlu1 %10258  ;;  %11605 = vrot.lane.b32.xlu0 %v19329_v1, %s22249_s4  ;;  %v10581_v36 = vsel %vm6787_vm5, %v20545_v19, 0  ;;  %v10629_v19 = vsel %vm6787_vm5, %v20543_v46, 0  ;;  %v10677_v46 = vsel %vm6787_vm5, %v20549_v37, 0 }
0x1713   : > { %16013 = vmatpush3.bf16.msra.mxu1 %v10533_v59  ;;  %17098 = vrcp.f32 %v10259_v2  ;;  %11755 = vrot.lane.b32.xlu1 %v19347_v23, %s22249_s4  ;;  %v10725_v37 = vsel %vm6787_vm5, %v20547_v34, 0  ;;  %v10773_v34 = vsel %vm6787_vm5, %v20553_v17, 0  ;;  %v10821_v17 = vsel %vm6787_vm5, %v20551_v60, 0 }
0x1714   : > { %v10322_v18 = vpack.c.bf16 %v10306_v13, %v10306_v13  ;;  %v10262_v48 = vpop.xlane.xlu0 %10261  ;;  %16014 = vmatprep.mubr.msk.bf16.mxu1 %vm17303_vm1, %v22162_v28  ;;  %16024 = vmatprep.subr.bf16.mxu1 %v22162_v28  ;;  %v10869_v60 = vsel %vm6787_vm5, %v20555_v55, 0  ;;  %v10917_v55 = vsel %vm6787_vm5, %v20663_v15, 0 }
0x1715   : > { %v17095_v3 = vpop.eup %17094  ;;  %17100 = vrcp.f32 %v10262_v48 }
0x1716   : > { %v10307_v50 = vmul.f32 %v17095_v3, %v20581_v62  ;;  %11603 = vrot.lane.b32.xlu0 %v19329_v1, %s22250_s22  ;;  %16009 = vmatmul.mubr.msk.bf16.vlgmr.msra.gmra.mrb[80].mxu0 %vm845_vm2, %v10322_v18 }
0x1717   : > { %v17097_v30 = vpop.eup %17096  ;;  %16019 = vmatpush3.bf16.msra.mxu0 %v10581_v36  ;;  %11753 = vrot.lane.b32.xlu1 %v19347_v23, %s22250_s22 }
0x1718   : > { %v10323_v6 = vpack.c.bf16 %v10307_v50, %v10307_v50  ;;  %v10308_v29 = vmul.f32 %v17097_v30, %v20585_v56  ;;  %16020 = vmatprep.mubr.msk.bf16.mxu0 %vm17303_vm1, %v22162_v28  ;;  %16030 = vmatprep.subr.bf16.mxu0 %v22162_v28 }
0x171a   : > { %16015 = vmatmul.mubr.msk.bf16.vlgmr.msra.gmra.mrb[60].mxu1 %vm845_vm2, %v10323_v6  ;;  %v10265_v62 = vpop.xlane.xlu1 %10264  ;;  %11705 = vrot.lane.b32.xlu0 %v19343_v32, %s22249_s4  ;;  %v10324_v56 = vpack.c.bf16 %v10308_v29, %v10308_v29 }
0x171b   : > { %16025 = vmatpush3.bf16.msra.mxu1 %v10629_v19  ;;  %17102 = vrcp.f32 %v10265_v62  ;;  %11855 = vrot.lane.b32.xlu1 %v19353_v25, %s22249_s4 }
0x171c   : > { %v10268_v24 = vpop.xlane.xlu0 %10267  ;;  %16026 = vmatprep.mubr.msk.bf16.mxu1 %vm17303_vm1, %v22162_v28  ;;  %16036 = vmatprep.subr.bf16.mxu1 %v22162_v28 }
0x171d   : > { %v17099_v8 = vpop.eup %17098  ;;  %17104 = vrcp.f32 %v10268_v24 }
0x171e   : > { %v10309_v53 = vmul.f32 %v17099_v8, %v20591_v57  ;;  %11703 = vrot.lane.b32.xlu0 %v19343_v32, %s22250_s22  ;;  %16021 = vmatmul.mubr.msk.bf16.vlgmr.msra.gmra.mrb[84].mxu0 %vm845_vm2, %v10324_v56 }
0x171f   : > { %v17101_v33 = vpop.eup %17100  ;;  %16031 = vmatpush3.bf16.msra.mxu0 %v10677_v46  ;;  %11853 = vrot.lane.b32.xlu1 %v19353_v25, %s22250_s22 }
0x1720   : > { %v10325_v54 = vpack.c.bf16 %v10309_v53, %v10309_v53  ;;  %v10310_v21 = vmul.f32 %v17101_v33, %v20595_v14  ;;  %16032 = vmatprep.mubr.msk.bf16.mxu0 %vm17303_vm1, %v22162_v28  ;;  %16042 = vmatprep.subr.bf16.mxu0 %v22162_v28 }
0x1722   : > { %16027 = vmatmul.mubr.msk.bf16.vlgmr.msra.gmra.mrb[64].mxu1 %vm845_vm2, %v10325_v54  ;;  %v10271_v57 = vpop.xlane.xlu1 %10270  ;;  %11805 = vrot.lane.b32.xlu0 %v19345_v63, %s22249_s4  ;;  %v10326_v14 = vpack.c.bf16 %v10310_v21, %v10310_v21 }
0x1723   : > { %16037 = vmatpush3.bf16.msra.mxu1 %v10725_v37  ;;  %17106 = vrcp.f32 %v10271_v57  ;;  %12111 = vrot.lane.b32.xlu1 %v19297_v42, %s22251_s30 }
0x1724   : > { %v10274_v11 = vpop.xlane.xlu0 %10273  ;;  %16038 = vmatprep.mubr.msk.bf16.mxu1 %vm17303_vm1, %v22162_v28  ;;  %16048 = vmatprep.subr.bf16.mxu1 %v22162_v28 }
0x1725   : > { %v17103_v31 = vpop.eup %17102  ;;  %17108 = vrcp.f32 %v10274_v11 }
0x1726   : > { %v10311_v59 = vmul.f32 %v17103_v31, %v20601_v49  ;;  %11803 = vrot.lane.b32.xlu0 %v19345_v63, %s22250_s22  ;;  %16033 = vmatmul.mubr.msk.bf16.vlgmr.msra.gmra.mrb[88].mxu0 %vm845_vm2, %v10326_v14 }
0x1727   : > { %v17105_v42 = vpop.eup %17104  ;;  %16043 = vmatpush3.bf16.msra.mxu0 %v10773_v34  ;;  %12207 = vrot.lane.b32.xlu1 %v19303_v26, %s22251_s30 }
0x1728   : > { %v10327_v13 = vpack.c.bf16 %v10311_v59, %v10311_v59  ;;  %v10312_v2 = vmul.f32 %v17105_v42, %v20605_v22  ;;  %16044 = vmatprep.mubr.msk.bf16.mxu0 %vm17303_vm1, %v22162_v28  ;;  %16054 = vmatprep.subr.bf16.mxu0 %v22162_v28 }
0x172a   : > { %16039 = vmatmul.mubr.msk.bf16.vlgmr.msra.gmra.mrb[68].mxu1 %vm845_vm2, %v10327_v13  ;;  %v10277_v49 = vpop.xlane.xlu1 %10276  ;;  %12159 = vrot.lane.b32.xlu0 %v19299_v45, %s22251_s30  ;;  %v10328_v26 = vpack.c.bf16 %v10312_v2, %v10312_v2 }
0x172b   : > { %16049 = vmatpush3.bf16.msra.mxu1 %v10821_v17  ;;  %17110 = vrcp.f32 %v10277_v49  ;;  %12303 = vrot.lane.b32.xlu1 %v19311_v27, %s22251_s30 }
0x172c   : > { %v10280_v22 = vpop.xlane.xlu0 %10279  ;;  %16050 = vmatprep.mubr.msk.bf16.mxu1 %vm17303_vm1, %v22162_v28  ;;  %16060 = vmatprep.subr.bf16.mxu1 %v22162_v28 }
0x172d   : > { %v17107_v18 = vpop.eup %17106  ;;  %17112 = vrcp.f32 %v10280_v22 }
0x172e   : > { %v10313_v48 = vmul.f32 %v17107_v18, %v20611_v51  ;;  %12255 = vrot.lane.b32.xlu0 %v19309_v0, %s22251_s30  ;;  %16045 = vmatmul.mubr.msk.bf16.vlgmr.msra.gmra.mrb[92].mxu0 %vm845_vm2, %v10328_v26  ;;  %v10965_v51 = vsel %vm6787_vm5, %v20657_v35, 0 }
0x172f   : > { %v17109_v45 = vpop.eup %17108  ;;  %16055 = vmatpush3.bf16.msra.mxu0 %v10869_v60  ;;  %12399 = vrot.lane.b32.xlu1 %v19313_v40, %s22251_s30 }
0x1730   : > { %v10329_v27 = vpack.c.bf16 %v10313_v48, %v10313_v48  ;;  %v10314_v3 = vmul.f32 %v17109_v45, %v20615_v39  ;;  %16056 = vmatprep.mubr.msk.bf16.mxu0 %vm17303_vm1, %v22162_v28  ;;  %16066 = vmatprep.subr.bf16.mxu0 %v22162_v28  ;;  %v11008_v15 = vpop.permute.xlu0 %11007 }
0x1731   : > { %v11013_v35 = vsel %vm6787_vm5, %v11008_v15, 0 }
0x1732   : > { %16051 = vmatmul.mubr.msk.bf16.vlgmr.msra.gmra.mrb[72].mxu1 %vm845_vm2, %v10329_v27  ;;  %12351 = vrot.lane.b32.xlu0 %v19315_v47, %s22251_s30  ;;  %v10330_v0 = vpack.c.bf16 %v10314_v3, %v10314_v3 }
0x1733   : > { %16061 = vmatpush3.bf16.msra.mxu1 %v10917_v55  ;;  %12495 = vrot.lane.b32.xlu1 %v19327_v12, %s22251_s30 }
0x1734   : > { %16062 = vmatprep.mubr.msk.bf16.mxu1 %vm17303_vm1, %v22162_v28  ;;  %16072 = vmatprep.subr.bf16.mxu1 %v22162_v28 }
0x1735   : > { %v17111_v40 = vpop.eup %17110 }
0x1736   : > { %v10315_v39 = vmul.f32 %v17111_v40, %v20619_v20  ;;  %12447 = vrot.lane.b32.xlu0 %v19325_v52, %s22251_s30  ;;  %16057 = vmatmul.mubr.msk.bf16.vlgmr.msra.gmra.mrb[96].mxu0 %vm845_vm2, %v10330_v0  ;;  %v11056_v20 = vpop.permute.xlu1 %11055 }
0x1737   : > { %v17113_v47 = vpop.eup %17112  ;;  %16067 = vmatpush3.bf16.msra.mxu0 %v10965_v51  ;;  %16068 = vmatprep.mubr.msk.bf16.mxu0 %vm17303_vm1, %v22162_v28  ;;  %v11061_v50 = vsel %vm6787_vm5, %v11056_v20, 0 }
0x1738   : > { %v10331_v12 = vpack.c.bf16 %v10315_v39, %v10315_v39  ;;  %v10316_v36 = vmul.f32 %v17113_v47, %v20623_v5  ;;  %16078 = vmatprep.subr.bf16.mxu0 %v22162_v28 }
0x173a   : > { %16063 = vmatmul.mubr.msk.bf16.vlgmr.msra.gmra.mrb[76].mxu1 %vm845_vm2, %v10331_v12  ;;  %v10332_v52 = vpack.c.bf16 %v10316_v36, %v10316_v36 }
0x173b   : > { %16073 = vmatpush3.bf16.msra.mxu1 %v11013_v35  ;;  %16074 = vmatprep.mubr.msk.bf16.mxu1 %vm17303_vm1, %v22162_v28 }
0x173c   : > { %16084 = vmatprep.subr.bf16.mxu1 %v22162_v28 }
0x173e   : > { %16069 = vmatmul.mubr.msk.bf16.vlgmr.msra.gmra.mrb[100].mxu0 %vm845_vm2, %v10332_v52 }
0x173f   : > { %16079 = vmatpush3.bf16.msra.mxu0 %v11061_v50  ;;  %16080 = vmatprep.mubr.msk.bf16.mxu0 %vm17303_vm1, %v22162_v28 }
0x1740   : > { %16090 = vmatprep.subr.bf16.mxu0 %v22162_v28 }
0x175f   : > { %v10283_v5 = vpop.xlane.xlu1 %10282 }
0x1760   : > { %17114 = vrcp.f32 %v10283_v5 }
0x1761   : > { %v10286_v30 = vpop.xlane.xlu0 %10285 }
0x1762   : > { %17116 = vrcp.f32 %v10286_v30 }
0x1763   : > { %v11156_v6 = vpop.permute.xlu1 %11155 }
0x1764   : > { %v11161_v14 = vsel %vm845_vm2, %v11156_v6, 0 }
0x1765   : > { %v11106_v29 = vpop.permute.xlu0 %11105 }
0x1766   : > { %v11111_v37 = vsel %vm845_vm2, %v11106_v29, 0 }
0x1767   : > { %v11154_v19 = vpop.permute.xlu1 %11153 }
0x1769   : > { %v11104_v62 = vpop.permute.xlu0 %11103 }
0x176a   : > { %v17115_v56 = vpop.eup %17114 }
0x176b   : > { %v10317_v24 = vmul.f32 %v17115_v56, %v20633_v44  ;;  %v11256_v8 = vpop.permute.xlu1 %11255 }
0x176c   : > { %v17117_v46 = vpop.eup %17116  ;;  %v11261_v59 = vsel %vm845_vm2, %v11256_v8, 0 }
0x176d   : > { %v10333_v53 = vpack.c.bf16 %v10317_v24, %v10317_v24  ;;  %v10318_v33 = vmul.f32 %v17117_v46, %v20635_v9  ;;  %v11206_v54 = vpop.permute.xlu0 %11205 }
0x176e   : > { %v11211_v31 = vsel %vm845_vm2, %v11206_v54, 0 }
0x176f   : > { %v10334_v21 = vpack.c.bf16 %v10318_v33, %v10318_v33  ;;  %v11254_v57 = vpop.permute.xlu1 %11253  ;;  %16075 = vmatmul.mubr.msk.bf16.vlgmr.msra.gmra.mrb[80].mxu1 %vm845_vm2, %v10333_v53 }
0x1770   : > { %16085 = vmatpush3.bf16.xpose.msra.mxu1 %v11111_v37  ;;  %16086 = vmatprep.mubr.msk.bf16.mxu1 %vm17303_vm1, %v22162_v28 }
0x1771   : > { %16081 = vmatmul.mubr.msk.bf16.vlgmr.msra.gmra.mrb[104].mxu0 %vm845_vm2, %v10334_v21  ;;  %v11204_v44 = vpop.permute.xlu0 %11203  ;;  %16096 = vmatprep.subr.bf16.mxu1 %v22162_v28 }
0x1772   : > { %16091 = vmatpush3.bf16.xpose.msra.mxu0 %v11161_v14  ;;  %16092 = vmatprep.mubr.msk.bf16.mxu0 %vm17303_vm1, %v22162_v28 }
0x1773   : > { %v11356_v9 = vpop.permute.xlu1 %11355  ;;  %16102 = vmatprep.subr.bf16.mxu0 %v22162_v28 }
0x1774   : > { %v11361_v26 = vsel %vm845_vm2, %v11356_v9, 0 }
0x1775   : > { %v11306_v11 = vpop.permute.xlu0 %11305 }
0x1776   : > { %v11311_v17 = vsel %vm845_vm2, %v11306_v11, 0 }
0x1777   : > { %v11354_v34 = vpop.permute.xlu1 %11353  ;;  %16087 = vmatmul.mubr.msk.bf16.vlgmr.msra.gmra.mrb[84].mxu1 %vm845_vm2, %v11104_v62 }
0x1778   : > { %16097 = vmatpush3.bf16.xpose.msra.mxu1 %v11211_v31  ;;  %16098 = vmatprep.mubr.msk.bf16.mxu1 %vm17303_vm1, %v22162_v28 }
0x1779   : > { %16093 = vmatmul.mubr.msk.bf16.vlgmr.msra.gmra.mrb[108].mxu0 %vm845_vm2, %v11154_v19  ;;  %v11304_v42 = vpop.permute.xlu0 %11303  ;;  %16108 = vmatprep.subr.bf16.mxu1 %v22162_v28 }
0x177a   : > { %16103 = vmatpush3.bf16.xpose.msra.mxu0 %v11261_v59  ;;  %16104 = vmatprep.mubr.msk.bf16.mxu0 %vm17303_vm1, %v22162_v28 }
0x177b   : > { %v11456_v13 = vpop.permute.xlu1 %11455  ;;  %16114 = vmatprep.subr.bf16.mxu0 %v22162_v28 }
0x177c   : > { %v11461_v27 = vsel %vm845_vm2, %v11456_v13, 0 }
0x177d   : > { %v11406_v2 = vpop.permute.xlu0 %11405 }
0x177e   : > { %v11411_v48 = vsel %vm845_vm2, %v11406_v2, 0 }
0x177f   : > { %v11454_v49 = vpop.permute.xlu1 %11453  ;;  %16099 = vmatmul.mubr.msk.bf16.vlgmr.msra.gmra.mrb[88].mxu1 %vm845_vm2, %v11204_v44 }
0x1780   : > { %16109 = vmatpush3.bf16.xpose.msra.mxu1 %v11311_v17  ;;  %16110 = vmatprep.mubr.msk.bf16.mxu1 %vm17303_vm1, %v22162_v28 }
0x1781   : > { %16105 = vmatmul.mubr.msk.bf16.vlgmr.msra.gmra.mrb[112].mxu0 %vm845_vm2, %v11254_v57  ;;  %v11404_v22 = vpop.permute.xlu0 %11403  ;;  %16120 = vmatprep.subr.bf16.mxu1 %v22162_v28 }
0x1782   : > { %16115 = vmatpush3.bf16.xpose.msra.mxu0 %v11361_v26  ;;  %16116 = vmatprep.mubr.msk.bf16.mxu0 %vm17303_vm1, %v22162_v28 }
0x1783   : > { %v11556_v18 = vpop.permute.xlu1 %11555  ;;  %16126 = vmatprep.subr.bf16.mxu0 %v22162_v28 }
0x1784   : > { %v11561_v39 = vsel %vm845_vm2, %v11556_v18, 0 }
0x1785   : > { %v11506_v60 = vpop.permute.xlu0 %11505 }
0x1786   : > { %v11511_v40 = vsel %vm845_vm2, %v11506_v60, 0 }
0x1787   : > { %v11554_v45 = vpop.permute.xlu1 %11553  ;;  %16111 = vmatmul.mubr.msk.bf16.vlgmr.msra.gmra.mrb[92].mxu1 %vm845_vm2, %v11304_v42 }
0x1788   : > { %16121 = vmatpush3.bf16.xpose.msra.mxu1 %v11411_v48  ;;  %16122 = vmatprep.mubr.msk.bf16.mxu1 %vm17303_vm1, %v22162_v28 }
0x1789   : > { %16117 = vmatmul.mubr.msk.bf16.vlgmr.msra.gmra.mrb[116].mxu0 %vm845_vm2, %v11354_v34  ;;  %v11504_v3 = vpop.permute.xlu0 %11503  ;;  %16132 = vmatprep.subr.bf16.mxu1 %v22162_v28 }
0x178a   : > { %16127 = vmatpush3.bf16.xpose.msra.mxu0 %v11461_v27  ;;  %16128 = vmatprep.mubr.msk.bf16.mxu0 %vm17303_vm1, %v22162_v28 }
0x178b   : > { %v11656_v55 = vpop.permute.xlu1 %11655  ;;  %16138 = vmatprep.subr.bf16.mxu0 %v22162_v28 }
0x178c   : > { %v11661_v35 = vsel %vm845_vm2, %v11656_v55, 0 }
0x178d   : > { %v11606_v0 = vpop.permute.xlu0 %11605 }
0x178e   : > { %v11611_v36 = vsel %vm845_vm2, %v11606_v0, 0 }
0x178f   : > { %v11654_v51 = vpop.permute.xlu1 %11653  ;;  %16123 = vmatmul.mubr.msk.bf16.vlgmr.msra.gmra.mrb[96].mxu1 %vm845_vm2, %v11404_v22 }
0x1790   : > { %16133 = vmatpush3.bf16.xpose.msra.mxu1 %v11511_v40  ;;  %16134 = vmatprep.mubr.msk.bf16.mxu1 %vm17303_vm1, %v22162_v28 }
0x1791   : > { %16129 = vmatmul.mubr.msk.bf16.vlgmr.msra.gmra.mrb[120].mxu0 %vm845_vm2, %v11454_v49  ;;  %v11604_v47 = vpop.permute.xlu0 %11603  ;;  %16144 = vmatprep.subr.bf16.mxu1 %v22162_v28 }
0x1792   : > { %16139 = vmatpush3.bf16.xpose.msra.mxu0 %v11561_v39  ;;  %16140 = vmatprep.mubr.msk.bf16.mxu0 %vm17303_vm1, %v22162_v28 }
0x1793   : > { %16150 = vmatprep.subr.bf16.mxu0 %v22162_v28  ;;  %v11756_v15 = vpop.permute.xlu1 %11755 }
0x1794   : > { %v11761_v30 = vsel %vm845_vm2, %v11756_v15, 0 }
0x1795   : > { %v11706_v12 = vpop.permute.xlu0 %11705 }
0x1796   : > { %v11711_v50 = vsel %vm845_vm2, %v11706_v12, 0 }
0x1797   : > { %16135 = vmatmul.mubr.msk.bf16.vlgmr.msra.gmra.mrb[100].mxu1 %vm845_vm2, %v11504_v3  ;;  %v11754_v20 = vpop.permute.xlu1 %11753 }
0x1798   : > { %16145 = vmatpush3.bf16.xpose.msra.mxu1 %v11611_v36  ;;  %16146 = vmatprep.mubr.msk.bf16.mxu1 %vm17303_vm1, %v22162_v28 }
0x1799   : > { %16141 = vmatmul.mubr.msk.bf16.vlgmr.msra.gmra.mrb[124].mxu0 %vm845_vm2, %v11554_v45  ;;  %16156 = vmatprep.subr.bf16.mxu1 %v22162_v28  ;;  %v11704_v52 = vpop.permute.xlu0 %11703 }
0x179a   : > { %16151 = vmatpush3.bf16.xpose.msra.mxu0 %v11661_v35  ;;  %16152 = vmatprep.mubr.msk.bf16.mxu0 %vm17303_vm1, %v22162_v28 }
0x179b   : > { %16162 = vmatprep.subr.bf16.mxu0 %v22162_v28  ;;  %v11856_v5 = vpop.permute.xlu1 %11855 }
0x179c   : > { %v11861_v56 = vsel %vm845_vm2, %v11856_v5, 0 }
0x179d   : > { %v11806_v6 = vpop.permute.xlu0 %11805 }
0x179e   : > { %v11811_v19 = vsel %vm845_vm2, %v11806_v6, 0 }
0x179f   : > { %16147 = vmatmul.mubr.msk.bf16.vlgmr.msra.gmra.mrb[104].mxu1 %vm845_vm2, %v11604_v47  ;;  %v11854_v29 = vpop.permute.xlu1 %11853 }
0x17a0   : > { %16157 = vmatpush3.bf16.xpose.msra.mxu1 %v11711_v50  ;;  %16158 = vmatprep.mubr.msk.bf16.mxu1 %vm17303_vm1, %v22162_v28 }
0x17a1   : > { %16153 = vmatmul.mubr.msk.bf16.vlgmr.msra.gmra.mrb[128].mxu0 %vm845_vm2, %v11654_v51  ;;  %16168 = vmatprep.subr.bf16.mxu1 %v22162_v28  ;;  %v11804_v62 = vpop.permute.xlu0 %11803 }
0x17a2   : > { %16163 = vmatpush3.bf16.xpose.msra.mxu0 %v11761_v30  ;;  %16164 = vmatprep.mubr.msk.bf16.mxu0 %vm17303_vm1, %v22162_v28 }
0x17a3   : > { %16174 = vmatprep.subr.bf16.mxu0 %v22162_v28  ;;  %v12112_v24 = vpop.permute.xlu1 %12111 }
0x17a4   : > { %v12117_v46 = vsel %vm6787_vm5, %v12112_v24, 0 }
0x17a5   : > { %v12160_v8 = vpop.permute.xlu0 %12159 }
0x17a6   : > { %v12165_v53 = vsel %vm6787_vm5, %v12160_v8, 0 }
0x17a7   : > { %16159 = vmatmul.mubr.msk.bf16.vlgmr.msra.gmra.mrb[108].mxu1 %vm845_vm2, %v11704_v52 }
0x17a8   : > { %16169 = vmatpush3.bf16.xpose.msra.mxu1 %v11811_v19  ;;  %16170 = vmatprep.mubr.msk.bf16.mxu1 %vm17303_vm1, %v22162_v28 }
0x17a9   : > { %16165 = vmatmul.mubr.msk.bf16.vlgmr.msra.gmra.mrb[132].mxu0 %vm845_vm2, %v11754_v20  ;;  %16180 = vmatprep.subr.bf16.mxu1 %v22162_v28 }
0x17aa   : > { %16175 = vmatpush3.bf16.xpose.msra.mxu0 %v11861_v56  ;;  %16176 = vmatprep.mubr.msk.bf16.mxu0 %vm17303_vm1, %v22162_v28 }
0x17ab   : > { %16186 = vmatprep.subr.bf16.mxu0 %v22162_v28 }
0x17af   : > { %16171 = vmatmul.mubr.msk.bf16.vlgmr.msra.gmra.mrb[112].mxu1 %vm845_vm2, %v11804_v62 }
0x17b0   : > { %16181 = vmatpush3.bf16.msra.mxu1 %v12117_v46  ;;  %16182 = vmatprep.mubr.msk.bf16.mxu1 %vm17303_vm1, %v22162_v28 }
0x17b1   : > { %16177 = vmatmul.mubr.msk.bf16.vlgmr.msra.gmra.mrb[136].mxu0 %vm845_vm2, %v11854_v29  ;;  %16192 = vmatprep.subr.bf16.mxu1 %v22162_v28 }
0x17b2   : > { %16187 = vmatpush3.bf16.msra.mxu0 %v12165_v53  ;;  %16188 = vmatprep.mubr.msk.bf16.mxu0 %vm17303_vm1, %v22162_v28 }
0x17b3   : > { %16198 = vmatprep.subr.bf16.mxu0 %v22162_v28 }
0x17dd   : > { %v20915_v33 = vpop.f32.mrb[52].mxu1 }
0x17de   : > { %v15992_v54 = vpop.f32.mrb[53].mxu1 }
0x17df   : > { %v10380_v21 = vpop.f32.mrb[54].mxu1  ;;  %v20917_v37 = vpop.f32.mrb[76].mxu0 }
0x17e0   : > { %v15993_v14 = vpop.f32.mrb[55].mxu1  ;;  %v15998_v44 = vpop.f32.mrb[77].mxu0 }
0x17e1   : > { %v10428_v9 = vpop.f32.mrb[78].mxu0 }
0x17e2   : > { %v15999_v11 = vpop.f32.mrb[79].mxu0 }
0x17e5   : > { %v20921_v31 = vpop.f32.mrb[56].mxu1 }
0x17e6   : > { %v16004_v34 = vpop.f32.mrb[57].mxu1 }
0x17e7   : > { %v10476_v59 = vpop.f32.mrb[58].mxu1 }
0x17e8   : > { %v16005_v42 = vpop.f32.mrb[59].mxu1 }
0x17e9   : > { %v20923_v13 = vpop.f32.mrb[80].mxu0 }
0x17ea   : > { %v16010_v17 = vpop.f32.mrb[81].mxu0 }
0x17eb   : > { %v10524_v49 = vpop.f32.mrb[82].mxu0 }
0x17ec   : > { %v16011_v26 = vpop.f32.mrb[83].mxu0 }
0x17ed   : > { %v20927_v22 = vpop.f32.mrb[60].mxu1 }
0x17ee   : > { %v16016_v18 = vpop.f32.mrb[61].mxu1 }
0x17ef   : > { %v10572_v60 = vpop.f32.mrb[62].mxu1 }
0x17f0   : > { %v16017_v48 = vpop.f32.mrb[63].mxu1 }
0x17f1   : > { %v20929_v45 = vpop.f32.mrb[84].mxu0 }
0x17f2   : > { %v16022_v3 = vpop.f32.mrb[85].mxu0 }
0x17f3   : > { %v10620_v55 = vpop.f32.mrb[86].mxu0 }
0x17f4   : > { %v16023_v0 = vpop.f32.mrb[87].mxu0 }
0x17f5   : > { %v20933_v40 = vpop.f32.mrb[64].mxu1 }
0x17f6   : > { %v16028_v51 = vpop.f32.mrb[65].mxu1 }
0x17f7   : > { %v10668_v39 = vpop.f32.mrb[66].mxu1 }
0x17f8   : > { %v16029_v47 = vpop.f32.mrb[67].mxu1 }
0x17f9   : > { %v20935_v15 = vpop.f32.mrb[88].mxu0 }
0x17fa   : > { %v16034_v36 = vpop.f32.mrb[89].mxu0 }
0x17fb   : > { %v10716_v35 = vpop.f32.mrb[90].mxu0 }
0x17fc   : > { %v16035_v20 = vpop.f32.mrb[91].mxu0 }
0x17fd   : > { %v20939_v52 = vpop.f32.mrb[68].mxu1 }
0x17fe   : > { %v16040_v50 = vpop.f32.mrb[69].mxu1 }
0x17ff   : > { %v10764_v5 = vpop.f32.mrb[70].mxu1 }
0x1800   : > { %v16041_v30 = vpop.f32.mrb[71].mxu1 }
0x1801   : > { %v20941_v6 = vpop.f32.mrb[92].mxu0 }
0x1802   : > { %v16046_v19 = vpop.f32.mrb[93].mxu0 }
0x1803   : > { %v10812_v62 = vpop.f32.mrb[94].mxu0 }
0x1804   : > { %v16047_v56 = vpop.f32.mrb[95].mxu0 }
0x1805   : > { %v20945_v24 = vpop.f32.mrb[72].mxu1 }
0x1806   : > { %v16052_v8 = vpop.f32.mrb[73].mxu1 }
0x1807   : > { %v10860_v46 = vpop.f32.mrb[74].mxu1 }
0x1808   : > { %v16053_v53 = vpop.f32.mrb[75].mxu1 }
0x1809   : > { %v20947_v54 = vpop.f32.mrb[96].mxu0 }
0x180a   : > { %v16058_v14 = vpop.f32.mrb[97].mxu0 }
0x180b   : > { %v10908_v44 = vpop.f32.mrb[98].mxu0 }
0x180c   : > { %v16059_v9 = vpop.f32.mrb[99].mxu0 }
0x180d   : > { %v20951_v11 = vpop.f32.mrb[76].mxu1 }
0x180e   : > { %v16064_v34 = vpop.f32.mrb[77].mxu1 }
0x180f   : > { %v10956_v59 = vpop.f32.mrb[78].mxu1 }
0x1810   : > { %v16065_v42 = vpop.f32.mrb[79].mxu1 }
0x1811   : > { %v20953_v17 = vpop.f32.mrb[100].mxu0 }
0x1812   : > { %v16070_v26 = vpop.f32.mrb[101].mxu0 }
0x1813   : > { %v11004_v18 = vpop.f32.mrb[102].mxu0 }
0x1814   : > { %v16071_v60 = vpop.f32.mrb[103].mxu0 }
0x1842   : > { %v20957_v48 = vpop.f32.mrb[80].mxu1 }
0x1843   : > { %22252 = vst [vmem:[#allocation43_spill] sm:$0xff] %v20957_v48  ;;  %v16076_v3 = vpop.f32.mrb[81].mxu1 }
0x1844   : > { %v11052_v55 = vpop.f32.mrb[82].mxu1  ;;  %v20959_v0 = vpop.f32.mrb[104].mxu0 }
0x1845   : > { %v16077_v39 = vpop.f32.mrb[83].mxu1  ;;  %v16082_v47 = vpop.f32.mrb[105].mxu0 }
0x1846   : > { %v11100_v36 = vpop.f32.mrb[106].mxu0 }
0x1847   : > { %v16083_v35 = vpop.f32.mrb[107].mxu0 }
0x184a   : > { %v11147_v20 = vpop.f32.mrb[84].mxu1 }
0x184b   : > { %v20963_v50 = vmul.f32 0.35355338, %v11147_v20  ;;  %v16088_v5 = vpop.f32.mrb[85].mxu1 }
0x184c   : > { %v11150_v30 = vpop.f32.mrb[86].mxu1  ;;  %v11197_v19 = vpop.f32.mrb[108].mxu0 }
0x184d   : > { %v20965_v62 = vmul.f32 0.35355338, %v11197_v19  ;;  %v16089_v56 = vpop.f32.mrb[87].mxu1  ;;  %v16094_v8 = vpop.f32.mrb[109].mxu0  ;;  %v11919_v46 = vsel %vm845_vm2, %v20963_v50, -inf }
0x184e   : > { %v11200_v53 = vpop.f32.mrb[110].mxu0  ;;  %11920 = vmax.xlane.f32.xlu0 %v11919_v46 }
0x184f   : > { %v16095_v14 = vpop.f32.mrb[111].mxu0  ;;  %v11922_v44 = vsel %vm845_vm2, %v20965_v62, -inf }
0x1850   : > { %11923 = vmax.xlane.f32.xlu1 %v11922_v44 }
0x1852   : > { %v11247_v9 = vpop.f32.mrb[88].mxu1 }
0x1853   : > { %v20971_v34 = vmul.f32 0.35355338, %v11247_v9  ;;  %v16100_v59 = vpop.f32.mrb[89].mxu1 }
0x1854   : > { %v11250_v42 = vpop.f32.mrb[90].mxu1  ;;  %v11297_v26 = vpop.f32.mrb[112].mxu0 }
0x1855   : > { %v20973_v18 = vmul.f32 0.35355338, %v11297_v26  ;;  %v16101_v60 = vpop.f32.mrb[91].mxu1  ;;  %v16106_v3 = vpop.f32.mrb[113].mxu0  ;;  %v11925_v55 = vsel %vm845_vm2, %v20971_v34, -inf }
0x1856   : > { %v11300_v39 = vpop.f32.mrb[114].mxu0  ;;  %11926 = vmax.xlane.f32.xlu0 %v11925_v55 }
0x1857   : > { %v16107_v47 = vpop.f32.mrb[115].mxu0  ;;  %v11928_v36 = vsel %vm845_vm2, %v20973_v18, -inf }
0x185a   : > { %11929 = vmax.xlane.f32.xlu0 %v11928_v36  ;;  %v11347_v35 = vpop.f32.mrb[92].mxu1 }
0x185b   : > { %v20979_v20 = vmul.f32 0.35355338, %v11347_v35  ;;  %v16112_v5 = vpop.f32.mrb[93].mxu1 }
0x185c   : > { %v11350_v30 = vpop.f32.mrb[94].mxu1  ;;  %v11397_v19 = vpop.f32.mrb[116].mxu0 }
0x185d   : > { %v20981_v56 = vmul.f32 0.35355338, %v11397_v19  ;;  %v16113_v8 = vpop.f32.mrb[95].mxu1  ;;  %v16118_v46 = vpop.f32.mrb[117].mxu0  ;;  %v11931_v53 = vsel %vm845_vm2, %v20979_v20, -inf }
0x185e   : > { %v11400_v14 = vpop.f32.mrb[118].mxu0  ;;  %11932 = vmax.xlane.f32.xlu1 %v11931_v53 }
0x185f   : > { %v16119_v44 = vpop.f32.mrb[119].mxu0  ;;  %v11934_v9 = vsel %vm845_vm2, %v20981_v56, -inf }
0x1860   : > { %11935 = vmax.xlane.f32.xlu0 %v11934_v9 }
0x1862   : > { %v11447_v59 = vpop.f32.mrb[96].mxu1 }
0x1863   : > { %v20987_v42 = vmul.f32 0.35355338, %v11447_v59  ;;  %v16124_v26 = vpop.f32.mrb[97].mxu1 }
0x1864   : > { %v11450_v60 = vpop.f32.mrb[98].mxu1  ;;  %v11497_v3 = vpop.f32.mrb[120].mxu0 }
0x1865   : > { %v20989_v55 = vmul.f32 0.35355338, %v11497_v3  ;;  %v16125_v39 = vpop.f32.mrb[99].mxu1  ;;  %v16130_v47 = vpop.f32.mrb[121].mxu0  ;;  %v11937_v36 = vsel %vm845_vm2, %v20987_v42, -inf }
0x1866   : > { %v11500_v35 = vpop.f32.mrb[122].mxu0  ;;  %11938 = vmax.xlane.f32.xlu1 %v11937_v36 }
0x1867   : > { %v16131_v5 = vpop.f32.mrb[123].mxu0  ;;  %v11940_v30 = vsel %vm845_vm2, %v20989_v55, -inf }
0x1868   : > { %11941 = vmax.xlane.f32.xlu0 %v11940_v30 }
0x186a   : > { %v11547_v19 = vpop.f32.mrb[100].mxu1 }
0x186b   : > { %v20995_v8 = vmul.f32 0.35355338, %v11547_v19  ;;  %v16136_v46 = vpop.f32.mrb[101].mxu1 }
0x186c   : > { %v11550_v53 = vpop.f32.mrb[102].mxu1  ;;  %v11597_v14 = vpop.f32.mrb[124].mxu0 }
0x186d   : > { %v20997_v44 = vmul.f32 0.35355338, %v11597_v14  ;;  %v16137_v9 = vpop.f32.mrb[103].mxu1  ;;  %v16142_v59 = vpop.f32.mrb[125].mxu0  ;;  %v11943_v26 = vsel %vm845_vm2, %v20995_v8, -inf }
0x186e   : > { %v11600_v60 = vpop.f32.mrb[126].mxu0  ;;  %11944 = vmax.xlane.f32.xlu1 %v11943_v26 }
0x186f   : > { %v16143_v3 = vpop.f32.mrb[127].mxu0  ;;  %v11946_v39 = vsel %vm845_vm2, %v20997_v44, -inf }
0x1870   : > { %11947 = vmax.xlane.f32.xlu0 %v11946_v39 }
0x1872   : > { %v11647_v47 = vpop.f32.mrb[104].mxu1 }
0x1873   : > { %v21003_v36 = vmul.f32 0.35355338, %v11647_v47  ;;  %v16148_v35 = vpop.f32.mrb[105].mxu1 }
0x1874   : > { %v11650_v5 = vpop.f32.mrb[106].mxu1  ;;  %v11697_v30 = vpop.f32.mrb[128].mxu0 }
0x1875   : > { %v21005_v19 = vmul.f32 0.35355338, %v11697_v30  ;;  %v16149_v46 = vpop.f32.mrb[107].mxu1  ;;  %v16154_v53 = vpop.f32.mrb[129].mxu0  ;;  %v11949_v14 = vsel %vm845_vm2, %v21003_v36, -inf }
0x1876   : > { %v11700_v9 = vpop.f32.mrb[130].mxu0  ;;  %11950 = vmax.xlane.f32.xlu1 %v11949_v14 }
0x1877   : > { %v16155_v59 = vpop.f32.mrb[131].mxu0  ;;  %v11952_v26 = vsel %vm845_vm2, %v21005_v19, -inf }
0x1878   : > { %11953 = vmax.xlane.f32.xlu0 %v11952_v26 }
0x187a   : > { %v11747_v60 = vpop.f32.mrb[108].mxu1 }
0x187b   : > { %v21011_v3 = vmul.f32 0.35355338, %v11747_v60  ;;  %v16160_v39 = vpop.f32.mrb[109].mxu1 }
0x187c   : > { %v11750_v47 = vpop.f32.mrb[110].mxu1  ;;  %v11797_v35 = vpop.f32.mrb[132].mxu0 }
0x187d   : > { %v21013_v5 = vmul.f32 0.35355338, %v11797_v35  ;;  %v16161_v30 = vpop.f32.mrb[111].mxu1  ;;  %v16166_v46 = vpop.f32.mrb[133].mxu0  ;;  %v11955_v53 = vsel %vm845_vm2, %v21011_v3, -inf }
0x187e   : > { %v11800_v9 = vpop.f32.mrb[134].mxu0  ;;  %11956 = vmax.xlane.f32.xlu1 %v11955_v53 }
0x187f   : > { %v16167_v14 = vpop.f32.mrb[135].mxu0  ;;  %v11958_v59 = vsel %vm845_vm2, %v21013_v5, -inf }
0x1880   : > { %11959 = vmax.xlane.f32.xlu0 %v11958_v59  ;;  %v21035_v59 = vpop.permute.xlu0 %12255 }
0x1882   : > { %v11847_v26 = vpop.f32.mrb[112].mxu1 }
0x1883   : > { %v21019_v60 = vmul.f32 0.35355338, %v11847_v26  ;;  %v16172_v39 = vpop.f32.mrb[113].mxu1 }
0x1884   : > { %v11850_v47 = vpop.f32.mrb[114].mxu1  ;;  %v11897_v51 = vpop.f32.mrb[136].mxu0 }
0x1885   : > { %v21021_v35 = vmul.f32 0.35355338, %v11897_v51  ;;  %v16173_v30 = vpop.f32.mrb[115].mxu1  ;;  %v16178_v46 = vpop.f32.mrb[137].mxu0  ;;  %v11961_v49 = vsel %vm845_vm2, %v21019_v60, -inf }
0x1886   : > { %v11900_v9 = vpop.f32.mrb[138].mxu0  ;;  %11962 = vmax.xlane.f32.xlu1 %v11961_v49  ;;  %v21033_v51 = vpop.permute.xlu1 %12207 }
0x1887   : > { %v16179_v53 = vpop.f32.mrb[139].mxu0  ;;  %v11964_v14 = vsel %vm845_vm2, %v21021_v35, -inf  ;;  %v21039_v49 = vpop.permute.xlu0 %12351 }
0x1888   : > { %11965 = vmax.xlane.f32.xlu0 %v11964_v14 }
0x188a   : > { %v21037_v26 = vpop.permute.xlu1 %12303 }
0x188b   : > { %v21043_v47 = vpop.permute.xlu0 %12447 }
0x188e   : > { %v21041_v39 = vpop.permute.xlu1 %12399 }
0x1892   : > { %v21045_v30 = vpop.permute.xlu1 %12495 }
0x1897   : > { %12591 = vrot.lane.b32.xlu1 %v19329_v1, %s22251_s30 }
0x189b   : > { %12639 = vrot.lane.b32.xlu1 %v19337_v16, %s22251_s30 }
0x189e   : > { %12543 = vrot.lane.b32.xlu0 %v19331_v4, %s22251_s30 }
0x18db   : > { %v11921_v1 = vpop.xlane.xlu0 %11920 }
0x18dc   : > { %v11967_v16 = vsub.f32 %v20963_v50, %v11921_v1 }
0x18dd   : > { %v11924_v46 = vpop.xlane.xlu1 %11923 }
0x18de   : > { %v11983_v9 = vmul.f32 1.442695, %v11967_v16  ;;  %v11968_v4 = vsub.f32 %v20965_v62, %v11924_v46 }
0x18e0   : > { %17118 = vpow2.f32 %v11983_v9  ;;  %v11985_v53 = vmul.f32 1.442695, %v11968_v4 }
0x18e2   : > { %17120 = vpow2.f32 %v11985_v53 }
0x18e3   : > { %v11927_v14 = vpop.xlane.xlu0 %11926 }
0x18e4   : > { %v11969_v21 = vsub.f32 %v20971_v34, %v11927_v14 }
0x18e6   : > { %v11987_v29 = vmul.f32 1.442695, %v11969_v21 }
0x18e7   : > { %v11930_v27 = vpop.xlane.xlu0 %11929 }
0x18e8   : > { %17122 = vpow2.f32 %v11987_v29  ;;  %v11970_v12 = vsub.f32 %v20973_v18, %v11930_v27 }
0x18ea   : > { %v21051_v57 = vpop.eup %17118  ;;  %v11989_v2 = vmul.f32 1.442695, %v11970_v12 }
0x18eb   : > { %v11933_v48 = vpop.xlane.xlu1 %11932  ;;  %v12015_v50 = vsel %vm845_vm2, %v21051_v57, 0.0 }
0x18ec   : > { %v21055_v1 = vpop.eup %17120  ;;  %17124 = vpow2.f32 %v11989_v2  ;;  %v11971_v62 = vsub.f32 %v20979_v20, %v11933_v48  ;;  %12016 = vadd.xlane.f32.xlu1 %v12015_v50 }
0x18ed   : > { %v11936_v16 = vpop.xlane.xlu0 %11935  ;;  %v12018_v21 = vsel %vm845_vm2, %v21055_v1, 0.0 }
0x18ee   : > { %v11991_v29 = vmul.f32 1.442695, %v11971_v62  ;;  %v11972_v27 = vsub.f32 %v20981_v56, %v11936_v16  ;;  %12019 = vadd.xlane.f32.xlu0 %v12018_v21 }
0x18f0   : > { %17126 = vpow2.f32 %v11991_v29  ;;  %v11993_v12 = vmul.f32 1.442695, %v11972_v27 }
0x18f2   : > { %v21061_v34 = vpop.eup %17122  ;;  %17128 = vpow2.f32 %v11993_v12 }
0x18f3   : > { %v11939_v18 = vpop.xlane.xlu1 %11938  ;;  %v12021_v2 = vsel %vm845_vm2, %v21061_v34, 0.0 }
0x18f4   : > { %v11973_v48 = vsub.f32 %v20987_v42, %v11939_v18  ;;  %12022 = vadd.xlane.f32.xlu1 %v12021_v2 }
0x18f5   : > { %v11942_v20 = vpop.xlane.xlu0 %11941 }
0x18f6   : > { %v21066_v46 = vpop.eup %17124  ;;  %v11995_v9 = vmul.f32 1.442695, %v11973_v48  ;;  %v11974_v4 = vsub.f32 %v20989_v55, %v11942_v20 }
0x18f7   : > { %v12024_v56 = vsel %vm845_vm2, %v21066_v46, 0.0 }
0x18f8   : > { %17130 = vpow2.f32 %v11995_v9  ;;  %v11997_v53 = vmul.f32 1.442695, %v11974_v4  ;;  %12025 = vadd.xlane.f32.xlu0 %v12024_v56 }
0x18fa   : > { %v21071_v14 = vpop.eup %17126  ;;  %17132 = vpow2.f32 %v11997_v53 }
0x18fb   : > { %v11945_v50 = vpop.xlane.xlu1 %11944  ;;  %v12027_v42 = vsel %vm845_vm2, %v21071_v14, 0.0 }
0x18fc   : > { %v21075_v62 = vpop.eup %17128  ;;  %v11975_v16 = vsub.f32 %v20995_v8, %v11945_v50  ;;  %12028 = vadd.xlane.f32.xlu1 %v12027_v42 }
0x18fd   : > { %v11948_v21 = vpop.xlane.xlu0 %11947  ;;  %v12030_v55 = vsel %vm845_vm2, %v21075_v62, 0.0 }
0x18fe   : > { %v11999_v29 = vmul.f32 1.442695, %v11975_v16  ;;  %v11976_v27 = vsub.f32 %v20997_v44, %v11948_v21  ;;  %12031 = vadd.xlane.f32.xlu0 %v12030_v55 }
0x1900   : > { %17134 = vpow2.f32 %v11999_v29  ;;  %v12001_v12 = vmul.f32 1.442695, %v11976_v27 }
0x1902   : > { %v21081_v18 = vpop.eup %17130  ;;  %17136 = vpow2.f32 %v12001_v12 }
0x1903   : > { %v11951_v2 = vpop.xlane.xlu1 %11950  ;;  %v12033_v48 = vsel %vm845_vm2, %v21081_v18, 0.0 }
0x1904   : > { %v21085_v20 = vpop.eup %17132  ;;  %v11977_v8 = vsub.f32 %v21003_v36, %v11951_v2  ;;  %12034 = vadd.xlane.f32.xlu1 %v12033_v48 }
0x1905   : > { %v11954_v9 = vpop.xlane.xlu0 %11953  ;;  %v12036_v4 = vsel %vm845_vm2, %v21085_v20, 0.0 }
0x1906   : > { %v12003_v44 = vmul.f32 1.442695, %v11977_v8  ;;  %v11978_v56 = vsub.f32 %v21005_v19, %v11954_v9  ;;  %12037 = vadd.xlane.f32.xlu0 %v12036_v4 }
0x1908   : > { %17138 = vpow2.f32 %v12003_v44  ;;  %v12005_v53 = vmul.f32 1.442695, %v11978_v56 }
0x190a   : > { %v21091_v50 = vpop.eup %17134  ;;  %17140 = vpow2.f32 %v12005_v53 }
0x190b   : > { %v12039_v42 = vsel %vm845_vm2, %v21091_v50, 0.0  ;;  %v11957_v27 = vpop.xlane.xlu1 %11956 }
0x190c   : > { %v21095_v16 = vpop.eup %17136  ;;  %12040 = vadd.xlane.f32.xlu1 %v12039_v42  ;;  %v11979_v2 = vsub.f32 %v21011_v3, %v11957_v27  ;;  %v22254_v27 = vpack.i.bf16 %v20429_v7, %v20427_v38  ;;  %v22259_v38 = vpack.i.bf16 %v20917_v37, %v20915_v33  ;;  %v22266_v33 = vpack.i.bf16 %v20929_v45, %v20927_v22 }
0x190d   : > { %v12042_v36 = vsel %vm845_vm2, %v21095_v16, 0.0  ;;  %v11960_v12 = vpop.xlane.xlu0 %11959 }
0x190e   : > { %12043 = vadd.xlane.f32.xlu0 %v12042_v36  ;;  %v11980_v8 = vsub.f32 %v21013_v5, %v11960_v12  ;;  %v12007_v4 = vmul.f32 1.442695, %v11979_v2  ;;  %v22256_v12 = vpack.i.bf16 %v20923_v13, %v20921_v31  ;;  %v22257_v2 = vpack.i.bf16 %v20423_v61, %v20421_v10  ;;  %v22261_v10 = vld [vmem:[#allocation34_spill] sm:$0xff] }
0x190f   : > { %v22262_v61 = vpack.i.bf16 %v20435_v41, %v22261_v10 }
0x1910   : > { %v12009_v56 = vmul.f32 1.442695, %v11980_v8  ;;  %17142 = vpow2.f32 %v12007_v4 }
0x1912   : > { %v21099_v21 = vpop.eup %17138  ;;  %17144 = vpow2.f32 %v12009_v56 }
0x1913   : > { %v12045_v19 = vsel %vm845_vm2, %v21099_v21, 0.0  ;;  %v11963_v48 = vpop.xlane.xlu1 %11962 }
0x1914   : > { %v21103_v55 = vpop.eup %17140  ;;  %12046 = vadd.xlane.f32.xlu1 %v12045_v19  ;;  %v11981_v44 = vsub.f32 %v21019_v60, %v11963_v48  ;;  %v22268_v48 = vld [vmem:[#allocation35_spill] sm:$0xff] }
0x1915   : > { %v12048_v29 = vsel %vm845_vm2, %v21103_v55, 0.0  ;;  %v11966_v9 = vpop.xlane.xlu0 %11965 }
0x1916   : > { %12049 = vadd.xlane.f32.xlu0 %v12048_v29  ;;  %v11982_v53 = vsub.f32 %v21021_v35, %v11966_v9  ;;  %v12011_v42 = vmul.f32 1.442695, %v11981_v44 }
0x1917   : > { %v21159_v7 = vpop.permute.xlu1 %12591 }
0x1918   : > { %17146 = vpow2.f32 %v12011_v42  ;;  %v12213_v42 = vsel %vm6787_vm5, %v21033_v51, 0 }
0x1919   : > { %v21175_v37 = vpop.permute.xlu0 %12543 }
0x191b   : > { %v21169_v13 = vpop.permute.xlu1 %12639 }
0x1925   : > { %12735 = vrot.lane.b32.xlu1 %v19347_v23, %s22251_s30  ;;  %v12013_v23 = vmul.f32 1.442695, %v11982_v53 }
0x1927   : > { %17148 = vpow2.f32 %v12013_v23 }
0x192c   : > { %12687 = vrot.lane.b32.xlu0 %v19343_v32, %s22251_s30  ;;  %v21115_v32 = vpop.eup %17142 }
0x192d   : > { %v21117_v36 = vpop.eup %17144  ;;  %v12051_v3 = vsel %vm845_vm2, %v21115_v32, 0.0 }
0x192e   : > { %v21121_v5 = vpop.eup %17146  ;;  %v12054_v60 = vsel %vm845_vm2, %v21117_v36, 0.0 }
0x192f   : > { %v12057_v19 = vsel %vm845_vm2, %v21121_v5, 0.0 }
0x1931   : > { %v21125_v35 = vpop.eup %17148 }
0x1932   : > { %v12060_v29 = vsel %vm845_vm2, %v21125_v35, 0.0 }
0x1949   : > { %12052 = vadd.xlane.f32.xlu1 %v12051_v3 }
0x194b   : > { %12055 = vadd.xlane.f32.xlu0 %v12054_v60 }
0x194d   : > { %12058 = vadd.xlane.f32.xlu1 %v12057_v19 }
0x194f   : > { %12061 = vadd.xlane.f32.xlu0 %v12060_v29 }
0x195e   : > { %12831 = vrot.lane.b32.xlu1 %v19353_v25, %s22251_s30  ;;  %v22258_v25 = vpack.i.bf16 %v20441_v58, %v20439_v43  ;;  %v22263_v43 = vld [vmem:[#allocation38_spill] sm:$0xff]  ;;  %v22264_v58 = vld [vmem:[#allocation37_spill] sm:$0xff] }
0x195f   : > { %v22265_v31 = vpack.i.bf16 %v22263_v43, %v22264_v58 }
0x1962   : > { %16498 = vrot.lane.b32.xlu1 %v22254_v27, %s22253_s28 }
0x1965   : > { %12783 = vrot.lane.b32.xlu0 %v19345_v63, %s22251_s30  ;;  %v22260_v63 = vpack.i.bf16 %v20935_v15, %v20933_v40  ;;  %v22267_v15 = vld [vmem:[#allocation36_spill] sm:$0xff] }
0x1966   : > { %16508 = vrot.lane.b32.xlu1 %v22256_v12, %s22255_s29  ;;  %v22269_v41 = vpack.i.bf16 %v22267_v15, %v22268_v48  ;;  %v12501_v15 = vsel %vm6787_vm5, %v21045_v30, 0 }
0x1969   : > { %16493 = vrot.lane.b32.xlu0 %v22257_v2, %s22253_s28 }
0x196a   : > { %16518 = vrot.lane.b32.xlu1 %v22258_v25, %s22253_s28 }
0x196d   : > { %16503 = vrot.lane.b32.xlu0 %v22259_v38, %s22255_s29  ;;  %v12357_v38 = vsel %vm6787_vm5, %v21039_v49, 0 }
0x196e   : > { %16528 = vrot.lane.b32.xlu1 %v22260_v63, %s22255_s29 }
0x1971   : > { %16513 = vrot.lane.b32.xlu0 %v22262_v61, %s22253_s28  ;;  %v12405_v61 = vsel %vm6787_vm5, %v21041_v39, 0 }
0x1972   : > { %16538 = vrot.lane.b32.xlu1 %v22265_v31, %s22253_s28 }
0x1975   : > { %16523 = vrot.lane.b32.xlu0 %v22266_v33, %s22255_s29 }
0x1979   : > { %v12017_v40 = vpop.xlane.xlu1 %12016  ;;  %16533 = vrot.lane.b32.xlu0 %v22269_v41, %s22253_s28 }
0x197a   : > { %17150 = vrcp.f32 %v12017_v40 }
0x197b   : > { %v12020_v8 = vpop.xlane.xlu0 %12019 }
0x197c   : > { %17152 = vrcp.f32 %v12020_v8 }
0x1981   : > { %v12023_v9 = vpop.xlane.xlu1 %12022 }
0x1982   : > { %17154 = vrcp.f32 %v12023_v9 }
0x1984   : > { %v17151_v4 = vpop.eup %17150 }
0x1985   : > { %v12079_v44 = vmul.f32 %v17151_v4, %v21051_v57  ;;  %v12026_v56 = vpop.xlane.xlu0 %12025  ;;  %v12261_v57 = vsel %vm6787_vm5, %v21035_v59, 0  ;;  %v12309_v59 = vsel %vm6787_vm5, %v21037_v26, 0 }
0x1986   : > { %v17153_v53 = vpop.eup %17152  ;;  %17156 = vrcp.f32 %v12026_v56  ;;  %v12645_v56 = vsel %vm6787_vm5, %v21169_v13, 0 }
0x1987   : > { %v12095_v22 = vpack.c.bf16 %v12079_v44, %v12079_v44  ;;  %v12080_v45 = vmul.f32 %v17153_v53, %v21055_v1  ;;  %v12597_v44 = vsel %vm6787_vm5, %v21159_v7, 0 }
0x1989   : > { %v12096_v23 = vpack.c.bf16 %v12080_v45, %v12080_v45  ;;  %16183 = vmatmul.mubr.msk.bf16.vlgmr.msra.gmra.mrb[116].mxu1 %vm845_vm2, %v12095_v22  ;;  %v12029_v3 = vpop.xlane.xlu1 %12028 }
0x198a   : > { %16193 = vmatpush3.bf16.msra.mxu1 %v12213_v42  ;;  %17158 = vrcp.f32 %v12029_v3  ;;  %16194 = vmatprep.mubr.msk.bf16.mxu1 %vm17303_vm1, %v22162_v28 }
0x198b   : > { %16189 = vmatmul.mubr.msk.bf16.vlgmr.msra.gmra.mrb[140].mxu0 %vm845_vm2, %v12096_v23  ;;  %v12032_v60 = vpop.xlane.xlu0 %12031  ;;  %16204 = vmatprep.subr.bf16.mxu1 %v22162_v28 }
0x198c   : > { %v17155_v1 = vpop.eup %17154  ;;  %16199 = vmatpush3.bf16.msra.mxu0 %v12261_v57  ;;  %17160 = vrcp.f32 %v12032_v60  ;;  %16200 = vmatprep.mubr.msk.bf16.mxu0 %vm17303_vm1, %v22162_v28 }
0x198d   : > { %v12081_v51 = vmul.f32 %v17155_v1, %v21061_v34  ;;  %16210 = vmatprep.subr.bf16.mxu0 %v22162_v28 }
0x198f   : > { %v12097_v19 = vpack.c.bf16 %v12081_v51, %v12081_v51 }
0x1990   : > { %v17157_v29 = vpop.eup %17156 }
0x1991   : > { %v12082_v27 = vmul.f32 %v17157_v29, %v21066_v46  ;;  %16195 = vmatmul.mubr.msk.bf16.vlgmr.msra.gmra.mrb[120].mxu1 %vm845_vm2, %v12097_v19  ;;  %v12035_v12 = vpop.xlane.xlu1 %12034 }
0x1992   : > { %16205 = vmatpush3.bf16.msra.mxu1 %v12309_v59  ;;  %17162 = vrcp.f32 %v12035_v12  ;;  %16206 = vmatprep.mubr.msk.bf16.mxu1 %vm17303_vm1, %v22162_v28 }
0x1993   : > { %v12098_v2 = vpack.c.bf16 %v12082_v27, %v12082_v27  ;;  %v12038_v25 = vpop.xlane.xlu0 %12037  ;;  %16216 = vmatprep.subr.bf16.mxu1 %v22162_v28 }
0x1994   : > { %v17159_v34 = vpop.eup %17158  ;;  %17164 = vrcp.f32 %v12038_v25 }
0x1995   : > { %v12083_v26 = vmul.f32 %v17159_v34, %v21071_v14  ;;  %16201 = vmatmul.mubr.msk.bf16.vlgmr.msra.gmra.mrb[144].mxu0 %vm845_vm2, %v12098_v2 }
0x1996   : > { %v17161_v46 = vpop.eup %17160  ;;  %16211 = vmatpush3.bf16.msra.mxu0 %v12357_v38  ;;  %16212 = vmatprep.mubr.msk.bf16.mxu0 %vm17303_vm1, %v22162_v28 }
0x1997   : > { %v12099_v63 = vpack.c.bf16 %v12083_v26, %v12083_v26  ;;  %v12084_v10 = vmul.f32 %v17161_v46, %v21075_v62  ;;  %16222 = vmatprep.subr.bf16.mxu0 %v22162_v28  ;;  %v12453_v62 = vsel %vm6787_vm5, %v21043_v47, 0 }
0x1999   : > { %16207 = vmatmul.mubr.msk.bf16.vlgmr.msra.gmra.mrb[124].mxu1 %vm845_vm2, %v12099_v63  ;;  %v12041_v49 = vpop.xlane.xlu1 %12040  ;;  %v12100_v14 = vpack.c.bf16 %v12084_v10, %v12084_v10 }
0x199a   : > { %16217 = vmatpush3.bf16.msra.mxu1 %v12405_v61  ;;  %17166 = vrcp.f32 %v12041_v49  ;;  %16218 = vmatprep.mubr.msk.bf16.mxu1 %vm17303_vm1, %v22162_v28 }
0x199b   : > { %v12044_v43 = vpop.xlane.xlu0 %12043  ;;  %16228 = vmatprep.subr.bf16.mxu1 %v22162_v28 }
0x199c   : > { %v17163_v58 = vpop.eup %17162  ;;  %17168 = vrcp.f32 %v12044_v43 }
0x199d   : > { %v12085_v31 = vmul.f32 %v17163_v58, %v21081_v18  ;;  %16213 = vmatmul.mubr.msk.bf16.vlgmr.msra.gmra.mrb[148].mxu0 %vm845_vm2, %v12100_v14 }
0x199e   : > { %v17165_v39 = vpop.eup %17164  ;;  %16223 = vmatpush3.bf16.msra.mxu0 %v12453_v62  ;;  %16224 = vmatprep.mubr.msk.bf16.mxu0 %vm17303_vm1, %v22162_v28 }
0x199f   : > { %v12101_v33 = vpack.c.bf16 %v12085_v31, %v12085_v31  ;;  %v12086_v40 = vmul.f32 %v17165_v39, %v21085_v20  ;;  %16234 = vmatprep.subr.bf16.mxu0 %v22162_v28  ;;  %v12549_v20 = vsel %vm6787_vm5, %v21175_v37, 0 }
0x19a1   : > { %16219 = vmatmul.mubr.msk.bf16.vlgmr.msra.gmra.mrb[128].mxu1 %vm845_vm2, %v12101_v33  ;;  %v12047_v47 = vpop.xlane.xlu1 %12046  ;;  %v12102_v18 = vpack.c.bf16 %v12086_v40, %v12086_v40  ;;  %v22271_v40 = vpack.i.bf16 %v20941_v6, %v20939_v52 }
0x19a2   : > { %16229 = vmatpush3.bf16.msra.mxu1 %v12501_v15  ;;  %17170 = vrcp.f32 %v12047_v47  ;;  %16230 = vmatprep.mubr.msk.bf16.mxu1 %vm17303_vm1, %v22162_v28 }
0x19a3   : > { %v12050_v48 = vpop.xlane.xlu0 %12049  ;;  %16240 = vmatprep.subr.bf16.mxu1 %v22162_v28 }
0x19a4   : > { %v17167_v41 = vpop.eup %17166  ;;  %17172 = vrcp.f32 %v12050_v48 }
0x19a5   : > { %v12087_v8 = vmul.f32 %v17167_v41, %v21091_v50  ;;  %16225 = vmatmul.mubr.msk.bf16.vlgmr.msra.gmra.mrb[152].mxu0 %vm845_vm2, %v12102_v18  ;;  %v12736_v13 = vpop.permute.xlu1 %12735 }
0x19a6   : > { %v17169_v30 = vpop.eup %17168  ;;  %16235 = vmatpush3.bf16.msra.mxu0 %v12549_v20  ;;  %16236 = vmatprep.mubr.msk.bf16.mxu0 %vm17303_vm1, %v22162_v28  ;;  %v12741_v23 = vsel %vm6787_vm5, %v12736_v13, 0  ;;  %v22274_v13 = vld [vmem:[#allocation39_spill] sm:$0xff] }
0x19a7   : > { %v12103_v9 = vpack.c.bf16 %v12087_v8, %v12087_v8  ;;  %v12088_v4 = vmul.f32 %v17169_v30, %v21095_v16  ;;  %16246 = vmatprep.subr.bf16.mxu0 %v22162_v28  ;;  %v12688_v22 = vpop.permute.xlu0 %12687 }
0x19a8   : > { %v12693_v42 = vsel %vm6787_vm5, %v12688_v22, 0 }
0x19a9   : > { %16231 = vmatmul.mubr.msk.bf16.vlgmr.msra.gmra.mrb[132].mxu1 %vm845_vm2, %v12103_v9  ;;  %v12104_v50 = vpack.c.bf16 %v12088_v4, %v12088_v4 }
0x19aa   : > { %16241 = vmatpush3.bf16.msra.mxu1 %v12597_v44  ;;  %16242 = vmatprep.mubr.msk.bf16.mxu1 %vm17303_vm1, %v22162_v28 }
0x19ab   : > { %16252 = vmatprep.subr.bf16.mxu1 %v22162_v28 }
0x19ac   : > { %v17171_v37 = vpop.eup %17170 }
0x19ad   : > { %v12089_v16 = vmul.f32 %v17171_v37, %v21099_v21  ;;  %16237 = vmatmul.mubr.msk.bf16.vlgmr.msra.gmra.mrb[156].mxu0 %vm845_vm2, %v12104_v50  ;;  %v22272_v50 = vpack.i.bf16 %v20947_v54, %v20945_v24 }
0x19ae   : > { %v17173_v53 = vpop.eup %17172  ;;  %16247 = vmatpush3.bf16.msra.mxu0 %v12645_v56  ;;  %16248 = vmatprep.mubr.msk.bf16.mxu0 %vm17303_vm1, %v22162_v28 }
0x19af   : > { %v12105_v7 = vpack.c.bf16 %v12089_v16, %v12089_v16  ;;  %v12090_v45 = vmul.f32 %v17173_v53, %v21103_v55  ;;  %16258 = vmatprep.subr.bf16.mxu0 %v22162_v28 }
0x19b1   : > { %16243 = vmatmul.mubr.msk.bf16.vlgmr.msra.gmra.mrb[136].mxu1 %vm845_vm2, %v12105_v7  ;;  %v12106_v21 = vpack.c.bf16 %v12090_v45, %v12090_v45 }
0x19b2   : > { %16253 = vmatpush3.bf16.msra.mxu1 %v12693_v42  ;;  %16254 = vmatprep.mubr.msk.bf16.mxu1 %vm17303_vm1, %v22162_v28  ;;  %v22273_v42 = vld [vmem:[#allocation40_spill] sm:$0xff] }
0x19b3   : > { %16264 = vmatprep.subr.bf16.mxu1 %v22162_v28 }
0x19b5   : > { %16249 = vmatmul.mubr.msk.bf16.vlgmr.msra.gmra.mrb[160].mxu0 %vm845_vm2, %v12106_v21  ;;  %v22275_v21 = vpack.i.bf16 %v22273_v42, %v22274_v13  ;;  %v22282_v42 = vld [vmem:[#allocation19_spill] sm:$0xff] }
0x19b6   : > { %16259 = vmatpush3.bf16.msra.mxu0 %v12741_v23  ;;  %16260 = vmatprep.mubr.msk.bf16.mxu0 %vm17303_vm1, %v22162_v28 }
0x19b7   : > { %16270 = vmatprep.subr.bf16.mxu0 %v22162_v28 }
0x19d6   : > { %v12053_v55 = vpop.xlane.xlu1 %12052 }
0x19d7   : > { %17174 = vrcp.f32 %v12053_v55 }
0x19d8   : > { %v12056_v3 = vpop.xlane.xlu0 %12055 }
0x19d9   : > { %17176 = vrcp.f32 %v12056_v3 }
0x19da   : > { %v12059_v57 = vpop.xlane.xlu1 %12058 }
0x19db   : > { %17178 = vrcp.f32 %v12059_v57 }
0x19dc   : > { %v12062_v60 = vpop.xlane.xlu0 %12061 }
0x19dd   : > { %17180 = vrcp.f32 %v12062_v60 }
0x19de   : > { %v12832_v2 = vpop.permute.xlu1 %12831 }
0x19e0   : > { %v12784_v29 = vpop.permute.xlu0 %12783 }
0x19e1   : > { %v17175_v1 = vpop.eup %17174  ;;  %v12789_v34 = vsel %vm6787_vm5, %v12784_v29, 0  ;;  %v22277_v29 = vld [vmem:[#allocation41_spill] sm:$0xff] }
0x19e2   : > { %v12091_v51 = vmul.f32 %v17175_v1, %v21115_v32  ;;  %v12837_v32 = vsel %vm6787_vm5, %v12832_v2, 0 }
0x19e3   : > { %v17177_v19 = vpop.eup %17176 }
0x19e4   : > { %v12107_v59 = vpack.c.bf16 %v12091_v51, %v12091_v51  ;;  %v12092_v27 = vmul.f32 %v17177_v19, %v21117_v36  ;;  %v22276_v19 = vld [vmem:[#allocation42_spill] sm:$0xff] }
0x19e5   : > { %v17179_v12 = vpop.eup %17178 }
0x19e6   : > { %v12108_v25 = vpack.c.bf16 %v12092_v27, %v12092_v27  ;;  %16255 = vmatmul.mubr.msk.bf16.vlgmr.msra.gmra.mrb[140].mxu1 %vm845_vm2, %v12107_v59  ;;  %v12093_v26 = vmul.f32 %v17179_v12, %v21121_v5  ;;  %v16626_v5 = vld [vmem:[%s22065_s11] sm:$0xff]   ;;  %v22278_v59 = vpack.i.bf16 %v22276_v19, %v22277_v29 }
0x19e7   : > { %v17181_v38 = vpop.eup %17180  ;;  %16265 = vmatpush3.bf16.msra.mxu1 %v12789_v34  ;;  %16266 = vmatprep.mubr.msk.bf16.mxu1 %vm17303_vm1, %v22162_v28 }
0x19e8   : > { %16261 = vmatmul.mubr.msk.bf16.vlgmr.msra.gmra.mrb[164].mxu0 %vm845_vm2, %v12108_v25  ;;  %v12094_v36 = vmul.f32 %v17181_v38, %v21125_v35  ;;  %v12109_v46 = vpack.c.bf16 %v12093_v26, %v12093_v26  ;;  %16276 = vmatprep.subr.bf16.mxu1 %v16626_v5 }
0x19e9   : > { %16271 = vmatpush3.bf16.msra.mxu0 %v12837_v32  ;;  %16272 = vmatprep.mubr.msk.bf16.mxu0 %vm17303_vm1, %v22162_v28  ;;  %v16627_v28 = vld [vmem:[%s22065_s11 + $0x8] sm:$0xff]  }
0x19ea   : > { %v12110_v63 = vpack.c.bf16 %v12094_v36, %v12094_v36 }
0x19ee   : > { %16267 = vmatmul.mubr.msk.bf16.vlgmr.msra.gmra.mrb[144].mxu1 %vm845_vm2, %v12109_v46  ;;  %v22279_v46 = vpack.i.bf16 %v20953_v17, %v20951_v11 }
0x19ef   : > { %16277 = vmatpush3.bf16.msra.mxu1 %v16626_v5 }
0x19f0   : > { %16273 = vmatmul.mubr.msk.bf16.vlgmr.msra.gmra.mrb[168].mxu0 %vm845_vm2, %v12110_v63  ;;  %16278 = vmatprep.subr.bf16.mxu1 %v16627_v28 }
0x19f3   : > { %16279 = vmatpush3.bf16.msra.mxu1 %v16627_v28 }
0x1a5c   : > { %v12153_v10 = vpop.f32.mrb[116].mxu1 }
0x1a5d   : > { %v16184_v61 = vpop.f32.mrb[117].mxu1 }
0x1a5e   : > { %v12156_v49 = vpop.f32.mrb[118].mxu1  ;;  %v12201_v14 = vpop.f32.mrb[140].mxu0 }
0x1a5f   : > { %v16542_v35 = vpack.i.bf16 %v12201_v14, %v12153_v10  ;;  %v16185_v43 = vpop.f32.mrb[119].mxu1  ;;  %v16190_v58 = vpop.f32.mrb[141].mxu0  ;;  %v22280_v14 = vld [vmem:[#allocation43_spill] sm:$0xff] }
0x1a60   : > { %v12204_v62 = vpop.f32.mrb[142].mxu0  ;;  %v22281_v28 = vpack.i.bf16 %v20959_v0, %v22280_v14 }
0x1a61   : > { %16543 = vrot.lane.b32.xlu0 %v16542_v35, %s22270_s0  ;;  %v16191_v31 = vpop.f32.mrb[143].mxu0  ;;  %v16494_v35 = vpop.permute.xlu0 %16493 }
0x1a64   : > { %v12249_v39 = vpop.f32.mrb[120].mxu1 }
0x1a65   : > { %v16196_v33 = vpop.f32.mrb[121].mxu1  ;;  %16548 = vrot.lane.b32.xlu0 %v22271_v40, %s22255_s29  ;;  %v16504_v58 = vpop.permute.xlu0 %16503 }
0x1a66   : > { %v12252_v15 = vpop.f32.mrb[122].mxu1 }
0x1a67   : > { %v16197_v47 = vpop.f32.mrb[123].mxu1 }
0x1a68   : > { %v12297_v18 = vpop.f32.mrb[144].mxu0  ;;  %v16499_v47 = vpop.permute.xlu1 %16498 }
0x1a69   : > { %v16552_v48 = vpack.i.bf16 %v12297_v18, %v12249_v39  ;;  %v16202_v41 = vpop.f32.mrb[145].mxu0  ;;  %v16501_v19 = vunpack.i.h.bf16 %v16499_v47  ;;  %v16500_v29 = vunpack.i.l.bf16 %v16499_v47 }
0x1a6a   : > { %v12300_v20 = vpop.f32.mrb[146].mxu0 }
0x1a6b   : > { %16553 = vrot.lane.b32.xlu1 %v16552_v48, %s22270_s0  ;;  %v16203_v8 = vpop.f32.mrb[147].mxu0  ;;  %v16514_v48 = vpop.permute.xlu0 %16513 }
0x1a6c   : > { %v12345_v30 = vpop.f32.mrb[124].mxu1  ;;  %v16515_v14 = vunpack.i.l.bf16 %v16514_v48 }
0x1a6d   : > { %v16208_v9 = vpop.f32.mrb[125].mxu1 }
0x1a6e   : > { %v12348_v4 = vpop.f32.mrb[126].mxu1 }
0x1a6f   : > { %v16209_v44 = vpop.f32.mrb[127].mxu1  ;;  %16558 = vrot.lane.b32.xlu1 %v22272_v50, %s22255_s29  ;;  %v16509_v50 = vpop.permute.xlu1 %16508 }
0x1a70   : > { %v12393_v52 = vpop.f32.mrb[148].mxu0 }
0x1a71   : > { %v16562_v6 = vpack.i.bf16 %v12393_v52, %v12345_v30  ;;  %v16214_v37 = vpop.f32.mrb[149].mxu0  ;;  %v16524_v52 = vpop.permute.xlu0 %16523 }
0x1a72   : > { %v12396_v56 = vpop.f32.mrb[150].mxu0 }
0x1a73   : > { %16563 = vrot.lane.b32.xlu0 %v16562_v6, %s22270_s0  ;;  %v16215_v16 = vpop.f32.mrb[151].mxu0  ;;  %v16519_v6 = vpop.permute.xlu1 %16518  ;;  %v16496_v56 = vunpack.i.h.bf16 %v16494_v35 }
0x1a74   : > { %v12441_v53 = vpop.f32.mrb[128].mxu1  ;;  %v16495_v16 = vunpack.i.l.bf16 %v16494_v35  ;;  %v16525_v35 = vunpack.i.l.bf16 %v16524_v52 }
0x1a75   : > { %v16220_v22 = vpop.f32.mrb[129].mxu1  ;;  %v21315_v37 = vpop.permute.xlu0 %16533  ;;  %v13072_v13 = vsel %vm845_vm2, %v22282_v42, %v16496_v56 }
0x1a76   : > { %v12444_v7 = vpop.f32.mrb[130].mxu1  ;;  %v16505_v22 = vunpack.i.l.bf16 %v16504_v58  ;;  %v16536_v42 = vunpack.i.h.bf16 %v21315_v37 }
0x1a77   : > { %v16221_v45 = vpop.f32.mrb[131].mxu1  ;;  %16568 = vrot.lane.b32.xlu0 %v22275_v21, %s22253_s28  ;;  %v16529_v7 = vpop.permute.xlu1 %16528  ;;  %v22283_v21 = vld [vmem:[#allocation15_spill] sm:$0xff] }
0x1a78   : > { %v12489_v23 = vpop.f32.mrb[152].mxu0 }
0x1a79   : > { %v16572_v55 = vpack.i.bf16 %v12489_v23, %v12441_v53  ;;  %v16226_v24 = vpop.f32.mrb[153].mxu0  ;;  %v16506_v53 = vunpack.i.h.bf16 %v16504_v58  ;;  %v13071_v23 = vsel %vm845_vm2, %v22283_v21, %v16495_v16  ;;  %v22286_v58 = vld [vmem:[#allocation23_spill] sm:$0xff] }
0x1a7a   : > { %v12492_v54 = vpop.f32.mrb[154].mxu0 }
0x1a7b   : > { %16573 = vrot.lane.b32.xlu1 %v16572_v55, %s22270_s0  ;;  %v16227_v3 = vpop.f32.mrb[155].mxu0  ;;  %v13087_v54 = vsel %vm1259_vm3, %v13071_v23, %v16505_v22 }
0x1a7c   : > { %v12537_v57 = vpop.f32.mrb[132].mxu1  ;;  %v13088_v3 = vsel %vm1259_vm3, %v13072_v13, %v16506_v53  ;;  %v16535_v13 = vunpack.i.l.bf16 %v21315_v37 }
0x1a7d   : > { %v16232_v60 = vpop.f32.mrb[133].mxu1 }
0x1a7e   : > { %v12540_v1 = vpop.f32.mrb[134].mxu1 }
0x1a7f   : > { %v16233_v51 = vpop.f32.mrb[135].mxu1  ;;  %16578 = vrot.lane.b32.xlu1 %v22278_v59, %s22253_s28  ;;  %v16511_v59 = vunpack.i.h.bf16 %v16509_v50 }
0x1a80   : > { %v12585_v27 = vpop.f32.mrb[156].mxu0  ;;  %v21325_v51 = vpop.permute.xlu1 %16538 }
0x1a81   : > { %v16582_v12 = vpack.i.bf16 %v12585_v27, %v12537_v57  ;;  %v16238_v2 = vpop.f32.mrb[157].mxu0  ;;  %v16510_v27 = vunpack.i.l.bf16 %v16509_v50 }
0x1a82   : > { %v12588_v25 = vpop.f32.mrb[158].mxu0  ;;  %v22284_v2 = vld [vmem:[#allocation21_spill] sm:$0xff] }
0x1a83   : > { %16583 = vrot.lane.b32.xlu0 %v16582_v12, %s22270_s0  ;;  %v16239_v34 = vpop.f32.mrb[159].mxu0  ;;  %v13074_v25 = vsel %vm845_vm2, %v22284_v2, %v16501_v19  ;;  %v16541_v2 = vunpack.i.h.bf16 %v21325_v51 }
0x1a84   : > { %v12633_v38 = vpop.f32.mrb[136].mxu1  ;;  %v22285_v34 = vld [vmem:[#allocation20_spill] sm:$0xff] }
0x1a85   : > { %v16244_v26 = vpop.f32.mrb[137].mxu1 }
0x1a86   : > { %v12636_v32 = vpop.f32.mrb[138].mxu1 }
0x1a87   : > { %v16245_v36 = vpop.f32.mrb[139].mxu1  ;;  %16588 = vrot.lane.b32.xlu0 %v22279_v46, %s22255_s29  ;;  %v13090_v46 = vsel %vm1259_vm3, %v13074_v25, %v16511_v59  ;;  %v16540_v25 = vunpack.i.l.bf16 %v21325_v51 }
0x1a88   : > { %v12681_v63 = vpop.f32.mrb[160].mxu0 }
0x1a89   : > { %v16592_v5 = vpack.i.bf16 %v12681_v63, %v12633_v38  ;;  %v16250_v10 = vpop.f32.mrb[161].mxu0  ;;  %v13073_v38 = vsel %vm845_vm2, %v22285_v34, %v16500_v29 }
0x1a8a   : > { %v12684_v61 = vpop.f32.mrb[162].mxu0  ;;  %v13089_v36 = vsel %vm1259_vm3, %v13073_v38, %v16510_v27 }
0x1a8b   : > { %16593 = vrot.lane.b32.xlu1 %v16592_v5, %s22270_s0  ;;  %v16251_v49 = vpop.f32.mrb[163].mxu0 }
0x1a8c   : > { %v16516_v49 = vunpack.i.h.bf16 %v16514_v48 }
0x1a8f   : > { %16598 = vrot.lane.b32.xlu1 %v22281_v28, %s22255_s29  ;;  %v16526_v28 = vunpack.i.h.bf16 %v16524_v52  ;;  %s22314_s29 = sshll.u32 %s22316_s25, 7 }
0x1a90   : > { %s21972_s26 = scalar_lea.vmem %s22075_s21, %s22314_s29 }
0x1ab9   : > { %v12729_v43 = vpop.f32.mrb[140].mxu1 }
0x1aba   : > { %v16256_v62 = vpop.f32.mrb[141].mxu1 }
0x1abb   : > { %v12732_v31 = vpop.f32.mrb[142].mxu1  ;;  %v12777_v39 = vpop.f32.mrb[164].mxu0  ;;  %v13076_v62 = vsel %vm845_vm2, %v22286_v58, %v16516_v49 }
0x1abc   : > { %v16602_v11 = vpack.i.bf16 %v12777_v39, %v12729_v43  ;;  %v16257_v17 = vpop.f32.mrb[143].mxu1  ;;  %v16262_v33 = vpop.f32.mrb[165].mxu0  ;;  %v22287_v31 = vld [vmem:[#allocation22_spill] sm:$0xff] }
0x1abd   : > { %v12780_v40 = vpop.f32.mrb[166].mxu0  ;;  %v13075_v39 = vsel %vm845_vm2, %v22287_v31, %v16515_v14 }
0x1abe   : > { %16603 = vrot.lane.b32.xlu0 %v16602_v11, %s22270_s0  ;;  %v16263_v15 = vpop.f32.mrb[167].mxu0  ;;  %v13091_v33 = vsel %vm1259_vm3, %v13075_v39, %v16525_v35  ;;  %v13092_v40 = vsel %vm1259_vm3, %v13076_v62, %v16526_v28 }
0x1ac1   : > { %v12825_v18 = vpop.f32.mrb[144].mxu1 }
0x1ac2   : > { %v16268_v41 = vpop.f32.mrb[145].mxu1 }
0x1ac3   : > { %v12828_v20 = vpop.f32.mrb[146].mxu1  ;;  %v12873_v0 = vpop.f32.mrb[168].mxu0  ;;  %v16521_v41 = vunpack.i.h.bf16 %v16519_v6 }
0x1ac4   : > { %v16607_v8 = vpack.i.bf16 %v12873_v0, %v12825_v18  ;;  %v16269_v30 = vpop.f32.mrb[147].mxu1  ;;  %v16274_v9 = vpop.f32.mrb[169].mxu0  ;;  %v16520_v20 = vunpack.i.l.bf16 %v16519_v6  ;;  %v16531_v0 = vunpack.i.h.bf16 %v16529_v7 }
0x1ac5   : > { %v12876_v4 = vpop.f32.mrb[170].mxu0  ;;  %v22288_v9 = vld [vmem:[#allocation25_spill] sm:$0xff] }
0x1ac6   : > { %v16275_v44 = vpop.f32.mrb[171].mxu0  ;;  %16608 = vrot.lane.b32.xlu1 %v16607_v8, %s22270_s0  ;;  %v16530_v8 = vunpack.i.l.bf16 %v16529_v7  ;;  %v13078_v4 = vsel %vm845_vm2, %v22288_v9, %v16521_v41 }
0x1ac7   : > { %v22289_v44 = vld [vmem:[#allocation24_spill] sm:$0xff]  ;;  %v13094_v53 = vsel %vm1259_vm3, %v13078_v4, %v16531_v0 }
0x1ac8   : > { %v13077_v50 = vsel %vm845_vm2, %v22289_v44, %v16520_v20 }
0x1ac9   : > { %v13093_v16 = vsel %vm1259_vm3, %v13077_v50, %v16530_v8 }
0x1ad3   : > { %v16544_v45 = vpop.permute.xlu0 %16543 }
0x1ad4   : > { %v16546_v55 = vunpack.i.h.bf16 %v16544_v45  ;;  %v16545_v24 = vunpack.i.l.bf16 %v16544_v45 }
0x1ad6   : > { %v13103_v57 = vsel %vm4996_vm4, %v13087_v54, %v16545_v24  ;;  %v13104_v60 = vsel %vm4996_vm4, %v13088_v3, %v16546_v55  ;;  %v22290_v24 = vld [vmem:[#allocation27_spill] sm:$0xff]  ;;  %v22291_v3 = vld [vmem:[#allocation26_spill] sm:$0xff] }
0x1ad7   : > { %v13119_v1 = vpack.c.bf16 %v13104_v60, %v13103_v57  ;;  %v16549_v10 = vpop.permute.xlu0 %16548  ;;  %v13080_v54 = vsel %vm845_vm2, %v22290_v24, %v16536_v42  ;;  %v13079_v57 = vsel %vm845_vm2, %v22291_v3, %v16535_v13 }
0x1ad8   : > { %v16551_v21 = vunpack.i.h.bf16 %v16549_v10  ;;  %v16550_v23 = vunpack.i.l.bf16 %v16549_v10 }
0x1ad9   : > { %16280 = vmatprep.mubr.msk.bf16.mxu1 %vm712_vm0, %v13119_v1 }
0x1ada   : > { %v13095_v19 = vsel %vm1259_vm3, %v13079_v57, %v16550_v23  ;;  %v13096_v29 = vsel %vm1259_vm3, %v13080_v54, %v16551_v21  ;;  %v21398_v23 = vld [vmem:[%s22066_s12] ss:$0 sm:$0xff] }
0x1add   : > { %v16554_v12 = vpop.permute.xlu1 %16553 }
0x1ade   : > { %v16556_v26 = vunpack.i.h.bf16 %v16554_v12  ;;  %v16555_v32 = vunpack.i.l.bf16 %v16554_v12 }
0x1ae0   : > { %v13106_v63 = vsel %vm4996_vm4, %v13090_v46, %v16556_v26  ;;  %v13105_v5 = vsel %vm4996_vm4, %v13089_v36, %v16555_v32  ;;  %v22292_v32 = vld [vmem:[#allocation29_spill] sm:$0xff]  ;;  %v22293_v46 = vld [vmem:[#allocation28_spill] sm:$0xff] }
0x1ae1   : > { %v13120_v61 = vpack.c.bf16 %v13106_v63, %v13105_v5  ;;  %v16559_v18 = vpop.permute.xlu1 %16558  ;;  %v13082_v36 = vsel %vm845_vm2, %v22292_v32, %v16541_v2  ;;  %v13081_v63 = vsel %vm845_vm2, %v22293_v46, %v16540_v25 }
0x1ae2   : > { %v16561_v34 = vunpack.i.h.bf16 %v16559_v18  ;;  %v16560_v38 = vunpack.i.l.bf16 %v16559_v18 }
0x1ae3   : > { %16281 = vmatmul.mubr.msk.bf16.vlgmr.msra.gmra.mrb[148].mxu1 %vm712_vm0, %v13120_v61 }
0x1ae4   : > { %v13098_v61 = vsel %vm1259_vm3, %v13082_v36, %v16561_v34  ;;  %v13097_v49 = vsel %vm1259_vm3, %v13081_v63, %v16560_v38  ;;  %v22301_v38 = vld [vmem:[#allocation18_spill] sm:$0xff] }
0x1ae5   : > { %v16564_v43 = vpop.permute.xlu0 %16563 }
0x1ae6   : > { %v16566_v11 = vunpack.i.h.bf16 %v16564_v43  ;;  %v16565_v17 = vunpack.i.l.bf16 %v16564_v43 }
0x1ae8   : > { %v13107_v15 = vsel %vm4996_vm4, %v13091_v33, %v16565_v17  ;;  %v13108_v47 = vsel %vm4996_vm4, %v13092_v40, %v16566_v11  ;;  %v22294_v11 = vld [vmem:[#allocation31_spill] sm:$0xff]  ;;  %v22295_v33 = vld [vmem:[#allocation30_spill] sm:$0xff] }
0x1ae9   : > { %v13121_v48 = vpack.c.bf16 %v13108_v47, %v13107_v15  ;;  %v16569_v7 = vpop.permute.xlu0 %16568 }
0x1aea   : > { %v16571_v43 = vunpack.i.h.bf16 %v16569_v7  ;;  %v16570_v58 = vunpack.i.l.bf16 %v16569_v7 }
0x1aeb   : > { %16284 = vmatprep.mubr.msk.bf16.mxu1 %vm712_vm0, %v13121_v48 }
0x1aec   : > { %v13084_v17 = vsel %vm845_vm2, %v22294_v11, %v16571_v43  ;;  %v13083_v40 = vsel %vm845_vm2, %v22295_v33, %v16570_v58  ;;  %v22303_v43 = vld [vmem:[#allocation2_spill] sm:$0xff] }
0x1aed   : > { %v16574_v30 = vpop.permute.xlu1 %16573  ;;  %v22305_v11 = vld [vmem:[#allocation6_spill] sm:$0xff] }
0x1aee   : > { %v16576_v52 = vunpack.i.h.bf16 %v16574_v30  ;;  %v16575_v56 = vunpack.i.l.bf16 %v16574_v30 }
0x1af0   : > { %v13110_v22 = vsel %vm4996_vm4, %v13094_v53, %v16576_v52  ;;  %v13109_v6 = vsel %vm4996_vm4, %v13093_v16, %v16575_v56  ;;  %v22296_v52 = vld [vmem:[#allocation33_spill] sm:$0xff]  ;;  %v22297_v16 = vld [vmem:[#allocation32_spill] sm:$0xff] }
0x1af1   : > { %v13122_v45 = vpack.c.bf16 %v13110_v22, %v13109_v6  ;;  %v16579_v27 = vpop.permute.xlu1 %16578 }
0x1af2   : > { %v16581_v30 = vunpack.i.h.bf16 %v16579_v27  ;;  %v16580_v9 = vunpack.i.l.bf16 %v16579_v27 }
0x1af3   : > { %16285 = vmatmul.mubr.msk.bf16.gmra.mrb[152].mxu1 %vm712_vm0, %v13122_v45 }
0x1af4   : > { %v13086_v56 = vsel %vm845_vm2, %v22296_v52, %v16581_v30  ;;  %v13085_v53 = vsel %vm845_vm2, %v22297_v16, %v16580_v9  ;;  %v22308_v52 = vld [vmem:[#allocation13_spill] sm:$0xff] }
0x1af5   : > { %v16584_v55 = vpop.permute.xlu0 %16583 }
0x1af6   : > { %v16586_v60 = vunpack.i.h.bf16 %v16584_v55  ;;  %v16585_v1 = vunpack.i.l.bf16 %v16584_v55 }
0x1af8   : > { %v13111_v59 = vsel %vm4996_vm4, %v13095_v19, %v16585_v1  ;;  %v13112_v37 = vsel %vm4996_vm4, %v13096_v29, %v16586_v60  ;;  %v22298_v1 = vld [vmem:[#allocation5_spill] sm:$0xff] }
0x1af9   : > { %v13123_v12 = vpack.c.bf16 %v13112_v37, %v13111_v59  ;;  %v16589_v35 = vpop.permute.xlu0 %16588  ;;  %v22299_v59 = vld [vmem:[#allocation3_spill] sm:$0xff] }
0x1afa   : > { %v16591_v62 = vunpack.i.h.bf16 %v16589_v35  ;;  %v16590_v31 = vunpack.i.l.bf16 %v16589_v35 }
0x1afb   : > { %16288 = vmatprep.mubr.msk.bf16.mxu1 %vm712_vm0, %v13123_v12  ;;  %v22300_v12 = vld [vmem:[#allocation4_spill] sm:$0xff] }
0x1afc   : > { %v13099_v18 = vsel %vm1259_vm3, %v13083_v40, %v16590_v31  ;;  %v13100_v48 = vsel %vm1259_vm3, %v13084_v17, %v16591_v62  ;;  %v22304_v62 = vld [vmem:[#allocation9_spill] sm:$0xff] }
0x1afd   : > { %v16594_v26 = vpop.permute.xlu1 %16593 }
0x1afe   : > { %v16596_v5 = vunpack.i.h.bf16 %v16594_v26  ;;  %v16595_v10 = vunpack.i.l.bf16 %v16594_v26 }
0x1b00   : > { %v13114_v14 = vsel %vm4996_vm4, %v13098_v61, %v16596_v5  ;;  %v13113_v51 = vsel %vm4996_vm4, %v13097_v49, %v16595_v10 }
0x1b01   : > { %v13124_v28 = vpack.c.bf16 %v13114_v14, %v13113_v51  ;;  %v16599_v41 = vpop.permute.xlu1 %16598  ;;  %v22302_v14 = vld [vmem:[#allocation8_spill] sm:$0xff] }
0x1b02   : > { %v16601_v4 = vunpack.i.h.bf16 %v16599_v41  ;;  %v16600_v44 = vunpack.i.l.bf16 %v16599_v41 }
0x1b03   : > { %16289 = vmatmul.mubr.msk.bf16.gmra.mrb[156].mxu1 %vm712_vm0, %v13124_v28 }
0x1b04   : > { %v13102_v7 = vsel %vm1259_vm3, %v13086_v56, %v16601_v4  ;;  %v13101_v45 = vsel %vm1259_vm3, %v13085_v53, %v16600_v44  ;;  %v22307_v44 = vld [vmem:[#allocation7_spill] sm:$0xff]  ;;  %v22309_v53 = vld [vmem:[#allocation10_spill] sm:$0xff] }
0x1b30   : > { %v16604_v39 = vpop.permute.xlu0 %16603 }
0x1b31   : > { %v16606_v15 = vunpack.i.h.bf16 %v16604_v39  ;;  %v16605_v47 = vunpack.i.l.bf16 %v16604_v39 }
0x1b33   : > { %v13115_v20 = vsel %vm4996_vm4, %v13099_v18, %v16605_v47  ;;  %v13116_v0 = vsel %vm4996_vm4, %v13100_v48, %v16606_v15 }
0x1b34   : > { %v13125_v8 = vpack.c.bf16 %v13116_v0, %v13115_v20 }
0x1b36   : > { %16292 = vmatprep.mubr.msk.bf16.mxu1 %vm712_vm0, %v13125_v8  ;;  %v22306_v8 = vld [vmem:[#allocation12_spill] sm:$0xff] }
0x1b38   : > { %v16609_v50 = vpop.permute.xlu1 %16608 }
0x1b39   : > { %v16611_v22 = vunpack.i.h.bf16 %v16609_v50  ;;  %v16610_v6 = vunpack.i.l.bf16 %v16609_v50 }
0x1b3b   : > { %v13118_v42 = vsel %vm4996_vm4, %v13102_v7, %v16611_v22  ;;  %v13117_v13 = vsel %vm4996_vm4, %v13101_v45, %v16610_v6 }
0x1b3c   : > { %v13126_v21 = vpack.c.bf16 %v13118_v42, %v13117_v13 }
0x1b3e   : > { %16293 = vmatmul.mubr.msk.bf16.gmra.mrb[160].mxu1 %vm712_vm0, %v13126_v21 }
0x1bb6   : > { %v16282_v55 = vpop.f32.mrb[148].mxu1 }
0x1bb7   : > { %v13203_v24 = vpop.f32.mrb[149].mxu1  ;;  %v13212_v54 = vadd.f32 %v16282_v55, %v21398_v23 }
0x1bb8   : > { %v13204_v3 = vadd.f32 %v21398_v23, %v13203_v24  ;;  %v16283_v57 = vpop.f32.mrb[150].mxu1 }
0x1bb9   : > { %v13206_v60 = vpop.f32.mrb[151].mxu1  ;;  %v21407_v37 = vadd.f32 %v13212_v54, %v22299_v59  ;;  %v13215_v27 = vadd.f32 %v16283_v57, %v21398_v23 }
0x1bba   : > { %v21403_v19 = vadd.f32 %v13204_v3, %v22298_v1  ;;  %v13207_v29 = vadd.f32 %v21398_v23, %v13206_v60  ;;  %v22310_v3 = vld [vmem:[#allocation16_spill] sm:$0xff] }
0x1bbb   : > { %v21418_v26 = vadd.f32 %v13215_v27, %v22301_v38  ;;  %v13288_v32 = vsel %vm712_vm0, %v21407_v37, 0.0  ;;  %v22312_v27 = vld [vmem:[#allocation17_spill] sm:$0xff] }
0x1bbc   : > { %v21411_v2 = vadd.f32 %v13207_v29, %v22300_v12  ;;  %v13282_v25 = vsel %vm712_vm0, %v21403_v19, 0.0  ;;  %v22311_v29 = vld [vmem:[#allocation11_spill] sm:$0xff] }
0x1bbd   : > { %13283 = vadd.xlane.f32.xlu0 %v13282_v25  ;;  %v13291_v36 = vsel %vm712_vm0, %v21418_v26, 0.0 }
0x1bbe   : > { %v13285_v34 = vsel %vm712_vm0, %v21411_v2, 0.0 }
0x1bbf   : > { %13286 = vadd.xlane.f32.xlu1 %v13285_v34  ;;  %v22313_v34 = vld [vmem:[#allocation14_spill] sm:$0xff] }
0x1bc1   : > { %13289 = vadd.xlane.f32.xlu0 %v13288_v32 }
0x1bc5   : > { %13292 = vadd.xlane.f32.xlu0 %v13291_v36 }
0x1bc6   : > { %v16286_v46 = vpop.f32.mrb[152].mxu1 }
0x1bc7   : > { %v13219_v63 = vpop.f32.mrb[153].mxu1  ;;  %v13228_v5 = vadd.f32 %v16286_v46, %v21398_v23 }
0x1bc8   : > { %v13220_v10 = vadd.f32 %v21398_v23, %v13219_v63  ;;  %v16287_v61 = vpop.f32.mrb[154].mxu1 }
0x1bc9   : > { %v13222_v49 = vpop.f32.mrb[155].mxu1  ;;  %v13231_v28 = vadd.f32 %v16287_v61, %v21398_v23  ;;  %v21432_v58 = vadd.f32 %v13228_v5, %v22303_v43 }
0x1bca   : > { %v21427_v51 = vadd.f32 %v13220_v10, %v22302_v14  ;;  %v13223_v35 = vadd.f32 %v21398_v23, %v13222_v49 }
0x1bcb   : > { %v21440_v17 = vadd.f32 %v13231_v28, %v22305_v11  ;;  %v13300_v40 = vsel %vm712_vm0, %v21432_v58, 0.0 }
0x1bcc   : > { %v21435_v31 = vadd.f32 %v13223_v35, %v22304_v62  ;;  %v13294_v39 = vsel %vm712_vm0, %v21427_v51, 0.0 }
0x1bcd   : > { %13295 = vadd.xlane.f32.xlu1 %v13294_v39  ;;  %v13303_v15 = vsel %vm712_vm0, %v21440_v17, 0.0 }
0x1bce   : > { %v13297_v33 = vsel %vm712_vm0, %v21435_v31, 0.0 }
0x1bcf   : > { %13298 = vadd.xlane.f32.xlu0 %v13297_v33 }
0x1bd1   : > { %13301 = vadd.xlane.f32.xlu1 %v13300_v40 }
0x1bd3   : > { %13304 = vadd.xlane.f32.xlu0 %v13303_v15 }
0x1bd6   : > { %v16290_v47 = vpop.f32.mrb[156].mxu1 }
0x1bd7   : > { %v13235_v18 = vpop.f32.mrb[157].mxu1  ;;  %v13244_v48 = vadd.f32 %v16290_v47, %v21398_v23 }
0x1bd8   : > { %v13236_v41 = vadd.f32 %v21398_v23, %v13235_v18  ;;  %v16291_v20 = vpop.f32.mrb[158].mxu1 }
0x1bd9   : > { %v13238_v0 = vpop.f32.mrb[159].mxu1  ;;  %v13247_v9 = vadd.f32 %v16291_v20, %v21398_v23  ;;  %v21456_v50 = vadd.f32 %v13244_v48, %v22307_v44 }
0x1bda   : > { %v21451_v30 = vadd.f32 %v13236_v41, %v22306_v8  ;;  %v13239_v4 = vadd.f32 %v21398_v23, %v13238_v0 }
0x1bdb   : > { %v21464_v22 = vadd.f32 %v13247_v9, %v22309_v53  ;;  %v13312_v7 = vsel %vm712_vm0, %v21456_v50, 0.0 }
0x1bdc   : > { %v21459_v56 = vadd.f32 %v13239_v4, %v22308_v52  ;;  %v13306_v16 = vsel %vm712_vm0, %v21451_v30, 0.0 }
0x1bdd   : > { %13307 = vadd.xlane.f32.xlu1 %v13306_v16  ;;  %v13315_v45 = vsel %vm712_vm0, %v21464_v22, 0.0 }
0x1bde   : > { %v13309_v6 = vsel %vm712_vm0, %v21459_v56, 0.0 }
0x1bdf   : > { %13310 = vadd.xlane.f32.xlu0 %v13309_v6 }
0x1be1   : > { %13313 = vadd.xlane.f32.xlu1 %v13312_v7 }
0x1be3   : > { %13316 = vadd.xlane.f32.xlu0 %v13315_v45 }
0x1c11   : > { %v16294_v42 = vpop.f32.mrb[160].mxu1 }
0x1c12   : > { %v13251_v13 = vpop.f32.mrb[161].mxu1  ;;  %v13260_v21 = vadd.f32 %v16294_v42, %v21398_v23 }
0x1c13   : > { %v13252_v55 = vadd.f32 %v21398_v23, %v13251_v13  ;;  %v16295_v24 = vpop.f32.mrb[162].mxu1 }
0x1c14   : > { %v13254_v54 = vpop.f32.mrb[163].mxu1  ;;  %v13263_v60 = vadd.f32 %v16295_v24, %v21398_v23  ;;  %v21480_v59 = vadd.f32 %v13260_v21, %v22311_v29 }
0x1c15   : > { %v21475_v57 = vadd.f32 %v13252_v55, %v22310_v3  ;;  %v13255_v1 = vadd.f32 %v21398_v23, %v13254_v54 }
0x1c16   : > { %v21488_v38 = vadd.f32 %v13263_v60, %v22313_v34  ;;  %v13324_v23 = vsel %vm712_vm0, %v21480_v59, 0.0 }
0x1c17   : > { %v21483_v12 = vadd.f32 %v13255_v1, %v22312_v27  ;;  %v13318_v25 = vsel %vm712_vm0, %v21475_v57, 0.0 }
0x1c18   : > { %13319 = vadd.xlane.f32.xlu1 %v13318_v25  ;;  %v13327_v36 = vsel %vm712_vm0, %v21488_v38, 0.0 }
0x1c19   : > { %v13321_v32 = vsel %vm712_vm0, %v21483_v12, 0.0 }
0x1c1a   : > { %13322 = vadd.xlane.f32.xlu0 %v13321_v32 }
0x1c1c   : > { %13325 = vadd.xlane.f32.xlu1 %v13324_v23 }
0x1c1e   : > { %13328 = vadd.xlane.f32.xlu0 %v13327_v36 }
0x1c4a   : > { %v13284_v46 = vpop.xlane.xlu0 %13283 }
0x1c4b   : > { %v13330_v63 = vmul.f32 0.03125, %v13284_v46  ;;  %v16628_v46 = vld [vmem:[%s22069_s15] sm:$0xff]  }
0x1c4c   : > { %v13287_v5 = vpop.xlane.xlu1 %13286  ;;  %16296 = vmatprep.subr.bf16.mxu0 %v16628_v46 }
0x1c4d   : > { %v21497_v10 = vsub.f32 %v21403_v19, %v13330_v63  ;;  %v13331_v61 = vmul.f32 0.03125, %v13287_v5  ;;  %16297 = vmatpush3.bf16.msra.mxu0 %v16628_v46 }
0x1c4e   : > { %v13290_v49 = vpop.xlane.xlu0 %13289 }
0x1c4f   : > { %v21500_v14 = vsub.f32 %v21411_v2, %v13331_v61  ;;  %v13332_v28 = vmul.f32 0.03125, %v13290_v49  ;;  %v13362_v35 = vmul.f32 %v21497_v10, %v21497_v10 }
0x1c51   : > { %v21505_v43 = vsub.f32 %v21407_v37, %v13332_v28  ;;  %v13378_v62 = vsel %vm712_vm0, %v13362_v35, 0.0  ;;  %v13363_v39 = vmul.f32 %v21500_v14, %v21500_v14 }
0x1c52   : > { %13379 = vadd.xlane.f32.xlu1 %v13378_v62  ;;  %v13293_v19 = vpop.xlane.xlu0 %13292 }
0x1c53   : > { %v13333_v11 = vmul.f32 0.03125, %v13293_v19  ;;  %v13381_v33 = vsel %vm712_vm0, %v13363_v39, 0.0  ;;  %v13364_v2 = vmul.f32 %v21505_v43, %v21505_v43 }
0x1c54   : > { %13382 = vadd.xlane.f32.xlu0 %v13381_v33 }
0x1c55   : > { %v21514_v40 = vsub.f32 %v21418_v26, %v13333_v11  ;;  %v13384_v37 = vsel %vm712_vm0, %v13364_v2, 0.0 }
0x1c56   : > { %13385 = vadd.xlane.f32.xlu1 %v13384_v37 }
0x1c57   : > { %v13365_v15 = vmul.f32 %v21514_v40, %v21514_v40 }
0x1c59   : > { %v13387_v47 = vsel %vm712_vm0, %v13365_v15, 0.0 }
0x1c5a   : > { %v13296_v18 = vpop.xlane.xlu1 %13295  ;;  %13388 = vadd.xlane.f32.xlu0 %v13387_v47 }
0x1c5b   : > { %v13334_v48 = vmul.f32 0.03125, %v13296_v18 }
0x1c5c   : > { %v13299_v41 = vpop.xlane.xlu0 %13298 }
0x1c5d   : > { %v21521_v20 = vsub.f32 %v21427_v51, %v13334_v48  ;;  %v13335_v0 = vmul.f32 0.03125, %v13299_v41 }
0x1c5e   : > { %v13302_v8 = vpop.xlane.xlu1 %13301 }
0x1c5f   : > { %v21524_v26 = vsub.f32 %v21435_v31, %v13335_v0  ;;  %v13336_v9 = vmul.f32 0.03125, %v13302_v8  ;;  %v13366_v4 = vmul.f32 %v21521_v20, %v21521_v20  ;;  %v16631_v0 = vld [vmem:[%s22071_s17 + $0x8] sm:$0xff]  }
0x1c60   : > { %v13305_v44 = vpop.xlane.xlu0 %13304 }
0x1c61   : > { %v21529_v52 = vsub.f32 %v21432_v58, %v13336_v9  ;;  %v13337_v16 = vmul.f32 0.03125, %v13305_v44  ;;  %v13390_v53 = vsel %vm712_vm0, %v13366_v4, 0.0  ;;  %v13367_v51 = vmul.f32 %v21524_v26, %v21524_v26 }
0x1c62   : > { %13391 = vadd.xlane.f32.xlu1 %v13390_v53 }
0x1c63   : > { %v21535_v6 = vsub.f32 %v21440_v17, %v13337_v16  ;;  %v13393_v31 = vsel %vm712_vm0, %v13367_v51, 0.0  ;;  %v13368_v7 = vmul.f32 %v21529_v52, %v21529_v52 }
0x1c64   : > { %13394 = vadd.xlane.f32.xlu0 %v13393_v31 }
0x1c65   : > { %v13396_v45 = vsel %vm712_vm0, %v13368_v7, 0.0  ;;  %v13369_v58 = vmul.f32 %v21535_v6, %v21535_v6 }
0x1c66   : > { %13397 = vadd.xlane.f32.xlu1 %v13396_v45 }
0x1c67   : > { %v13399_v42 = vsel %vm712_vm0, %v13369_v58, 0.0 }
0x1c68   : > { %13400 = vadd.xlane.f32.xlu0 %v13399_v42 }
0x1c6a   : > { %v13308_v13 = vpop.xlane.xlu1 %13307 }
0x1c6b   : > { %v13338_v21 = vmul.f32 0.03125, %v13308_v13 }
0x1c6c   : > { %v13311_v55 = vpop.xlane.xlu0 %13310 }
0x1c6d   : > { %v21545_v17 = vsub.f32 %v21451_v30, %v13338_v21  ;;  %v13339_v24 = vmul.f32 0.03125, %v13311_v55  ;;  %v21607_v21 = vld [vmem:[%s22067_s13] ss:$0 sm:$0xff] }
0x1c6e   : > { %v13314_v54 = vpop.xlane.xlu1 %13313 }
0x1c6f   : > { %v21548_v3 = vsub.f32 %v21459_v56, %v13339_v24  ;;  %v13340_v60 = vmul.f32 0.03125, %v13314_v54  ;;  %v13370_v1 = vmul.f32 %v21545_v17, %v21545_v17 }
0x1c70   : > { %v13317_v29 = vpop.xlane.xlu0 %13316 }
0x1c71   : > { %v21553_v27 = vsub.f32 %v21456_v50, %v13340_v60  ;;  %v13341_v25 = vmul.f32 0.03125, %v13317_v29  ;;  %v13402_v34 = vsel %vm712_vm0, %v13370_v1, 0.0  ;;  %v13371_v30 = vmul.f32 %v21548_v3, %v21548_v3 }
0x1c72   : > { %13403 = vadd.xlane.f32.xlu1 %v13402_v34 }
0x1c73   : > { %v21559_v32 = vsub.f32 %v21464_v22, %v13341_v25  ;;  %v13405_v56 = vsel %vm712_vm0, %v13371_v30, 0.0  ;;  %v13372_v23 = vmul.f32 %v21553_v27, %v21553_v27  ;;  %v16629_v22 = vld [vmem:[%s22069_s15 + $0x8] sm:$0xff]   ;;  %v21615_v30 = vld [vmem:[%s22068_s14] ss:$0 sm:$0xff] }
0x1c74   : > { %13406 = vadd.xlane.f32.xlu0 %v13405_v56  ;;  %16298 = vmatprep.subr.bf16.mxu0 %v16629_v22 }
0x1c75   : > { %v13408_v36 = vsel %vm712_vm0, %v13372_v23, 0.0  ;;  %v13373_v50 = vmul.f32 %v21559_v32, %v21559_v32  ;;  %16299 = vmatpush3.bf16.msra.mxu0 %v16629_v22 }
0x1c76   : > { %13409 = vadd.xlane.f32.xlu1 %v13408_v36 }
0x1c77   : > { %v13411_v63 = vsel %vm712_vm0, %v13373_v50, 0.0 }
0x1c78   : > { %13412 = vadd.xlane.f32.xlu0 %v13411_v63 }
0x1ca5   : > { %v13320_v5 = vpop.xlane.xlu1 %13319 }
0x1ca6   : > { %v13342_v61 = vmul.f32 0.03125, %v13320_v5 }
0x1ca7   : > { %v13323_v49 = vpop.xlane.xlu0 %13322 }
0x1ca8   : > { %v21575_v28 = vsub.f32 %v21475_v57, %v13342_v61  ;;  %v13343_v35 = vmul.f32 0.03125, %v13323_v49 }
0x1ca9   : > { %v13326_v62 = vpop.xlane.xlu1 %13325 }
0x1caa   : > { %v21578_v39 = vsub.f32 %v21483_v12, %v13343_v35  ;;  %v13344_v19 = vmul.f32 0.03125, %v13326_v62  ;;  %v13374_v11 = vmul.f32 %v21575_v28, %v21575_v28 }
0x1cab   : > { %v13329_v33 = vpop.xlane.xlu0 %13328 }
0x1cac   : > { %v21583_v2 = vsub.f32 %v21480_v59, %v13344_v19  ;;  %v13345_v37 = vmul.f32 0.03125, %v13329_v33  ;;  %v13414_v15 = vsel %vm712_vm0, %v13374_v11, 0.0  ;;  %v13375_v57 = vmul.f32 %v21578_v39, %v21578_v39 }
0x1cad   : > { %13415 = vadd.xlane.f32.xlu1 %v13414_v15 }
0x1cae   : > { %v21589_v47 = vsub.f32 %v21488_v38, %v13345_v37  ;;  %v13417_v12 = vsel %vm712_vm0, %v13375_v57, 0.0  ;;  %v13376_v18 = vmul.f32 %v21583_v2, %v21583_v2  ;;  %v16630_v38 = vld [vmem:[%s22071_s17] sm:$0xff]  }
0x1caf   : > { %13418 = vadd.xlane.f32.xlu0 %v13417_v12  ;;  %16316 = vmatprep.subr.bf16.mxu1 %v16630_v38 }
0x1cb0   : > { %v13420_v48 = vsel %vm712_vm0, %v13376_v18, 0.0  ;;  %v13377_v59 = vmul.f32 %v21589_v47, %v21589_v47  ;;  %16317 = vmatpush3.bf16.msra.mxu1 %v16630_v38 }
0x1cb1   : > { %13421 = vadd.xlane.f32.xlu1 %v13420_v48  ;;  %16318 = vmatprep.subr.bf16.mxu1 %v16631_v0 }
0x1cb2   : > { %v13423_v41 = vsel %vm712_vm0, %v13377_v59, 0.0 }
0x1cb3   : > { %13424 = vadd.xlane.f32.xlu0 %v13423_v41 }
0x1cb4   : > { %16319 = vmatpush3.bf16.msra.mxu1 %v16631_v0 }
0x1cdf   : > { %v13380_v8 = vpop.xlane.xlu1 %13379 }
0x1ce0   : > { %v13426_v9 = vmul.f32 0.03125, %v13380_v8 }
0x1ce1   : > { %v13383_v4 = vpop.xlane.xlu0 %13382 }
0x1ce2   : > { %v13442_v44 = vadd.f32 1e-05, %v13426_v9  ;;  %v13427_v16 = vmul.f32 0.03125, %v13383_v4 }
0x1ce3   : > { %v13386_v53 = vpop.xlane.xlu1 %13385 }
0x1ce4   : > { %17182 = vrsqrt.f32 %v13442_v44  ;;  %v13443_v51 = vadd.f32 1e-05, %v13427_v16  ;;  %v13428_v31 = vmul.f32 0.03125, %v13386_v53 }
0x1ce6   : > { %17184 = vrsqrt.f32 %v13443_v51  ;;  %v13444_v7 = vadd.f32 1e-05, %v13428_v31 }
0x1ce7   : > { %v13389_v45 = vpop.xlane.xlu0 %13388 }
0x1ce8   : > { %17186 = vrsqrt.f32 %v13444_v7  ;;  %v13429_v58 = vmul.f32 0.03125, %v13389_v45 }
0x1cea   : > { %v13445_v42 = vadd.f32 1e-05, %v13429_v58 }
0x1cec   : > { %17188 = vrsqrt.f32 %v13445_v42 }
0x1cee   : > { %v17183_v13 = vpop.eup %17182 }
0x1cef   : > { %v13474_v55 = vmul.f32 %v17183_v13, %v21497_v10  ;;  %v13392_v24 = vpop.xlane.xlu1 %13391 }
0x1cf0   : > { %v17185_v54 = vpop.eup %17184  ;;  %v13430_v60 = vmul.f32 0.03125, %v13392_v24 }
0x1cf1   : > { %v13475_v1 = vmul.f32 %v17185_v54, %v21500_v14  ;;  %v13395_v29 = vpop.xlane.xlu0 %13394  ;;  %v13496_v25 = vmul.f32 %v21607_v21, %v13474_v55 }
0x1cf2   : > { %v17187_v34 = vpop.eup %17186  ;;  %v13446_v56 = vadd.f32 1e-05, %v13430_v60  ;;  %v13431_v23 = vmul.f32 0.03125, %v13395_v29 }
0x1cf3   : > { %v13476_v36 = vmul.f32 %v17187_v34, %v21505_v43  ;;  %v13398_v50 = vpop.xlane.xlu1 %13397  ;;  %v13497_v10 = vmul.f32 %v21607_v21, %v13475_v1  ;;  %v21620_v22 = vadd.f32 %v21615_v30, %v13496_v25 }
0x1cf4   : > { %17190 = vrsqrt.f32 %v13446_v56  ;;  %v13447_v46 = vadd.f32 1e-05, %v13431_v23  ;;  %v13432_v63 = vmul.f32 0.03125, %v13398_v50 }
0x1cf5   : > { %v13401_v14 = vpop.xlane.xlu0 %13400  ;;  %v21623_v5 = vadd.f32 %v21615_v30, %v13497_v10  ;;  %v13498_v62 = vmul.f32 %v21607_v21, %v13476_v36 }
0x1cf6   : > { %v17189_v61 = vpop.eup %17188  ;;  %17192 = vrsqrt.f32 %v13447_v46  ;;  %v13448_v49 = vadd.f32 1e-05, %v13432_v63  ;;  %v13433_v35 = vmul.f32 0.03125, %v13401_v14 }
0x1cf7   : > { %v13477_v43 = vmul.f32 %v17189_v61, %v21514_v40  ;;  %v13558_v19 = vpack.c.bf16 %v21623_v5, %v21620_v22  ;;  %v21632_v37 = vadd.f32 %v21615_v30, %v13498_v62 }
0x1cf8   : > { %17194 = vrsqrt.f32 %v13448_v49  ;;  %v13449_v11 = vadd.f32 1e-05, %v13433_v35 }
0x1cf9   : > { %v13499_v33 = vmul.f32 %v21607_v21, %v13477_v43  ;;  %16300 = vmatprep.mubr.msk.bf16.mxu0 %vm712_vm0, %v13558_v19 }
0x1cfa   : > { %17196 = vrsqrt.f32 %v13449_v11 }
0x1cfb   : > { %v21635_v15 = vadd.f32 %v21615_v30, %v13499_v33 }
0x1cfd   : > { %v13559_v57 = vpack.c.bf16 %v21635_v15, %v21632_v37 }
0x1cfe   : > { %v17191_v40 = vpop.eup %17190 }
0x1cff   : > { %v13478_v12 = vmul.f32 %v17191_v40, %v21521_v20  ;;  %v13404_v18 = vpop.xlane.xlu1 %13403  ;;  %16301 = vmatmul.mubr.msk.bf16.vlgmr.msra.gmra.mrb[172].mxu0 %vm712_vm0, %v13559_v57 }
0x1d00   : > { %v17193_v48 = vpop.eup %17192  ;;  %v13434_v59 = vmul.f32 0.03125, %v13404_v18 }
0x1d01   : > { %v13479_v41 = vmul.f32 %v17193_v48, %v21524_v26  ;;  %v13407_v38 = vpop.xlane.xlu0 %13406  ;;  %v13500_v0 = vmul.f32 %v21607_v21, %v13478_v12 }
0x1d02   : > { %v17195_v8 = vpop.eup %17194  ;;  %v13450_v9 = vadd.f32 1e-05, %v13434_v59  ;;  %v13435_v4 = vmul.f32 0.03125, %v13407_v38 }
0x1d03   : > { %v13480_v44 = vmul.f32 %v17195_v8, %v21529_v52  ;;  %v13410_v16 = vpop.xlane.xlu1 %13409  ;;  %v13501_v53 = vmul.f32 %v21607_v21, %v13479_v41  ;;  %v21648_v58 = vadd.f32 %v21615_v30, %v13500_v0 }
0x1d04   : > { %v17197_v51 = vpop.eup %17196  ;;  %17198 = vrsqrt.f32 %v13450_v9  ;;  %v13451_v20 = vadd.f32 1e-05, %v13435_v4  ;;  %v13436_v31 = vmul.f32 0.03125, %v13410_v16 }
0x1d05   : > { %v13502_v7 = vmul.f32 %v21607_v21, %v13480_v44  ;;  %v13481_v45 = vmul.f32 %v17197_v51, %v21535_v6  ;;  %v13413_v26 = vpop.xlane.xlu0 %13412  ;;  %v21651_v42 = vadd.f32 %v21615_v30, %v13501_v53 }
0x1d06   : > { %17200 = vrsqrt.f32 %v13451_v20  ;;  %v13452_v52 = vadd.f32 1e-05, %v13436_v31  ;;  %v13437_v13 = vmul.f32 0.03125, %v13413_v26 }
0x1d07   : > { %v13503_v55 = vmul.f32 %v21607_v21, %v13481_v45  ;;  %v13560_v24 = vpack.c.bf16 %v21651_v42, %v21648_v58  ;;  %v21657_v60 = vadd.f32 %v21615_v30, %v13502_v7 }
0x1d08   : > { %17202 = vrsqrt.f32 %v13452_v52  ;;  %v13453_v54 = vadd.f32 1e-05, %v13437_v13  ;;  %v16635_v13 = vld [vmem:[%s22071_s17 + $0x28] sm:$0xff]  }
0x1d09   : > { %v21660_v6 = vadd.f32 %v21615_v30, %v13503_v55  ;;  %16304 = vmatprep.mubr.msk.bf16.mxu0 %vm712_vm0, %v13560_v24  ;;  %v16636_v55 = vld [vmem:[%s22071_s17 + $0x30] sm:$0xff]   ;;  %v16637_v24 = vld [vmem:[%s22071_s17 + $0x38] sm:$0xff]  }
0x1d0a   : > { %17204 = vrsqrt.f32 %v13453_v54  ;;  %v21739_v54 = vld [vmem:[%s22070_s16] ss:$0 sm:$0xff] }
0x1d0b   : > { %v13561_v1 = vpack.c.bf16 %v21660_v6, %v21657_v60 }
0x1d0d   : > { %16305 = vmatmul.mubr.msk.bf16.gmra.mrb[176].mxu0 %vm712_vm0, %v13561_v1 }
0x1d0e   : > { %v17199_v29 = vpop.eup %17198 }
0x1d0f   : > { %v13482_v25 = vmul.f32 %v17199_v29, %v21545_v17 }
0x1d10   : > { %v17201_v34 = vpop.eup %17200 }
0x1d11   : > { %v13483_v56 = vmul.f32 %v17201_v34, %v21548_v3  ;;  %v13504_v23 = vmul.f32 %v21607_v21, %v13482_v25 }
0x1d12   : > { %v17203_v36 = vpop.eup %17202 }
0x1d13   : > { %v13484_v50 = vmul.f32 %v17203_v36, %v21553_v27  ;;  %v13505_v10 = vmul.f32 %v21607_v21, %v13483_v56  ;;  %v21674_v61 = vadd.f32 %v21615_v30, %v13504_v23 }
0x1d14   : > { %v17205_v46 = vpop.eup %17204 }
0x1d15   : > { %v13506_v63 = vmul.f32 %v21607_v21, %v13484_v50  ;;  %v13485_v14 = vmul.f32 %v17205_v46, %v21559_v32  ;;  %v21677_v17 = vadd.f32 %v21615_v30, %v13505_v10 }
0x1d17   : > { %v13507_v3 = vmul.f32 %v21607_v21, %v13485_v14  ;;  %v13562_v49 = vpack.c.bf16 %v21677_v17, %v21674_v61  ;;  %v21683_v27 = vadd.f32 %v21615_v30, %v13506_v63 }
0x1d19   : > { %v21686_v35 = vadd.f32 %v21615_v30, %v13507_v3  ;;  %16308 = vmatprep.mubr.msk.bf16.mxu0 %vm712_vm0, %v13562_v49 }
0x1d1b   : > { %v13563_v32 = vpack.c.bf16 %v21686_v35, %v21683_v27 }
0x1d1d   : > { %16309 = vmatmul.mubr.msk.bf16.gmra.mrb[180].mxu0 %vm712_vm0, %v13563_v32 }
0x1d3a   : > { %v13416_v62 = vpop.xlane.xlu1 %13415 }
0x1d3b   : > { %v13438_v43 = vmul.f32 0.03125, %v13416_v62 }
0x1d3c   : > { %v13419_v19 = vpop.xlane.xlu0 %13418 }
0x1d3d   : > { %v13454_v11 = vadd.f32 1e-05, %v13438_v43  ;;  %v13439_v33 = vmul.f32 0.03125, %v13419_v19 }
0x1d3e   : > { %v13422_v57 = vpop.xlane.xlu1 %13421 }
0x1d3f   : > { %17206 = vrsqrt.f32 %v13454_v11  ;;  %v13455_v40 = vadd.f32 1e-05, %v13439_v33  ;;  %v13440_v12 = vmul.f32 0.03125, %v13422_v57 }
0x1d40   : > { %v13425_v18 = vpop.xlane.xlu0 %13424 }
0x1d41   : > { %17208 = vrsqrt.f32 %v13455_v40  ;;  %v13456_v48 = vadd.f32 1e-05, %v13440_v12  ;;  %v13441_v59 = vmul.f32 0.03125, %v13425_v18 }
0x1d43   : > { %17210 = vrsqrt.f32 %v13456_v48  ;;  %v13457_v41 = vadd.f32 1e-05, %v13441_v59 }
0x1d45   : > { %17212 = vrsqrt.f32 %v13457_v41 }
0x1d49   : > { %v17207_v38 = vpop.eup %17206 }
0x1d4a   : > { %v13486_v0 = vmul.f32 %v17207_v38, %v21575_v28 }
0x1d4b   : > { %v17209_v8 = vpop.eup %17208 }
0x1d4c   : > { %v13487_v9 = vmul.f32 %v17209_v8, %v21578_v39  ;;  %v13508_v4 = vmul.f32 %v21607_v21, %v13486_v0 }
0x1d4d   : > { %v17211_v44 = vpop.eup %17210 }
0x1d4e   : > { %v13488_v16 = vmul.f32 %v17211_v44, %v21583_v2  ;;  %v13509_v53 = vmul.f32 %v21607_v21, %v13487_v9  ;;  %v21700_v7 = vadd.f32 %v21615_v30, %v13508_v4  ;;  %v16632_v2 = vld [vmem:[%s22071_s17 + $0x10] sm:$0xff]  }
0x1d4f   : > { %v17213_v51 = vpop.eup %17212  ;;  %16320 = vmatprep.subr.bf16.mxu1 %v16632_v2 }
0x1d50   : > { %v13510_v20 = vmul.f32 %v21607_v21, %v13488_v16  ;;  %v13489_v31 = vmul.f32 %v17213_v51, %v21589_v47  ;;  %v21703_v28 = vadd.f32 %v21615_v30, %v13509_v53  ;;  %16321 = vmatpush3.bf16.msra.mxu1 %v16632_v2 }
0x1d52   : > { %v13511_v39 = vmul.f32 %v21607_v21, %v13489_v31  ;;  %v13564_v45 = vpack.c.bf16 %v21703_v28, %v21700_v7  ;;  %v21712_v26 = vadd.f32 %v21615_v30, %v13510_v20  ;;  %v16633_v21 = vld [vmem:[%s22071_s17 + $0x18] sm:$0xff]  }
0x1d53   : > { %16322 = vmatprep.subr.bf16.mxu1 %v16633_v21 }
0x1d54   : > { %v21715_v47 = vadd.f32 %v21615_v30, %v13511_v39  ;;  %16312 = vmatprep.mubr.msk.bf16.mxu0 %vm712_vm0, %v13564_v45  ;;  %16323 = vmatpush3.bf16.msra.mxu1 %v16633_v21  ;;  %v16634_v30 = vld [vmem:[%s22071_s17 + $0x20] sm:$0xff]  }
0x1d55   : > { %16324 = vmatprep.subr.bf16.mxu1 %v16634_v30 }
0x1d56   : > { %v13565_v52 = vpack.c.bf16 %v21715_v47, %v21712_v26 }
0x1d58   : > { %16313 = vmatmul.mubr.msk.bf16.gmra.mrb[184].mxu0 %vm712_vm0, %v13565_v52  ;;  %16325 = vmatpush3.bf16.msra.mxu1 %v16634_v30 }
0x1d59   : > { %16326 = vmatprep.subr.bf16.mxu1 %v16635_v13 }
0x1d5c   : > { %16327 = vmatpush3.bf16.msra.mxu1 %v16635_v13 }
0x1d5d   : > { %16328 = vmatprep.subr.bf16.mxu1 %v16636_v55 }
0x1d60   : > { %16329 = vmatpush3.bf16.msra.mxu1 %v16636_v55 }
0x1d61   : > { %16330 = vmatprep.subr.bf16.mxu1 %v16637_v24 }
0x1d64   : > { %16331 = vmatpush3.bf16.msra.mxu1 %v16637_v24 }
0x1dd2   : > { %v16302_v1 = vpop.f32.mrb[172].mxu0 }
0x1dd3   : > { %v13651_v29 = vadd.f32 %v16302_v1, %v21739_v54  ;;  %v13642_v25 = vpop.f32.mrb[173].mxu0 }
0x1dd4   : > { %v13643_v34 = vadd.f32 %v21739_v54, %v13642_v25  ;;  %v16303_v56 = vpop.f32.mrb[174].mxu0 }
0x1dd5   : > { %v13723_v23 = vmul.f32 0.70710677, %v13651_v29  ;;  %v13654_v36 = vadd.f32 %v16303_v56, %v21739_v54  ;;  %v13645_v50 = vpop.f32.mrb[175].mxu0  ;;  %v13707_v40 = vmul.f32 0.5, %v13651_v29 }
0x1dd6   : > { %v13721_v10 = vmul.f32 0.70710677, %v13643_v34  ;;  %v13646_v46 = vadd.f32 %v21739_v54, %v13645_v50  ;;  %v13705_v38 = vmul.f32 0.5, %v13643_v34 }
0x1dd7   : > { %17214 = verf.f32 %v13723_v23  ;;  %v13724_v63 = vmul.f32 0.70710677, %v13654_v36  ;;  %v13708_v0 = vmul.f32 0.5, %v13654_v36 }
0x1dd8   : > { %17216 = verf.f32 %v13721_v10  ;;  %v13722_v14 = vmul.f32 0.70710677, %v13646_v46  ;;  %v13706_v44 = vmul.f32 0.5, %v13646_v46 }
0x1dd9   : > { %17218 = verf.f32 %v13724_v63 }
0x1dda   : > { %17220 = verf.f32 %v13722_v14 }
0x1de0   : > { %v16306_v3 = vpop.f32.mrb[176].mxu0 }
0x1de1   : > { %v17215_v49 = vpop.eup %17214  ;;  %v13667_v32 = vadd.f32 %v16306_v3, %v21739_v54  ;;  %v13658_v62 = vpop.f32.mrb[177].mxu0 }
0x1de2   : > { %v17217_v43 = vpop.eup %17216  ;;  %v13755_v19 = vadd.f32 1.0, %v17215_v49  ;;  %v13659_v11 = vadd.f32 %v21739_v54, %v13658_v62  ;;  %v16307_v33 = vpop.f32.mrb[178].mxu0 }
0x1de3   : > { %v17219_v57 = vpop.eup %17218  ;;  %v13753_v12 = vadd.f32 1.0, %v17217_v43  ;;  %v13727_v18 = vmul.f32 0.70710677, %v13667_v32  ;;  %v13670_v48 = vadd.f32 %v16307_v33, %v21739_v54  ;;  %v13661_v59 = vpop.f32.mrb[179].mxu0  ;;  %v13711_v25 = vmul.f32 0.5, %v13667_v32 }
0x1de4   : > { %v17221_v41 = vpop.eup %17220  ;;  %v13756_v8 = vadd.f32 1.0, %v17219_v57  ;;  %v13725_v9 = vmul.f32 0.70710677, %v13659_v11  ;;  %v13771_v4 = vmul.f32 %v13755_v19, %v13707_v40  ;;  %v13662_v20 = vadd.f32 %v21739_v54, %v13661_v59 }
0x1de5   : > { %v13754_v16 = vadd.f32 1.0, %v17221_v41  ;;  %17222 = verf.f32 %v13727_v18  ;;  %v13728_v51 = vmul.f32 0.70710677, %v13670_v48  ;;  %v13769_v31 = vmul.f32 %v13753_v12, %v13705_v38 }
0x1de6   : > { %v13772_v53 = vmul.f32 %v13756_v8, %v13708_v0  ;;  %17224 = verf.f32 %v13725_v9  ;;  %v13726_v2 = vmul.f32 0.70710677, %v13662_v20  ;;  %v13709_v34 = vmul.f32 0.5, %v13659_v11 }
0x1de7   : > { %v13770_v39 = vmul.f32 %v13754_v16, %v13706_v44  ;;  %17226 = verf.f32 %v13728_v51  ;;  %v13712_v50 = vmul.f32 0.5, %v13670_v48  ;;  %v13710_v3 = vmul.f32 0.5, %v13662_v20 }
0x1de8   : > { %v13786_v45 = vpack.c.bf16 %v13772_v53, %v13771_v4  ;;  %17228 = verf.f32 %v13726_v2 }
0x1de9   : > { %v13785_v52 = vpack.c.bf16 %v13770_v39, %v13769_v31 }
0x1deb   : > { %16332 = vmatprep.mubr.bf16.mxu1 %v13785_v52 }
0x1dec   : > { %16333 = vmatmul.mubr.bf16.vlgmr.msra.gmra.mrb[164].mxu1 %v13786_v45 }
0x1def   : > { %v17223_v21 = vpop.eup %17222 }
0x1df0   : > { %v17225_v30 = vpop.eup %17224  ;;  %v16310_v13 = vpop.f32.mrb[180].mxu0  ;;  %v13759_v55 = vadd.f32 1.0, %v17223_v21 }
0x1df1   : > { %v13683_v24 = vadd.f32 %v16310_v13, %v21739_v54  ;;  %v13674_v1 = vpop.f32.mrb[181].mxu0  ;;  %v17227_v29 = vpop.eup %17226  ;;  %v13757_v36 = vadd.f32 1.0, %v17225_v30 }
0x1df2   : > { %v13675_v56 = vadd.f32 %v21739_v54, %v13674_v1  ;;  %v16311_v23 = vpop.f32.mrb[182].mxu0  ;;  %v13760_v10 = vadd.f32 1.0, %v17227_v29  ;;  %v17229_v14 = vpop.eup %17228  ;;  %v13775_v19 = vmul.f32 %v13759_v55, %v13711_v25 }
0x1df3   : > { %v13731_v46 = vmul.f32 0.70710677, %v13683_v24  ;;  %v13677_v63 = vpop.f32.mrb[183].mxu0  ;;  %v13686_v62 = vadd.f32 %v16311_v23, %v21739_v54  ;;  %v13758_v57 = vadd.f32 1.0, %v17229_v14  ;;  %v13773_v11 = vmul.f32 %v13757_v36, %v13709_v34 }
0x1df4   : > { %v13729_v49 = vmul.f32 0.70710677, %v13675_v56  ;;  %v13678_v43 = vadd.f32 %v21739_v54, %v13677_v63  ;;  %v13776_v33 = vmul.f32 %v13760_v10, %v13712_v50  ;;  %v13715_v4 = vmul.f32 0.5, %v13683_v24 }
0x1df5   : > { %17230 = verf.f32 %v13731_v46  ;;  %v13732_v32 = vmul.f32 0.70710677, %v13686_v62  ;;  %v13774_v12 = vmul.f32 %v13758_v57, %v13710_v3  ;;  %v13716_v44 = vmul.f32 0.5, %v13686_v62 }
0x1df6   : > { %17232 = verf.f32 %v13729_v49  ;;  %v13788_v40 = vpack.c.bf16 %v13776_v33, %v13775_v19  ;;  %v13730_v18 = vmul.f32 0.70710677, %v13678_v43  ;;  %v13713_v53 = vmul.f32 0.5, %v13675_v56 }
0x1df7   : > { %17234 = verf.f32 %v13732_v32  ;;  %v13787_v48 = vpack.c.bf16 %v13774_v12, %v13773_v11  ;;  %v13714_v51 = vmul.f32 0.5, %v13678_v43 }
0x1df8   : > { %17236 = verf.f32 %v13730_v18 }
0x1df9   : > { %16336 = vmatprep.mubr.bf16.mxu1 %v13787_v48 }
0x1dfa   : > { %16337 = vmatmul.mubr.bf16.gmra.mrb[168].mxu1 %v13788_v40 }
0x1dff   : > { %v17231_v59 = vpop.eup %17230 }
0x1e00   : > { %v17233_v41 = vpop.eup %17232  ;;  %v13763_v38 = vadd.f32 1.0, %v17231_v59  ;;  %v21760_v59 = vld [vmem:[%s22072_s18] ss:$0 sm:$0xff] }
0x1e01   : > { %v17235_v0 = vpop.eup %17234  ;;  %v13761_v8 = vadd.f32 1.0, %v17233_v41 }
0x1e02   : > { %v17237_v9 = vpop.eup %17236  ;;  %v13764_v16 = vadd.f32 1.0, %v17235_v0  ;;  %v13779_v31 = vmul.f32 %v13763_v38, %v13715_v4 }
0x1e03   : > { %v13762_v20 = vadd.f32 1.0, %v17237_v9  ;;  %v13777_v45 = vmul.f32 %v13761_v8, %v13713_v53 }
0x1e04   : > { %v13780_v39 = vmul.f32 %v13764_v16, %v13716_v44 }
0x1e05   : > { %v13778_v2 = vmul.f32 %v13762_v20, %v13714_v51 }
0x1e06   : > { %v13790_v52 = vpack.c.bf16 %v13780_v39, %v13779_v31 }
0x1e07   : > { %v13789_v21 = vpack.c.bf16 %v13778_v2, %v13777_v45 }
0x1e09   : > { %16340 = vmatprep.mubr.bf16.mxu1 %v13789_v21 }
0x1e0a   : > { %16341 = vmatmul.mubr.bf16.gmra.mrb[172].mxu1 %v13790_v52 }
0x1e2b   : > { %v16314_v30 = vpop.f32.mrb[184].mxu0 }
0x1e2c   : > { %v13699_v13 = vadd.f32 %v16314_v30, %v21739_v54  ;;  %v13690_v55 = vpop.f32.mrb[185].mxu0 }
0x1e2d   : > { %v13691_v1 = vadd.f32 %v21739_v54, %v13690_v55  ;;  %v16315_v24 = vpop.f32.mrb[186].mxu0 }
0x1e2e   : > { %v13735_v29 = vmul.f32 0.70710677, %v13699_v13  ;;  %v13702_v25 = vadd.f32 %v16315_v24, %v21739_v54  ;;  %v13693_v34 = vpop.f32.mrb[187].mxu0  ;;  %v13719_v62 = vmul.f32 0.5, %v13699_v13 }
0x1e2f   : > { %v13733_v56 = vmul.f32 0.70710677, %v13691_v1  ;;  %v13694_v23 = vadd.f32 %v21739_v54, %v13693_v34  ;;  %v13717_v33 = vmul.f32 0.5, %v13691_v1 }
0x1e30   : > { %17238 = verf.f32 %v13735_v29  ;;  %v13736_v36 = vmul.f32 0.70710677, %v13702_v25  ;;  %v13720_v43 = vmul.f32 0.5, %v13702_v25 }
0x1e31   : > { %17240 = verf.f32 %v13733_v56  ;;  %v13734_v50 = vmul.f32 0.70710677, %v13694_v23  ;;  %v13718_v57 = vmul.f32 0.5, %v13694_v23 }
0x1e32   : > { %17242 = verf.f32 %v13736_v36 }
0x1e33   : > { %17244 = verf.f32 %v13734_v50 }
0x1e3a   : > { %v17239_v10 = vpop.eup %17238 }
0x1e3b   : > { %v17241_v46 = vpop.eup %17240  ;;  %v13767_v63 = vadd.f32 1.0, %v17239_v10 }
0x1e3c   : > { %v17243_v14 = vpop.eup %17242  ;;  %v13765_v3 = vadd.f32 1.0, %v17241_v46 }
0x1e3d   : > { %v17245_v49 = vpop.eup %17244  ;;  %v13768_v19 = vadd.f32 1.0, %v17243_v14  ;;  %v13783_v11 = vmul.f32 %v13767_v63, %v13719_v62 }
0x1e3e   : > { %v13766_v32 = vadd.f32 1.0, %v17245_v49  ;;  %v13781_v40 = vmul.f32 %v13765_v3, %v13717_v33 }
0x1e3f   : > { %v13784_v54 = vmul.f32 %v13768_v19, %v13720_v43 }
0x1e40   : > { %v13782_v12 = vmul.f32 %v13766_v32, %v13718_v57 }
0x1e41   : > { %v13792_v18 = vpack.c.bf16 %v13784_v54, %v13783_v11 }
0x1e42   : > { %v13791_v48 = vpack.c.bf16 %v13782_v12, %v13781_v40 }
0x1e44   : > { %16344 = vmatprep.mubr.bf16.mxu1 %v13791_v48 }
0x1e45   : > { %16345 = vmatmul.mubr.bf16.gmra.mrb[176].mxu1 %v13792_v18 }
0x1ebf   : > { %v16334_v41 = vpop.f32.mrb[164].mxu1 }
0x1ec0   : > { %v13890_v38 = vadd.f32 %v16334_v41, %v21760_v59  ;;  %v13881_v0 = vpop.f32.mrb[165].mxu1 }
0x1ec1   : > { %v13882_v8 = vadd.f32 %v21760_v59, %v13881_v0  ;;  %v16335_v9 = vpop.f32.mrb[166].mxu1 }
0x1ec2   : > { %v21765_v4 = vadd.f32 %v13890_v38, %v21632_v37  ;;  %v13893_v44 = vadd.f32 %v16335_v9, %v21760_v59  ;;  %v13884_v16 = vpop.f32.mrb[167].mxu1 }
0x1ec3   : > { %v13885_v53 = vadd.f32 %v21760_v59, %v13884_v16  ;;  %v21770_v51 = vadd.f32 %v13882_v8, %v21620_v22 }
0x1ec4   : > { %v21773_v20 = vadd.f32 %v13893_v44, %v21635_v15  ;;  %v13966_v31 = vsel %vm712_vm0, %v21765_v4, 0.0 }
0x1ec5   : > { %13967 = vadd.xlane.f32.xlu1 %v13966_v31  ;;  %v21778_v39 = vadd.f32 %v13885_v53, %v21623_v5  ;;  %v13960_v45 = vsel %vm712_vm0, %v21770_v51, 0.0 }
0x1ec6   : > { %v13969_v37 = vsel %vm712_vm0, %v21773_v20, 0.0 }
0x1ec7   : > { %13970 = vadd.xlane.f32.xlu0 %v13969_v37  ;;  %v13963_v22 = vsel %vm712_vm0, %v21778_v39, 0.0 }
0x1ec9   : > { %13961 = vadd.xlane.f32.xlu1 %v13960_v45 }
0x1ecb   : > { %13964 = vadd.xlane.f32.xlu0 %v13963_v22 }
0x1ecd   : > { %v16338_v15 = vpop.f32.mrb[168].mxu1 }
0x1ece   : > { %v13906_v2 = vadd.f32 %v16338_v15, %v21760_v59  ;;  %v13897_v52 = vpop.f32.mrb[169].mxu1 }
0x1ecf   : > { %v13898_v21 = vadd.f32 %v21760_v59, %v13897_v52  ;;  %v16339_v5 = vpop.f32.mrb[170].mxu1 }
0x1ed0   : > { %v21789_v30 = vadd.f32 %v13906_v2, %v21657_v60  ;;  %v13909_v13 = vadd.f32 %v16339_v5, %v21760_v59  ;;  %v13900_v55 = vpop.f32.mrb[171].mxu1 }
0x1ed1   : > { %v13901_v1 = vadd.f32 %v21760_v59, %v13900_v55  ;;  %v21794_v24 = vadd.f32 %v13898_v21, %v21648_v58 }
0x1ed2   : > { %v21797_v29 = vadd.f32 %v13909_v13, %v21660_v6  ;;  %v13978_v25 = vsel %vm712_vm0, %v21789_v30, 0.0 }
0x1ed3   : > { %13979 = vadd.xlane.f32.xlu1 %v13978_v25  ;;  %v21802_v34 = vadd.f32 %v13901_v1, %v21651_v42  ;;  %v13972_v56 = vsel %vm712_vm0, %v21794_v24, 0.0 }
0x1ed4   : > { %v13981_v60 = vsel %vm712_vm0, %v21797_v29, 0.0 }
0x1ed5   : > { %13982 = vadd.xlane.f32.xlu0 %v13981_v60  ;;  %v13975_v58 = vsel %vm712_vm0, %v21802_v34, 0.0 }
0x1ed7   : > { %13973 = vadd.xlane.f32.xlu1 %v13972_v56 }
0x1ed9   : > { %13976 = vadd.xlane.f32.xlu0 %v13975_v58 }
0x1edd   : > { %v16342_v6 = vpop.f32.mrb[172].mxu1 }
0x1ede   : > { %v13922_v23 = vadd.f32 %v16342_v6, %v21760_v59  ;;  %v13913_v36 = vpop.f32.mrb[173].mxu1 }
0x1edf   : > { %v13914_v50 = vadd.f32 %v21760_v59, %v13913_v36  ;;  %v16343_v42 = vpop.f32.mrb[174].mxu1 }
0x1ee0   : > { %v21813_v10 = vadd.f32 %v13922_v23, %v21683_v27  ;;  %v13925_v46 = vadd.f32 %v16343_v42, %v21760_v59  ;;  %v13916_v63 = vpop.f32.mrb[175].mxu1 }
0x1ee1   : > { %v13917_v14 = vadd.f32 %v21760_v59, %v13916_v63  ;;  %v21818_v3 = vadd.f32 %v13914_v50, %v21674_v61 }
0x1ee2   : > { %v21821_v49 = vadd.f32 %v13925_v46, %v21686_v35  ;;  %v13990_v62 = vsel %vm712_vm0, %v21813_v10, 0.0 }
0x1ee3   : > { %13991 = vadd.xlane.f32.xlu1 %v13990_v62  ;;  %v21826_v43 = vadd.f32 %v13917_v14, %v21677_v17  ;;  %v13984_v19 = vsel %vm712_vm0, %v21818_v3, 0.0 }
0x1ee4   : > { %v13993_v27 = vsel %vm712_vm0, %v21821_v49, 0.0 }
0x1ee5   : > { %13994 = vadd.xlane.f32.xlu0 %v13993_v27  ;;  %v13987_v61 = vsel %vm712_vm0, %v21826_v43, 0.0 }
0x1ee7   : > { %13985 = vadd.xlane.f32.xlu1 %v13984_v19 }
0x1ee9   : > { %13988 = vadd.xlane.f32.xlu0 %v13987_v61 }
0x1f18   : > { %v16346_v35 = vpop.f32.mrb[176].mxu1 }
0x1f19   : > { %v13929_v33 = vpop.f32.mrb[177].mxu1  ;;  %v13938_v57 = vadd.f32 %v16346_v35, %v21760_v59 }
0x1f1a   : > { %v13930_v32 = vadd.f32 %v21760_v59, %v13929_v33  ;;  %v16347_v17 = vpop.f32.mrb[178].mxu1 }
0x1f1b   : > { %v13932_v11 = vpop.f32.mrb[179].mxu1  ;;  %v13941_v40 = vadd.f32 %v16347_v17, %v21760_v59  ;;  %v21842_v18 = vadd.f32 %v13938_v57, %v21712_v26 }
0x1f1c   : > { %v21837_v54 = vadd.f32 %v13930_v32, %v21700_v7  ;;  %v13933_v12 = vadd.f32 %v21760_v59, %v13932_v11 }
0x1f1d   : > { %v21850_v38 = vadd.f32 %v13941_v40, %v21715_v47  ;;  %v14002_v59 = vsel %vm712_vm0, %v21842_v18, 0.0 }
0x1f1e   : > { %v21845_v48 = vadd.f32 %v13933_v12, %v21703_v28  ;;  %v13996_v41 = vsel %vm712_vm0, %v21837_v54, 0.0 }
0x1f1f   : > { %13997 = vadd.xlane.f32.xlu1 %v13996_v41  ;;  %v14005_v26 = vsel %vm712_vm0, %v21850_v38, 0.0 }
0x1f20   : > { %v13999_v7 = vsel %vm712_vm0, %v21845_v48, 0.0 }
0x1f21   : > { %14000 = vadd.xlane.f32.xlu0 %v13999_v7 }
0x1f23   : > { %14003 = vadd.xlane.f32.xlu1 %v14002_v59 }
0x1f25   : > { %14006 = vadd.xlane.f32.xlu0 %v14005_v26 }
0x1f52   : > { %v13968_v28 = vpop.xlane.xlu1 %13967 }
0x1f53   : > { %v14010_v0 = vmul.f32 0.03125, %v13968_v28 }
0x1f54   : > { %v13971_v8 = vpop.xlane.xlu0 %13970 }
0x1f55   : > { %v21859_v9 = vsub.f32 %v21765_v4, %v14010_v0  ;;  %v14011_v47 = vmul.f32 0.03125, %v13971_v8 }
0x1f56   : > { %v13962_v44 = vpop.xlane.xlu1 %13961 }
0x1f57   : > { %v21862_v16 = vsub.f32 %v21773_v20, %v14011_v47  ;;  %v14008_v53 = vmul.f32 0.03125, %v13962_v44  ;;  %v14042_v31 = vmul.f32 %v21859_v9, %v21859_v9 }
0x1f58   : > { %v13965_v37 = vpop.xlane.xlu0 %13964 }
0x1f59   : > { %v21867_v45 = vsub.f32 %v21770_v51, %v14008_v53  ;;  %v14009_v22 = vmul.f32 0.03125, %v13965_v37  ;;  %v14062_v15 = vsel %vm712_vm0, %v14042_v31, 0.0  ;;  %v14043_v4 = vmul.f32 %v21862_v16, %v21862_v16 }
0x1f5a   : > { %14063 = vadd.xlane.f32.xlu1 %v14062_v15 }
0x1f5b   : > { %v21873_v2 = vsub.f32 %v21778_v39, %v14009_v22  ;;  %v14065_v20 = vsel %vm712_vm0, %v14043_v4, 0.0  ;;  %v14040_v52 = vmul.f32 %v21867_v45, %v21867_v45 }
0x1f5c   : > { %14066 = vadd.xlane.f32.xlu0 %v14065_v20 }
0x1f5d   : > { %v14056_v21 = vsel %vm712_vm0, %v14040_v52, 0.0  ;;  %v14041_v51 = vmul.f32 %v21873_v2, %v21873_v2 }
0x1f5e   : > { %14057 = vadd.xlane.f32.xlu1 %v14056_v21 }
0x1f5f   : > { %v14059_v5 = vsel %vm712_vm0, %v14041_v51, 0.0 }
0x1f60   : > { %14060 = vadd.xlane.f32.xlu0 %v14059_v5  ;;  %v13980_v13 = vpop.xlane.xlu1 %13979 }
0x1f61   : > { %v14014_v55 = vmul.f32 0.03125, %v13980_v13 }
0x1f62   : > { %v13983_v1 = vpop.xlane.xlu0 %13982 }
0x1f63   : > { %v21883_v39 = vsub.f32 %v21789_v30, %v14014_v55  ;;  %v14015_v25 = vmul.f32 0.03125, %v13983_v1 }
0x1f64   : > { %v13974_v60 = vpop.xlane.xlu1 %13973 }
0x1f65   : > { %v21886_v56 = vsub.f32 %v21797_v29, %v14015_v25  ;;  %v14012_v58 = vmul.f32 0.03125, %v13974_v60  ;;  %v14046_v6 = vmul.f32 %v21883_v39, %v21883_v39 }
0x1f66   : > { %v13977_v23 = vpop.xlane.xlu0 %13976 }
0x1f67   : > { %v21891_v36 = vsub.f32 %v21794_v24, %v14012_v58  ;;  %v14013_v50 = vmul.f32 0.03125, %v13977_v23  ;;  %v14074_v42 = vsel %vm712_vm0, %v14046_v6, 0.0  ;;  %v14047_v30 = vmul.f32 %v21886_v56, %v21886_v56 }
0x1f68   : > { %14075 = vadd.xlane.f32.xlu1 %v14074_v42 }
0x1f69   : > { %v21897_v46 = vsub.f32 %v21802_v34, %v14013_v50  ;;  %v14077_v29 = vsel %vm712_vm0, %v14047_v30, 0.0  ;;  %v14044_v63 = vmul.f32 %v21891_v36, %v21891_v36 }
0x1f6a   : > { %14078 = vadd.xlane.f32.xlu0 %v14077_v29 }
0x1f6b   : > { %v14068_v14 = vsel %vm712_vm0, %v14044_v63, 0.0  ;;  %v14045_v24 = vmul.f32 %v21897_v46, %v21897_v46 }
0x1f6c   : > { %14069 = vadd.xlane.f32.xlu1 %v14068_v14  ;;  %v21957_v14 = vld [vmem:[%s22073_s19] ss:$0 sm:$0xff] }
0x1f6d   : > { %v14071_v62 = vsel %vm712_vm0, %v14045_v24, 0.0 }
0x1f6e   : > { %14072 = vadd.xlane.f32.xlu0 %v14071_v62 }
0x1f70   : > { %v13992_v27 = vpop.xlane.xlu1 %13991 }
0x1f71   : > { %v14018_v19 = vmul.f32 0.03125, %v13992_v27 }
0x1f72   : > { %v13995_v61 = vpop.xlane.xlu0 %13994 }
0x1f73   : > { %v21907_v34 = vsub.f32 %v21813_v10, %v14018_v19  ;;  %v14019_v35 = vmul.f32 0.03125, %v13995_v61  ;;  %v21963_v19 = vld [vmem:[%s22074_s20] ss:$0 sm:$0xff] }
0x1f74   : > { %v13986_v33 = vpop.xlane.xlu1 %13985 }
0x1f75   : > { %v21910_v57 = vsub.f32 %v21821_v49, %v14019_v35  ;;  %v14016_v32 = vmul.f32 0.03125, %v13986_v33  ;;  %v14050_v17 = vmul.f32 %v21907_v34, %v21907_v34 }
0x1f76   : > { %v13989_v11 = vpop.xlane.xlu0 %13988 }
0x1f77   : > { %v21915_v40 = vsub.f32 %v21818_v3, %v14016_v32  ;;  %v14017_v12 = vmul.f32 0.03125, %v13989_v11  ;;  %v14086_v41 = vsel %vm712_vm0, %v14050_v17, 0.0  ;;  %v14051_v10 = vmul.f32 %v21910_v57, %v21910_v57 }
0x1f78   : > { %14087 = vadd.xlane.f32.xlu1 %v14086_v41 }
0x1f79   : > { %v21921_v7 = vsub.f32 %v21826_v43, %v14017_v12  ;;  %v14089_v49 = vsel %vm712_vm0, %v14051_v10, 0.0  ;;  %v14048_v59 = vmul.f32 %v21915_v40, %v21915_v40 }
0x1f7a   : > { %14090 = vadd.xlane.f32.xlu0 %v14089_v49 }
0x1f7b   : > { %v14080_v26 = vsel %vm712_vm0, %v14048_v59, 0.0  ;;  %v14049_v3 = vmul.f32 %v21921_v7, %v21921_v7 }
0x1f7c   : > { %14081 = vadd.xlane.f32.xlu1 %v14080_v26 }
0x1f7d   : > { %v14083_v28 = vsel %vm712_vm0, %v14049_v3, 0.0 }
0x1f7e   : > { %14084 = vadd.xlane.f32.xlu0 %v14083_v28 }
0x1fac   : > { %v13998_v0 = vpop.xlane.xlu1 %13997 }
0x1fad   : > { %v14020_v8 = vmul.f32 0.03125, %v13998_v0 }
0x1fae   : > { %v14001_v47 = vpop.xlane.xlu0 %14000 }
0x1faf   : > { %v21931_v43 = vsub.f32 %v21837_v54, %v14020_v8  ;;  %v14021_v44 = vmul.f32 0.03125, %v14001_v47 }
0x1fb0   : > { %v14004_v53 = vpop.xlane.xlu1 %14003 }
0x1fb1   : > { %v21934_v31 = vsub.f32 %v21845_v48, %v14021_v44  ;;  %v14022_v37 = vmul.f32 0.03125, %v14004_v53  ;;  %v14052_v22 = vmul.f32 %v21931_v43, %v21931_v43 }
0x1fb2   : > { %v14007_v15 = vpop.xlane.xlu0 %14006 }
0x1fb3   : > { %v21939_v4 = vsub.f32 %v21842_v18, %v14022_v37  ;;  %v14023_v20 = vmul.f32 0.03125, %v14007_v15  ;;  %v14092_v52 = vsel %vm712_vm0, %v14052_v22, 0.0  ;;  %v14053_v54 = vmul.f32 %v21934_v31, %v21934_v31 }
0x1fb4   : > { %14093 = vadd.xlane.f32.xlu1 %v14092_v52 }
0x1fb5   : > { %v21945_v21 = vsub.f32 %v21850_v38, %v14023_v20  ;;  %v14095_v48 = vsel %vm712_vm0, %v14053_v54, 0.0  ;;  %v14054_v51 = vmul.f32 %v21939_v4, %v21939_v4 }
0x1fb6   : > { %14096 = vadd.xlane.f32.xlu0 %v14095_v48 }
0x1fb7   : > { %v14098_v5 = vsel %vm712_vm0, %v14054_v51, 0.0  ;;  %v14055_v18 = vmul.f32 %v21945_v21, %v21945_v21 }
0x1fb8   : > { %14099 = vadd.xlane.f32.xlu1 %v14098_v5 }
0x1fb9   : > { %v14101_v13 = vsel %vm712_vm0, %v14055_v18, 0.0 }
0x1fba   : > { %14102 = vadd.xlane.f32.xlu0 %v14101_v13 }
0x1fe7   : > { %v14064_v55 = vpop.xlane.xlu1 %14063 }
0x1fe8   : > { %v14106_v1 = vmul.f32 0.03125, %v14064_v55 }
0x1fe9   : > { %v14067_v25 = vpop.xlane.xlu0 %14066 }
0x1fea   : > { %v14122_v38 = vadd.f32 1e-05, %v14106_v1  ;;  %v14107_v60 = vmul.f32 0.03125, %v14067_v25 }
0x1feb   : > { %v14058_v58 = vpop.xlane.xlu1 %14057 }
0x1fec   : > { %17246 = vrsqrt.f32 %v14122_v38  ;;  %v14123_v6 = vadd.f32 1e-05, %v14107_v60  ;;  %v14104_v23 = vmul.f32 0.03125, %v14058_v58 }
0x1fed   : > { %v14061_v50 = vpop.xlane.xlu0 %14060 }
0x1fee   : > { %17248 = vrsqrt.f32 %v14123_v6  ;;  %v14120_v42 = vadd.f32 1e-05, %v14104_v23  ;;  %v14105_v30 = vmul.f32 0.03125, %v14061_v50 }
0x1ff0   : > { %17250 = vrsqrt.f32 %v14120_v42  ;;  %v14121_v29 = vadd.f32 1e-05, %v14105_v30 }
0x1ff2   : > { %17252 = vrsqrt.f32 %v14121_v29 }
0x1ff5   : > { %v14076_v62 = vpop.xlane.xlu1 %14075 }
0x1ff6   : > { %v17247_v63 = vpop.eup %17246  ;;  %v14110_v61 = vmul.f32 0.03125, %v14076_v62 }
0x1ff7   : > { %v14154_v24 = vmul.f32 %v17247_v63, %v21859_v9  ;;  %v14079_v32 = vpop.xlane.xlu0 %14078 }
0x1ff8   : > { %v17249_v27 = vpop.eup %17248  ;;  %v14126_v9 = vadd.f32 1e-05, %v14110_v61  ;;  %v14111_v11 = vmul.f32 0.03125, %v14079_v32 }
0x1ff9   : > { %v14176_v35 = vmul.f32 %v21957_v14, %v14154_v24  ;;  %v14155_v33 = vmul.f32 %v17249_v27, %v21862_v16  ;;  %v14070_v49 = vpop.xlane.xlu1 %14069 }
0x1ffa   : > { %v17251_v17 = vpop.eup %17250  ;;  %17254 = vrsqrt.f32 %v14126_v9  ;;  %v14127_v59 = vadd.f32 1e-05, %v14111_v11  ;;  %v14108_v26 = vmul.f32 0.03125, %v14070_v49 }
0x1ffb   : > { %v14198_v12 = vadd.f32 %v21963_v19, %v14176_v35  ;;  %v14177_v41 = vmul.f32 %v21957_v14, %v14155_v33  ;;  %v14152_v10 = vmul.f32 %v17251_v17, %v21867_v45  ;;  %v14073_v8 = vpop.xlane.xlu0 %14072 }
0x1ffc   : > { %v17253_v16 = vpop.eup %17252  ;;  %17256 = vrsqrt.f32 %v14127_v59  ;;  %v14124_v47 = vadd.f32 1e-05, %v14108_v26  ;;  %v14109_v44 = vmul.f32 0.03125, %v14073_v8 }
0x1ffd   : > { %14214 = vst.msk [vmem:[%s21972_s26 + $0x10] sm:$0xff] %vm712_vm0, %v14198_v12  ;;  %v14199_v3 = vadd.f32 %v21963_v19, %v14177_v41  ;;  %v14174_v28 = vmul.f32 %v21957_v14, %v14152_v10  ;;  %v14153_v0 = vmul.f32 %v17253_v16, %v21873_v2 }
0x1ffe   : > { %17258 = vrsqrt.f32 %v14124_v47  ;;  %v14125_v37 = vadd.f32 1e-05, %v14109_v44 }
0x1fff   : > { %14215 = vst.msk [vmem:[%s21972_s26 + $0x18] sm:$0xff] %vm712_vm0, %v14199_v3  ;;  %v14196_v45 = vadd.f32 %v21963_v19, %v14174_v28  ;;  %v14175_v53 = vmul.f32 %v21957_v14, %v14153_v0 }
0x2000   : > { %17260 = vrsqrt.f32 %v14125_v37 }
0x2001   : > { %14212 = vst.msk [vmem:[%s21972_s26] sm:$0xff] %vm712_vm0, %v14196_v45  ;;  %v14197_v22 = vadd.f32 %v21963_v19, %v14175_v53 }
0x2003   : > { %14213 = vst.msk [vmem:[%s21972_s26 + $0x8] sm:$0xff] %vm712_vm0, %v14197_v22 }
0x2004   : > { %v17255_v2 = vpop.eup %17254 }
0x2005   : > { %v14088_v15 = vpop.xlane.xlu1 %14087  ;;  %v14158_v20 = vmul.f32 %v17255_v2, %v21883_v39 }
0x2006   : > { %v14114_v52 = vmul.f32 0.03125, %v14088_v15  ;;  %v17257_v54 = vpop.eup %17256 }
0x2007   : > { %v14091_v48 = vpop.xlane.xlu0 %14090  ;;  %v14180_v51 = vmul.f32 %v21957_v14, %v14158_v20  ;;  %v14159_v5 = vmul.f32 %v17257_v54, %v21886_v56 }
0x2008   : > { %v14130_v18 = vadd.f32 1e-05, %v14114_v52  ;;  %v14115_v13 = vmul.f32 0.03125, %v14091_v48  ;;  %v17259_v55 = vpop.eup %17258 }
0x2009   : > { %v14082_v1 = vpop.xlane.xlu1 %14081  ;;  %v14202_v25 = vadd.f32 %v21963_v19, %v14180_v51  ;;  %v14181_v38 = vmul.f32 %v21957_v14, %v14159_v5  ;;  %v14156_v60 = vmul.f32 %v17259_v55, %v21891_v36 }
0x200a   : > { %17262 = vrsqrt.f32 %v14130_v18  ;;  %v17261_v39 = vpop.eup %17260  ;;  %v14131_v58 = vadd.f32 1e-05, %v14115_v13  ;;  %v14112_v6 = vmul.f32 0.03125, %v14082_v1 }
0x200b   : > { %v14085_v23 = vpop.xlane.xlu0 %14084  ;;  %14218 = vst.msk [vmem:[%s21972_s26 + $0x30] sm:$0xff] %vm712_vm0, %v14202_v25  ;;  %v14203_v56 = vadd.f32 %v21963_v19, %v14181_v38  ;;  %v14178_v50 = vmul.f32 %v21957_v14, %v14156_v60  ;;  %v14157_v42 = vmul.f32 %v17261_v39, %v21897_v46 }
0x200c   : > { %v14113_v30 = vmul.f32 0.03125, %v14085_v23  ;;  %17264 = vrsqrt.f32 %v14131_v58  ;;  %v14128_v29 = vadd.f32 1e-05, %v14112_v6 }
0x200d   : > { %14219 = vst.msk [vmem:[%s21972_s26 + $0x38] sm:$0xff] %vm712_vm0, %v14203_v56  ;;  %v14200_v36 = vadd.f32 %v21963_v19, %v14178_v50  ;;  %v14179_v63 = vmul.f32 %v21957_v14, %v14157_v42 }
0x200e   : > { %v14129_v24 = vadd.f32 1e-05, %v14113_v30  ;;  %17266 = vrsqrt.f32 %v14128_v29 }
0x200f   : > { %14216 = vst.msk [vmem:[%s21972_s26 + $0x20] sm:$0xff] %vm712_vm0, %v14200_v36  ;;  %v14201_v62 = vadd.f32 %v21963_v19, %v14179_v63 }
0x2010   : > { %17268 = vrsqrt.f32 %v14129_v24 }
0x2011   : > { %14217 = vst.msk [vmem:[%s21972_s26 + $0x28] sm:$0xff] %vm712_vm0, %v14201_v62 }
0x2014   : > { %v17263_v46 = vpop.eup %17262 }
0x2015   : > { %v14162_v27 = vmul.f32 %v17263_v46, %v21907_v34 }
0x2016   : > { %v17265_v61 = vpop.eup %17264 }
0x2017   : > { %v14184_v35 = vmul.f32 %v21957_v14, %v14162_v27  ;;  %v14163_v33 = vmul.f32 %v17265_v61, %v21910_v57 }
0x2018   : > { %v17267_v32 = vpop.eup %17266 }
0x2019   : > { %v14206_v17 = vadd.f32 %v21963_v19, %v14184_v35  ;;  %v14185_v11 = vmul.f32 %v21957_v14, %v14163_v33  ;;  %v14160_v12 = vmul.f32 %v17267_v32, %v21915_v40 }
0x201a   : > { %v17269_v9 = vpop.eup %17268 }
0x201b   : > { %14222 = vst.msk [vmem:[%s21972_s26 + $0x50] sm:$0xff] %vm712_vm0, %v14206_v17  ;;  %v14161_v41 = vmul.f32 %v17269_v9, %v21921_v7  ;;  %v14207_v34 = vadd.f32 %v21963_v19, %v14185_v11  ;;  %v14182_v10 = vmul.f32 %v21957_v14, %v14160_v12 }
0x201d   : > { %v14183_v49 = vmul.f32 %v21957_v14, %v14161_v41  ;;  %14223 = vst.msk [vmem:[%s21972_s26 + $0x58] sm:$0xff] %vm712_vm0, %v14207_v34  ;;  %v14204_v57 = vadd.f32 %v21963_v19, %v14182_v10 }
0x201f   : > { %v14205_v16 = vadd.f32 %v21963_v19, %v14183_v49  ;;  %14220 = vst.msk [vmem:[%s21972_s26 + $0x40] sm:$0xff] %vm712_vm0, %v14204_v57 }
0x2021   : > { %14221 = vst.msk [vmem:[%s21972_s26 + $0x48] sm:$0xff] %vm712_vm0, %v14205_v16 }
0x2041   : > { %v14094_v40 = vpop.xlane.xlu1 %14093 }
0x2042   : > { %v14116_v59 = vmul.f32 0.03125, %v14094_v40 }
0x2043   : > { %v14097_v26 = vpop.xlane.xlu0 %14096 }
0x2044   : > { %v14132_v7 = vadd.f32 1e-05, %v14116_v59  ;;  %v14117_v3 = vmul.f32 0.03125, %v14097_v26 }
0x2045   : > { %v14100_v28 = vpop.xlane.xlu1 %14099 }
0x2046   : > { %17270 = vrsqrt.f32 %v14132_v7  ;;  %v14133_v0 = vadd.f32 1e-05, %v14117_v3  ;;  %v14118_v8 = vmul.f32 0.03125, %v14100_v28 }
0x2047   : > { %v14103_v47 = vpop.xlane.xlu0 %14102 }
0x2048   : > { %17272 = vrsqrt.f32 %v14133_v0  ;;  %v14134_v44 = vadd.f32 1e-05, %v14118_v8  ;;  %v14119_v45 = vmul.f32 0.03125, %v14103_v47 }
0x204a   : > { %17274 = vrsqrt.f32 %v14134_v44  ;;  %v14135_v53 = vadd.f32 1e-05, %v14119_v45 }
0x204c   : > { %17276 = vrsqrt.f32 %v14135_v53 }
0x2050   : > { %v17271_v37 = vpop.eup %17270 }
0x2051   : > { %v14164_v22 = vmul.f32 %v17271_v37, %v21931_v43 }
0x2052   : > { %v17273_v2 = vpop.eup %17272 }
0x2053   : > { %v14186_v15 = vmul.f32 %v21957_v14, %v14164_v22  ;;  %v14165_v20 = vmul.f32 %v17273_v2, %v21934_v31 }
0x2054   : > { %v17275_v52 = vpop.eup %17274 }
0x2055   : > { %v14208_v54 = vadd.f32 %v21963_v19, %v14186_v15  ;;  %v14187_v48 = vmul.f32 %v21957_v14, %v14165_v20  ;;  %v14166_v51 = vmul.f32 %v17275_v52, %v21939_v4 }
0x2056   : > { %v17277_v5 = vpop.eup %17276 }
0x2057   : > { %14224 = vst.msk [vmem:[%s21972_s26 + $0x60] sm:$0xff] %vm712_vm0, %v14208_v54  ;;  %v14209_v18 = vadd.f32 %v21963_v19, %v14187_v48  ;;  %v14188_v43 = vmul.f32 %v21957_v14, %v14166_v51  ;;  %v14167_v13 = vmul.f32 %v17277_v5, %v21945_v21 }
0x2059   : > { %14225 = vst.msk [vmem:[%s21972_s26 + $0x68] sm:$0xff] %vm712_vm0, %v14209_v18  ;;  %v14210_v31 = vadd.f32 %v21963_v19, %v14188_v43  ;;  %v14189_v55 = vmul.f32 %v21957_v14, %v14167_v13 }
0x205b   : > { %14226 = vst.msk [vmem:[%s21972_s26 + $0x70] sm:$0xff] %vm712_vm0, %v14210_v31  ;;  %v14211_v1 = vadd.f32 %v21963_v19, %v14189_v55 }
0x205d   : > { %14227 = vst.msk [vmem:[%s21972_s26 + $0x78] sm:$0xff] %vm712_vm0, %v14211_v1 }
0x205e PF: > { %s31_s2 = sadd.s32 1, %s17300_s2  }
0x205f   : > { %p28_p4 = scmp.ge.s32.totalorder %s31_s2, 4  }
0x2061   :  { %30 = sbr.rel (!%p28_p4) target bundleno = 7 (0x7), region = 134 }

</bundles_post_ra>
